<compile_context>
chip_gen: v7x
topology: tpu7x:2x2x1
jax: 0.10.0
libtpu: 0.0.40
codegen_flags: <defaults>
</compile_context>

<pallas_src>
import numpy as np
import jax
import jax.numpy as jnp
from jax.experimental import pallas as pl
from jax.experimental.pallas import tpu as pltpu

# ------------------------- module configuration -----------------------------
D_IN = 3
D_OUT = 1
D_HIDDEN = 64
N_LAYERS = 3
N_LEVELS = 16
F_PER_LEVEL = 2
ENC_DIM = N_LEVELS * F_PER_LEVEL          # 32
K0 = D_IN + ENC_DIM                       # 35  (include_input cat)
K0_PAD = 40                               # zero-padded to an 8-multiple
LOG2_T = 14                               # log2_hashmap_size (small for test)
BASE_RES = 16
DESIRED_RES = 1024
PER_LEVEL_SCALE = float(np.exp2(np.log2(DESIRED_RES / 16) / (16 - 1)))
BOUND = 1.0
SCALE = 1.0
GEO_BIAS = 0.5
BATCH_TILE = 2048                         # rows per grid step (lane axis)


def _softplus_beta100(x):
    # torch.nn.Softplus(beta=100), branchless: max(x,0)+log1p(exp(-|100x|))/100
    z = 100.0 * x
    return jnp.maximum(x, 0.0) + jnp.log1p(jnp.exp(-jnp.abs(z))) / 100.0


# ------------------------------ Pallas kernel -------------------------------
def make_sdf_kernel(n_hidden):
    """n_hidden = N_LAYERS - 2 (number of hidden [H,H] matmuls)."""

    def kernel(featT_ref, w0T_ref, b0_ref, *rest):
        # rest = [w1, b1, ..., w_{n_hidden}, b_{n_hidden}, wlast, blast, o]
        o_ref = rest[-1]

        # layer 0: [H, K0_PAD] bf16 @ [K0_PAD, tile] bf16 -> f32 accumulation.
        # x rows are folded into the feature slab (under-filled K, free cycles).
        a = jnp.dot(w0T_ref[...], featT_ref[...],
                    preferred_element_type=jnp.float32)        # [H, tile] f32
        a = a + b0_ref[...]                                     # b0: [H, 1]
        a = _softplus_beta100(a)

        # hidden layers: bf16 activations x bf16 weights, f32 accumulate.
        for l in range(n_hidden):
            w_ref = rest[2 * l]
            b_ref = rest[2 * l + 1]
            a = jnp.dot(w_ref[...], a.astype(jnp.bfloat16),
                        preferred_element_type=jnp.float32) + b_ref[...]
            a = _softplus_beta100(a)

        # last layer (out_dim = 1): f32 VPU mul + sublane reduce -> lane-dense
        # [1, tile] store.  (MXU variant only worthwhile if VALU/vst saturate.)
        wlast_ref = rest[2 * n_hidden]
        blast_ref = rest[2 * n_hidden + 1]
        out = jnp.sum(wlast_ref[...] * a, axis=0, keepdims=True) + blast_ref[...]
        o_ref[...] = out

    return kernel


# --------------------------- hash-grid encoder (glue) ------------------------
def hashgrid_encode_T(x01, table):
    """x01: [N,3] in [0,1]. table: [N_LEVELS, F, 2**LOG2_T].
    Returns transposed features [ENC_DIM, N] (batch on the last axis)."""
    T = 1 << LOG2_T
    primes = np.array([1, 2654435761, 805459861], dtype=np.uint32)
    feats = []
    for lvl in range(N_LEVELS):
        scale = BASE_RES * (PER_LEVEL_SCALE ** lvl) - 1.0
        pos = x01.astype(jnp.float32) * scale + 0.5
        pos_grid = jnp.floor(pos)
        frac = pos - pos_grid
        pos_grid = pos_grid.astype(jnp.uint32)
        level_feat = jnp.zeros((F_PER_LEVEL, x01.shape[0]), jnp.float32)
        for corner in range(8):
            offs = np.array([(corner >> d) & 1 for d in range(3)], dtype=np.uint32)
            cg = pos_grid + jnp.asarray(offs)                           # [N,3]
            w = jnp.prod(jnp.where(jnp.asarray(offs == 1),
                                   frac, 1.0 - frac), axis=-1)          # [N]
            idx = cg * jnp.asarray(primes)                              # uint32 wrap-mul
            h = (idx[:, 0] ^ idx[:, 1] ^ idx[:, 2]) % jnp.uint32(T)
            level_feat = level_feat + w[None, :] * table[lvl][:, h]     # [F, N]
        feats.append(level_feat)
    return jnp.concatenate(feats, axis=0)                               # [32, N]


# ------------------------------ parameters ----------------------------------
def init_params(key, w0h_std=0.0):
    keys = jax.random.split(key, N_LAYERS + 3)

    # tcnn-style hash table init: U(-1e-4, 1e-4); stored [level, feature, entry]
    table = jax.random.uniform(keys[0], (N_LEVELS, F_PER_LEVEL, 1 << LOG2_T),
                               minval=-1e-4, maxval=1e-4, dtype=jnp.float32)

    # hash_encoding_mask (never updated inside forward -> all ones)
    mask = jnp.ones((1, ENC_DIM), jnp.float32)

    # down-weighting: weights = erf(1/sqrt(8*r^2*res^2)), custom erf, r = 1.0
    resolutions = (np.arange(16, DESIRED_RES + 16, DESIRED_RES // 32,
                             dtype=np.int32) / DESIRED_RES).reshape(1, -1)
    r = 1.0
    arg = 1.0 / np.sqrt(8.0 * r ** 2 * resolutions ** 2)
    dwt = np.sign(arg) * np.sqrt(1.0 - np.exp(-4.0 / np.pi * arg ** 2))
    dwt = jnp.asarray(dwt, jnp.float32)                                 # [1, 32]

    # MLP (geometric init; weight_norm is identity at init).  Stored [in, out].
    layers = []
    out0 = D_HIDDEN if N_LAYERS > 1 else D_OUT
    w0x = (jax.random.normal(keys[1], (D_IN, out0), jnp.float32)
           * (np.sqrt(2.0) / np.sqrt(out0)))
    # geometric init uses weight[:, 3:] = 0; w0h_std lets the test exercise the
    # encoder path with non-zero weights without changing forward semantics.
    w0h = w0h_std * jax.random.normal(keys[-1], (ENC_DIM, out0), jnp.float32)
    b0 = jnp.zeros((1, out0), jnp.float32)
    layers += [w0x, w0h, b0]
    for l in range(1, N_LAYERS):
        in_dim = D_HIDDEN
        out_dim = D_OUT if l == N_LAYERS - 1 else D_HIDDEN
        if l == N_LAYERS - 1:
            w = (np.sqrt(np.pi) / np.sqrt(in_dim)
                 + 1e-4 * jax.random.normal(keys[1 + l], (in_dim, out_dim),
                                            jnp.float32))
            b = jnp.full((1, out_dim), -GEO_BIAS, jnp.float32)
        else:
            w = (jax.random.normal(keys[1 + l], (in_dim, out_dim), jnp.float32)
                 * (np.sqrt(2.0) / np.sqrt(out_dim)))
            b = jnp.zeros((1, out_dim), jnp.float32)
        layers += [w, b]

    return {"table": table, "mask": mask, "dwt": dwt, "layers": layers}


def pack_mlp_params(params):
    """Fold mask*dwt into the layer-0 weight, concatenate the x / hash parts
    along K (zero-padded to K0_PAD), transpose, and cast matmul weights to bf16.
    Returns (w0T[bf16], b0T[f32], [(wT[bf16], bT[f32]), ...], wlast[f32], blast[f32])."""
    lp = params["layers"]
    scale = (params["mask"] * params["dwt"]).reshape(ENC_DIM, 1)        # [32,1]
    w0x, w0h, b0 = lp[0], lp[1], lp[2]                                  # [3,H],[32,H],[1,H]
    H = w0x.shape[1]
    w0_eff = jnp.concatenate(
        [w0x, scale * w0h, jnp.zeros((K0_PAD - K0, H), jnp.float32)], axis=0)  # [40, H]
    w0T = jnp.transpose(w0_eff).astype(jnp.bfloat16)                    # [H, 40] bf16
    b0T = b0.reshape(-1, 1)                                             # [H, 1]  f32
    hidden = []
    idx = 3
    for _ in range(1, N_LAYERS - 1):
        w, b = lp[idx], lp[idx + 1]
        idx += 2
        hidden.append((jnp.transpose(w).astype(jnp.bfloat16),           # [H, H] bf16
                       b.reshape(-1, 1)))                               # [H, 1] f32
    w_last, b_last = lp[idx], lp[idx + 1]                               # [H,1],[1,1]
    return w0T, b0T, hidden, w_last, b_last.reshape(1, 1)


# ------------------------------ forward wrapper ------------------------------
def sdf_forward(x, params, bound=1.0, tile=BATCH_TILE):
    N = x.shape[0]
    x = x.astype(jnp.float32) * SCALE
    x = jnp.clip(x, -bound, bound)
    x01 = (x + bound) / (2.0 * bound)

    n_pad = tile * pl.cdiv(N, tile)
    if n_pad != N:
        x01 = jnp.pad(x01, ((0, n_pad - N), (0, 0)))

    # Transposed feature slab [K0_PAD, n_pad]: x(3) | hash(32) | zero(5), bf16.
    hT = hashgrid_encode_T(x01, params["table"])                         # [32, n_pad]
    featT = jnp.concatenate(
        [jnp.transpose(x01), hT,
         jnp.zeros((K0_PAD - K0, n_pad), jnp.float32)], axis=0
    ).astype(jnp.bfloat16)                                               # [40, n_pad]

    w0T, b0T, hidden, w_last, b_last = pack_mlp_params(params)

    operands = [featT, w0T, b0T]
    in_specs = [
        pl.BlockSpec((K0_PAD, tile), lambda i: (0, i)),
        pl.BlockSpec(w0T.shape, lambda i: (0, 0)),
        pl.BlockSpec(b0T.shape, lambda i: (0, 0)),
    ]
    for w, b in hidden:
        operands += [w, b]
        in_specs += [pl.BlockSpec(w.shape, lambda i: (0, 0)),
                     pl.BlockSpec(b.shape, lambda i: (0, 0))]
    operands += [w_last, b_last]
    in_specs += [pl.BlockSpec(w_last.shape, lambda i: (0, 0)),
                 pl.BlockSpec((1, 1), lambda i: (0, 0))]

    out = pl.pallas_call(
        make_sdf_kernel(N_LAYERS - 2),
        out_shape=jax.ShapeDtypeStruct((1, n_pad), jnp.float32),
        grid=(n_pad // tile,),
        in_specs=in_specs,
        out_specs=pl.BlockSpec((1, tile), lambda i: (0, i)),
        compiler_params=pltpu.CompilerParams(
            dimension_semantics=("parallel",)),
    )(*operands)
    return out[0, :N].reshape(N, D_OUT)


# ------------------------------ pure-JAX reference ---------------------------
def sdf_forward_ref(x, params, bound=1.0):
    """Mirrors the kernel's bf16 operand quantization (features / matmul
    weights / hidden activations) with f32 accumulation, so kernel vs. ref
    differences are accumulation-order only."""
    x = x.astype(jnp.float32) * SCALE
    x = jnp.clip(x, -bound, bound)
    x01 = (x + bound) / (2.0 * bound)
    hT = hashgrid_encode_T(x01, params["table"])                         # [32, N]
    feat = jnp.concatenate([x01, jnp.transpose(hT)], axis=-1)            # [N, 35]

    w0T, b0T, hidden, w_last, b_last = pack_mlp_params(params)
    feat_b = feat.astype(jnp.bfloat16).astype(jnp.float32)
    w0 = jnp.transpose(w0T.astype(jnp.float32))[:K0, :]                  # drop K pad
    a = jnp.dot(feat_b, w0, precision=jax.lax.Precision.HIGHEST) + b0T.reshape(1, -1)
    a = _softplus_beta100(a)
    for w_b16, b in hidden:
        w = jnp.transpose(w_b16.astype(jnp.float32))
        a_b = a.astype(jnp.bfloat16).astype(jnp.float32)
        a = jnp.dot(a_b, w, precision=jax.lax.Precision.HIGHEST) + b.reshape(1, -1)
        a = _softplus_beta100(a)
    a = jnp.dot(a, w_last, precision=jax.lax.Precision.HIGHEST) + b_last
    return a


# ----------------------------------- main ------------------------------------
if __name__ == "__main__":
    key = jax.random.PRNGKey(0)
    pkey, xkey = jax.random.split(key)
    # Geometric init zeroes the encoder-feature weights of layer 0; perturb them
    # slightly so the correctness check exercises the hash-grid path too.
    params = init_params(pkey, w0h_std=0.01)

    N = 2 * BATCH_TILE                      # two grid steps (megacore-friendly)
    x = jax.random.uniform(xkey, (N, D_IN), jnp.float32, minval=-1.2, maxval=1.2)

    sdf_fn = jax.jit(sdf_forward)
    ref_fn = jax.jit(sdf_forward_ref)

    sdf = jax.block_until_ready(sdf_fn(x, params))
    ref = jax.block_until_ready(ref_fn(x, params))

    np.testing.assert_allclose(np.asarray(sdf), np.asarray(ref),
                               rtol=1e-4, atol=1e-4)
    assert sdf.shape == (N, D_OUT)
    print("KERNEL_OK")
</pallas_src>

<mosaic_0001>
module attributes {stable_mosaic.version = 11 : i64} {
  func.func private @main(%arg0: i32) attributes {dimension_semantics = [#tpu.dimension_semantics<core_parallel>], iteration_bounds = array<i64: 2>, tpu.core_type = #tpu.core_type<sc_scalar_subcore>, window_params = []} {
    return
  }
}

module attributes {stable_mosaic.version = 11 : i64} {
  func.func private @main(%arg0: i32) attributes {dimension_semantics = [#tpu.dimension_semantics<core_parallel>], iteration_bounds = array<i64: 2>, tpu.core_type = #tpu.core_type<sc_scalar_subcore>, window_params = []} {
    return
  }
}

module attributes {stable_mosaic.version = 11 : i64} {
  func.func @kernel(%arg0: i32, %arg1: memref<40x2048xbf16, #tpu.memory_space<vmem>>, %arg2: memref<64x40xbf16, #tpu.memory_space<vmem>>, %arg3: memref<64x1xf32, #tpu.memory_space<vmem>>, %arg4: memref<64x64xbf16, #tpu.memory_space<vmem>>, %arg5: memref<64x1xf32, #tpu.memory_space<vmem>>, %arg6: memref<64x1xf32, #tpu.memory_space<vmem>>, %arg7: memref<1x1xf32, #tpu.memory_space<vmem>>, %arg8: memref<1x2048xf32, #tpu.memory_space<vmem>>) attributes {dimension_semantics = [#tpu.dimension_semantics<parallel>], iteration_bounds = array<i64: 2>, scalar_prefetch = 0 : i64, scratch_operands = 0 : i64, tpu.core_type = #tpu.core_type<tc>, window_params = [{transform_indices = @transform_0, window_bounds = array<i64: 40, 2048>}, {pipeline_mode = #tpu.pipeline_mode<synchronous>, transform_indices = @transform_1, window_bounds = array<i64: 64, 40>}, {pipeline_mode = #tpu.pipeline_mode<synchronous>, transform_indices = @transform_2, window_bounds = array<i64: 64, 1>}, {pipeline_mode = #tpu.pipeline_mode<synchronous>, transform_indices = @transform_3, window_bounds = array<i64: 64, 64>}, {pipeline_mode = #tpu.pipeline_mode<synchronous>, transform_indices = @transform_4, window_bounds = array<i64: 64, 1>}, {pipeline_mode = #tpu.pipeline_mode<synchronous>, transform_indices = @transform_5, window_bounds = array<i64: 64, 1>}, {pipeline_mode = #tpu.pipeline_mode<synchronous>, transform_indices = @transform_6, window_bounds = array<i64: 1, 1>}, {transform_indices = @transform_7, window_bounds = array<i64: 1, 2048>}]} {
    %c0 = arith.constant 0 : index
    %c0_0 = arith.constant 0 : index
    %0 = vector.load %arg2[%c0, %c0_0] : memref<64x40xbf16, #tpu.memory_space<vmem>>, vector<64x40xbf16>
    %c0_1 = arith.constant 0 : index
    %c0_2 = arith.constant 0 : index
    %1 = vector.load %arg1[%c0_1, %c0_2] : memref<40x2048xbf16, #tpu.memory_space<vmem>>, vector<40x2048xbf16>
    %cst = arith.constant dense<0.000000e+00> : vector<64x2048xf32>
    %2 = tpu.matmul %0, %1, %cst {dimension_numbers = #tpu.dot_dimension_numbers<[1], [0], [0], [1], [0, 0, 1, 1], [], []>} : vector<64x40xbf16>, vector<40x2048xbf16>, vector<64x2048xf32> -> vector<64x2048xf32>
    %c0_3 = arith.constant 0 : index
    %c0_4 = arith.constant 0 : index
    %3 = vector.load %arg3[%c0_3, %c0_4] : memref<64x1xf32, #tpu.memory_space<vmem>>, vector<64x1xf32>
    %4 = vector.broadcast %3 : vector<64x1xf32> to vector<64x2048xf32>
    %5 = arith.addf %2, %4 : vector<64x2048xf32>
    %cst_5 = arith.constant 1.000000e+02 : f32
    %6 = vector.broadcast %cst_5 : f32 to vector<64x2048xf32>
    %7 = arith.mulf %6, %5 : vector<64x2048xf32>
    %cst_6 = arith.constant 0.000000e+00 : f32
    %8 = vector.broadcast %cst_6 : f32 to vector<64x2048xf32>
    %9 = arith.maximumf %5, %8 : vector<64x2048xf32>
    %10 = math.absf %7 : vector<64x2048xf32>
    %cst_7 = arith.constant 0.000000e+00 : f32
    %11 = vector.broadcast %cst_7 : f32 to vector<64x2048xf32>
    %12 = arith.subf %11, %10 : vector<64x2048xf32>
    %13 = math.exp %12 : vector<64x2048xf32>
    %14 = math.log1p %13 : vector<64x2048xf32>
    %cst_8 = arith.constant 1.000000e+02 : f32
    %15 = vector.broadcast %cst_8 : f32 to vector<64x2048xf32>
    %16 = arith.divf %14, %15 : vector<64x2048xf32>
    %17 = arith.addf %9, %16 : vector<64x2048xf32>
    %c0_9 = arith.constant 0 : index
    %c0_10 = arith.constant 0 : index
    %18 = vector.load %arg4[%c0_9, %c0_10] : memref<64x64xbf16, #tpu.memory_space<vmem>>, vector<64x64xbf16>
    %19 = arith.truncf %17 : vector<64x2048xf32> to vector<64x2048xbf16>
    %cst_11 = arith.constant dense<0.000000e+00> : vector<64x2048xf32>
    %20 = tpu.matmul %18, %19, %cst_11 {dimension_numbers = #tpu.dot_dimension_numbers<[1], [0], [0], [1], [0, 0, 1, 1], [], []>} : vector<64x64xbf16>, vector<64x2048xbf16>, vector<64x2048xf32> -> vector<64x2048xf32>
    %c0_12 = arith.constant 0 : index
    %c0_13 = arith.constant 0 : index
    %21 = vector.load %arg5[%c0_12, %c0_13] : memref<64x1xf32, #tpu.memory_space<vmem>>, vector<64x1xf32>
    %22 = vector.broadcast %21 : vector<64x1xf32> to vector<64x2048xf32>
    %23 = arith.addf %20, %22 : vector<64x2048xf32>
    %cst_14 = arith.constant 1.000000e+02 : f32
    %24 = vector.broadcast %cst_14 : f32 to vector<64x2048xf32>
    %25 = arith.mulf %24, %23 : vector<64x2048xf32>
    %cst_15 = arith.constant 0.000000e+00 : f32
    %26 = vector.broadcast %cst_15 : f32 to vector<64x2048xf32>
    %27 = arith.maximumf %23, %26 : vector<64x2048xf32>
    %28 = math.absf %25 : vector<64x2048xf32>
    %cst_16 = arith.constant 0.000000e+00 : f32
    %29 = vector.broadcast %cst_16 : f32 to vector<64x2048xf32>
    %30 = arith.subf %29, %28 : vector<64x2048xf32>
    %31 = math.exp %30 : vector<64x2048xf32>
    %32 = math.log1p %31 : vector<64x2048xf32>
    %cst_17 = arith.constant 1.000000e+02 : f32
    %33 = vector.broadcast %cst_17 : f32 to vector<64x2048xf32>
    %34 = arith.divf %32, %33 : vector<64x2048xf32>
    %35 = arith.addf %27, %34 : vector<64x2048xf32>
    %c0_18 = arith.constant 0 : index
    %c0_19 = arith.constant 0 : index
    %36 = vector.load %arg6[%c0_18, %c0_19] : memref<64x1xf32, #tpu.memory_space<vmem>>, vector<64x1xf32>
    %37 = vector.broadcast %36 : vector<64x1xf32> to vector<64x2048xf32>
    %38 = arith.mulf %37, %35 : vector<64x2048xf32>
    %cst_20 = arith.constant dense<0.000000e+00> : vector<2048xf32>
    %39 = vector.multi_reduction <add>, %38, %cst_20 [0] : vector<64x2048xf32> to vector<2048xf32>
    %40 = vector.shape_cast %39 : vector<2048xf32> to vector<1x2048xf32>
    %c0_21 = arith.constant 0 : index
    %c0_22 = arith.constant 0 : index
    %41 = vector.load %arg7[%c0_21, %c0_22] : memref<1x1xf32, #tpu.memory_space<vmem>>, vector<1x1xf32>
    %42 = vector.broadcast %41 : vector<1x1xf32> to vector<1x2048xf32>
    %43 = arith.addf %40, %42 : vector<1x2048xf32>
    %c0_23 = arith.constant 0 : index
    %c0_24 = arith.constant 0 : index
    %44 = vector.load %arg8[%c0_23, %c0_24] : memref<1x2048xf32, #tpu.memory_space<vmem>>, vector<1x2048xf32>
    tpu.vector_store %arg8[%c0_23, %c0_24], %43 {strides = array<i32>} : memref<1x2048xf32, #tpu.memory_space<vmem>>, vector<1x2048xf32>,
    return
  }
  func.func @transform_0(%arg0: i32) -> (i32, i32) {
    %c0_i32 = arith.constant 0 : i32
    %c0_i32_0 = arith.constant 0 : i32
    return %c0_i32, %arg0 : i32, i32
  }
  func.func @transform_1(%arg0: i32) -> (i32, i32) {
    %c0_i32 = arith.constant 0 : i32
    %c0_i32_0 = arith.constant 0 : i32
    %c0_i32_1 = arith.constant 0 : i32
    return %c0_i32, %c0_i32_0 : i32, i32
  }
  func.func @transform_2(%arg0: i32) -> (i32, i32) {
    %c0_i32 = arith.constant 0 : i32
    %c0_i32_0 = arith.constant 0 : i32
    %c0_i32_1 = arith.constant 0 : i32
    return %c0_i32, %c0_i32_0 : i32, i32
  }
  func.func @transform_3(%arg0: i32) -> (i32, i32) {
    %c0_i32 = arith.constant 0 : i32
    %c0_i32_0 = arith.constant 0 : i32
    %c0_i32_1 = arith.constant 0 : i32
    return %c0_i32, %c0_i32_0 : i32, i32
  }
  func.func @transform_4(%arg0: i32) -> (i32, i32) {
    %c0_i32 = arith.constant 0 : i32
    %c0_i32_0 = arith.constant 0 : i32
    %c0_i32_1 = arith.constant 0 : i32
    return %c0_i32, %c0_i32_0 : i32, i32
  }
  func.func @transform_5(%arg0: i32) -> (i32, i32) {
    %c0_i32 = arith.constant 0 : i32
    %c0_i32_0 = arith.constant 0 : i32
    %c0_i32_1 = arith.constant 0 : i32
    return %c0_i32, %c0_i32_0 : i32, i32
  }
  func.func @transform_6(%arg0: i32) -> (i32, i32) {
    %c0_i32 = arith.constant 0 : i32
    %c0_i32_0 = arith.constant 0 : i32
    %c0_i32_1 = arith.constant 0 : i32
    return %c0_i32, %c0_i32_0 : i32, i32
  }
  func.func @transform_7(%arg0: i32) -> (i32, i32) {
    %c0_i32 = arith.constant 0 : i32
    %c0_i32_0 = arith.constant 0 : i32
    return %c0_i32, %arg0 : i32, i32
  }
}

</mosaic_0001>

<bundles_post_ra>
// kernel: sdf_forward.1
= control target key start
LH: loop header
LB: loop body
LE: loop exit
PB: predicated region body
PF: predicated region fallthrough
CT: control target
= control target key end

     0   :  { %s14929_s0 = inlined_call_operand.vmem [shape: bf16[40,4096], index: 0, kind: input, shape index: {}]   ;;  %s14930_s1 = inlined_call_operand.vmem [shape: bf16[64,40], index: 1, kind: input, shape index: {}]   ;;  %s14931_s2 = inlined_call_operand.vmem [shape: f32[64,1], index: 2, kind: input, shape index: {}]   ;;  %s14932_s3 = inlined_call_operand.vmem [shape: bf16[64,64], index: 3, kind: input, shape index: {}]   ;;  %s14933_s4 = inlined_call_operand.vmem [shape: f32[64,1], index: 4, kind: input, shape index: {}]   ;;  %s14934_s5 = inlined_call_operand.vmem [shape: f32[64,1], index: 5, kind: input, shape index: {}]   ;;  %s14935_s6 = inlined_call_operand.<no memory space> [shape: f32[1,1], index: 6, kind: input, shape index: {}]   ;;  %s14936_s7 = inlined_call_operand.hbm [shape: f32[1,4096], index: 7, kind: output, shape index: {}]  }
   0x1   :  { %v12_v0 = vstv %s14935_s6 }
   0x2   :  { %13 = vst [vmem:[#allocation2] sm:$0x1] %v12_v0 }
   0x3   :  { %14 = vsyncpa [#allocation5], 0 }
   0x4   :  { %16 = vsyncpa [#allocation5 + $0x1], 0  ;;  %s8393_s26 = smov 0   ;;  %s8395_s27 = smov 0  }
   0x5   :  { %s8397_s28 = smov 0   ;;  %s8399_s29 = smov 0  }
   0x6 LB: > { %s7039_s6 = sadd.s32 4294967295, %s8345_s29   ;;  %s7040_s30 = sadd.s32 4294967294, %s8345_s29   ;;  %s8345_s29 = sphi %s8399_s29, %s16186_s29   ;;  %s8341_s28 = sphi %s8397_s28, %s16185_s28   ;;  %s8337_s27 = sphi %s8395_s27, %s16184_s27   ;;  %s8333_s26 = sphi %s8393_s26, %s16183_s26  }
   0x7   : > { %s8416_s8 = sadd.s32 1, %s8345_s29   ;;  %s29_s9 = sadd.s32 1, %s8341_s28 }
   0x8   : > { %s26_s10 = ssub.s32 %s8345_s29, %s8416_s8  ;;  %p36_p0 = scmp.ne.s32.totalorder %s8341_s28, %s8337_s27 }
   0x9   : > { %p27_p1 = scmp.eq.s32.totalorder %s26_s10, 0  ;;  %p37_p2 = scmp.eq.s32.totalorder %s8345_s29, 0 }
   0xa   : > { %p192_p3 = scmp.eq.s32.totalorder %s7039_s6, 1  ;;  %p197_p4 = scmp.ne.s32.totalorder %s8337_s27, %s8333_s26 }
   0xb   : > { %s8429_s11 = scalar_select %p27_p1, %s8341_s28, %s29_s9  }
   0xc   : > { %p38_p5 = por %p37_p2, %p36_p0  ;;  %p8431_p6 = por %p192_p3, %p36_p0 }
   0xd   : > { %p198_p7 = scmp.eq.s32.totalorder %s7040_s30, 1  ;;  %p7042_p9 = scmp.ge.s32.totalorder %s8345_s29, 2 }
   0xf   : > { %p8435_p8 = por %p198_p7, %p197_p4  ;;  %232 = sbr.rel (%p7042_p9) target bundleno = 47 (0x2f), region = 40 }
  0x16   : > { %235 = sbr.rel (!%p38_p5) target bundleno = 47 (0x2f), region = 44  ;;  %s237_s14 = sand.u32 (%p38_p5), 1, %s8341_s28  }
  0x17   : > { %s7180_s15 = sshll.u32 (%p38_p5), %s8345_s29, 6  ;;  %s7182_s16 = smul.u32 (%p38_p5), 320, %s237_s14 }
  0x18   : > { %s8447_s19 = scalar_lea.vmem (%p38_p5), %s14929_s0, %s7180_s15 }
  0x19   : > { %v255_v1 = vld [vmem:[%s8447_s19] sm:$0xff] (%p38_p5)  ;;  %v257_v2 = vld [vmem:[%s8447_s19 + $0x8] sm:$0xff] (%p38_p5)  ;;  %v259_v3 = vld [vmem:[%s8447_s19 + $0x10] sm:$0xff] (%p38_p5)  ;;  %s8455_s20 = scalar_lea.vmem (%p38_p5), [#allocation3], %s7182_s16 }
  0x1a   : > { %v261_v4 = vld [vmem:[%s8447_s19 + $0x18] sm:$0xff] (%p38_p5)  ;;  %v263_v5 = vld [vmem:[%s8447_s19 + $0x20] sm:$0xff] (%p38_p5)  ;;  %v265_v6 = vld [vmem:[%s8447_s19 + $0x28] sm:$0xff] (%p38_p5)  ;;  %256 = vst [vmem:[%s8455_s20] sm:$0xff] (%p38_p5), %v255_v1 }
  0x1b   : > { %258 = vst [vmem:[%s8455_s20 + $0x8] sm:$0xff] (%p38_p5), %v257_v2  ;;  %260 = vst [vmem:[%s8455_s20 + $0x10] sm:$0xff] (%p38_p5), %v259_v3  ;;  %v267_v7 = vld [vmem:[%s8447_s19 + $0x30] sm:$0xff] (%p38_p5)  ;;  %v269_v8 = vld [vmem:[%s8447_s19 + $0x38] sm:$0xff] (%p38_p5) }
  0x1c   : > { %262 = vst [vmem:[%s8455_s20 + $0x18] sm:$0xff] (%p38_p5), %v261_v4  ;;  %264 = vst [vmem:[%s8455_s20 + $0x20] sm:$0xff] (%p38_p5), %v263_v5  ;;  %v271_v9 = vld [vmem:[%s8447_s19 + $0x80] sm:$0xff] (%p38_p5)  ;;  %v273_v10 = vld [vmem:[%s8447_s19 + $0x88] sm:$0xff] (%p38_p5) }
  0x1d   : > { %266 = vst [vmem:[%s8455_s20 + $0x28] sm:$0xff] %v265_v6  ;;  %268 = vst [vmem:[%s8455_s20 + $0x30] sm:$0xff] %v267_v7  ;;  %v275_v11 = vld [vmem:[%s8447_s19 + $0x90] sm:$0xff]  ;;  %v277_v12 = vld [vmem:[%s8447_s19 + $0x98] sm:$0xff] }
  0x1e   : > { %270 = vst [vmem:[%s8455_s20 + $0x38] sm:$0xff] %v269_v8  ;;  %272 = vst [vmem:[%s8455_s20 + $0x40] sm:$0xff] %v271_v9  ;;  %v279_v13 = vld [vmem:[%s8447_s19 + $0xa0] sm:$0xff]  ;;  %v281_v14 = vld [vmem:[%s8447_s19 + $0xa8] sm:$0xff] }
  0x1f   : > { %274 = vst [vmem:[%s8455_s20 + $0x48] sm:$0xff] %v273_v10  ;;  %276 = vst [vmem:[%s8455_s20 + $0x50] sm:$0xff] %v275_v11  ;;  %v283_v15 = vld [vmem:[%s8447_s19 + $0xb0] sm:$0xff]  ;;  %v285_v16 = vld [vmem:[%s8447_s19 + $0xb8] sm:$0xff] }
  0x20   : > { %278 = vst [vmem:[%s8455_s20 + $0x58] sm:$0xff] %v277_v12  ;;  %280 = vst [vmem:[%s8455_s20 + $0x60] sm:$0xff] %v279_v13  ;;  %v287_v17 = vld [vmem:[%s8447_s19 + $0x100] sm:$0xff]  ;;  %v289_v18 = vld [vmem:[%s8447_s19 + $0x108] sm:$0xff] }
  0x21   : > { %282 = vst [vmem:[%s8455_s20 + $0x68] sm:$0xff] %v281_v14  ;;  %284 = vst [vmem:[%s8455_s20 + $0x70] sm:$0xff] %v283_v15  ;;  %v291_v19 = vld [vmem:[%s8447_s19 + $0x110] sm:$0xff]  ;;  %v293_v20 = vld [vmem:[%s8447_s19 + $0x118] sm:$0xff] }
  0x22   : > { %286 = vst [vmem:[%s8455_s20 + $0x78] sm:$0xff] %v285_v16  ;;  %288 = vst [vmem:[%s8455_s20 + $0x80] sm:$0xff] %v287_v17  ;;  %v295_v21 = vld [vmem:[%s8447_s19 + $0x120] sm:$0xff]  ;;  %v297_v22 = vld [vmem:[%s8447_s19 + $0x128] sm:$0xff] }
  0x23   : > { %290 = vst [vmem:[%s8455_s20 + $0x88] sm:$0xff] %v289_v18  ;;  %292 = vst [vmem:[%s8455_s20 + $0x90] sm:$0xff] %v291_v19  ;;  %v299_v23 = vld [vmem:[%s8447_s19 + $0x130] sm:$0xff]  ;;  %v301_v24 = vld [vmem:[%s8447_s19 + $0x138] sm:$0xff] }
  0x24   : > { %294 = vst [vmem:[%s8455_s20 + $0x98] sm:$0xff] %v293_v20  ;;  %296 = vst [vmem:[%s8455_s20 + $0xa0] sm:$0xff] %v295_v21  ;;  %v303_v25 = vld [vmem:[%s8447_s19 + $0x180] sm:$0xff]  ;;  %v305_v26 = vld [vmem:[%s8447_s19 + $0x188] sm:$0xff] }
  0x25   : > { %298 = vst [vmem:[%s8455_s20 + $0xa8] sm:$0xff] %v297_v22  ;;  %300 = vst [vmem:[%s8455_s20 + $0xb0] sm:$0xff] %v299_v23  ;;  %v307_v27 = vld [vmem:[%s8447_s19 + $0x190] sm:$0xff]  ;;  %v309_v28 = vld [vmem:[%s8447_s19 + $0x198] sm:$0xff] }
  0x26   : > { %302 = vst [vmem:[%s8455_s20 + $0xb8] sm:$0xff] %v301_v24  ;;  %304 = vst [vmem:[%s8455_s20 + $0xc0] sm:$0xff] %v303_v25  ;;  %v311_v29 = vld [vmem:[%s8447_s19 + $0x1a0] sm:$0xff]  ;;  %v313_v30 = vld [vmem:[%s8447_s19 + $0x1a8] sm:$0xff] }
  0x27   : > { %306 = vst [vmem:[%s8455_s20 + $0xc8] sm:$0xff] %v305_v26  ;;  %308 = vst [vmem:[%s8455_s20 + $0xd0] sm:$0xff] %v307_v27  ;;  %v315_v31 = vld [vmem:[%s8447_s19 + $0x1b0] sm:$0xff]  ;;  %v317_v32 = vld [vmem:[%s8447_s19 + $0x1b8] sm:$0xff] }
  0x28   : > { %310 = vst [vmem:[%s8455_s20 + $0xd8] sm:$0xff] %v309_v28  ;;  %312 = vst [vmem:[%s8455_s20 + $0xe0] sm:$0xff] %v311_v29  ;;  %v319_v33 = vld [vmem:[%s8447_s19 + $0x200] sm:$0xff]  ;;  %v321_v34 = vld [vmem:[%s8447_s19 + $0x208] sm:$0xff] }
  0x29   : > { %314 = vst [vmem:[%s8455_s20 + $0xe8] sm:$0xff] %v313_v30  ;;  %316 = vst [vmem:[%s8455_s20 + $0xf0] sm:$0xff] %v315_v31  ;;  %v323_v35 = vld [vmem:[%s8447_s19 + $0x210] sm:$0xff]  ;;  %v325_v36 = vld [vmem:[%s8447_s19 + $0x218] sm:$0xff] }
  0x2a   : > { %318 = vst [vmem:[%s8455_s20 + $0xf8] sm:$0xff] %v317_v32  ;;  %320 = vst [vmem:[%s8455_s20 + $0x100] sm:$0xff] %v319_v33  ;;  %v327_v37 = vld [vmem:[%s8447_s19 + $0x220] sm:$0xff]  ;;  %v329_v38 = vld [vmem:[%s8447_s19 + $0x228] sm:$0xff] }
  0x2b   : > { %322 = vst [vmem:[%s8455_s20 + $0x108] sm:$0xff] %v321_v34  ;;  %324 = vst [vmem:[%s8455_s20 + $0x110] sm:$0xff] %v323_v35  ;;  %v331_v39 = vld [vmem:[%s8447_s19 + $0x230] sm:$0xff]  ;;  %v333_v40 = vld [vmem:[%s8447_s19 + $0x238] sm:$0xff] }
  0x2c   : > { %326 = vst [vmem:[%s8455_s20 + $0x118] sm:$0xff] %v325_v36  ;;  %328 = vst [vmem:[%s8455_s20 + $0x120] sm:$0xff] %v327_v37 }
  0x2d   : > { %330 = vst [vmem:[%s8455_s20 + $0x128] sm:$0xff] %v329_v38  ;;  %332 = vst [vmem:[%s8455_s20 + $0x130] sm:$0xff] %v331_v39 }
  0x2e   : > { %334 = vst [vmem:[%s8455_s20 + $0x138] sm:$0xff] %v333_v40 }
  0x2f PF: > { %p7045_p10 = scmp.ge.s32.totalorder %s8345_s29, 1  ;;  %p339_p11 = scmp.lt.s32.totalorder %s8345_s29, 3 }
  0x31   : > { %p340_p12 = pnand %p7045_p10, %p339_p11 }
  0x33   : > { %343 = sbr.rel (%p340_p12) target bundleno = 1608 (0x648), region = 67 }
  0x3a   : > { %s8534_s21 = sand.u32 1, %s8337_s27   ;;  %v14937_v41 = vmov 0   ;;  %vm709_vm0 = vcmask 1043456   ;;  %v428_v4 = vld [vmem:[%s14931_s2] sm:$0xff]  ;;  %v429_v7 = vld [vmem:[%s14931_s2 + $0x8] sm:$0xff]  ;;  %v430_v8 = vld [vmem:[%s14931_s2 + $0x10] sm:$0xff] }
  0x3b   : > { %s7183_s22 = smul.u32 320, %s8534_s21  ;;  %790 = vmatprep.mubr.bf16.mxu0 %v14937_v41  ;;  %863 = vmatprep.mubr.bf16.mxu1 %v14937_v41  ;;  %v8573_v10 = vld [vmem:[%s14930_s1] sm:$0xff]   ;;  %v431_v14 = vld [vmem:[%s14931_s2 + $0x18] sm:$0xff]  ;;  %vm696_vm1 = vcmask 326656   ;;  %v433_v27 = vld [vmem:[%s14931_s2 + $0x28] sm:$0xff]  ;;  %s7046_s24 = sshll.u32 %s8534_s21, 4 }
  0x3c   : > { %7225 = vset.pattern.permute.xlu0 %v14937_v41  ;;  %7226 = vset.pattern.permute.xlu1 %v14937_v41  ;;  %v432_v24 = vld [vmem:[%s14931_s2 + $0x20] sm:$0xff]  ;;  %v8599_v31 = vld [vmem:[%s14930_s1 + $0x8] sm:$0xff]   ;;  %v434_v36 = vld [vmem:[%s14931_s2 + $0x30] sm:$0xff]  ;;  %s14853_s25 = scalar_lea.vmem [#allocation4], %s7046_s24  ;;  %s7181_s30 = sshll.u32 %s7039_s6, 8 }
  0x3d   : > { %s8541_s23 = scalar_lea.vmem [#allocation3], %s7183_s22  ;;  %438 = vperm.xlu0 %7225, %v428_v4   ;;  %448 = vperm.xlu1 %7226, %v430_v8   ;;  %s6975_s9 = sshll.u32 %s14853_s25, 4  ;;  %s14886_s9 = int_to_ptr.vmem [resolvable:$true] %s6975_s9 }
  0x3e   : > { %v388_v42 = vld [vmem:[%s8541_s23] sm:$0xff]  ;;  %v389_v44 = vld [vmem:[%s8541_s23 + $0x8] sm:$0xff]  ;;  %v390_v0 = vld [vmem:[%s8541_s23 + $0x10] sm:$0xff]  ;;  %s14884_s14 = scalar_lea.hbm %s14936_s7, %s7181_s30  ;;  %s6961_s6 = scalar_lea.sflag [#allocation5], %s8534_s21 }
  0x3f   : > { %v396_v43 = vld [vmem:[%s8541_s23 + $0x40] sm:$0xff]  ;;  %v397_v46 = vld [vmem:[%s8541_s23 + $0x48] sm:$0xff]  ;;  %v398_v1 = vld [vmem:[%s8541_s23 + $0x50] sm:$0xff]  ;;  %s8283_s15 = scalar_lea.vmem %s14886_s9, 256  ;;  %s8349_s16 = smov [#allocation4]  }
  0x40   : > { %v7052_v45 = vcombine.high %v388_v42, %v396_v43  ;;  %v7051_v47 = vcombine.low %v388_v42, %v396_v43  ;;  %v404_v48 = vld [vmem:[%s8541_s23 + $0x80] sm:$0xff]  ;;  %v7054_v50 = vcombine.high %v389_v44, %v397_v46  ;;  %v7053_v51 = vcombine.low %v389_v44, %v397_v46  ;;  %v405_v53 = vld [vmem:[%s8541_s23 + $0x88] sm:$0xff]  ;;  %v391_v2 = vld [vmem:[%s8541_s23 + $0x18] sm:$0xff]  ;;  %p8284_p13 = scmp.ne.s32.totalorder %s14886_s9, %s8283_s15  ;;  %s8287_s17 = sshll.u32 %s8349_s16, 4  ;;  %s8288_s17 = int_to_ptr.vmem [resolvable:$false] %s8287_s17 }
  0x41   : > { %v412_v49 = vld [vmem:[%s8541_s23 + $0xc0] sm:$0xff]  ;;  %v413_v54 = vld [vmem:[%s8541_s23 + $0xc8] sm:$0xff]  ;;  %v399_v3 = vld [vmem:[%s8541_s23 + $0x58] sm:$0xff]  ;;  %v7056_v6 = vcombine.high %v390_v0, %v398_v1  ;;  %v7055_v15 = vcombine.low %v390_v0, %v398_v1  ;;  %443 = vperm.xlu0 %7225, %v429_v7   ;;  %453 = vperm.xlu1 %7226, %v431_v14   ;;  %s8289_s18 = scalar_lea.vmem %s8288_s17, 512  ;;  %p8290_p2 = scmp.lt.s32.totalorder %s14886_s9, %s8288_s17 }
  0x42   : > { %v7068_v52 = vcombine.high %v404_v48, %v412_v49  ;;  %v420_v55 = vld [vmem:[%s8541_s23 + $0x100] sm:$0xff]  ;;  %758 = vmatprep.subr.bf16.mxu0 %v7052_v45  ;;  %v7070_v56 = vcombine.high %v405_v53, %v413_v54  ;;  %v421_v57 = vld [vmem:[%s8541_s23 + $0x108] sm:$0xff]  ;;  %831 = vmatprep.subr.bf16.mxu1 %v7054_v50  ;;  %v7067_v58 = vcombine.low %v404_v48, %v412_v49  ;;  %v406_v12 = vld [vmem:[%s8541_s23 + $0x90] sm:$0xff]  ;;  %p8285_p0 = pnand %p8284_p13, %p8431_p6  ;;  %p8291_p3 = scmp.lt.s32.totalorder %s8289_s18, %s8283_s15 }
  0x43   : > { %759 = vmatpush1.bf16.msra.mxu0 %v7051_v47  ;;  %832 = vmatpush1.bf16.msra.mxu1 %v7053_v51  ;;  %v7069_v59 = vcombine.low %v405_v53, %v413_v54  ;;  %v7084_v60 = vcombine.high %v420_v55, %v420_v55  ;;  %v7083_v61 = vcombine.low %v420_v55, %v420_v55  ;;  %v414_v13 = vld [vmem:[%s8541_s23 + $0xd0] sm:$0xff]  ;;  %v407_v16 = vld [vmem:[%s8541_s23 + $0x98] sm:$0xff]  ;;  %v8602_v32 = vld [vmem:[%s8541_s23 + $0x20] sm:$0xff] }
  0x44   : > { %760 = vmatprep.subr.bf16.mxu0 %v7068_v52  ;;  %833 = vmatprep.subr.bf16.mxu1 %v7070_v56  ;;  %v7086_v62 = vcombine.high %v421_v57, %v421_v57  ;;  %v7085_v63 = vcombine.low %v421_v57, %v421_v57  ;;  %v7058_v11 = vcombine.high %v391_v2, %v399_v3  ;;  %v415_v17 = vld [vmem:[%s8541_s23 + $0xd8] sm:$0xff]  ;;  %v422_v20 = vld [vmem:[%s8541_s23 + $0x110] sm:$0xff]  ;;  %v8605_v33 = vld [vmem:[%s8541_s23 + $0x60] sm:$0xff]  ;;  %p8286_p1 = pneg %p8285_p0  ;;  %p8292_p4 = por %p8291_p3, %p8290_p2 }
  0x45   : > { %v711_v5 = vsel %vm709_vm0, %v7083_v61, 0  ;;  %v7057_v18 = vcombine.low %v391_v2, %v399_v3  ;;  %v7072_v19 = vcombine.high %v406_v12, %v414_v13  ;;  %v7074_v21 = vcombine.high %v407_v16, %v415_v17  ;;  %v423_v22 = vld [vmem:[%s8541_s23 + $0x118] sm:$0xff]  ;;  %458 = vperm.xlu0 %7225, %v432_v24   ;;  %v8608_v34 = vld [vmem:[%s8541_s23 + $0x28] sm:$0xff]  ;;  %463 = vperm.xlu1 %7226, %v433_v27   ;;  %v408_v54 = vld [vmem:[%s8541_s23 + $0xa0] sm:$0xff] }
  0x46   : > { %v717_v9 = vsel %vm709_vm0, %v7085_v63, 0  ;;  %v7071_v23 = vcombine.low %v406_v12, %v414_v13  ;;  %v7073_v25 = vcombine.low %v407_v16, %v415_v17  ;;  %v7088_v26 = vcombine.high %v422_v20, %v422_v20  ;;  %v8611_v35 = vld [vmem:[%s8541_s23 + $0x68] sm:$0xff]  ;;  %v3591_v42 = vld [vmem:[%s14933_s4] sm:$0xff]  ;;  %v435_v43 = vld [vmem:[%s14931_s2 + $0x38] sm:$0xff]  ;;  %p8293_p5 = pnand %p8292_p4, %p8286_p1 }
  0x47   : > { %761 = vmatpush1.bf16.msra.mxu0 %v7067_v58  ;;  %834 = vmatpush1.bf16.msra.mxu1 %v7069_v59  ;;  %v7090_v28 = vcombine.high %v423_v22, %v423_v22  ;;  %v7087_v29 = vcombine.low %v422_v20, %v422_v20  ;;  %v7089_v30 = vcombine.low %v423_v22, %v423_v22  ;;  %v8639_v44 = vld [vmem:[%s14930_s1 + $0x10] sm:$0xff]   ;;  %v3592_v46 = vld [vmem:[%s14933_s4 + $0x8] sm:$0xff]  ;;  %v3595_v47 = vld [vmem:[%s14933_s4 + $0x20] sm:$0xff] }
  0x48   : > { %7099 = vmatprep.subr.msk.bf16.mxu0 %vm709_vm0, %v7084_v60  ;;  %7104 = vmatprep.subr.msk.bf16.mxu1 %vm709_vm0, %v7086_v62  ;;  %v7060_v39 = vcombine.high %v8602_v32, %v8605_v33  ;;  %v7062_v40 = vcombine.high %v8608_v34, %v8611_v35  ;;  %v3593_v45 = vld [vmem:[%s14933_s4 + $0x10] sm:$0xff]  ;;  %v3594_v48 = vld [vmem:[%s14933_s4 + $0x18] sm:$0xff]  ;;  %v3596_v51 = vld [vmem:[%s14933_s4 + $0x28] sm:$0xff]  ;;  %v7059_v56 = vcombine.low %v8602_v32, %v8605_v33 }
  0x49   : > { %v723_v37 = vsel %vm709_vm0, %v7087_v29, 0  ;;  %v729_v38 = vsel %vm709_vm0, %v7089_v30, 0  ;;  %468 = vperm.xlu0 %7225, %v434_v36   ;;  %473 = vperm.xlu1 %7226, %v435_v43   ;;  %v8662_v49 = vld [vmem:[%s14930_s1 + $0x18] sm:$0xff]   ;;  %v3597_v50 = vld [vmem:[%s14933_s4 + $0x30] sm:$0xff]  ;;  %v6432_v52 = vld [vmem:[%s14934_s5] sm:$0xff]  ;;  %v7061_v60 = vcombine.low %v8608_v34, %v8611_v35 }
  0x4a   : > { %v3598_v53 = vld [vmem:[%s14933_s4 + $0x38] sm:$0xff]  ;;  %v416_v55 = vld [vmem:[%s8541_s23 + $0xe0] sm:$0xff]  ;;  %v409_v57 = vld [vmem:[%s8541_s23 + $0xa8] sm:$0xff] }
  0x4b   : > { %763 = vmatpush1.bf16.msra.mxu0 %v711_v5  ;;  %836 = vmatpush1.bf16.msra.mxu1 %v717_v9  ;;  %v417_v58 = vld [vmem:[%s8541_s23 + $0xe8] sm:$0xff]  ;;  %v7076_v61 = vcombine.high %v408_v54, %v416_v55  ;;  %v424_v62 = vld [vmem:[%s8541_s23 + $0x120] sm:$0xff]  ;;  %v7075_v1 = vcombine.low %v408_v54, %v416_v55  ;;  %v394_v9 = vld [vmem:[%s8541_s23 + $0x30] sm:$0xff] }
  0x4c   : > { %904 = vmatprep.subr.bf16.mxu0 %v7056_v6  ;;  %977 = vmatprep.subr.bf16.mxu1 %v7058_v11  ;;  %v6434_v59 = vld [vmem:[%s14934_s5 + $0x10] sm:$0xff]  ;;  %v7078_v63 = vcombine.high %v409_v57, %v417_v58  ;;  %v6436_v2 = vld [vmem:[%s14934_s5 + $0x20] sm:$0xff]  ;;  %v7077_v3 = vcombine.low %v409_v57, %v417_v58  ;;  %v7092_v4 = vcombine.high %v424_v62, %v424_v62  ;;  %v6433_v5 = vld [vmem:[%s14934_s5 + $0x8] sm:$0xff] }
  0x4d   : > { %3601 = vperm.xlu0 %7225, %v3591_v42   ;;  %3606 = vperm.xlu1 %7226, %v3592_v46   ;;  %v425_v0 = vld [vmem:[%s8541_s23 + $0x128] sm:$0xff]  ;;  %v7091_v7 = vcombine.low %v424_v62, %v424_v62  ;;  %v402_v11 = vld [vmem:[%s8541_s23 + $0x70] sm:$0xff]  ;;  %v395_v12 = vld [vmem:[%s8541_s23 + $0x38] sm:$0xff] }
  0x4e   : > { %7100 = vmatmul.mubr.msk.bf16.vlgmr.msra.gmra.mrb[0].mxu0 %vm696_vm1, %v8573_v10  ;;  %7105 = vmatmul.mubr.msk.bf16.vlgmr.msra.gmra.mrb[0].mxu1 %vm696_vm1, %v8573_v10  ;;  %v7094_v6 = vcombine.high %v425_v0, %v425_v0  ;;  %v7093_v8 = vcombine.low %v425_v0, %v425_v0  ;;  %v403_v13 = vld [vmem:[%s8541_s23 + $0x78] sm:$0xff]  ;;  %v6438_v14 = vld [vmem:[%s14934_s5 + $0x30] sm:$0xff]  ;;  %v7064_v16 = vcombine.high %v394_v9, %v402_v11 }
  0x4f   : > { %905 = vmatpush1.bf16.msra.mxu0 %v7055_v15  ;;  %978 = vmatpush1.bf16.msra.mxu1 %v7057_v18  ;;  %v735_v15 = vsel %vm709_vm0, %v7091_v7, 0  ;;  %v7066_v18 = vcombine.high %v395_v12, %v403_v13  ;;  %v6816_v20 = vld [vmem:[#allocation2] sm:$0x1]  ;;  %v6439_v22 = vld [vmem:[%s14934_s5 + $0x38] sm:$0xff] }
  0x50   : > { %800 = vmatprep.mubr.bf16.mxu0 %v14937_v41  ;;  %873 = vmatprep.mubr.bf16.mxu1 %v14937_v41  ;;  %v741_v17 = vsel %vm709_vm0, %v7093_v8, 0  ;;  %v418_v24 = vld [vmem:[%s8541_s23 + $0xf0] sm:$0xff]  ;;  %v419_v27 = vld [vmem:[%s8541_s23 + $0xf8] sm:$0xff] }
  0x51   : > { %906 = vmatprep.subr.bf16.mxu0 %v7072_v19  ;;  %979 = vmatprep.subr.bf16.mxu1 %v7074_v21  ;;  %v6435_v19 = vld [vmem:[%s14934_s5 + $0x18] sm:$0xff]  ;;  %v6437_v21 = vld [vmem:[%s14934_s5 + $0x28] sm:$0xff] }
  0x52   : > { %3611 = vperm.xlu0 %7225, %v3593_v45   ;;  %3616 = vperm.xlu1 %7226, %v3594_v48   ;;  %v426_v30 = vld [vmem:[%s8541_s23 + $0x130] sm:$0xff]  ;;  %v427_v33 = vld [vmem:[%s8541_s23 + $0x138] sm:$0xff] }
  0x53   : > { %907 = vmatpush1.bf16.msra.mxu0 %v7071_v23  ;;  %980 = vmatpush1.bf16.msra.mxu1 %v7073_v25  ;;  %v410_v23 = vld [vmem:[%s8541_s23 + $0xb0] sm:$0xff]  ;;  %v7063_v25 = vcombine.low %v394_v9, %v402_v11  ;;  %v7096_v36 = vcombine.high %v426_v30, %v426_v30 }
  0x54   : > { %7109 = vmatprep.subr.msk.bf16.mxu0 %vm709_vm0, %v7088_v26  ;;  %7114 = vmatprep.subr.msk.bf16.mxu1 %vm709_vm0, %v7090_v28  ;;  %v411_v26 = vld [vmem:[%s8541_s23 + $0xb8] sm:$0xff]  ;;  %v7065_v28 = vcombine.low %v395_v12, %v403_v13  ;;  %v7080_v29 = vcombine.high %v410_v23, %v418_v24  ;;  %v7079_v34 = vcombine.low %v410_v23, %v418_v24 }
  0x55   : > { %v7082_v32 = vcombine.high %v411_v26, %v419_v27  ;;  %v7081_v35 = vcombine.low %v411_v26, %v419_v27 }
  0x56   : > { %7101 = vmatmul.mubr.msk.bf16.gmra.mrb[4].mxu0 %vm696_vm1, %v8599_v31  ;;  %7106 = vmatmul.mubr.msk.bf16.gmra.mrb[4].mxu1 %vm696_vm1, %v8599_v31 }
  0x57   : > { %810 = vmatprep.mubr.bf16.mxu0 %v14937_v41  ;;  %883 = vmatprep.mubr.bf16.mxu1 %v14937_v41 }
  0x58   : > { %909 = vmatpush1.bf16.msra.mxu0 %v723_v37  ;;  %982 = vmatpush1.bf16.msra.mxu1 %v729_v38  ;;  %v7098_v37 = vcombine.high %v427_v33, %v427_v33  ;;  %v7095_v38 = vcombine.low %v426_v30, %v426_v30 }
  0x59   : > { %1050 = vmatprep.subr.bf16.mxu0 %v7060_v39  ;;  %1123 = vmatprep.subr.bf16.mxu1 %v7062_v40  ;;  %v7097_v39 = vcombine.low %v427_v33, %v427_v33 }
  0x5a   : > { %3621 = vperm.xlu0 %7225, %v3595_v47   ;;  %3626 = vperm.xlu1 %7226, %v3596_v51   ;;  %v747_v40 = vsel %vm709_vm0, %v7095_v38, 0 }
  0x5b   : > { %v753_v42 = vsel %vm709_vm0, %v7097_v39, 0 }
  0x5e   : > { %7102 = vmatmul.mubr.msk.bf16.gmra.mrb[8].mxu0 %vm696_vm1, %v8639_v44  ;;  %7107 = vmatmul.mubr.msk.bf16.gmra.mrb[8].mxu1 %vm696_vm1, %v8639_v44 }
  0x5f   : > { %820 = vmatprep.mubr.bf16.mxu0 %v14937_v41  ;;  %893 = vmatprep.mubr.bf16.mxu1 %v14937_v41 }
  0x60   : > { %3631 = vperm.xlu0 %7225, %v3597_v50   ;;  %3636 = vperm.xlu1 %7226, %v3598_v53  }
  0x64   : > { %6442 = vperm.xlu0 %7225, %v6432_v52   ;;  %6447 = vperm.xlu1 %7226, %v6433_v5  }
  0x66   : > { %7103 = vmatmul.mubr.msk.bf16.gmra.mrb[12].mxu0 %vm696_vm1, %v8662_v49  ;;  %7108 = vmatmul.mubr.msk.bf16.gmra.mrb[12].mxu1 %vm696_vm1, %v8662_v49 }
  0x67   : > { %936 = vmatprep.mubr.bf16.mxu0 %v14937_v41  ;;  %1009 = vmatprep.mubr.bf16.mxu1 %v14937_v41 }
  0x68   : > { %6452 = vperm.xlu0 %7225, %v6434_v59   ;;  %6457 = vperm.xlu1 %7226, %v6435_v19  }
  0x6c   : > { %6462 = vperm.xlu0 %7225, %v6436_v2   ;;  %6467 = vperm.xlu1 %7226, %v6437_v21  }
  0x6e   : > { %7110 = vmatmul.mubr.msk.bf16.vlgmr.msra.gmra.mrb[16].mxu0 %vm696_vm1, %v8573_v10  ;;  %7115 = vmatmul.mubr.msk.bf16.vlgmr.msra.gmra.mrb[16].mxu1 %vm696_vm1, %v8573_v10 }
  0x6f   : > { %1051 = vmatpush1.bf16.msra.mxu0 %v7059_v56  ;;  %1124 = vmatpush1.bf16.msra.mxu1 %v7061_v60 }
  0x70   : > { %946 = vmatprep.mubr.bf16.mxu0 %v14937_v41  ;;  %1019 = vmatprep.mubr.bf16.mxu1 %v14937_v41 }
  0x71   : > { %1052 = vmatprep.subr.bf16.mxu0 %v7076_v61  ;;  %1125 = vmatprep.subr.bf16.mxu1 %v7078_v63 }
  0x72   : > { %6472 = vperm.xlu0 %7225, %v6438_v14   ;;  %6477 = vperm.xlu1 %7226, %v6439_v22  }
  0x73   : > { %1053 = vmatpush1.bf16.msra.mxu0 %v7075_v1  ;;  %1126 = vmatpush1.bf16.msra.mxu1 %v7077_v3 }
  0x74   : > { %7119 = vmatprep.subr.msk.bf16.mxu0 %vm709_vm0, %v7092_v4  ;;  %7124 = vmatprep.subr.msk.bf16.mxu1 %vm709_vm0, %v7094_v6 }
  0x76   : > { %7111 = vmatmul.mubr.msk.bf16.gmra.mrb[20].mxu0 %vm696_vm1, %v8599_v31  ;;  %7116 = vmatmul.mubr.msk.bf16.gmra.mrb[20].mxu1 %vm696_vm1, %v8599_v31 }
  0x77   : > { %956 = vmatprep.mubr.bf16.mxu0 %v14937_v41  ;;  %1029 = vmatprep.mubr.bf16.mxu1 %v14937_v41 }
  0x78   : > { %1055 = vmatpush1.bf16.msra.mxu0 %v735_v15  ;;  %1128 = vmatpush1.bf16.msra.mxu1 %v741_v17 }
  0x79   : > { %1196 = vmatprep.subr.bf16.mxu0 %v7064_v16  ;;  %1269 = vmatprep.subr.bf16.mxu1 %v7066_v18 }
  0x7a   : > { %6819 = vperm.xlu0 %7225, %v6816_v20  }
  0x7e   : > { %7112 = vmatmul.mubr.msk.bf16.gmra.mrb[24].mxu0 %vm696_vm1, %v8639_v44  ;;  %7117 = vmatmul.mubr.msk.bf16.gmra.mrb[24].mxu1 %vm696_vm1, %v8639_v44 }
  0x7f   : > { %966 = vmatprep.mubr.bf16.mxu0 %v14937_v41  ;;  %1039 = vmatprep.mubr.bf16.mxu1 %v14937_v41 }
  0x86   : > { %7113 = vmatmul.mubr.msk.bf16.gmra.mrb[28].mxu0 %vm696_vm1, %v8662_v49  ;;  %7118 = vmatmul.mubr.msk.bf16.gmra.mrb[28].mxu1 %vm696_vm1, %v8662_v49 }
  0x87   : > { %1082 = vmatprep.mubr.bf16.mxu0 %v14937_v41  ;;  %1155 = vmatprep.mubr.bf16.mxu1 %v14937_v41 }
  0x8e   : > { %7120 = vmatmul.mubr.msk.bf16.vlgmr.msra.gmra.mrb[32].mxu0 %vm696_vm1, %v8573_v10  ;;  %7125 = vmatmul.mubr.msk.bf16.vlgmr.msra.gmra.mrb[32].mxu1 %vm696_vm1, %v8573_v10 }
  0x8f   : > { %1197 = vmatpush1.bf16.msra.mxu0 %v7063_v25  ;;  %1270 = vmatpush1.bf16.msra.mxu1 %v7065_v28 }
  0x90   : > { %1092 = vmatprep.mubr.bf16.mxu0 %v14937_v41  ;;  %1165 = vmatprep.mubr.bf16.mxu1 %v14937_v41 }
  0x91   : > { %1198 = vmatprep.subr.bf16.mxu0 %v7080_v29  ;;  %1271 = vmatprep.subr.bf16.mxu1 %v7082_v32 }
  0x93   : > { %1199 = vmatpush1.bf16.msra.mxu0 %v7079_v34  ;;  %1272 = vmatpush1.bf16.msra.mxu1 %v7081_v35 }
  0x94   : > { %7129 = vmatprep.subr.msk.bf16.mxu0 %vm709_vm0, %v7096_v36  ;;  %7134 = vmatprep.subr.msk.bf16.mxu1 %vm709_vm0, %v7098_v37 }
  0x96   : > { %7121 = vmatmul.mubr.msk.bf16.gmra.mrb[36].mxu0 %vm696_vm1, %v8599_v31  ;;  %7126 = vmatmul.mubr.msk.bf16.gmra.mrb[36].mxu1 %vm696_vm1, %v8599_v31 }
  0x97   : > { %1102 = vmatprep.mubr.bf16.mxu0 %v14937_v41  ;;  %1175 = vmatprep.mubr.bf16.mxu1 %v14937_v41 }
  0x98   : > { %1201 = vmatpush1.bf16.msra.mxu0 %v747_v40  ;;  %1274 = vmatpush1.bf16.msra.mxu1 %v753_v42 }
  0x9e   : > { %7122 = vmatmul.mubr.msk.bf16.gmra.mrb[40].mxu0 %vm696_vm1, %v8639_v44  ;;  %7127 = vmatmul.mubr.msk.bf16.gmra.mrb[40].mxu1 %vm696_vm1, %v8639_v44 }
  0x9f   : > { %1112 = vmatprep.mubr.bf16.mxu0 %v14937_v41  ;;  %1185 = vmatprep.mubr.bf16.mxu1 %v14937_v41 }
  0xa6   : > { %7123 = vmatmul.mubr.msk.bf16.gmra.mrb[44].mxu0 %vm696_vm1, %v8662_v49  ;;  %7128 = vmatmul.mubr.msk.bf16.gmra.mrb[44].mxu1 %vm696_vm1, %v8662_v49 }
  0xa7   : > { %1228 = vmatprep.mubr.bf16.mxu0 %v14937_v41  ;;  %1301 = vmatprep.mubr.bf16.mxu1 %v14937_v41 }
  0xae   : > { %7130 = vmatmul.mubr.msk.bf16.vlgmr.msra.gmra.mrb[48].mxu0 %vm696_vm1, %v8573_v10  ;;  %7135 = vmatmul.mubr.msk.bf16.vlgmr.msra.gmra.mrb[48].mxu1 %vm696_vm1, %v8573_v10 }
  0xaf   : > { %1238 = vmatprep.mubr.bf16.mxu0 %v14937_v41  ;;  %1311 = vmatprep.mubr.bf16.mxu1 %v14937_v41 }
  0xb6   : > { %7131 = vmatmul.mubr.msk.bf16.gmra.mrb[52].mxu0 %vm696_vm1, %v8599_v31  ;;  %7136 = vmatmul.mubr.msk.bf16.gmra.mrb[52].mxu1 %vm696_vm1, %v8599_v31 }
  0xb7   : > { %1248 = vmatprep.mubr.bf16.mxu0 %v14937_v41  ;;  %1321 = vmatprep.mubr.bf16.mxu1 %v14937_v41 }
  0xbc   : > { %v8803_v10 = vpop.permute.xlu0 %438  ;;  %v8837_v15 = vpop.permute.xlu1 %448 }
  0xbd   : > { %15077 = vst [vmem:[#allocation7_spill] sm:$0xff] %v8803_v10  ;;  %15079 = vst [vmem:[#allocation9_spill] sm:$0xff] %v8837_v15 }
  0xbe   : > { %7132 = vmatmul.mubr.msk.bf16.gmra.mrb[56].mxu0 %vm696_vm1, %v8639_v44  ;;  %7137 = vmatmul.mubr.msk.bf16.gmra.mrb[56].mxu1 %vm696_vm1, %v8639_v44 }
  0xbf   : > { %1258 = vmatprep.mubr.bf16.mxu0 %v14937_v41  ;;  %1331 = vmatprep.mubr.bf16.mxu1 %v14937_v41 }
  0xc0   : > { %v8805_v31 = vpop.permute.xlu0 %443 }
  0xc1   : > { %15078 = vst [vmem:[#allocation8_spill] sm:$0xff] %v8805_v31 }
  0xc6   : > { %7133 = vmatmul.mubr.msk.bf16.gmra.mrb[60].mxu0 %vm696_vm1, %v8662_v49  ;;  %7138 = vmatmul.mubr.msk.bf16.gmra.mrb[60].mxu1 %vm696_vm1, %v8662_v49 }
  0xc7   : > { %3704 = vmatprep.mubr.bf16.mxu0 %v14937_v41  ;;  %3777 = vmatprep.mubr.bf16.mxu1 %v14937_v41 }
 0x121   : > { %v792_v43 = vpop.f32.mrb[0].mxu0  ;;  %v865_v45 = vpop.f32.mrb[0].mxu1 }
 0x122   : > { %v8808_v44 = vadd.f32 %v792_v43, %v8803_v10  ;;  %v794_v46 = vpop.f32.mrb[1].mxu0  ;;  %v8811_v47 = vadd.f32 %v865_v45, %v8803_v10  ;;  %v867_v49 = vpop.f32.mrb[1].mxu1 }
 0x123   : > { %v8814_v48 = vadd.f32 %v794_v46, %v8803_v10  ;;  %v796_v50 = vpop.f32.mrb[2].mxu0  ;;  %v8818_v52 = vadd.f32 %v867_v49, %v8803_v10  ;;  %v869_v54 = vpop.f32.mrb[2].mxu1 }
 0x124   : > { %v1342_v51 = vmul.f32 100.0, %v8808_v44  ;;  %v8821_v53 = vadd.f32 %v796_v50, %v8805_v31  ;;  %v798_v55 = vpop.f32.mrb[3].mxu0  ;;  %v1344_v56 = vmul.f32 100.0, %v8811_v47  ;;  %v871_v57 = vpop.f32.mrb[3].mxu1  ;;  %v8828_v63 = vadd.f32 %v869_v54, %v8805_v31 }
 0x125   : > { %v1343_v59 = vmul.f32 100.0, %v8814_v48  ;;  %v1345_v62 = vmul.f32 100.0, %v8818_v52  ;;  %v8831_v2 = vadd.f32 %v798_v55, %v8805_v31  ;;  %v8835_v14 = vadd.f32 %v871_v57, %v8805_v31 }
 0x126   : > { %v1598_v58 = vand.u32 2147483647, %v1342_v51  ;;  %v1358_v60 = vmul.f32 100.0, %v8821_v53  ;;  %v1600_v61 = vand.u32 2147483647, %v1344_v56  ;;  %v1360_v4 = vmul.f32 100.0, %v8828_v63 }
 0x127   : > { %v1599_v7 = vand.u32 2147483647, %v1343_v59  ;;  %v1601_v12 = vand.u32 2147483647, %v1345_v62  ;;  %v1359_v17 = vmul.f32 100.0, %v8831_v2  ;;  %v1361_v23 = vmul.f32 100.0, %v8835_v14 }
 0x128   : > { %v1726_v0 = vsub.f32 0.0, %v1598_v58  ;;  %v1614_v1 = vand.u32 2147483647, %v1358_v60  ;;  %v1728_v3 = vsub.f32 0.0, %v1600_v61  ;;  %v1616_v13 = vand.u32 2147483647, %v1360_v4 }
 0x129   : > { %v802_v5 = vpop.f32.mrb[4].mxu0  ;;  %v875_v9 = vpop.f32.mrb[4].mxu1  ;;  %v1727_v22 = vsub.f32 0.0, %v1599_v7  ;;  %v1729_v27 = vsub.f32 0.0, %v1601_v12  ;;  %v1615_v30 = vand.u32 2147483647, %v1359_v17  ;;  %v6822_v57 = vlaneseq }
 0x12a   : > { %v1854_v6 = vmul.f32 1.442695, %v1726_v0  ;;  %v1742_v8 = vsub.f32 0.0, %v1614_v1  ;;  %v1858_v11 = vmul.f32 1.442695, %v1728_v3  ;;  %v804_v18 = vpop.f32.mrb[5].mxu0  ;;  %v8846_v24 = vadd.f32 %v802_v5, %v8837_v15 }
 0x12b   : > { %v1744_v19 = vsub.f32 0.0, %v1616_v13  ;;  %v8840_v20 = vpop.f32.mrb[5].mxu1  ;;  %v8842_v21 = vpop.f32.mrb[6].mxu0  ;;  %v8856_v33 = vadd.f32 %v875_v9, %v8837_v15  ;;  %v1856_v35 = vmul.f32 1.442695, %v1727_v22  ;;  %v1743_v43 = vsub.f32 0.0, %v1615_v30 }
 0x12c   : > { %7251 = vpow2.f32 %v1854_v6  ;;  %v1886_v16 = vmul.f32 1.442695, %v1742_v8  ;;  %v8848_v25 = vpop.f32.mrb[6].mxu1  ;;  %v8850_v26 = vpop.f32.mrb[7].mxu0  ;;  %v1374_v32 = vmul.f32 100.0, %v8846_v24  ;;  %v8886_v4 = vadd.f32 %v804_v18, %v8837_v15 }
 0x12d   : > { %7253 = vpow2.f32 %v1858_v11  ;;  %v1890_v28 = vmul.f32 1.442695, %v1744_v19  ;;  %v8852_v29 = vpop.f32.mrb[7].mxu1  ;;  %v1617_v36 = vand.u32 2147483647, %v1361_v23  ;;  %v1376_v50 = vmul.f32 100.0, %v8856_v33 }
 0x12e   : > { %7255 = vpow2.f32 %v1886_v16  ;;  %v1860_v39 = vmul.f32 1.442695, %v1729_v27  ;;  %v1630_v45 = vand.u32 2147483647, %v1374_v32  ;;  %v1888_v60 = vmul.f32 1.442695, %v1743_v43 }
 0x12f   : > { %7257 = vpow2.f32 %v1890_v28  ;;  %v1745_v55 = vsub.f32 0.0, %v1617_v36  ;;  %v1632_v62 = vand.u32 2147483647, %v1376_v50  ;;  %v8892_v7 = vshrl.u32 %v6822_v57, 7 }
 0x130   : > { %7259 = vpow2.f32 %v1856_v35  ;;  %v1758_v61 = vsub.f32 0.0, %v1630_v45  ;;  %v8913_v32 = vadd.f32 %v8840_v20, %v8837_v15  ;;  %v8920_v43 = vmul.f32 100.0, %v8886_v4  ;;  %v8922_v45 = vpop.permute.xlu1 %453 }
 0x131   : > { %v8858_v34 = vpop.f32.mrb[8].mxu0  ;;  %v8860_v37 = vpop.f32.mrb[8].mxu1  ;;  %7261 = vpow2.f32 %v1860_v39  ;;  %v1892_v3 = vmul.f32 1.442695, %v1745_v55  ;;  %15080 = vst [vmem:[#allocation10_spill] sm:$0xff] %v8892_v7  ;;  %v1760_v30 = vsub.f32 0.0, %v1632_v62 }
 0x132   : > { %v8862_v38 = vpop.f32.mrb[9].mxu0  ;;  %v8864_v40 = vpop.f32.mrb[9].mxu1  ;;  %v1918_v19 = vmul.f32 1.442695, %v1758_v61  ;;  %15083 = vst [vmem:[#allocation13_spill] sm:$0xff] %v8922_v45 }
 0x133   : > { %v8866_v42 = vpop.f32.mrb[10].mxu0  ;;  %v8868_v46 = vpop.f32.mrb[10].mxu1 }
 0x134   : > { %v8870_v49 = vpop.f32.mrb[11].mxu0  ;;  %v8873_v51 = vpop.f32.mrb[11].mxu1 }
 0x136   : > { %v8875_v54 = vpop.eup %7251 }
 0x137   : > { %v8877_v56 = vpop.eup %7253  ;;  %v2110_v58 = vadd.f32 1.0, %v8875_v54  ;;  %v2113_v36 = vmul.f32 -0.5, %v8875_v54  ;;  %v2116_v55 = vand.u32 2147483647, %v8875_v54 }
 0x138   : > { %v2128_v59 = vadd.f32 1.0, %v8877_v56  ;;  %v8883_v1 = vpop.eup %7255 }
 0x139   : > { %7263 = vlog2.f32 %v2110_v58  ;;  %v8881_v0 = vpop.f32.mrb[12].mxu0  ;;  %v8888_v5 = vpop.f32.mrb[12].mxu1  ;;  %v2254_v27 = vadd.f32 1.0, %v8883_v1  ;;  %v2131_v58 = vmul.f32 -0.5, %v8877_v56  ;;  %v2257_v62 = vmul.f32 -0.5, %v8883_v1 }
 0x13a   : > { %7265 = vlog2.f32 %v2128_v59  ;;  %v8890_v6 = vpop.f32.mrb[13].mxu0  ;;  %v8897_v12 = vpop.f32.mrb[13].mxu1  ;;  %v2114_v20 = vadd.f32 1.0, %v2113_v36  ;;  %v2260_v15 = vand.u32 2147483647, %v8883_v1 }
 0x13b   : > { %v8899_v13 = vpop.f32.mrb[14].mxu0  ;;  %v8901_v16 = vpop.eup %7257  ;;  %7267 = vpow2.f32 %v1888_v60  ;;  %v8933_v60 = vadd.f32 %v8842_v21, %v8922_v45  ;;  %v2134_v21 = vand.u32 2147483647, %v8877_v56  ;;  %v2132_v36 = vadd.f32 1.0, %v2131_v58 }
 0x13c   : > { %v8905_v22 = vpop.f32.mrb[14].mxu1  ;;  %v8907_v23 = vpop.f32.mrb[15].mxu0  ;;  %7269 = vpow2.f32 %v1892_v3  ;;  %v2272_v50 = vadd.f32 1.0, %v8901_v16  ;;  %v1922_v3 = vmul.f32 1.442695, %v1760_v30  ;;  %v2275_v11 = vmul.f32 -0.5, %v8901_v16 }
 0x13d   : > { %15081 = vst [vmem:[#allocation11_spill] sm:$0xff] %v8907_v23  ;;  %v8915_v35 = vpop.f32.mrb[15].mxu1  ;;  %7271 = vlog2.f32 %v2254_v27  ;;  %v8927_v57 = vpop.eup %7259  ;;  %v1377_v27 = vmul.f32 100.0, %v8913_v32  ;;  %v2258_v7 = vadd.f32 1.0, %v2257_v62  ;;  %vm8975_vm2 = vcmp.lt.f32.partialorder %v2116_v55, 0.0004427343 }
 0x13e   : > { %15082 = vst [vmem:[#allocation12_spill] sm:$0xff] %v8915_v35  ;;  %7273 = vpow2.f32 %v1918_v19  ;;  %v8935_v61 = vpop.eup %7261  ;;  %v1631_v19 = vand.u32 2147483647, %v8920_v43  ;;  %v2119_v17 = vadd.f32 1.0, %v8927_v57  ;;  %v1390_v43 = vmul.f32 100.0, %v8933_v60 }
 0x13f   : > { %7275 = vlog2.f32 %v2272_v50  ;;  %v2137_v18 = vadd.f32 1.0, %v8935_v61  ;;  %v1633_v31 = vand.u32 2147483647, %v1377_v27  ;;  %vm8979_vm3 = vcmp.lt.f32.partialorder %v2134_v21, 0.0004427343 }
 0x140   : > { %7277 = vlog2.f32 %v2119_v17  ;;  %vm8990_vm4 = vcmp.lt.f32.partialorder %v2260_v15, 0.0004427343  ;;  %v1759_v35 = vsub.f32 0.0, %v1631_v19  ;;  %v15102_v19 = vmax.f32 %v8808_v44, 0.0 }
 0x141   : > { %v8939_v41 = vpop.f32.mrb[16].mxu0  ;;  %v8943_v59 = vpop.f32.mrb[16].mxu1  ;;  %7279 = vlog2.f32 %v2137_v18  ;;  %v2259_v18 = vmul.f32 %v8883_v1, %v2258_v7  ;;  %v2140_v21 = vmul.f32 -0.5, %v8935_v61 }
 0x142   : > { %15084 = vst [vmem:[#allocation14_spill] sm:$0xff] %v8939_v41  ;;  %15085 = vst [vmem:[#allocation15_spill] sm:$0xff] %v8943_v59  ;;  %v8948_v50 = vpop.f32.mrb[17].mxu0  ;;  %v8950_v30 = vpop.f32.mrb[17].mxu1  ;;  %v8959_v59 = vadd.f32 %v8848_v25, %v8922_v45  ;;  %v2278_v41 = vand.u32 2147483647, %v8901_v16  ;;  %7281 = vpow2.f32 %v1922_v3 }
 0x143   : > { %v7264_v39 = vpop.eup %7263  ;;  %15086 = vst [vmem:[#allocation16_spill] sm:$0xff] %v8948_v50  ;;  %15087 = vst [vmem:[#allocation17_spill] sm:$0xff] %v8950_v30  ;;  %v8954_v8 = vpop.f32.mrb[18].mxu0 }
 0x144   : > { %v7266_v28 = vpop.eup %7265  ;;  %v2112_v9 = vmul.f32 0.6931472, %v7264_v39  ;;  %15088 = vst [vmem:[#allocation18_spill] sm:$0xff] %v8954_v8  ;;  %v8961_v50 = vpop.f32.mrb[18].mxu1  ;;  %v2115_v39 = vmul.f32 %v8875_v54, %v2114_v20  ;;  %v8969_v8 = vadd.f32 %v8850_v26, %v8922_v45  ;;  %v2276_v54 = vadd.f32 1.0, %v2275_v11 }
 0x145   : > { %15089 = vst [vmem:[#allocation19_spill] sm:$0xff] %v8961_v50  ;;  %v8963_v30 = vpop.eup %7267  ;;  %v2130_v58 = vmul.f32 0.6931472, %v7266_v28  ;;  %v8971_v62 = vpop.f32.mrb[19].mxu0  ;;  %v2133_v20 = vmul.f32 %v8877_v56, %v2132_v36  ;;  %vm9002_vm5 = vcmp.lt.f32.partialorder %v2278_v41, 0.0004427343 }
 0x146   : > { %15090 = vst [vmem:[#allocation20_spill] sm:$0xff] %v8971_v62  ;;  %v8973_v27 = vpop.f32.mrb[19].mxu1  ;;  %v8983_v28 = vpop.eup %7269  ;;  %v2118_v26 = vsel %vm8975_vm2, %v2115_v39, %v2112_v9  ;;  %v2122_v62 = vmul.f32 -0.5, %v8927_v57  ;;  %v2263_v17 = vadd.f32 1.0, %v8963_v30  ;;  %v2277_v3 = vmul.f32 %v8901_v16, %v2276_v54 }
 0x147   : > { %15091 = vst [vmem:[#allocation21_spill] sm:$0xff] %v8973_v27  ;;  %v7272_v55 = vpop.eup %7271  ;;  %v2125_v27 = vand.u32 2147483647, %v8927_v57  ;;  %v2136_v56 = vsel %vm8979_vm3, %v2133_v20, %v2130_v58  ;;  %v3263_v25 = vmul.f32 0.01, %v2118_v26  ;;  %v1761_v20 = vsub.f32 0.0, %v1633_v31 }
 0x148   : > { %v8997_v10 = vpop.eup %7273  ;;  %v2256_v9 = vmul.f32 0.6931472, %v7272_v55  ;;  %v1646_v55 = vand.u32 2147483647, %v1390_v43  ;;  %v3265_v1 = vmul.f32 0.01, %v2136_v56  ;;  %7283 = vlog2.f32 %v2263_v17 }
 0x149   : > { %v8995_v11 = vpop.f32.mrb[20].mxu0  ;;  %v9006_v15 = vpop.f32.mrb[20].mxu1  ;;  %v2398_v7 = vadd.f32 1.0, %v8997_v10  ;;  %v1920_v26 = vmul.f32 1.442695, %v1759_v35  ;;  %v1392_v16 = vmul.f32 100.0, %v8959_v59  ;;  %v9018_v54 = vadd.f32 %v3263_v25, %v15102_v19 }
 0x14a   : > { %15098 = vst [vmem:[#allocation22_spill] sm:$0xff] %v8995_v11  ;;  %15101 = vst [vmem:[#allocation23_spill] sm:$0xff] %v9006_v15  ;;  %v7276_v39 = vpop.eup %7275  ;;  %v2281_v11 = vadd.f32 1.0, %v8983_v28  ;;  %v2262_v50 = vsel %vm8990_vm4, %v2259_v18, %v2256_v9  ;;  %v1774_v23 = vsub.f32 0.0, %v1646_v55  ;;  %v15104_v31 = vmax.f32 %v8821_v53, 0.0  ;;  %v9025_v56 = vpop.f32.mrb[21].mxu0 }
 0x14b   : > { %v2274_v58 = vmul.f32 0.6931472, %v7276_v39  ;;  %v3279_v41 = vmul.f32 0.01, %v2262_v50  ;;  %15103 = vst [vmem:[#allocation24_spill] sm:$0xff] %v9018_v54  ;;  %v2123_v9 = vadd.f32 1.0, %v2122_v62  ;;  %v7278_v36 = vpop.eup %7277 }
 0x14c   : > { %7285 = vlog2.f32 %v2281_v11  ;;  %v1924_v18 = vmul.f32 1.442695, %v1761_v20  ;;  %v1950_v35 = vmul.f32 1.442695, %v1774_v23  ;;  %v15106_v39 = vmax.f32 %v8811_v47, 0.0  ;;  %v9039_v11 = vpop.f32.mrb[21].mxu1 }
 0x14d   : > { %v2280_v15 = vsel %vm9002_vm5, %v2277_v3, %v2274_v58  ;;  %v9023_v43 = vadd.f32 %v3279_v41, %v15104_v31  ;;  %v15108_v25 = vmax.f32 %v8828_v63, 0.0  ;;  %7287 = vlog2.f32 %v2398_v7  ;;  %v9080_v44 = vpop.f32.mrb[22].mxu1 }
 0x14e   : > { %v3281_v17 = vmul.f32 0.01, %v2280_v15  ;;  %v9029_v3 = vadd.f32 %v3265_v1, %v15106_v39  ;;  %v7280_v15 = vpop.eup %7279  ;;  %v2143_v50 = vand.u32 2147483647, %v8935_v61  ;;  %7289 = vpow2.f32 %v1920_v26 }
 0x14f   : > { %15105 = vst [vmem:[#allocation25_spill] sm:$0xff] %v9023_v43  ;;  %v1648_v23 = vand.u32 2147483647, %v1392_v16  ;;  %v9041_v47 = vpop.eup %7281  ;;  %v2141_v58 = vadd.f32 1.0, %v2140_v21  ;;  %7291 = vpow2.f32 %v1950_v35  ;;  %v1391_v63 = vmul.f32 100.0, %v8969_v8  ;;  %v9163_v43 = vpop.permute.xlu1 %463 }
 0x150   : > { %15107 = vst [vmem:[#allocation26_spill] sm:$0xff] %v9029_v3  ;;  %v9035_v53 = vadd.f32 %v3281_v17, %v15108_v25  ;;  %v2124_v55 = vmul.f32 %v8927_v57, %v2123_v9  ;;  %vm9047_vm6 = vcmp.lt.f32.partialorder %v2125_v27, 0.0004427343  ;;  %v2266_v41 = vmul.f32 -0.5, %v8963_v30  ;;  %v9059_v9 = vpop.permute.xlu0 %458  ;;  %15128 = vst [vmem:[#allocation31_spill] sm:$0xff] %v9163_v43 }
 0x151   : > { %7293 = vpow2.f32 %v1924_v18  ;;  %v2121_v7 = vmul.f32 0.6931472, %v7278_v36  ;;  %v2284_v26 = vmul.f32 -0.5, %v8983_v28  ;;  %v1776_v16 = vsub.f32 0.0, %v1648_v23  ;;  %15112 = vst [vmem:[#allocation28_spill] sm:$0xff] %v9059_v9 }
 0x152   : > { %15109 = vst [vmem:[#allocation27_spill] sm:$0xff] %v9035_v53  ;;  %v1647_v19 = vand.u32 2147483647, %v1391_v63  ;;  %v2139_v21 = vmul.f32 0.6931472, %v7280_v15  ;;  %v2401_v31 = vmul.f32 -0.5, %v8997_v10  ;;  %v9057_v57 = vadd.f32 %v8852_v29, %v8922_v45  ;;  %v7284_v27 = vpop.eup %7283 }
 0x153   : > { %v2416_v17 = vadd.f32 1.0, %v9041_v47  ;;  %v2142_v35 = vmul.f32 %v8935_v61, %v2141_v58  ;;  %vm9062_vm7 = vcmp.lt.f32.partialorder %v2143_v50, 0.0004427343  ;;  %v1954_v36 = vmul.f32 1.442695, %v1776_v16  ;;  %v9075_v50 = vpop.f32.mrb[22].mxu0 }
 0x154   : > { %v1775_v39 = vsub.f32 0.0, %v1647_v19  ;;  %v2267_v25 = vadd.f32 1.0, %v2266_v41  ;;  %v2269_v15 = vand.u32 2147483647, %v8963_v30  ;;  %v2287_v23 = vand.u32 2147483647, %v8983_v28 }
 0x155   : > { %v9070_v29 = vadd.f32 %v8858_v34, %v9059_v9  ;;  %v2127_v63 = vsel %vm9047_vm6, %v2124_v55, %v2121_v7  ;;  %v2285_v20 = vadd.f32 1.0, %v2284_v26  ;;  %v2404_v61 = vand.u32 2147483647, %v8997_v10 }
 0x156   : > { %7295 = vpow2.f32 %v1954_v36  ;;  %v7286_v58 = vpop.eup %7285  ;;  %v2145_v41 = vsel %vm9062_vm7, %v2142_v35, %v2139_v21  ;;  %v2402_v16 = vadd.f32 1.0, %v2401_v31  ;;  %v1393_v19 = vmul.f32 100.0, %v9057_v57  ;;  %v9131_v21 = vpop.f32.mrb[23].mxu0 }
 0x157   : > { %7297 = vlog2.f32 %v2416_v17  ;;  %v7288_v34 = vpop.eup %7287  ;;  %v2265_v62 = vmul.f32 0.6931472, %v7284_v27  ;;  %v1952_v1 = vmul.f32 1.442695, %v1775_v39  ;;  %v9085_v7 = vadd.f32 %v8860_v37, %v9059_v9 }
 0x158   : > { %v9087_v26 = vpop.eup %7289  ;;  %v2268_v18 = vmul.f32 %v8963_v30, %v2267_v25  ;;  %vm9090_vm8 = vcmp.lt.f32.partialorder %v2269_v15, 0.0004427343  ;;  %vm9094_vm9 = vcmp.lt.f32.partialorder %v2287_v23, 0.0004427343  ;;  %v1406_v17 = vmul.f32 100.0, %v9070_v29 }
 0x159   : > { %v9099_v27 = vpop.eup %7291  ;;  %v3264_v35 = vmul.f32 0.01, %v2127_v63  ;;  %v3266_v36 = vmul.f32 0.01, %v2145_v41  ;;  %v2286_v37 = vmul.f32 %v8983_v28, %v2285_v20  ;;  %vm9102_vm10 = vcmp.lt.f32.partialorder %v2404_v61, 0.0004427343 }
 0x15a   : > { %v2283_v25 = vmul.f32 0.6931472, %v7286_v58  ;;  %v2403_v15 = vmul.f32 %v8997_v10, %v2402_v16  ;;  %v2542_v23 = vadd.f32 1.0, %v9099_v27  ;;  %v1649_v55 = vand.u32 2147483647, %v1393_v19 }
 0x15b   : > { %v9106_v30 = vpop.eup %7293  ;;  %v2271_v3 = vsel %vm9090_vm8, %v2268_v18, %v2265_v62  ;;  %v2400_v53 = vmul.f32 0.6931472, %v7288_v34  ;;  %7299 = vpow2.f32 %v1952_v1  ;;  %v1408_v63 = vmul.f32 100.0, %v9085_v7 }
 0x15c   : > { %v2407_v28 = vadd.f32 1.0, %v9087_v26  ;;  %7301 = vlog2.f32 %v2542_v23  ;;  %v1662_v20 = vand.u32 2147483647, %v1406_v17  ;;  %v9116_v61 = vadd.f32 %v8862_v38, %v9059_v9 }
 0x15d   : > { %v15121_v10 = vmax.f32 %v8814_v48, 0.0  ;;  %v2419_v41 = vmul.f32 -0.5, %v9041_v47  ;;  %v2425_v62 = vadd.f32 1.0, %v9106_v30  ;;  %v15122_v19 = vmax.f32 %v8818_v52, 0.0 }
 0x15e   : > { %v3280_v1 = vmul.f32 0.01, %v2271_v3  ;;  %v2289_v18 = vsel %vm9094_vm9, %v2286_v37, %v2283_v25  ;;  %v1777_v38 = vsub.f32 0.0, %v1649_v55  ;;  %v2406_v17 = vsel %vm9102_vm10, %v2403_v15, %v2400_v53  ;;  %v9145_v53 = vpop.f32.mrb[23].mxu1 }
 0x15f   : > { %v9120_v58 = vadd.f32 %v3264_v35, %v15121_v10  ;;  %v9127_v34 = vadd.f32 %v3266_v36, %v15122_v19  ;;  %v2422_v35 = vand.u32 2147483647, %v9041_v47  ;;  %v2545_v23 = vmul.f32 -0.5, %v9099_v27 }
 0x160   : > { %v9133_v48 = vpop.eup %7295  ;;  %v1664_v10 = vand.u32 2147483647, %v1408_v63  ;;  %7303 = vlog2.f32 %v2407_v28  ;;  %v1790_v36 = vsub.f32 0.0, %v1662_v20  ;;  %v1407_v31 = vmul.f32 100.0, %v9116_v61 }
 0x161   : > { %15123 = vst [vmem:[#allocation29_spill] sm:$0xff] %v9127_v34  ;;  %v7298_v52 = vpop.eup %7297  ;;  %v2560_v3 = vadd.f32 1.0, %v9133_v48  ;;  %v3282_v55 = vmul.f32 0.01, %v2289_v18  ;;  %v2420_v37 = vadd.f32 1.0, %v2419_v41  ;;  %7305 = vlog2.f32 %v2425_v62 }
 0x162   : > { %v9143_v25 = vadd.f32 %v8864_v40, %v9059_v9  ;;  %v3295_v39 = vmul.f32 0.01, %v2406_v17  ;;  %v2548_v15 = vand.u32 2147483647, %v9099_v27  ;;  %v1956_v63 = vmul.f32 1.442695, %v1777_v38 }
 0x163   : > { %7307 = vlog2.f32 %v2560_v3  ;;  %v2418_v28 = vmul.f32 0.6931472, %v7298_v52  ;;  %vm9148_vm11 = vcmp.lt.f32.partialorder %v2422_v35, 0.0004427343  ;;  %v2546_v20 = vadd.f32 1.0, %v2545_v23 }
 0x164   : > { %v15126_v62 = vmax.f32 %v8831_v2, 0.0  ;;  %v1982_v40 = vmul.f32 1.442695, %v1790_v36  ;;  %v1792_v16 = vsub.f32 0.0, %v1664_v10  ;;  %v1663_v54 = vand.u32 2147483647, %v1407_v31 }
 0x165   : > { %v9157_v17 = vpop.eup %7299  ;;  %v2421_v3 = vmul.f32 %v9041_v47, %v2420_v37  ;;  %v2410_v38 = vmul.f32 -0.5, %v9087_v26  ;;  %v2563_v35 = vmul.f32 -0.5, %v9133_v48  ;;  %v1409_v52 = vmul.f32 100.0, %v9143_v25 }
 0x166   : > { %v9155_v18 = vadd.f32 %v3280_v1, %v15126_v62  ;;  %v7302_v23 = vpop.eup %7301  ;;  %v2413_v2 = vand.u32 2147483647, %v9087_v26  ;;  %v2428_v1 = vmul.f32 -0.5, %v9106_v30  ;;  %vm9167_vm12 = vcmp.lt.f32.partialorder %v2548_v15, 0.0004427343 }
 0x167   : > { %7309 = vpow2.f32 %v1956_v63  ;;  %v2424_v47 = vsel %vm9148_vm11, %v2421_v3, %v2418_v28  ;;  %v2544_v36 = vmul.f32 0.6931472, %v7302_v23  ;;  %v2547_v31 = vmul.f32 %v9099_v27, %v2546_v20 }
 0x168   : > { %15127 = vst [vmem:[#allocation30_spill] sm:$0xff] %v9155_v18  ;;  %v9176_v37 = vadd.f32 %v8866_v42, %v9163_v43  ;;  %v2566_v62 = vand.u32 2147483647, %v9133_v48  ;;  %7311 = vpow2.f32 %v1982_v40  ;;  %v1986_v41 = vmul.f32 1.442695, %v1792_v16 }
 0x169   : > { %v1791_v9 = vsub.f32 0.0, %v1663_v54  ;;  %v2550_v15 = vsel %vm9167_vm12, %v2547_v31, %v2544_v36  ;;  %v2564_v34 = vadd.f32 1.0, %v2563_v35  ;;  %v2551_v63 = vadd.f32 1.0, %v9157_v17  ;;  %v9192_v36 = vpop.f32.mrb[24].mxu0 }
 0x16a   : > { %v1665_v19 = vand.u32 2147483647, %v1409_v52  ;;  %v7304_v28 = vpop.eup %7303  ;;  %v15131_v3 = vmax.f32 %v8835_v14, 0.0  ;;  %v2411_v20 = vadd.f32 1.0, %v2410_v38  ;;  %v2431_v42 = vand.u32 2147483647, %v9106_v30 }
 0x16b   : > { %v3311_v23 = vmul.f32 0.01, %v2550_v15  ;;  %v7306_v18 = vpop.eup %7305  ;;  %v15132_v16 = vmax.f32 %v8846_v24, 0.0  ;;  %v3297_v40 = vmul.f32 0.01, %v2424_v47  ;;  %v2429_v10 = vadd.f32 1.0, %v2428_v1 }
 0x16c   : > { %v9184_v27 = vadd.f32 %v3282_v55, %v15131_v3  ;;  %v1422_v35 = vmul.f32 100.0, %v9176_v37  ;;  %v9194_v52 = vpop.f32.mrb[24].mxu1  ;;  %v15134_v55 = vmax.f32 %v8933_v60, 0.0  ;;  %vm9200_vm13 = vcmp.lt.f32.partialorder %v2566_v62, 0.0004427343 }
 0x16d   : > { %v9189_v54 = vadd.f32 %v3295_v39, %v15132_v16  ;;  %v7308_v14 = vpop.eup %7307  ;;  %7313 = vpow2.f32 %v1986_v41  ;;  %v1984_v24 = vmul.f32 1.442695, %v1791_v9  ;;  %v2565_v1 = vmul.f32 %v9133_v48, %v2564_v34 }
 0x16e   : > { %v9198_v38 = vadd.f32 %v3311_v23, %v15134_v55  ;;  %v2562_v39 = vmul.f32 0.6931472, %v7308_v14  ;;  %7315 = vlog2.f32 %v2551_v63  ;;  %v1793_v47 = vsub.f32 0.0, %v1665_v19  ;;  %v9208_v23 = vpop.f32.mrb[25].mxu0 }
 0x16f   : > { %15133 = vst [vmem:[#allocation32_spill] sm:$0xff] %v9189_v54  ;;  %v2409_v15 = vmul.f32 0.6931472, %v7304_v28  ;;  %v1678_v60 = vand.u32 2147483647, %v1422_v35  ;;  %v2554_v9 = vmul.f32 -0.5, %v9157_v17  ;;  %v2412_v48 = vmul.f32 %v9087_v26, %v2411_v20 }
 0x170   : > { %15135 = vst [vmem:[#allocation33_spill] sm:$0xff] %v9198_v38  ;;  %v2427_v62 = vmul.f32 0.6931472, %v7306_v18  ;;  %v2568_v55 = vsel %vm9200_vm13, %v2565_v1, %v2562_v39  ;;  %7317 = vpow2.f32 %v1984_v24  ;;  %v9219_v19 = vadd.f32 %v8868_v46, %v9163_v43 }
 0x171   : > { %v9214_v34 = vpop.eup %7309  ;;  %v3313_v63 = vmul.f32 0.01, %v2568_v55  ;;  %vm9221_vm14 = vcmp.lt.f32.partialorder %v2413_v2, 0.0004427343  ;;  %v2430_v18 = vmul.f32 %v9106_v30, %v2429_v10  ;;  %vm9226_vm15 = vcmp.lt.f32.partialorder %v2431_v42, 0.0004427343 }
 0x172   : > { %v1988_v14 = vmul.f32 1.442695, %v1793_v47  ;;  %v9230_v31 = vpop.eup %7311  ;;  %v15142_v26 = vmax.f32 %v8856_v33, 0.0  ;;  %v2415_v46 = vsel %vm9221_vm14, %v2412_v48, %v2409_v15  ;;  %v15144_v2 = vmax.f32 %v8959_v59, 0.0  ;;  %v9242_v30 = vpop.f32.mrb[25].mxu1 }
 0x173   : > { %v1806_v39 = vsub.f32 0.0, %v1678_v60  ;;  %15146 = vst [vmem:[#allocation36_spill] sm:$0xff] %v9242_v30  ;;  %v2433_v42 = vsel %vm9226_vm15, %v2430_v18, %v2427_v62  ;;  %v2555_v10 = vadd.f32 1.0, %v2554_v9  ;;  %v2557_v1 = vand.u32 2147483647, %v9157_v17  ;;  %v9300_v33 = vpop.f32.mrb[26].mxu1 }
 0x174   : > { %v9234_v20 = vadd.f32 %v3297_v40, %v15142_v26  ;;  %v9240_v24 = vadd.f32 %v3313_v63, %v15144_v2  ;;  %v2569_v47 = vadd.f32 1.0, %v9214_v34  ;;  %v1424_v59 = vmul.f32 100.0, %v9219_v19  ;;  %15155 = vst [vmem:[#allocation41_spill] sm:$0xff] %v9300_v33 }
 0x175   : > { %v2014_v15 = vmul.f32 1.442695, %v1806_v39  ;;  %v3296_v55 = vmul.f32 0.01, %v2415_v46  ;;  %v2686_v60 = vadd.f32 1.0, %v9230_v31  ;;  %7319 = vpow2.f32 %v1988_v14 }
 0x176   : > { %15143 = vst [vmem:[#allocation34_spill] sm:$0xff] %v9234_v20  ;;  %15145 = vst [vmem:[#allocation35_spill] sm:$0xff] %v9240_v24  ;;  %v2572_v9 = vmul.f32 -0.5, %v9214_v34  ;;  %v3298_v35 = vmul.f32 0.01, %v2433_v42  ;;  %v9261_v46 = vadd.f32 %v8870_v49, %v9163_v43  ;;  %v9265_v2 = vadd.f32 %v8873_v51, %v9163_v43 }
 0x177   : > { %v9254_v62 = vpop.eup %7313  ;;  %7321 = vpow2.f32 %v2014_v15  ;;  %v1680_v26 = vand.u32 2147483647, %v1424_v59  ;;  %v2556_v14 = vmul.f32 %v9157_v17, %v2555_v10  ;;  %vm9268_vm0 = vcmp.lt.f32.partialorder %v2557_v1, 0.0004427343  ;;  %v9282_v1 = vpop.f32.mrb[26].mxu0 }
 0x178   : > { %v7316_v18 = vpop.eup %7315  ;;  %7323 = vlog2.f32 %v2569_v47  ;;  %v2575_v15 = vand.u32 2147483647, %v9214_v34  ;;  %v15149_v42 = vmax.f32 %v8886_v4, 0.0  ;;  %v1423_v40 = vmul.f32 100.0, %v9261_v46  ;;  %15151 = vst [vmem:[#allocation38_spill] sm:$0xff] %v9282_v1  ;;  %v9284_v47 = vpop.permute.xlu0 %468 }
 0x179   : > { %7325 = vlog2.f32 %v2686_v60  ;;  %v1808_v49 = vsub.f32 0.0, %v1680_v26  ;;  %v2553_v51 = vmul.f32 0.6931472, %v7316_v18  ;;  %v2573_v28 = vadd.f32 1.0, %v2572_v9  ;;  %15152 = vst [vmem:[#allocation39_spill] sm:$0xff] %v9284_v47  ;;  %v9344_v1 = vpop.f32.mrb[27].mxu1 }
 0x17a   : > { %v9275_v59 = vadd.f32 %v3296_v55, %v15149_v42  ;;  %v9278_v3 = vpop.eup %7317  ;;  %v2704_v17 = vadd.f32 1.0, %v9254_v62  ;;  %v1425_v10 = vmul.f32 100.0, %v9265_v2  ;;  %v15153_v4 = vmax.f32 %v8913_v32, 0.0  ;;  %15163 = vst [vmem:[#allocation44_spill] sm:$0xff] %v9344_v1 }
 0x17b   : > { %v2689_v60 = vmul.f32 -0.5, %v9230_v31  ;;  %v2018_v26 = vmul.f32 1.442695, %v1808_v49  ;;  %v1679_v42 = vand.u32 2147483647, %v1423_v40  ;;  %v2707_v63 = vmul.f32 -0.5, %v9254_v62 }
 0x17c   : > { %15150 = vst [vmem:[#allocation37_spill] sm:$0xff] %v9275_v59  ;;  %v9288_v55 = vadd.f32 %v3298_v35, %v15153_v4  ;;  %v1681_v18 = vand.u32 2147483647, %v1425_v10  ;;  %v9294_v9 = vadd.f32 %v8881_v0, %v9284_v47  ;;  %v9298_v48 = vadd.f32 %v8888_v5, %v9284_v47 }
 0x17d   : > { %v2692_v32 = vand.u32 2147483647, %v9230_v31  ;;  %v2698_v35 = vmul.f32 -0.5, %v9278_v3  ;;  %7327 = vpow2.f32 %v2018_v26  ;;  %v1807_v49 = vsub.f32 0.0, %v1679_v42 }
 0x17e   : > { %15154 = vst [vmem:[#allocation40_spill] sm:$0xff] %v9288_v55  ;;  %v2559_v40 = vsel %vm9268_vm0, %v2556_v14, %v2553_v51  ;;  %7329 = vlog2.f32 %v2704_v17  ;;  %v9309_v0 = vadd.f32 %v8890_v6, %v9284_v47  ;;  %v2690_v4 = vadd.f32 1.0, %v2689_v60 }
 0x17f   : > { %v9311_v5 = vpop.eup %7319  ;;  %v2016_v41 = vmul.f32 1.442695, %v1807_v49  ;;  %v1438_v16 = vmul.f32 100.0, %v9294_v9  ;;  %v1440_v20 = vmul.f32 100.0, %v9298_v48  ;;  %v9318_v39 = vmul.f32 %v9214_v34, %v2573_v28 }
 0x180   : > { %vm9320_vm1 = vcmp.lt.f32.partialorder %v2575_v15, 0.0004427343  ;;  %v2708_v51 = vadd.f32 1.0, %v2707_v63  ;;  %v2710_v6 = vand.u32 2147483647, %v9254_v62  ;;  %v1809_v17 = vsub.f32 0.0, %v1681_v18 }
 0x181   : > { %v9315_v26 = vpop.eup %7321  ;;  %v3312_v42 = vmul.f32 0.01, %v2559_v40  ;;  %vm9325_vm2 = vcmp.lt.f32.partialorder %v2692_v32, 0.0004427343  ;;  %v2695_v49 = vadd.f32 1.0, %v9278_v3  ;;  %v2699_v10 = vadd.f32 1.0, %v2698_v35 }
 0x182   : > { %v2830_v24 = vadd.f32 1.0, %v9315_v26  ;;  %v7324_v34 = vpop.eup %7323  ;;  %7331 = vpow2.f32 %v2016_v41  ;;  %v1694_v28 = vand.u32 2147483647, %v1438_v16  ;;  %v1696_v15 = vand.u32 2147483647, %v1440_v20  ;;  %v9332_v63 = vpop.f32.mrb[27].mxu0 }
 0x183   : > { %v1439_v55 = vmul.f32 100.0, %v9309_v0  ;;  %15160 = vst [vmem:[#allocation42_spill] sm:$0xff] %v9332_v63  ;;  %v7326_v54 = vpop.eup %7325  ;;  %v2691_v18 = vmul.f32 %v9230_v31, %v2690_v4  ;;  %v2701_v32 = vand.u32 2147483647, %v9278_v3  ;;  %v2713_v40 = vadd.f32 1.0, %v9311_v5  ;;  %v9346_v31 = vpop.permute.xlu1 %473 }
 0x184   : > { %7333 = vlog2.f32 %v2830_v24  ;;  %v9338_v35 = vmul.f32 %v9254_v62, %v2708_v51  ;;  %v2020_v38 = vmul.f32 1.442695, %v1809_v17  ;;  %v1822_v59 = vsub.f32 0.0, %v1694_v28  ;;  %15164 = vst [vmem:[#allocation45_spill] sm:$0xff] %v9346_v31 }
 0x185   : > { %v1824_v41 = vsub.f32 0.0, %v1696_v15  ;;  %v15161_v16 = vmax.f32 %v8969_v8, 0.0  ;;  %v2571_v33 = vmul.f32 0.6931472, %v7324_v34  ;;  %7335 = vlog2.f32 %v2695_v49 }
 0x186   : > { %v1695_v63 = vand.u32 2147483647, %v1439_v55  ;;  %v2688_v4 = vmul.f32 0.6931472, %v7326_v54  ;;  %vm9348_vm3 = vcmp.lt.f32.partialorder %v2710_v6, 0.0004427343  ;;  %v9353_v62 = vmul.f32 %v9278_v3, %v2699_v10 }
 0x187   : > { %v9342_v20 = vadd.f32 %v3312_v42, %v15161_v16  ;;  %v2833_v51 = vmul.f32 -0.5, %v9315_v26  ;;  %v2046_v8 = vmul.f32 1.442695, %v1822_v59  ;;  %v9356_v17 = vpop.eup %7327  ;;  %7337 = vlog2.f32 %v2713_v40 }
 0x188   : > { %v2050_v42 = vmul.f32 1.442695, %v1824_v41  ;;  %v9360_v55 = vadd.f32 %v8899_v13, %v9346_v31  ;;  %v9364_v54 = vadd.f32 %v8905_v22, %v9346_v31  ;;  %v7330_v6 = vpop.eup %7329  ;;  %v2848_v3 = vadd.f32 1.0, %v9356_v17 }
 0x189   : > { %15162 = vst [vmem:[#allocation43_spill] sm:$0xff] %v9342_v20  ;;  %7339 = vpow2.f32 %v2020_v38  ;;  %v9370_v59 = vadd.f32 %v8897_v12, %v9284_v47  ;;  %v2577_v10 = vsel %vm9320_vm1, %v9318_v39, %v2571_v33  ;;  %v2716_v13 = vmul.f32 -0.5, %v9311_v5 }
 0x18a   : > { %7341 = vpow2.f32 %v2046_v8  ;;  %v1823_v34 = vsub.f32 0.0, %v1695_v63  ;;  %v2694_v22 = vsel %vm9325_vm2, %v2691_v18, %v2688_v4  ;;  %v2834_v28 = vadd.f32 1.0, %v2833_v51  ;;  %v15167_v51 = vld [vmem:[#allocation11_spill] sm:$0xff] }
 0x18b   : > { %7343 = vlog2.f32 %v2848_v3  ;;  %v1454_v15 = vmul.f32 100.0, %v9360_v55  ;;  %v2706_v38 = vmul.f32 0.6931472, %v7330_v6  ;;  %v2836_v40 = vand.u32 2147483647, %v9315_v26 }
 0x18c   : > { %7345 = vpow2.f32 %v2050_v42  ;;  %v1456_v12 = vmul.f32 100.0, %v9364_v54  ;;  %v9381_v41 = vpop.eup %7331  ;;  %v2719_v33 = vand.u32 2147483647, %v9311_v5  ;;  %v2851_v39 = vmul.f32 -0.5, %v9356_v17 }
 0x18d   : > { %v1441_v14 = vmul.f32 100.0, %v9370_v59  ;;  %v1710_v60 = vand.u32 2147483647, %v1454_v15  ;;  %v3314_v18 = vmul.f32 0.01, %v2577_v10  ;;  %v9388_v8 = vadd.f32 %v15167_v51, %v9346_v31 }
 0x18e   : > { %v7334_v63 = vpop.eup %7333  ;;  %v3327_v16 = vmul.f32 0.01, %v2694_v22  ;;  %v2048_v4 = vmul.f32 1.442695, %v1823_v34  ;;  %v2835_v6 = vmul.f32 %v9315_v26, %v2834_v28  ;;  %v1712_v49 = vand.u32 2147483647, %v1456_v12 }
 0x18f   : > { %v2832_v42 = vmul.f32 0.6931472, %v7334_v63  ;;  %v1838_v3 = vsub.f32 0.0, %v1710_v60  ;;  %v7336_v47 = vpop.eup %7335  ;;  %v2712_v20 = vsel %vm9348_vm3, %v9338_v35, %v2706_v38  ;;  %vm9394_vm4 = vcmp.lt.f32.partialorder %v2701_v32, 0.0004427343  ;;  %v9400_v28 = vpop.f32.mrb[28].mxu0 }
 0x190   : > { %v2717_v10 = vadd.f32 1.0, %v2716_v13  ;;  %vm2837_vm5 = vcmp.lt.f32.partialorder %v2836_v40, 0.0004427343  ;;  %v2852_v51 = vadd.f32 1.0, %v2851_v39  ;;  %v2839_v63 = vadd.f32 1.0, %v9381_v41  ;;  %15170 = vst [vmem:[#allocation11_spill] sm:$0xff] %v9400_v28 }
 0x191   : > { %v2838_v22 = vsel %vm2837_vm5, %v2835_v6, %v2832_v42  ;;  %v1697_v26 = vand.u32 2147483647, %v1441_v14  ;;  %v7338_v12 = vpop.eup %7337  ;;  %v15171_v60 = vmax.f32 %v9057_v57, 0.0  ;;  %vm9406_vm6 = vcmp.lt.f32.partialorder %v2719_v33, 0.0004427343  ;;  %v9411_v40 = vpop.f32.mrb[28].mxu1 }
 0x192   : > { %v3343_v35 = vmul.f32 0.01, %v2838_v22  ;;  %v2078_v13 = vmul.f32 1.442695, %v1838_v3  ;;  %v1455_v38 = vmul.f32 100.0, %v9388_v8  ;;  %15175 = vst [vmem:[#allocation47_spill] sm:$0xff] %v9411_v40  ;;  %7347 = vpow2.f32 %v2048_v4 }
 0x193   : > { %v9404_v24 = vadd.f32 %v3314_v18, %v15171_v60  ;;  %v9413_v39 = vpop.eup %7339  ;;  %v15176_v14 = vmax.f32 %v9070_v29, 0.0  ;;  %v2854_v57 = vand.u32 2147483647, %v9356_v17  ;;  %v1840_v18 = vsub.f32 0.0, %v1712_v49 }
 0x194   : > { %v9420_v33 = vpop.eup %7341  ;;  %v3329_v6 = vmul.f32 0.01, %v2712_v20  ;;  %v2697_v60 = vmul.f32 0.6931472, %v7336_v47  ;;  %v15178_v3 = vmax.f32 %v9176_v37, 0.0  ;;  %7349 = vpow2.f32 %v2078_v13 }
 0x195   : > { %15172 = vst [vmem:[#allocation46_spill] sm:$0xff] %v9404_v24  ;;  %v9417_v42 = vadd.f32 %v3327_v16, %v15176_v14  ;;  %v7344_v34 = vpop.eup %7343  ;;  %v2715_v40 = vmul.f32 0.6931472, %v7338_v12  ;;  %7351 = vlog2.f32 %v2839_v63  ;;  %v2974_v29 = vadd.f32 1.0, %v9420_v33  ;;  %v9427_v14 = vpop.f32.mrb[29].mxu0 }
 0x196   : > { %v9424_v22 = vadd.f32 %v3343_v35, %v15178_v3  ;;  %v1825_v16 = vsub.f32 0.0, %v1697_v26  ;;  %15180 = vst [vmem:[#allocation50_spill] sm:$0xff] %v9427_v14  ;;  %v9429_v28 = vpop.eup %7345  ;;  %v2850_v20 = vmul.f32 0.6931472, %v7344_v34  ;;  %v2853_v47 = vmul.f32 %v9356_v17, %v2852_v51 }
 0x197   : > { %15177 = vst [vmem:[#allocation48_spill] sm:$0xff] %v9417_v42  ;;  %v1711_v37 = vand.u32 2147483647, %v1455_v38  ;;  %vm2855_vm7 = vcmp.lt.f32.partialorder %v2854_v57, 0.0004427343  ;;  %7353 = vlog2.f32 %v2974_v29  ;;  %v2992_v4 = vadd.f32 1.0, %v9429_v28 }
 0x198   : > { %15179 = vst [vmem:[#allocation49_spill] sm:$0xff] %v9424_v22  ;;  %v2082_v12 = vmul.f32 1.442695, %v1840_v18  ;;  %v2718_v63 = vmul.f32 %v9311_v5, %v2717_v10  ;;  %v2856_v35 = vsel %vm2855_vm7, %v2853_v47, %v2850_v20  ;;  %v2857_v13 = vadd.f32 1.0, %v9413_v39  ;;  %v9442_v38 = vpop.f32.mrb[29].mxu1 }
 0x199   : > { %v2703_v3 = vsel %vm9394_vm4, %v9353_v62, %v2697_v60  ;;  %v3345_v34 = vmul.f32 0.01, %v2856_v35  ;;  %v2052_v51 = vmul.f32 1.442695, %v1825_v16  ;;  %15181 = vst [vmem:[#allocation51_spill] sm:$0xff] %v9442_v38  ;;  %v2842_v57 = vmul.f32 -0.5, %v9381_v41 }
 0x19a   : > { %v2860_v18 = vmul.f32 -0.5, %v9413_v39  ;;  %7355 = vlog2.f32 %v2992_v4  ;;  %v1839_v5 = vsub.f32 0.0, %v1711_v37  ;;  %v15182_v10 = vmax.f32 %v9085_v7, 0.0  ;;  %v9477_v7 = vpop.f32.mrb[30].mxu0  ;;  %v9488_v26 = vpop.f32.mrb[30].mxu1 }
 0x19b   : > { %v2721_v15 = vsel %vm9406_vm6, %v2718_v63, %v2715_v40  ;;  %v15184_v62 = vmax.f32 %v9219_v19, 0.0  ;;  %7357 = vpow2.f32 %v2082_v12  ;;  %v9456_v16 = vmul.f32 0.01, %v2703_v3  ;;  %15190 = vst [vmem:[#allocation54_spill] sm:$0xff] %v9488_v26  ;;  %v9536_v14 = vpop.f32.mrb[31].mxu0 }
 0x19c   : > { %v9448_v29 = vadd.f32 %v3329_v6, %v15182_v10  ;;  %7359 = vlog2.f32 %v2857_v13  ;;  %v2977_v20 = vmul.f32 -0.5, %v9420_v33  ;;  %v9460_v37 = vpop.eup %7347  ;;  %v2845_v32 = vand.u32 2147483647, %v9381_v41  ;;  %v15186_v10 = vld [vmem:[#allocation12_spill] sm:$0xff] }
 0x19d   : > { %v9454_v60 = vadd.f32 %v3345_v34, %v15184_v62  ;;  %7361 = vpow2.f32 %v2052_v51  ;;  %v9468_v6 = vmul.f32 0.01, %v2721_v15  ;;  %v2843_v4 = vadd.f32 1.0, %v2842_v57  ;;  %15187 = vst [vmem:[#allocation12_spill] sm:$0xff] %v9477_v7 }
 0x19e   : > { %15183 = vst [vmem:[#allocation52_spill] sm:$0xff] %v9448_v29  ;;  %v9466_v19 = vpop.eup %7349  ;;  %v2861_v12 = vadd.f32 1.0, %v2860_v18  ;;  %v2080_v63 = vmul.f32 1.442695, %v1839_v5  ;;  %v2863_v13 = vand.u32 2147483647, %v9413_v39  ;;  %v9475_v62 = vadd.f32 %v15186_v10, %v9346_v31 }
 0x19f   : > { %15185 = vst [vmem:[#allocation53_spill] sm:$0xff] %v9454_v60  ;;  %v7352_v35 = vpop.eup %7351  ;;  %v3118_v34 = vadd.f32 1.0, %v9466_v19  ;;  %v2978_v51 = vadd.f32 1.0, %v2977_v20  ;;  %v2980_v15 = vand.u32 2147483647, %v9420_v33  ;;  %v2995_v57 = vmul.f32 -0.5, %v9429_v28 }
 0x1a0   : > { %v2998_v18 = vand.u32 2147483647, %v9429_v28  ;;  %vm9482_vm8 = vcmp.lt.f32.partialorder %v2845_v32, 0.0004427343  ;;  %v2983_v40 = vadd.f32 1.0, %v9460_v37  ;;  %v2844_v20 = vmul.f32 %v9381_v41, %v2843_v4  ;;  %v15198_v10 = vld [vmem:[#allocation14_spill] sm:$0xff] }
 0x1a1   : > { %v7354_v5 = vpop.eup %7353  ;;  %7363 = vlog2.f32 %v3118_v34  ;;  %v2841_v47 = vmul.f32 0.6931472, %v7352_v35  ;;  %v9492_v3 = vmul.f32 %v9413_v39, %v2861_v12  ;;  %v2986_v32 = vmul.f32 -0.5, %v9460_v37  ;;  %15201 = vst [vmem:[#allocation14_spill] sm:$0xff] %v9536_v14 }
 0x1a2   : > { %7365 = vpow2.f32 %v2080_v63  ;;  %v2976_v17 = vmul.f32 0.6931472, %v7354_v5  ;;  %v3121_v29 = vmul.f32 -0.5, %v9466_v19  ;;  %v1457_v60 = vmul.f32 100.0, %v9475_v62  ;;  %v15197_v5 = vld [vmem:[#allocation7_spill] sm:$0xff] }
 0x1a3   : > { %vm9497_vm9 = vcmp.lt.f32.partialorder %v2863_v13, 0.0004427343  ;;  %v2979_v35 = vmul.f32 %v9420_v33, %v2978_v51  ;;  %vm9502_vm10 = vcmp.lt.f32.partialorder %v2980_v15, 0.0004427343  ;;  %v2996_v39 = vadd.f32 1.0, %v2995_v57 }
 0x1a4   : > { %v7356_v42 = vpop.eup %7355  ;;  %vm9506_vm11 = vcmp.lt.f32.partialorder %v2998_v18, 0.0004427343  ;;  %7367 = vlog2.f32 %v2983_v40  ;;  %v2989_v63 = vand.u32 2147483647, %v9460_v37  ;;  %v1713_v13 = vand.u32 2147483647, %v1457_v60 }
 0x1a5   : > { %v9510_v12 = vpop.eup %7357  ;;  %v9515_v22 = vadd.f32 %v15198_v10, %v15197_v5  ;;  %v2847_v51 = vsel %vm9482_vm8, %v2844_v20, %v2841_v47  ;;  %v3124_v15 = vand.u32 2147483647, %v9466_v19  ;;  %v15199_v18 = vld [vmem:[#allocation15_spill] sm:$0xff]  ;;  %v2982_v60 = vsel %vm9502_vm10, %v2979_v35, %v2976_v17  ;;  %v15200_v47 = vld [vmem:[#allocation16_spill] sm:$0xff]  ;;  %v15202_v17 = vld [vmem:[#allocation17_spill] sm:$0xff] }
 0x1a6   : > { %v7360_v33 = vpop.eup %7359  ;;  %v3136_v57 = vadd.f32 1.0, %v9510_v12  ;;  %v9523_v26 = vadd.f32 %v15199_v18, %v15197_v5  ;;  %v9529_v7 = vadd.f32 1.0, %v2986_v32  ;;  %v3122_v10 = vadd.f32 1.0, %v3121_v29 }
 0x1a7   : > { %v9525_v40 = vpop.eup %7361  ;;  %v1841_v31 = vsub.f32 0.0, %v1713_v13  ;;  %v2994_v38 = vmul.f32 0.6931472, %v7356_v42  ;;  %v2997_v49 = vmul.f32 %v9429_v28, %v2996_v39  ;;  %v9534_v20 = vadd.f32 %v15200_v47, %v15197_v5 }
 0x1a8   : > { %7369 = vlog2.f32 %v3136_v57  ;;  %v9538_v18 = vmul.f32 0.01, %v2847_v51  ;;  %v2859_v24 = vmul.f32 0.6931472, %v7360_v33  ;;  %v1346_v41 = vmul.f32 100.0, %v9515_v22 }
 0x1a9   : > { %v9543_v32 = vadd.f32 %v15202_v17, %v15197_v5  ;;  %v3359_v29 = vmul.f32 0.01, %v2982_v60  ;;  %v3001_v42 = vadd.f32 1.0, %v9525_v40  ;;  %vm9546_vm12 = vcmp.lt.f32.partialorder %v3124_v15, 0.0004427343 }
 0x1aa   : > { %v1348_v35 = vmul.f32 100.0, %v9523_v26  ;;  %v3123_v13 = vmul.f32 %v9466_v19, %v3122_v10  ;;  %v3139_v33 = vmul.f32 -0.5, %v9510_v12  ;;  %v2084_v51 = vmul.f32 1.442695, %v1841_v31  ;;  %v9564_v10 = vpop.f32.mrb[31].mxu1 }
 0x1ab   : > { %v7364_v39 = vpop.eup %7363  ;;  %v1602_v57 = vand.u32 2147483647, %v1346_v41  ;;  %v3000_v60 = vsel %vm9506_vm11, %v2997_v49, %v2994_v38  ;;  %v1347_v15 = vmul.f32 100.0, %v9534_v20  ;;  %v2865_v14 = vsel %vm9497_vm9, %v9492_v3, %v2859_v24  ;;  %15205 = vst [vmem:[#allocation15_spill] sm:$0xff] %v9564_v10 }
 0x1ac   : > { %v9553_v47 = vpop.eup %7365  ;;  %v3120_v17 = vmul.f32 0.6931472, %v7364_v39  ;;  %v1604_v5 = vand.u32 2147483647, %v1348_v35  ;;  %v3142_v1 = vand.u32 2147483647, %v9510_v12  ;;  %7371 = vlog2.f32 %v3001_v42 }
 0x1ad   : > { %v3127_v19 = vadd.f32 1.0, %v9553_v47  ;;  %v1349_v31 = vmul.f32 100.0, %v9543_v32  ;;  %v1730_v4 = vsub.f32 0.0, %v1602_v57  ;;  %v15206_v35 = vmax.f32 %v9294_v9, 0.0  ;;  %v15215_v57 = vld [vmem:[#allocation18_spill] sm:$0xff] }
 0x1ae   : > { %v3126_v38 = vsel %vm9546_vm12, %v3123_v13, %v3120_v17  ;;  %v1732_v49 = vsub.f32 0.0, %v1604_v5  ;;  %v7368_v41 = vpop.eup %7367  ;;  %v3361_v24 = vmul.f32 0.01, %v3000_v60  ;;  %v3140_v34 = vadd.f32 1.0, %v3139_v33  ;;  %v15214_v33 = vld [vmem:[#allocation8_spill] sm:$0xff] }
 0x1af   : > { %v9570_v39 = vadd.f32 %v3359_v29, %v15206_v35  ;;  %v3375_v3 = vmul.f32 0.01, %v3126_v38  ;;  %vm9572_vm13 = vcmp.lt.f32.partialorder %v2989_v63, 0.0004427343  ;;  %7373 = vpow2.f32 %v2084_v51  ;;  %v15216_v51 = vld [vmem:[#allocation19_spill] sm:$0xff]  ;;  %v15217_v35 = vld [vmem:[#allocation20_spill] sm:$0xff] }
 0x1b0   : > { %v1862_v10 = vmul.f32 1.442695, %v1730_v4  ;;  %v1866_v42 = vmul.f32 1.442695, %v1732_v49  ;;  %v1603_v30 = vand.u32 2147483647, %v1347_v15  ;;  %7375 = vlog2.f32 %v3127_v19 }
 0x1b1   : > { %15207 = vst [vmem:[#allocation16_spill] sm:$0xff] %v9570_v39  ;;  %v15210_v28 = vmax.f32 %v9360_v55, 0.0  ;;  %vm9580_vm14 = vcmp.lt.f32.partialorder %v3142_v1, 0.0004427343  ;;  %v1605_v9 = vand.u32 2147483647, %v1349_v31  ;;  %v9586_v60 = vadd.f32 %v15215_v57, %v15214_v33 }
 0x1b2   : > { %v7370_v29 = vpop.eup %7369  ;;  %7377 = vpow2.f32 %v1862_v10  ;;  %v1731_v63 = vsub.f32 0.0, %v1603_v30  ;;  %v9590_v17 = vadd.f32 %v15216_v51, %v15214_v33  ;;  %v3141_v15 = vmul.f32 %v9510_v12, %v3140_v34  ;;  %v9615_v51 = vpop.f32.mrb[32].mxu1 }
 0x1b3   : > { %v9578_v13 = vadd.f32 %v3375_v3, %v15210_v28  ;;  %v3138_v1 = vmul.f32 0.6931472, %v7370_v29  ;;  %7379 = vpow2.f32 %v1866_v42  ;;  %v1733_v31 = vsub.f32 0.0, %v1605_v9  ;;  %v9604_v28 = vpop.f32.mrb[32].mxu0 }
 0x1b4   : > { %v1864_v19 = vmul.f32 1.442695, %v1731_v63  ;;  %v1362_v10 = vmul.f32 100.0, %v9586_v60  ;;  %v1364_v30 = vmul.f32 100.0, %v9590_v17  ;;  %v2985_v38 = vmul.f32 0.6931472, %v7368_v41 }
 0x1b5   : > { %15211 = vst [vmem:[#allocation17_spill] sm:$0xff] %v9578_v13  ;;  %v3004_v4 = vmul.f32 -0.5, %v9525_v40  ;;  %v3144_v49 = vsel %vm9580_vm14, %v3141_v15, %v3138_v1  ;;  %v9602_v3 = vadd.f32 %v15217_v35, %v15214_v33  ;;  %v15218_v12 = vmax.f32 %v9116_v61, 0.0 }
 0x1b6   : > { %v3346_v42 = vmul.f32 0.01, %v2865_v14  ;;  %v3007_v9 = vand.u32 2147483647, %v9525_v40  ;;  %v3377_v41 = vmul.f32 0.01, %v3144_v49  ;;  %v2988_v29 = vmul.f32 %v9460_v37, %v9529_v7  ;;  %v7372_v1 = vpop.eup %7371 }
 0x1b7   : > { %v9609_v34 = vadd.f32 %v9456_v16, %v15218_v12  ;;  %v1618_v5 = vand.u32 2147483647, %v1362_v10  ;;  %v1620_v63 = vand.u32 2147483647, %v1364_v30  ;;  %v1363_v57 = vmul.f32 100.0, %v9602_v3 }
 0x1b8   : > { %v15219_v15 = vmax.f32 %v9298_v48, 0.0  ;;  %v15221_v16 = vmax.f32 %v9364_v54, 0.0  ;;  %7381 = vpow2.f32 %v1864_v19  ;;  %v1868_v49 = vmul.f32 1.442695, %v1733_v31  ;;  %v15232_v54 = vld [vmem:[#allocation22_spill] sm:$0xff] }
 0x1b9   : > { %v15223_v35 = vmax.f32 %v9143_v25, 0.0  ;;  %v2991_v7 = vsel %vm9572_vm13, %v2988_v29, %v2985_v38  ;;  %v1746_v10 = vsub.f32 0.0, %v1618_v5  ;;  %v1748_v30 = vsub.f32 0.0, %v1620_v63  ;;  %v9632_v12 = vpop.eup %7373  ;;  %v15238_v38 = vld [vmem:[#allocation23_spill] sm:$0xff] }
 0x1ba   : > { %v9619_v61 = vadd.f32 %v3361_v24, %v15219_v15  ;;  %v9623_v14 = vadd.f32 %v3377_v41, %v15221_v16  ;;  %v1569_v48 = vmax.f32 %v9370_v59, 0.0  ;;  %v3130_v24 = vmul.f32 -0.5, %v9553_v47  ;;  %v7376_v31 = vpop.eup %7375 }
 0x1bb   : > { %v9628_v37 = vadd.f32 %v9468_v6, %v15223_v35  ;;  %v1619_v19 = vand.u32 2147483647, %v1363_v57  ;;  %v15224_v25 = vmax.f32 %v9261_v46, 0.0  ;;  %v3005_v43 = vadd.f32 1.0, %v3004_v4  ;;  %v15228_v35 = vld [vmem:[#allocation21_spill] sm:$0xff] }
 0x1bc   : > { %15220 = vst [vmem:[#allocation18_spill] sm:$0xff] %v9619_v61  ;;  %15222 = vst [vmem:[#allocation19_spill] sm:$0xff] %v9623_v14  ;;  %v1894_v41 = vmul.f32 1.442695, %v1746_v10  ;;  %v9644_v29 = vpop.eup %7377  ;;  %v15225_v5 = vmax.f32 %v9265_v2, 0.0  ;;  %7383 = vpow2.f32 %v1868_v49  ;;  %v9659_v10 = vadd.f32 %v15228_v35, %v15214_v33 }
 0x1bd   : > { %v9641_v6 = vadd.f32 %v9538_v18, %v15224_v25  ;;  %v3360_v15 = vmul.f32 0.01, %v2991_v7  ;;  %vm9650_vm15 = vcmp.lt.f32.partialorder %v3007_v9, 0.0004427343  ;;  %v9654_v46 = vpop.eup %7379  ;;  %v3003_v18 = vmul.f32 0.6931472, %v7372_v1 }
 0x1be   : > { %v9648_v63 = vadd.f32 %v3346_v42, %v15225_v5  ;;  %v2146_v4 = vadd.f32 1.0, %v9644_v29  ;;  %v1898_v57 = vmul.f32 1.442695, %v1748_v30  ;;  %v3131_v25 = vadd.f32 1.0, %v3130_v24  ;;  %v9662_v9 = vpop.f32.mrb[33].mxu0  ;;  %v9664_v7 = vpop.f32.mrb[33].mxu1 }
 0x1bf   : > { %v2164_v2 = vadd.f32 1.0, %v9654_v46  ;;  %7385 = vpow2.f32 %v1894_v41  ;;  %v1747_v42 = vsub.f32 0.0, %v1619_v19  ;;  %15229 = vst [vmem:[#allocation20_spill] sm:$0xff] %v9662_v9  ;;  %15230 = vst [vmem:[#allocation21_spill] sm:$0xff] %v9664_v7  ;;  %v3006_v49 = vmul.f32 %v9525_v40, %v3005_v43  ;;  %v15231_v24 = vld [vmem:[#allocation9_spill] sm:$0xff]  ;;  %v9717_v61 = vpop.f32.mrb[34].mxu1 }
 0x1c0   : > { %v3133_v1 = vand.u32 2147483647, %v9553_v47  ;;  %v3145_v5 = vadd.f32 1.0, %v9632_v12  ;;  %7387 = vlog2.f32 %v2146_v4  ;;  %v3129_v30 = vmul.f32 0.6931472, %v7376_v31  ;;  %15240 = vst [vmem:[#allocation56_spill] sm:$0xff] %v9717_v61 }
 0x1c1   : > { %7389 = vlog2.f32 %v2164_v2  ;;  %v9672_v55 = vadd.f32 %v15232_v54, %v15231_v24  ;;  %v3009_v19 = vsel %vm9650_vm15, %v3006_v49, %v3003_v18  ;;  %v1365_v40 = vmul.f32 100.0, %v9659_v10 }
 0x1c2   : > { %7391 = vpow2.f32 %v1898_v57  ;;  %v9678_v43 = vpop.eup %7381  ;;  %v15233_v4 = vmax.f32 %v9309_v0, 0.0  ;;  %v3132_v2 = vmul.f32 %v9553_v47, %v3131_v25  ;;  %v3148_v35 = vmul.f32 -0.5, %v9632_v12  ;;  %v9691_v57 = vpop.f32.mrb[34].mxu0 }
 0x1c3   : > { %v1896_v54 = vmul.f32 1.442695, %v1747_v42  ;;  %vm9686_vm0 = vcmp.lt.f32.partialorder %v3133_v1, 0.0004427343  ;;  %7393 = vlog2.f32 %v3145_v5  ;;  %v1621_v18 = vand.u32 2147483647, %v1365_v40 }
 0x1c4   : > { %v9682_v31 = vadd.f32 %v3360_v15, %v15233_v4  ;;  %15237 = vst [vmem:[#allocation55_spill] sm:$0xff] %v9691_v57  ;;  %v3362_v49 = vmul.f32 0.01, %v3009_v19  ;;  %v3135_v0 = vsel %vm9686_vm0, %v3132_v2, %v3129_v30  ;;  %v1378_v47 = vmul.f32 100.0, %v9672_v55 }
 0x1c5   : > { %v2155_v25 = vadd.f32 1.0, %v9678_v43  ;;  %v1749_v5 = vsub.f32 0.0, %v1621_v18  ;;  %v3149_v40 = vadd.f32 1.0, %v3148_v35  ;;  %v3151_v16 = vand.u32 2147483647, %v9632_v12 }
 0x1c6   : > { %15234 = vst [vmem:[#allocation22_spill] sm:$0xff] %v9682_v31  ;;  %v9700_v4 = vpop.eup %7383  ;;  %7395 = vpow2.f32 %v1896_v54  ;;  %v9705_v30 = vadd.f32 %v15238_v38, %v15231_v24  ;;  %v3376_v19 = vmul.f32 0.01, %v3135_v0  ;;  %v2149_v2 = vmul.f32 -0.5, %v9644_v29 }
 0x1c7   : > { %v1900_v41 = vmul.f32 1.442695, %v1749_v5  ;;  %v9713_v18 = vadd.f32 %v3362_v49, %v1569_v48  ;;  %v2152_v35 = vand.u32 2147483647, %v9644_v29  ;;  %v2167_v54 = vmul.f32 -0.5, %v9654_v46 }
 0x1c8   : > { %v1634_v1 = vand.u32 2147483647, %v1378_v47  ;;  %v2170_v0 = vand.u32 2147483647, %v9654_v46  ;;  %7397 = vlog2.f32 %v2155_v25  ;;  %v2173_v15 = vadd.f32 1.0, %v9700_v4 }
 0x1c9   : > { %v9709_v42 = vpop.eup %7385  ;;  %15239 = vst [vmem:[#allocation23_spill] sm:$0xff] %v9713_v18  ;;  %v9723_v59 = vmul.f32 %v9632_v12, %v3149_v40  ;;  %7399 = vpow2.f32 %v1900_v41  ;;  %v1380_v49 = vmul.f32 100.0, %v9705_v30  ;;  %vm9727_vm1 = vcmp.lt.f32.partialorder %v3151_v16, 0.0004427343 }
 0x1ca   : > { %v7388_v38 = vpop.eup %7387  ;;  %v2290_v5 = vadd.f32 1.0, %v9709_v42  ;;  %v2150_v13 = vadd.f32 1.0, %v2149_v2  ;;  %v1762_v25 = vsub.f32 0.0, %v1634_v1  ;;  %v9733_v18 = vadd.f32 %v9025_v56, %v15231_v24  ;;  %v9748_v1 = vpop.f32.mrb[35].mxu0 }
 0x1cb   : > { %v7390_v14 = vpop.eup %7389  ;;  %v15243_v12 = vmax.f32 %v9388_v8, 0.0  ;;  %vm9739_vm2 = vcmp.lt.f32.partialorder %v2152_v35, 0.0004427343  ;;  %v2168_v48 = vadd.f32 1.0, %v2167_v54  ;;  %v2148_v61 = vmul.f32 0.6931472, %v7388_v38 }
 0x1cc   : > { %v7392_v47 = vpop.eup %7391  ;;  %7401 = vlog2.f32 %v2290_v5  ;;  %vm9743_vm3 = vcmp.lt.f32.partialorder %v2170_v0, 0.0004427343  ;;  %v2293_v56 = vmul.f32 -0.5, %v9709_v42  ;;  %15249 = vst [vmem:[#allocation58_spill] sm:$0xff] %v9748_v1  ;;  %v2166_v8 = vmul.f32 0.6931472, %v7390_v14 }
 0x1cd   : > { %v9737_v40 = vadd.f32 %v3376_v19, %v15243_v12  ;;  %v2308_v16 = vadd.f32 1.0, %v7392_v47  ;;  %v7394_v31 = vpop.eup %7393  ;;  %7403 = vlog2.f32 %v2173_v15  ;;  %v2311_v19 = vmul.f32 -0.5, %v7392_v47 }
 0x1ce   : > { %v1636_v35 = vand.u32 2147483647, %v1380_v49  ;;  %v2151_v5 = vmul.f32 %v9644_v29, %v2150_v13  ;;  %v2158_v54 = vmul.f32 -0.5, %v9678_v43  ;;  %v1926_v12 = vmul.f32 1.442695, %v1762_v25 }
 0x1cf   : > { %15244 = vst [vmem:[#allocation57_spill] sm:$0xff] %v9737_v40  ;;  %7405 = vlog2.f32 %v2308_v16  ;;  %v1379_v38 = vmul.f32 100.0, %v9733_v18  ;;  %v9755_v40 = vmul.f32 0.6931472, %v7394_v31  ;;  %v2169_v15 = vmul.f32 %v9654_v46, %v2168_v48  ;;  %v9764_v16 = vpop.f32.mrb[35].mxu1 }
 0x1d0   : > { %v9753_v0 = vpop.eup %7395  ;;  %v2161_v57 = vand.u32 2147483647, %v9678_v43  ;;  %v2296_v14 = vand.u32 2147483647, %v9709_v42  ;;  %v2154_v49 = vsel %vm9739_vm2, %v2151_v5, %v2148_v61  ;;  %v2176_v13 = vmul.f32 -0.5, %v9700_v4  ;;  %15250 = vst [vmem:[#allocation59_spill] sm:$0xff] %v9764_v16 }
 0x1d1   : > { %v2179_v29 = vand.u32 2147483647, %v9700_v4  ;;  %v2294_v25 = vadd.f32 1.0, %v2293_v56  ;;  %v2172_v31 = vsel %vm9743_vm3, %v2169_v15, %v2166_v8  ;;  %v2312_v1 = vadd.f32 1.0, %v2311_v19  ;;  %v9810_v16 = vpop.f32.mrb[36].mxu0  ;;  %v9812_v8 = vpop.f32.mrb[36].mxu1 }
 0x1d2   : > { %v2314_v33 = vand.u32 2147483647, %v7392_v47  ;;  %v1764_v46 = vsub.f32 0.0, %v1636_v35  ;;  %v7398_v48 = vpop.eup %7397  ;;  %v2299_v7 = vadd.f32 1.0, %v9753_v0  ;;  %7407 = vpow2.f32 %v1926_v12 }
 0x1d3   : > { %v1635_v9 = vand.u32 2147483647, %v1379_v38  ;;  %v9771_v61 = vadd.f32 %v9039_v11, %v15231_v24  ;;  %v9773_v41 = vpop.eup %7399  ;;  %v3153_v2 = vsel %vm9727_vm1, %v9723_v59, %v9755_v40  ;;  %v2159_v56 = vadd.f32 1.0, %v2158_v54 }
 0x1d4   : > { %vm9779_vm4 = vcmp.lt.f32.partialorder %v2296_v14, 0.0004427343  ;;  %v9785_v19 = vadd.f32 %v9075_v50, %v8922_v45  ;;  %v3267_v5 = vmul.f32 0.01, %v2154_v49  ;;  %vm9787_vm5 = vcmp.lt.f32.partialorder %v2161_v57, 0.0004427343 }
 0x1d5   : > { %v2177_v12 = vadd.f32 1.0, %v2176_v13  ;;  %v1930_v38 = vmul.f32 1.442695, %v1764_v46  ;;  %v1763_v15 = vsub.f32 0.0, %v1635_v9  ;;  %v3269_v39 = vmul.f32 0.01, %v2172_v31 }
 0x1d6   : > { %v7402_v35 = vpop.eup %7401  ;;  %vm9791_vm6 = vcmp.lt.f32.partialorder %v2179_v29, 0.0004427343  ;;  %v2295_v54 = vmul.f32 %v9709_v42, %v2294_v25  ;;  %v1381_v50 = vmul.f32 100.0, %v9771_v61  ;;  %v2157_v24 = vmul.f32 0.6931472, %v7398_v48 }
 0x1d7   : > { %v2292_v40 = vmul.f32 0.6931472, %v7402_v35  ;;  %v7404_v14 = vpop.eup %7403  ;;  %v2313_v49 = vmul.f32 %v7392_v47, %v2312_v1  ;;  %vm9797_vm7 = vcmp.lt.f32.partialorder %v2314_v33, 0.0004427343  ;;  %7409 = vlog2.f32 %v2299_v7 }
 0x1d8   : > { %v2317_v29 = vadd.f32 1.0, %v9773_v41  ;;  %v1637_v31 = vand.u32 2147483647, %v1381_v50  ;;  %v1394_v46 = vmul.f32 100.0, %v9785_v19  ;;  %7411 = vpow2.f32 %v1930_v38 }
 0x1d9   : > { %v7406_v13 = vpop.eup %7405  ;;  %v2298_v9 = vsel %vm9779_vm4, %v2295_v54, %v2292_v40  ;;  %v1928_v35 = vmul.f32 1.442695, %v1763_v15  ;;  %v15259_v47 = vmax.f32 %v9515_v22, 0.0  ;;  %v2160_v1 = vmul.f32 %v9678_v43, %v2159_v56 }
 0x1da   : > { %v3283_v42 = vmul.f32 0.01, %v2298_v9  ;;  %v2310_v25 = vmul.f32 0.6931472, %v7406_v13  ;;  %v1765_v7 = vsub.f32 0.0, %v1637_v31  ;;  %v15261_v54 = vmax.f32 %v9586_v60, 0.0 }
 0x1db   : > { %v9807_v33 = vadd.f32 %v3267_v5, %v15259_v47  ;;  %v1650_v48 = vand.u32 2147483647, %v1394_v46  ;;  %v2175_v40 = vmul.f32 0.6931472, %v7404_v14  ;;  %v9822_v22 = vadd.f32 %v9080_v44, %v8922_v45  ;;  %v15279_v60 = vld [vmem:[#allocation25_spill] sm:$0xff] }
 0x1dc   : > { %v9816_v50 = vadd.f32 %v3283_v42, %v15261_v54  ;;  %v2316_v38 = vsel %vm9797_vm7, %v2313_v49, %v2310_v25  ;;  %v2178_v43 = vmul.f32 %v9700_v4, %v2177_v12  ;;  %7413 = vlog2.f32 %v2317_v29  ;;  %v9829_v15 = vpop.eup %7407  ;;  %v9848_v42 = vpop.f32.mrb[37].mxu0 }
 0x1dd   : > { %15260 = vst [vmem:[#allocation60_spill] sm:$0xff] %v9807_v33  ;;  %v3285_v56 = vmul.f32 0.01, %v2316_v38  ;;  %v9827_v5 = vadd.f32 %v9131_v21, %v8922_v45  ;;  %v2302_v14 = vmul.f32 -0.5, %v9753_v0  ;;  %7415 = vpow2.f32 %v1928_v35 }
 0x1de   : > { %15262 = vst [vmem:[#allocation61_spill] sm:$0xff] %v9816_v50  ;;  %v1932_v49 = vmul.f32 1.442695, %v1765_v7  ;;  %v15263_v44 = vmax.f32 %v9523_v26, 0.0  ;;  %v2163_v4 = vsel %vm9787_vm5, %v2160_v1, %v2157_v24  ;;  %v15265_v12 = vmax.f32 %v9590_v17, 0.0 }
 0x1df   : > { %v1778_v13 = vsub.f32 0.0, %v1650_v48  ;;  %v3378_v9 = vmul.f32 0.01, %v3153_v2  ;;  %v2181_v29 = vsel %vm9791_vm6, %v2178_v43, %v2175_v40  ;;  %v2305_v31 = vand.u32 2147483647, %v9753_v0 }
 0x1e0   : > { %v9836_v57 = vadd.f32 %v3269_v39, %v15263_v44  ;;  %v9842_v21 = vadd.f32 %v3285_v56, %v15265_v12  ;;  %v1396_v46 = vmul.f32 100.0, %v9822_v22  ;;  %v2434_v24 = vadd.f32 1.0, %v9829_v15  ;;  %v9864_v56 = vpop.f32.mrb[37].mxu1 }
 0x1e1   : > { %v1958_v11 = vmul.f32 1.442695, %v1778_v13  ;;  %v1395_v17 = vmul.f32 100.0, %v9827_v5  ;;  %v7410_v39 = vpop.eup %7409  ;;  %v3268_v25 = vmul.f32 0.01, %v2163_v4  ;;  %v2303_v2 = vadd.f32 1.0, %v2302_v14 }
 0x1e2   : > { %15264 = vst [vmem:[#allocation62_spill] sm:$0xff] %v9836_v57  ;;  %15266 = vst [vmem:[#allocation63_spill] sm:$0xff] %v9842_v21  ;;  %v1493_v59 = vmax.f32 %v9659_v10, 0.0  ;;  %7417 = vpow2.f32 %v1932_v49  ;;  %v3270_v35 = vmul.f32 0.01, %v2181_v29  ;;  %v9856_v7 = vpop.eup %7411  ;;  %v15267_v48 = vmax.f32 %v9475_v62, 0.0 }
 0x1e3   : > { %7419 = vpow2.f32 %v1958_v11  ;;  %v1652_v1 = vand.u32 2147483647, %v1396_v46  ;;  %v2320_v54 = vmul.f32 -0.5, %v9773_v41  ;;  %v2323_v38 = vand.u32 2147483647, %v9773_v41 }
 0x1e4   : > { %v9860_v40 = vadd.f32 %v3378_v9, %v15267_v48  ;;  %v1651_v43 = vand.u32 2147483647, %v1395_v17  ;;  %vm9866_vm8 = vcmp.lt.f32.partialorder %v2305_v31, 0.0004427343  ;;  %7421 = vlog2.f32 %v2434_v24 }
 0x1e5   : > { %v15270_v62 = vmax.f32 %v9534_v20, 0.0  ;;  %v2304_v12 = vmul.f32 %v9753_v0, %v2303_v2  ;;  %v1780_v13 = vsub.f32 0.0, %v1652_v1  ;;  %v15272_v46 = vmax.f32 %v9543_v32, 0.0  ;;  %v15276_v2 = vld [vmem:[#allocation30_spill] sm:$0xff]  ;;  %v15280_v1 = vld [vmem:[#allocation24_spill] sm:$0xff] }
 0x1e6   : > { %v1779_v9 = vsub.f32 0.0, %v1651_v43  ;;  %v7414_v29 = vpop.eup %7413  ;;  %v2301_v11 = vmul.f32 0.6931472, %v7410_v39  ;;  %v2452_v24 = vadd.f32 1.0, %v9856_v7  ;;  %v9884_v17 = vadd.f32 %v9145_v53, %v8922_v45 }
 0x1e7   : > { %v9874_v4 = vadd.f32 %v3268_v25, %v15270_v62  ;;  %v9879_v31 = vadd.f32 %v3270_v35, %v15272_v46  ;;  %v9886_v48 = vpop.eup %7415  ;;  %v2321_v20 = vadd.f32 1.0, %v2320_v54  ;;  %vm9888_vm9 = vcmp.lt.f32.partialorder %v2323_v38, 0.0004427343  ;;  %v9894_v35 = vpop.f32.mrb[38].mxu0  ;;  %v15277_v54 = vld [vmem:[#allocation29_spill] sm:$0xff] }
 0x1e8   : > { %v1962_v0 = vmul.f32 1.442695, %v1780_v13  ;;  %v3528_v32 = vpack.c.bf16 %v15276_v2, %v9120_v58  ;;  %v2437_v39 = vmul.f32 -0.5, %v9829_v15  ;;  %v1960_v43 = vmul.f32 1.442695, %v1779_v9  ;;  %v15278_v13 = vld [vmem:[#allocation28_spill] sm:$0xff] }
 0x1e9   : > { %15271 = vst [vmem:[#allocation64_spill] sm:$0xff] %v9874_v4  ;;  %15273 = vst [vmem:[#allocation65_spill] sm:$0xff] %v9879_v31  ;;  %v1397_v53 = vmul.f32 100.0, %v9884_v17  ;;  %v2440_v62 = vand.u32 2147483647, %v9829_v15  ;;  %v3530_v38 = vpack.c.bf16 %v9184_v27, %v15277_v54  ;;  %v9904_v46 = vadd.f32 %v9192_v36, %v15278_v13  ;;  %v9906_v58 = vpop.f32.mrb[38].mxu1 }
 0x1ea   : > { %7423 = vpow2.f32 %v1962_v0  ;;  %3672 = vmatprep.subr.bf16.mxu0 %v3528_v32  ;;  %v2307_v2 = vsel %vm9866_vm8, %v2304_v12, %v2301_v11  ;;  %v2319_v26 = vmul.f32 0.6931472, %v7414_v29  ;;  %v2443_v9 = vadd.f32 1.0, %v9886_v48 }
 0x1eb   : > { %7425 = vlog2.f32 %v2452_v24  ;;  %v15281_v0 = vpack.c.bf16 %v15279_v60, %v15280_v1  ;;  %v2322_v27 = vmul.f32 %v9773_v41, %v2321_v20  ;;  %v1653_v54 = vand.u32 2147483647, %v1397_v53  ;;  %3745 = vmatprep.subr.bf16.mxu1 %v3530_v38  ;;  %v15282_v24 = vld [vmem:[#allocation27_spill] sm:$0xff]  ;;  %v15283_v1 = vld [vmem:[#allocation26_spill] sm:$0xff]  ;;  %v9941_v53 = vpop.f32.mrb[39].mxu0 }
 0x1ec   : > { %v9914_v32 = vpop.eup %7417  ;;  %v1410_v36 = vmul.f32 100.0, %v9904_v46  ;;  %v9920_v14 = vadd.f32 %v9194_v52, %v15278_v13  ;;  %v2438_v29 = vadd.f32 1.0, %v2437_v39  ;;  %v2455_v11 = vmul.f32 -0.5, %v9856_v7 }
 0x1ed   : > { %3673 = vmatpush1.bf16.msra.mxu0 %v15281_v0  ;;  %v9922_v12 = vpop.eup %7419  ;;  %7427 = vpow2.f32 %v1960_v43  ;;  %v15284_v0 = vpack.c.bf16 %v15282_v24, %v15283_v1  ;;  %v3284_v41 = vmul.f32 0.01, %v2307_v2  ;;  %vm9929_vm10 = vcmp.lt.f32.partialorder %v2440_v62, 0.0004427343 }
 0x1ee   : > { %v2578_v52 = vadd.f32 1.0, %v9922_v12  ;;  %v7422_v38 = vpop.eup %7421  ;;  %v2325_v39 = vsel %vm9888_vm9, %v2322_v27, %v2319_v26  ;;  %7429 = vlog2.f32 %v2443_v9  ;;  %v1781_v44 = vsub.f32 0.0, %v1653_v54 }
 0x1ef   : > { %3746 = vmatpush1.bf16.msra.mxu1 %v15284_v0  ;;  %v1666_v43 = vand.u32 2147483647, %v1410_v36  ;;  %v2458_v49 = vand.u32 2147483647, %v9856_v7  ;;  %v2461_v24 = vadd.f32 1.0, %v9914_v32  ;;  %v1412_v62 = vmul.f32 100.0, %v9920_v14 }
 0x1f0   : > { %7431 = vlog2.f32 %v2578_v52  ;;  %v2456_v2 = vadd.f32 1.0, %v2455_v11  ;;  %v2446_v1 = vmul.f32 -0.5, %v9886_v48  ;;  %v1964_v0 = vmul.f32 1.442695, %v1781_v44 }
 0x1f1   : > { %v1794_v60 = vsub.f32 0.0, %v1666_v43  ;;  %v3286_v47 = vmul.f32 0.01, %v2325_v39  ;;  %v2436_v25 = vmul.f32 0.6931472, %v7422_v38  ;;  %v2439_v26 = vmul.f32 %v9829_v15, %v2438_v29  ;;  %v15299_v39 = vld [vmem:[#allocation41_spill] sm:$0xff] }
 0x1f2   : > { %v1668_v9 = vand.u32 2147483647, %v1412_v62  ;;  %v15287_v27 = vmax.f32 %v9602_v3, 0.0  ;;  %v2581_v36 = vmul.f32 -0.5, %v9922_v12  ;;  %v9952_v11 = vadd.f32 %v9208_v23, %v15278_v13  ;;  %v15291_v62 = vld [vmem:[#allocation36_spill] sm:$0xff] }
 0x1f3   : > { %vm9956_vm11 = vcmp.lt.f32.partialorder %v2458_v49, 0.0004427343  ;;  %v2449_v15 = vand.u32 2147483647, %v9886_v48  ;;  %7433 = vlog2.f32 %v2461_v24  ;;  %v1990_v3 = vmul.f32 1.442695, %v1794_v60 }
 0x1f4   : > { %v9946_v54 = vadd.f32 %v3284_v41, %v15287_v27  ;;  %v9954_v44 = vpop.eup %7423  ;;  %v1796_v29 = vsub.f32 0.0, %v1668_v9  ;;  %v2447_v38 = vadd.f32 1.0, %v2446_v1  ;;  %7435 = vpow2.f32 %v1964_v0 }
 0x1f5   : > { %v7426_v41 = vpop.eup %7425  ;;  %v2596_v43 = vadd.f32 1.0, %v9954_v44  ;;  %v9964_v23 = vadd.f32 %v15291_v62, %v15278_v13  ;;  %v9968_v49 = vadd.f32 %v3286_v47, %v1493_v59  ;;  %v2442_v27 = vsel %vm9929_vm10, %v2439_v26, %v2436_v25  ;;  %v15295_v59 = vld [vmem:[#allocation31_spill] sm:$0xff]  ;;  %v15296_v47 = vld [vmem:[#allocation38_spill] sm:$0xff] }
 0x1f6   : > { %15288 = vst [vmem:[#allocation30_spill] sm:$0xff] %v9946_v54  ;;  %v2457_v24 = vmul.f32 %v9856_v7, %v2456_v2  ;;  %v1411_v60 = vmul.f32 100.0, %v9952_v11  ;;  %v2464_v1 = vmul.f32 -0.5, %v9914_v32  ;;  %v2582_v0 = vadd.f32 1.0, %v2581_v36 }
 0x1f7   : > { %15292 = vst [vmem:[#allocation29_spill] sm:$0xff] %v9968_v49  ;;  %v9974_v9 = vpop.eup %7427  ;;  %7437 = vlog2.f32 %v2596_v43  ;;  %v1994_v52 = vmul.f32 1.442695, %v1796_v29  ;;  %v2454_v62 = vmul.f32 0.6931472, %v7426_v41  ;;  %v9984_v7 = vadd.f32 %v15296_v47, %v15295_v59  ;;  %v9989_v29 = vpop.f32.mrb[39].mxu1 }
 0x1f8   : > { %vm9977_vm12 = vcmp.lt.f32.partialorder %v2449_v15, 0.0004427343  ;;  %v2584_v10 = vand.u32 2147483647, %v9922_v12  ;;  %7439 = vpow2.f32 %v1990_v3  ;;  %v7430_v20 = vpop.eup %7429  ;;  %v2448_v2 = vmul.f32 %v9886_v48, %v2447_v38 }
 0x1f9   : > { %v2599_v25 = vmul.f32 -0.5, %v9954_v44  ;;  %v1667_v26 = vand.u32 2147483647, %v1411_v60  ;;  %v1413_v36 = vmul.f32 100.0, %v9964_v23  ;;  %v3299_v41 = vmul.f32 0.01, %v2442_v27 }
 0x1fa   : > { %v7432_v15 = vpop.eup %7431  ;;  %v2467_v43 = vand.u32 2147483647, %v9914_v32  ;;  %v2587_v3 = vadd.f32 1.0, %v9974_v9  ;;  %v2583_v33 = vmul.f32 %v9922_v12, %v2582_v0  ;;  %7441 = vpow2.f32 %v1994_v52 }
 0x1fb   : > { %v2580_v47 = vmul.f32 0.6931472, %v7432_v15  ;;  %v1795_v48 = vsub.f32 0.0, %v1667_v26  ;;  %v2465_v38 = vadd.f32 1.0, %v2464_v1  ;;  %vm2585_vm13 = vcmp.lt.f32.partialorder %v2584_v10, 0.0004427343 }
 0x1fc   : > { %v1669_v60 = vand.u32 2147483647, %v1413_v36  ;;  %v1426_v50 = vmul.f32 100.0, %v9984_v7  ;;  %v2460_v13 = vsel %vm9956_vm11, %v2457_v24, %v2454_v62  ;;  %v2445_v27 = vmul.f32 0.6931472, %v7430_v20 }
 0x1fd   : > { %v2586_v49 = vsel %vm2585_vm13, %v2583_v33, %v2580_v47  ;;  %v2600_v31 = vadd.f32 1.0, %v2599_v25  ;;  %v7434_v54 = vpop.eup %7433  ;;  %vm9998_vm14 = vcmp.lt.f32.partialorder %v2467_v43, 0.0004427343  ;;  %v2602_v12 = vand.u32 2147483647, %v9954_v44 }
 0x1fe   : > { %v3315_v15 = vmul.f32 0.01, %v2586_v49  ;;  %7443 = vlog2.f32 %v2587_v3  ;;  %v10003_v52 = vpop.eup %7435  ;;  %v1992_v1 = vmul.f32 1.442695, %v1795_v48  ;;  %v1797_v0 = vsub.f32 0.0, %v1669_v60 }
 0x1ff   : > { %v1682_v10 = vand.u32 2147483647, %v1426_v50  ;;  %v10007_v24 = vadd.f32 %v15299_v39, %v15295_v59  ;;  %v15300_v33 = vmax.f32 %v9672_v55, 0.0  ;;  %v3301_v20 = vmul.f32 0.01, %v2460_v13 }
 0x200   : > { %v15302_v25 = vmax.f32 %v9785_v19, 0.0  ;;  %v2451_v43 = vsel %vm9977_vm12, %v2448_v2, %v2445_v27  ;;  %v2463_v50 = vmul.f32 0.6931472, %v7434_v54  ;;  %v2466_v3 = vmul.f32 %v9914_v32, %v2465_v38 }
 0x201   : > { %v10011_v62 = vadd.f32 %v3299_v41, %v15300_v33  ;;  %v7438_v36 = vpop.eup %7437  ;;  %v2601_v47 = vmul.f32 %v9954_v44, %v2600_v31  ;;  %v2605_v19 = vadd.f32 1.0, %v10003_v52  ;;  %v1810_v41 = vsub.f32 0.0, %v1682_v10 }
 0x202   : > { %v10015_v49 = vadd.f32 %v3315_v15, %v15302_v25  ;;  %v10022_v48 = vpop.eup %7439  ;;  %v2598_v13 = vmul.f32 0.6931472, %v7438_v36  ;;  %vm2603_vm15 = vcmp.lt.f32.partialorder %v2602_v12, 0.0004427343  ;;  %7445 = vpow2.f32 %v1992_v1  ;;  %v15308_v25 = vld [vmem:[#allocation42_spill] sm:$0xff]  ;;  %v15319_v12 = vld [vmem:[#allocation32_spill] sm:$0xff] }
 0x203   : > { %15301 = vst [vmem:[#allocation25_spill] sm:$0xff] %v10011_v62  ;;  %v1996_v60 = vmul.f32 1.442695, %v1797_v0  ;;  %v1428_v57 = vmul.f32 100.0, %v10007_v24  ;;  %v15304_v54 = vmax.f32 %v9705_v30, 0.0  ;;  %v2590_v15 = vmul.f32 -0.5, %v9974_v9 }
 0x204   : > { %15303 = vst [vmem:[#allocation24_spill] sm:$0xff] %v10015_v49  ;;  %v3300_v32 = vmul.f32 0.01, %v2451_v43  ;;  %v2604_v31 = vsel %vm2603_vm15, %v2601_v47, %v2598_v13  ;;  %v10033_v38 = vpop.eup %7441  ;;  %v2722_v10 = vadd.f32 1.0, %v10022_v48  ;;  %v2469_v1 = vsel %vm9998_vm14, %v2466_v3, %v2463_v50  ;;  %v15311_v50 = vld [vmem:[#allocation44_spill] sm:$0xff]  ;;  %v15323_v49 = vld [vmem:[#allocation39_spill] sm:$0xff] }
 0x205   : > { %v10030_v2 = vadd.f32 %v3301_v20, %v15304_v54  ;;  %v3317_v27 = vmul.f32 0.01, %v2604_v31  ;;  %v2593_v30 = vand.u32 2147483647, %v9974_v9  ;;  %7447 = vlog2.f32 %v2605_v19  ;;  %v15318_v31 = vld [vmem:[#allocation33_spill] sm:$0xff] }
 0x206   : > { %v2022_v0 = vmul.f32 1.442695, %v1810_v41  ;;  %v15306_v39 = vmax.f32 %v9822_v22, 0.0  ;;  %7449 = vpow2.f32 %v1996_v60  ;;  %v1684_v20 = vand.u32 2147483647, %v1428_v57  ;;  %v10061_v60 = vpop.f32.mrb[40].mxu0 }
 0x207   : > { %15305 = vst [vmem:[#allocation27_spill] sm:$0xff] %v10030_v2  ;;  %v10047_v36 = vadd.f32 %v15308_v25, %v15295_v59  ;;  %v15309_v47 = vmax.f32 %v9733_v18, 0.0  ;;  %v2740_v4 = vadd.f32 1.0, %v10033_v38  ;;  %v10056_v3 = vadd.f32 %v15311_v50, %v15295_v59  ;;  %v10063_v57 = vpop.f32.mrb[40].mxu1  ;;  %v15321_v2 = vld [vmem:[#allocation40_spill] sm:$0xff] }
 0x208   : > { %v10043_v33 = vadd.f32 %v3317_v27, %v15306_v39  ;;  %v7444_v43 = vpop.eup %7443  ;;  %7451 = vpow2.f32 %v2022_v0  ;;  %v1812_v19 = vsub.f32 0.0, %v1684_v20  ;;  %v3302_v18 = vmul.f32 0.01, %v2469_v1  ;;  %v15315_v20 = vld [vmem:[#allocation43_spill] sm:$0xff] }
 0x209   : > { %v10051_v13 = vadd.f32 %v3300_v32, %v15309_v47  ;;  %7453 = vlog2.f32 %v2722_v10  ;;  %v1427_v41 = vmul.f32 100.0, %v10047_v36  ;;  %v2591_v54 = vadd.f32 1.0, %v2590_v15  ;;  %v15314_v10 = vld [vmem:[#allocation37_spill] sm:$0xff]  ;;  %v10075_v15 = vpop.f32.mrb[41].mxu0 }
 0x20a   : > { %15307 = vst [vmem:[#allocation26_spill] sm:$0xff] %v10043_v33  ;;  %vm10065_vm0 = vcmp.lt.f32.partialorder %v2593_v30, 0.0004427343  ;;  %v2608_v27 = vmul.f32 -0.5, %v10003_v52  ;;  %v2026_v0 = vmul.f32 1.442695, %v1812_v19  ;;  %v3544_v25 = vpack.c.bf16 %v15315_v20, %v15314_v10 }
 0x20b   : > { %15310 = vst [vmem:[#allocation36_spill] sm:$0xff] %v10051_v13  ;;  %v1683_v39 = vand.u32 2147483647, %v1427_v41  ;;  %v2589_v47 = vmul.f32 0.6931472, %v7444_v43  ;;  %v2725_v50 = vmul.f32 -0.5, %v10022_v48  ;;  %7455 = vlog2.f32 %v2740_v4 }
 0x20c   : > { %v1429_v1 = vmul.f32 100.0, %v10056_v3  ;;  %15316 = vst [vmem:[#allocation38_spill] sm:$0xff] %v10075_v15  ;;  %v10077_v30 = vpop.f32.mrb[41].mxu1  ;;  %v10079_v22 = vpop.eup %7445  ;;  %v2611_v55 = vand.u32 2147483647, %v10003_v52  ;;  %7457 = vpow2.f32 %v2026_v0  ;;  %3674 = vmatprep.subr.bf16.mxu0 %v3544_v25  ;;  %v2592_v43 = vmul.f32 %v9974_v9, %v2591_v54  ;;  %v15322_v33 = vld [vmem:[#allocation46_spill] sm:$0xff] }
 0x20d   : > { %15317 = vst [vmem:[#allocation41_spill] sm:$0xff] %v10077_v30  ;;  %v2728_v19 = vand.u32 2147483647, %v10022_v48  ;;  %v1811_v41 = vsub.f32 0.0, %v1683_v39  ;;  %v2743_v10 = vmul.f32 -0.5, %v10033_v38  ;;  %v15320_v44 = vpack.c.bf16 %v15318_v31, %v15319_v12  ;;  %v15324_v0 = vld [vmem:[#allocation11_spill] sm:$0xff] }
 0x20e   : > { %v1685_v20 = vand.u32 2147483647, %v1429_v1  ;;  %v2609_v26 = vadd.f32 1.0, %v2608_v27  ;;  %v3546_v62 = vpack.c.bf16 %v15322_v33, %v15321_v2  ;;  %v10093_v39 = vadd.f32 %v15324_v0, %v15323_v49  ;;  %v10095_v25 = vpop.f32.mrb[42].mxu0  ;;  %v15332_v1 = vld [vmem:[#allocation47_spill] sm:$0xff]  ;;  %v10125_v0 = vpop.f32.mrb[42].mxu1 }
 0x20f   : > { %3675 = vmatpush1.bf16.msra.mxu0 %v15320_v44  ;;  %v2024_v21 = vmul.f32 1.442695, %v1811_v41  ;;  %15325 = vst [vmem:[#allocation42_spill] sm:$0xff] %v10095_v25  ;;  %v7448_v9 = vpop.eup %7447  ;;  %v15326_v54 = vmax.f32 %v9771_v61, 0.0  ;;  %v2595_v12 = vsel %vm10065_vm0, %v2592_v43, %v2589_v47  ;;  %v2726_v44 = vadd.f32 1.0, %v2725_v50  ;;  %v15333_v41 = vld [vmem:[#allocation35_spill] sm:$0xff] }
 0x210   : > { %v2731_v31 = vadd.f32 1.0, %v10079_v22  ;;  %v10104_v27 = vpop.eup %7449  ;;  %vm10106_vm1 = vcmp.lt.f32.partialorder %v2611_v55, 0.0004427343  ;;  %vm10110_vm2 = vcmp.lt.f32.partialorder %v2728_v19, 0.0004427343  ;;  %3747 = vmatprep.subr.bf16.mxu1 %v3546_v62  ;;  %v2744_v32 = vadd.f32 1.0, %v2743_v10 }
 0x211   : > { %v10099_v4 = vadd.f32 %v3302_v18, %v15326_v54  ;;  %v2746_v61 = vand.u32 2147483647, %v10033_v38  ;;  %7459 = vpow2.f32 %v2024_v21  ;;  %v1813_v47 = vsub.f32 0.0, %v1685_v20  ;;  %v15334_v43 = vld [vmem:[#allocation34_spill] sm:$0xff]  ;;  %15336 = vst [vmem:[#allocation37_spill] sm:$0xff] %v10125_v0 }
 0x212   : > { %v10115_v18 = vpop.eup %7451  ;;  %v1442_v50 = vmul.f32 100.0, %v10093_v39  ;;  %v10120_v55 = vadd.f32 %v15332_v1, %v15323_v49  ;;  %v15335_v19 = vpack.c.bf16 %v15333_v41, %v15334_v43  ;;  %v2607_v21 = vmul.f32 0.6931472, %v7448_v9  ;;  %v15341_v1 = vld [vmem:[#allocation50_spill] sm:$0xff] }
 0x213   : > { %15327 = vst [vmem:[#allocation44_spill] sm:$0xff] %v10099_v4  ;;  %v7454_v54 = vpop.eup %7453  ;;  %v3316_v4 = vmul.f32 0.01, %v2595_v12  ;;  %v2610_v62 = vmul.f32 %v10003_v52, %v2609_v26  ;;  %v2866_v10 = vadd.f32 1.0, %v10115_v18  ;;  %v2727_v20 = vmul.f32 %v10022_v48, %v2726_v44 }
 0x214   : > { %3748 = vmatpush1.bf16.msra.mxu1 %v15335_v19  ;;  %7461 = vlog2.f32 %v2731_v31  ;;  %v2734_v13 = vmul.f32 -0.5, %v10079_v22  ;;  %v2749_v25 = vadd.f32 1.0, %v10104_v27  ;;  %v2028_v41 = vmul.f32 1.442695, %v1813_v47 }
 0x215   : > { %7463 = vlog2.f32 %v2866_v10  ;;  %v1698_v43 = vand.u32 2147483647, %v1442_v50  ;;  %v7456_v19 = vpop.eup %7455  ;;  %v2724_v0 = vmul.f32 0.6931472, %v7454_v54  ;;  %v2745_v9 = vmul.f32 %v10033_v38, %v2744_v32 }
 0x216   : > { %vm10134_vm3 = vcmp.lt.f32.partialorder %v2746_v61, 0.0004427343  ;;  %v1444_v48 = vmul.f32 100.0, %v10120_v55  ;;  %v10140_v12 = vpop.eup %7457  ;;  %v15339_v44 = vmax.f32 %v9827_v5, 0.0  ;;  %v2613_v47 = vsel %vm10106_vm1, %v2610_v62, %v2607_v21 }
 0x217   : > { %v2869_v50 = vmul.f32 -0.5, %v10115_v18  ;;  %v1826_v38 = vsub.f32 0.0, %v1698_v43  ;;  %v2735_v61 = vadd.f32 1.0, %v2734_v13  ;;  %v2737_v32 = vand.u32 2147483647, %v10079_v22 }
 0x218   : > { %v10144_v31 = vadd.f32 %v3316_v4, %v15339_v44  ;;  %v2884_v54 = vadd.f32 1.0, %v10140_v12  ;;  %7465 = vpow2.f32 %v2028_v41  ;;  %v1700_v26 = vand.u32 2147483647, %v1444_v48  ;;  %v10155_v4 = vpop.f32.mrb[43].mxu0 }
 0x219   : > { %7467 = vlog2.f32 %v2749_v25  ;;  %v2054_v10 = vmul.f32 1.442695, %v1826_v38  ;;  %v10153_v5 = vadd.f32 %v15341_v1, %v15323_v49  ;;  %15342 = vst [vmem:[#allocation33_spill] sm:$0xff] %v10155_v4  ;;  %v3318_v2 = vmul.f32 0.01, %v2613_v47 }
 0x21a   : > { %15340 = vst [vmem:[#allocation43_spill] sm:$0xff] %v10144_v31  ;;  %v2730_v21 = vsel %vm10110_vm2, %v2727_v20, %v2724_v0  ;;  %v2742_v62 = vmul.f32 0.6931472, %v7456_v19  ;;  %7469 = vlog2.f32 %v2884_v54  ;;  %v2870_v43 = vadd.f32 1.0, %v2869_v50  ;;  %v10187_v31 = vpop.f32.mrb[43].mxu1 }
 0x21b   : > { %v10159_v13 = vpop.eup %7459  ;;  %7471 = vpow2.f32 %v2054_v10  ;;  %v1828_v41 = vsub.f32 0.0, %v1700_v26  ;;  %v1443_v25 = vmul.f32 100.0, %v10153_v5  ;;  %v10163_v48 = vmul.f32 %v10079_v22, %v2735_v61  ;;  %v15345_v26 = vld [vmem:[#allocation51_spill] sm:$0xff]  ;;  %15350 = vst [vmem:[#allocation40_spill] sm:$0xff] %v10187_v31 }
 0x21c   : > { %v2887_v1 = vmul.f32 -0.5, %v10140_v12  ;;  %v2875_v44 = vadd.f32 1.0, %v10159_v13  ;;  %v3331_v33 = vmul.f32 0.01, %v2730_v21  ;;  %vm10168_vm4 = vcmp.lt.f32.partialorder %v2737_v32, 0.0004427343 }
 0x21d   : > { %v2752_v20 = vmul.f32 -0.5, %v10104_v27  ;;  %v2872_v19 = vand.u32 2147483647, %v10115_v18  ;;  %v10176_v50 = vadd.f32 %v15345_v26, %v15323_v49  ;;  %v15346_v38 = vmax.f32 %v9884_v17, 0.0  ;;  %v15348_v32 = vld [vmem:[#allocation45_spill] sm:$0xff]  ;;  %v15349_v21 = vld [vmem:[#allocation12_spill] sm:$0xff] }
 0x21e   : > { %v7462_v22 = vpop.eup %7461  ;;  %v2755_v54 = vand.u32 2147483647, %v10104_v27  ;;  %v1699_v10 = vand.u32 2147483647, %v1443_v25  ;;  %v10185_v47 = vadd.f32 %v15349_v21, %v15348_v32  ;;  %v2748_v59 = vsel %vm10134_vm3, %v2745_v9, %v2742_v62 }
 0x21f   : > { %v10180_v61 = vadd.f32 %v3318_v2, %v15346_v38  ;;  %v7464_v4 = vpop.eup %7463  ;;  %v2871_v26 = vmul.f32 %v10115_v18, %v2870_v43  ;;  %v2058_v49 = vmul.f32 1.442695, %v1828_v41  ;;  %v1445_v17 = vmul.f32 100.0, %v10176_v50 }
 0x220   : > { %v2868_v2 = vmul.f32 0.6931472, %v7464_v4  ;;  %v2888_v38 = vadd.f32 1.0, %v2887_v1  ;;  %7473 = vlog2.f32 %v2875_v44  ;;  %v2753_v25 = vadd.f32 1.0, %v2752_v20 }
 0x221   : > { %15347 = vst [vmem:[#allocation32_spill] sm:$0xff] %v10180_v61  ;;  %v1827_v61 = vsub.f32 0.0, %v1699_v10  ;;  %vm2873_vm5 = vcmp.lt.f32.partialorder %v2872_v19, 0.0004427343  ;;  %v1701_v30 = vand.u32 2147483647, %v1445_v17  ;;  %7475 = vpow2.f32 %v2058_v49 }
 0x222   : > { %v1458_v21 = vmul.f32 100.0, %v10185_v47  ;;  %v10194_v15 = vpop.eup %7465  ;;  %v15351_v31 = vmax.f32 %v9904_v46, 0.0  ;;  %v2733_v9 = vmul.f32 0.6931472, %v7462_v22  ;;  %v2874_v18 = vsel %vm2873_vm5, %v2871_v26, %v2868_v2  ;;  %v10217_v49 = vpop.f32.mrb[44].mxu0 }
 0x223   : > { %v2890_v62 = vand.u32 2147483647, %v10140_v12  ;;  %v7468_v43 = vpop.eup %7467  ;;  %v3333_v4 = vmul.f32 0.01, %v2748_v59  ;;  %vm10201_vm6 = vcmp.lt.f32.partialorder %v2755_v54, 0.0004427343  ;;  %v2889_v20 = vmul.f32 %v10140_v12, %v2888_v38 }
 0x224   : > { %v10198_v52 = vadd.f32 %v3331_v33, %v15351_v31  ;;  %v3347_v1 = vmul.f32 0.01, %v2874_v18  ;;  %v7470_v44 = vpop.eup %7469  ;;  %v2056_v19 = vmul.f32 1.442695, %v1827_v61  ;;  %v1829_v10 = vsub.f32 0.0, %v1701_v30  ;;  %v15357_v54 = vld [vmem:[#allocation54_spill] sm:$0xff] }
 0x225   : > { %v1714_v46 = vand.u32 2147483647, %v1458_v21  ;;  %v10206_v31 = vpop.eup %7471  ;;  %v15355_v33 = vmax.f32 %v9984_v7, 0.0  ;;  %v2886_v26 = vmul.f32 0.6931472, %v7470_v44  ;;  %v2893_v59 = vadd.f32 1.0, %v10194_v15 }
 0x226   : > { %15352 = vst [vmem:[#allocation46_spill] sm:$0xff] %v10198_v52  ;;  %v10215_v17 = vadd.f32 %v15357_v54, %v15348_v32  ;;  %v10219_v2 = vpop.f32.mrb[44].mxu1  ;;  %v2739_v30 = vsel %vm10168_vm4, %v10163_v48, %v2733_v9  ;;  %v2754_v12 = vmul.f32 %v10104_v27, %v2753_v25  ;;  %vm2891_vm7 = vcmp.lt.f32.partialorder %v2890_v62, 0.0004427343 }
 0x227   : > { %v10210_v22 = vadd.f32 %v3347_v1, %v15355_v33  ;;  %v3010_v7 = vadd.f32 1.0, %v10206_v31  ;;  %v2892_v38 = vsel %vm2891_vm7, %v2889_v20, %v2886_v26  ;;  %v2878_v21 = vmul.f32 -0.5, %v10159_v13  ;;  %v10229_v1 = vpop.f32.mrb[45].mxu0 }
 0x228   : > { %v1842_v18 = vsub.f32 0.0, %v1714_v46  ;;  %v2751_v44 = vmul.f32 0.6931472, %v7468_v43  ;;  %v3349_v33 = vmul.f32 0.01, %v2892_v38  ;;  %7477 = vpow2.f32 %v2056_v19 }
 0x229   : > { %15356 = vst [vmem:[#allocation11_spill] sm:$0xff] %v10210_v22  ;;  %v2060_v54 = vmul.f32 1.442695, %v1829_v10  ;;  %7479 = vlog2.f32 %v2893_v59  ;;  %v1460_v0 = vmul.f32 100.0, %v10215_v17  ;;  %v15358_v9 = vmax.f32 %v9920_v14, 0.0 }
 0x22a   : > { %v2086_v27 = vmul.f32 1.442695, %v1842_v18  ;;  %v7474_v25 = vpop.eup %7473  ;;  %v3332_v20 = vmul.f32 0.01, %v2739_v30  ;;  %v15360_v46 = vmax.f32 %v10007_v24, 0.0  ;;  %7481 = vlog2.f32 %v3010_v7  ;;  %v15362_v7 = vld [vmem:[#allocation14_spill] sm:$0xff] }
 0x22b   : > { %v10235_v62 = vadd.f32 %v3333_v4, %v15358_v9  ;;  %v2879_v43 = vadd.f32 1.0, %v2878_v21  ;;  %v2757_v59 = vsel %vm10201_vm6, %v2754_v12, %v2751_v44  ;;  %v2881_v4 = vand.u32 2147483647, %v10159_v13  ;;  %v10248_v30 = vpop.eup %7475  ;;  %v15363_v18 = vld [vmem:[#allocation15_spill] sm:$0xff] }
 0x22c   : > { %v10239_v26 = vadd.f32 %v3349_v33, %v15360_v46  ;;  %7483 = vpow2.f32 %v2086_v27  ;;  %v2877_v24 = vmul.f32 0.6931472, %v7474_v25  ;;  %v1716_v38 = vand.u32 2147483647, %v1460_v0  ;;  %v10267_v0 = vpop.f32.mrb[45].mxu1 }
 0x22d   : > { %15359 = vst [vmem:[#allocation47_spill] sm:$0xff] %v10235_v62  ;;  %7485 = vpow2.f32 %v2060_v54  ;;  %v10252_v21 = vadd.f32 %v15362_v7, %v15348_v32  ;;  %v10256_v33 = vadd.f32 %v15363_v18, %v15348_v32  ;;  %v15364_v41 = vmax.f32 %v9952_v11, 0.0 }
 0x22e   : > { %15361 = vst [vmem:[#allocation35_spill] sm:$0xff] %v10239_v26  ;;  %v2896_v44 = vmul.f32 -0.5, %v10194_v15  ;;  %v3560_v54 = vpack.c.bf16 %v9641_v6, %v9609_v34  ;;  %v3562_v27 = vpack.c.bf16 %v9648_v63, %v9628_v37  ;;  %v2880_v25 = vmul.f32 %v10159_v13, %v2879_v43  ;;  %v15368_v43 = vld [vmem:[#allocation49_spill] sm:$0xff] }
 0x22f   : > { %v10260_v12 = vadd.f32 %v3332_v20, %v15364_v41  ;;  %v3013_v9 = vmul.f32 -0.5, %v10206_v31  ;;  %v1844_v46 = vsub.f32 0.0, %v1716_v38  ;;  %v1459_v7 = vmul.f32 100.0, %v10252_v21  ;;  %v15369_v38 = vld [vmem:[#allocation48_spill] sm:$0xff] }
 0x230   : > { %v3334_v11 = vmul.f32 0.01, %v2757_v59  ;;  %vm10272_vm8 = vcmp.lt.f32.partialorder %v2881_v4, 0.0004427343  ;;  %v3031_v18 = vmul.f32 -0.5, %v10248_v30  ;;  %v1461_v34 = vmul.f32 100.0, %v10256_v33  ;;  %3676 = vmatprep.subr.bf16.mxu0 %v3560_v54  ;;  %3749 = vmatprep.subr.bf16.mxu1 %v3562_v27 }
 0x231   : > { %15365 = vst [vmem:[#allocation34_spill] sm:$0xff] %v10260_v12  ;;  %v2883_v37 = vsel %vm10272_vm8, %v2880_v25, %v2877_v24  ;;  %v3028_v6 = vadd.f32 1.0, %v10248_v30  ;;  %v2090_v63 = vmul.f32 1.442695, %v1844_v46  ;;  %v1715_v13 = vand.u32 2147483647, %v1459_v7 }
 0x232   : > { %v15370_v59 = vpack.c.bf16 %v15368_v43, %v15369_v38  ;;  %v15371_v4 = vld [vmem:[#allocation53_spill] sm:$0xff]  ;;  %v15372_v41 = vld [vmem:[#allocation52_spill] sm:$0xff]  ;;  %v10287_v61 = vpop.eup %7477  ;;  %v2897_v10 = vadd.f32 1.0, %v2896_v44  ;;  %v2899_v54 = vand.u32 2147483647, %v10194_v15  ;;  %v3014_v46 = vadd.f32 1.0, %v3013_v9 }
 0x233   : > { %v15373_v14 = vpack.c.bf16 %v15371_v4, %v15372_v41  ;;  %v3016_v27 = vand.u32 2147483647, %v10206_v31  ;;  %v7480_v25 = vpop.eup %7479  ;;  %7487 = vpow2.f32 %v2090_v63  ;;  %v1843_v7 = vsub.f32 0.0, %v1715_v13  ;;  %v10300_v9 = vpop.f32.mrb[46].mxu0 }
 0x234   : > { %3677 = vmatpush1.bf16.msra.mxu0 %v15370_v59  ;;  %v1717_v20 = vand.u32 2147483647, %v1461_v34  ;;  %v7482_v43 = vpop.eup %7481  ;;  %v15374_v38 = vmax.f32 %v9964_v23, 0.0  ;;  %v3032_v4 = vadd.f32 1.0, %v3031_v18  ;;  %7489 = vlog2.f32 %v3028_v6  ;;  %v10356_v23 = vpop.f32.mrb[47].mxu0 }
 0x235   : > { %3750 = vmatpush1.bf16.msra.mxu1 %v15373_v14  ;;  %v3348_v14 = vmul.f32 0.01, %v2883_v37  ;;  %v3019_v19 = vadd.f32 1.0, %v10287_v61  ;;  %v2088_v24 = vmul.f32 1.442695, %v1843_v7  ;;  %v2898_v34 = vmul.f32 %v10194_v15, %v2897_v10  ;;  %15386 = vst [vmem:[#allocation45_spill] sm:$0xff] %v10356_v23 }
 0x236   : > { %v10294_v59 = vadd.f32 %v3334_v11, %v15374_v38  ;;  %v10297_v41 = vpop.eup %7483  ;;  %v1845_v48 = vsub.f32 0.0, %v1717_v20  ;;  %vm10305_vm9 = vcmp.lt.f32.partialorder %v2899_v54, 0.0004427343  ;;  %vm10309_vm10 = vcmp.lt.f32.partialorder %v3016_v27, 0.0004427343  ;;  %v15382_v38 = vld [vmem:[#allocation7_spill] sm:$0xff] }
 0x237   : > { %v10302_v63 = vpop.eup %7485  ;;  %v3154_v18 = vadd.f32 1.0, %v10297_v41  ;;  %v3015_v37 = vmul.f32 %v10206_v31, %v3014_v46  ;;  %v3034_v6 = vand.u32 2147483647, %v10248_v30  ;;  %7491 = vpow2.f32 %v2088_v24  ;;  %v10329_v46 = vpop.f32.mrb[46].mxu1 }
 0x238   : > { %15375 = vst [vmem:[#allocation50_spill] sm:$0xff] %v10294_v59  ;;  %v15380_v7 = vmax.f32 %v10047_v36, 0.0  ;;  %v2895_v10 = vmul.f32 0.6931472, %v7480_v25  ;;  %v10322_v54 = vmul.f32 %v10248_v30, %v3032_v4  ;;  %v3037_v27 = vadd.f32 1.0, %v10302_v63  ;;  %v15383_v30 = vld [vmem:[#allocation20_spill] sm:$0xff] }
 0x239   : > { %7493 = vlog2.f32 %v3154_v18  ;;  %v2092_v20 = vmul.f32 1.442695, %v1845_v48  ;;  %v10327_v31 = vadd.f32 %v9604_v28, %v15382_v38  ;;  %v3012_v24 = vmul.f32 0.6931472, %v7482_v43 }
 0x23a   : > { %v10319_v15 = vadd.f32 %v3348_v14, %v15380_v7  ;;  %7495 = vlog2.f32 %v3019_v19  ;;  %v3157_v36 = vmul.f32 -0.5, %v10297_v41  ;;  %v10334_v25 = vadd.f32 %v9615_v51, %v15382_v38 }
 0x23b   : > { %v10338_v14 = vadd.f32 %v15383_v30, %v15382_v38  ;;  %v3022_v19 = vmul.f32 -0.5, %v10287_v61  ;;  %7497 = vpow2.f32 %v2092_v20  ;;  %v1350_v28 = vmul.f32 100.0, %v10327_v31 }
 0x23c   : > { %15381 = vst [vmem:[#allocation51_spill] sm:$0xff] %v10319_v15  ;;  %v2901_v43 = vsel %vm10305_vm9, %v2898_v34, %v2895_v10  ;;  %v3025_v4 = vand.u32 2147483647, %v10287_v61  ;;  %v1352_v18 = vmul.f32 100.0, %v10334_v25  ;;  %vm10350_vm11 = vcmp.lt.f32.partialorder %v3034_v6, 0.0004427343 }
 0x23d   : > { %v1351_v51 = vmul.f32 100.0, %v10338_v14  ;;  %v10348_v7 = vpop.eup %7487  ;;  %7499 = vlog2.f32 %v3037_v27  ;;  %v3040_v20 = vmul.f32 -0.5, %v10302_v63  ;;  %v1606_v13 = vand.u32 2147483647, %v1350_v28  ;;  %v15387_v27 = vld [vmem:[#allocation21_spill] sm:$0xff] }
 0x23e   : > { %v3018_v34 = vsel %vm10309_vm10, %v3015_v37, %v3012_v24  ;;  %v3158_v10 = vadd.f32 1.0, %v3157_v36  ;;  %v3172_v44 = vadd.f32 1.0, %v10348_v7  ;;  %v1608_v62 = vand.u32 2147483647, %v1352_v18  ;;  %v7490_v26 = vpop.eup %7489 }
 0x23f   : > { %v3350_v6 = vmul.f32 0.01, %v2901_v43  ;;  %v1734_v59 = vsub.f32 0.0, %v1606_v13  ;;  %v1607_v52 = vand.u32 2147483647, %v1351_v51  ;;  %v10363_v22 = vadd.f32 %v15387_v27, %v15382_v38  ;;  %v10371_v38 = vpop.f32.mrb[47].mxu1 }
 0x240   : > { %v3023_v15 = vadd.f32 1.0, %v3022_v19  ;;  %v3043_v28 = vand.u32 2147483647, %v10302_v63  ;;  %v3160_v48 = vand.u32 2147483647, %v10297_v41  ;;  %7501 = vlog2.f32 %v3172_v44  ;;  %15388 = vst [vmem:[#allocation12_spill] sm:$0xff] %v10371_v38 }
 0x241   : > { %v10367_v11 = vpop.eup %7491  ;;  %v3363_v37 = vmul.f32 0.01, %v3018_v34  ;;  %v1870_v24 = vmul.f32 1.442695, %v1734_v59  ;;  %v1736_v36 = vsub.f32 0.0, %v1608_v62  ;;  %v1735_v18 = vsub.f32 0.0, %v1607_v52 }
 0x242   : > { %v3030_v43 = vmul.f32 0.6931472, %v7490_v26  ;;  %v3041_v13 = vadd.f32 1.0, %v3040_v20  ;;  %v3159_v51 = vmul.f32 %v10297_v41, %v3158_v10  ;;  %v3163_v27 = vadd.f32 1.0, %v10367_v11 }
 0x243   : > { %v7494_v12 = vpop.eup %7493  ;;  %vm10373_vm12 = vcmp.lt.f32.partialorder %v3025_v4, 0.0004427343  ;;  %v3175_v34 = vmul.f32 -0.5, %v10348_v7  ;;  %7503 = vpow2.f32 %v1870_v24  ;;  %v1353_v52 = vmul.f32 100.0, %v10363_v22 }
 0x244   : > { %v7496_v19 = vpop.eup %7495  ;;  %v3156_v44 = vmul.f32 0.6931472, %v7494_v12  ;;  %v15391_v62 = vmax.f32 %v10056_v3, 0.0  ;;  %v3024_v59 = vmul.f32 %v10287_v61, %v3023_v15  ;;  %vm3161_vm13 = vcmp.lt.f32.partialorder %v3160_v48, 0.0004427343 }
 0x245   : > { %v1874_v41 = vmul.f32 1.442695, %v1736_v36  ;;  %v10384_v20 = vpop.eup %7497  ;;  %v15392_v4 = vmax.f32 %v10093_v39, 0.0  ;;  %vm10390_vm14 = vcmp.lt.f32.partialorder %v3043_v28, 0.0004427343  ;;  %v3036_v61 = vsel %vm10350_vm11, %v10322_v54, %v3030_v43  ;;  %v15400_v54 = vld [vmem:[#allocation56_spill] sm:$0xff] }
 0x246   : > { %v10381_v26 = vadd.f32 %v3350_v6, %v15391_v62  ;;  %v3162_v24 = vsel %vm3161_vm13, %v3159_v51, %v3156_v44  ;;  %v3178_v38 = vand.u32 2147483647, %v10348_v7  ;;  %v1872_v3 = vmul.f32 1.442695, %v1735_v18  ;;  %v15398_v18 = vld [vmem:[#allocation8_spill] sm:$0xff]  ;;  %v15399_v62 = vld [vmem:[#allocation55_spill] sm:$0xff] }
 0x247   : > { %v10388_v10 = vadd.f32 %v3363_v37, %v15392_v4  ;;  %v3042_v15 = vmul.f32 %v10302_v63, %v3041_v13  ;;  %v3379_v48 = vmul.f32 0.01, %v3162_v24  ;;  %7505 = vlog2.f32 %v3163_v27  ;;  %v7500_v6 = vpop.eup %7499 }
 0x248   : > { %v3176_v39 = vadd.f32 1.0, %v3175_v34  ;;  %v3181_v37 = vadd.f32 1.0, %v10384_v20  ;;  %7507 = vpow2.f32 %v1874_v41  ;;  %v1609_v28 = vand.u32 2147483647, %v1353_v52 }
 0x249   : > { %15393 = vst [vmem:[#allocation54_spill] sm:$0xff] %v10388_v10  ;;  %v3021_v36 = vmul.f32 0.6931472, %v7496_v19  ;;  %v15396_v51 = vmax.f32 %v10185_v47, 0.0  ;;  %v10406_v4 = vadd.f32 %v15399_v62, %v15398_v18  ;;  %v10410_v63 = vadd.f32 %v15400_v54, %v15398_v18 }
 0x24a   : > { %v3365_v30 = vmul.f32 0.01, %v3036_v61  ;;  %vm10412_vm15 = vcmp.lt.f32.partialorder %v3178_v38, 0.0004427343  ;;  %7509 = vpow2.f32 %v1872_v3  ;;  %v1737_v13 = vsub.f32 0.0, %v1609_v28  ;;  %v7502_v27 = vpop.eup %7501  ;;  %v10421_v38 = vpop.f32.mrb[48].mxu0 }
 0x24b   : > { %v10402_v44 = vadd.f32 %v3379_v48, %v15396_v51  ;;  %v3039_v19 = vmul.f32 0.6931472, %v7500_v6  ;;  %v1366_v34 = vmul.f32 100.0, %v10406_v4  ;;  %v1368_v52 = vmul.f32 100.0, %v10410_v63  ;;  %v10426_v51 = vpop.f32.mrb[48].mxu1 }
 0x24c   : > { %v3174_v41 = vmul.f32 0.6931472, %v7502_v27  ;;  %v3177_v24 = vmul.f32 %v10348_v7, %v3176_v39  ;;  %7511 = vlog2.f32 %v3181_v37  ;;  %v1876_v61 = vmul.f32 1.442695, %v1737_v13  ;;  %v15403_v39 = vld [vmem:[#allocation22_spill] sm:$0xff]  ;;  %v15404_v37 = vld [vmem:[#allocation57_spill] sm:$0xff] }
 0x24d   : > { %15397 = vst [vmem:[#allocation14_spill] sm:$0xff] %v10402_v44  ;;  %v3027_v3 = vsel %vm10373_vm12, %v3024_v59, %v3021_v36  ;;  %v1622_v6 = vand.u32 2147483647, %v1366_v34  ;;  %v1624_v28 = vand.u32 2147483647, %v1368_v52  ;;  %v10428_v62 = vpop.eup %7503  ;;  %v3166_v7 = vmul.f32 -0.5, %v10367_v11 }
 0x24e   : > { %v3180_v54 = vsel %vm10412_vm15, %v3177_v24, %v3174_v41  ;;  %v3576_v13 = vpack.c.bf16 %v15404_v37, %v15403_v39  ;;  %v15405_v27 = vld [vmem:[#allocation23_spill] sm:$0xff]  ;;  %v10437_v59 = vpop.f32.mrb[49].mxu0  ;;  %v3045_v36 = vsel %vm10390_vm14, %v3042_v15, %v3039_v19  ;;  %7513 = vpow2.f32 %v1876_v61  ;;  %v15406_v52 = vld [vmem:[#allocation58_spill] sm:$0xff] }
 0x24f   : > { %v3578_v23 = vpack.c.bf16 %v9860_v40, %v15405_v27  ;;  %v3381_v34 = vmul.f32 0.01, %v3180_v54  ;;  %v10443_v47 = vadd.f32 %v15406_v52, %v15398_v18  ;;  %v15407_v43 = vmax.f32 %v10120_v55, 0.0  ;;  %v15411_v54 = vld [vmem:[#allocation17_spill] sm:$0xff]  ;;  %v15412_v55 = vld [vmem:[#allocation16_spill] sm:$0xff]  ;;  %v15414_v52 = vld [vmem:[#allocation19_spill] sm:$0xff] }
 0x250   : > { %v1750_v39 = vsub.f32 0.0, %v1622_v6  ;;  %v1752_v37 = vsub.f32 0.0, %v1624_v28  ;;  %3678 = vmatprep.subr.bf16.mxu0 %v3576_v13  ;;  %v3364_v27 = vmul.f32 0.01, %v3027_v3  ;;  %v15409_v12 = vmax.f32 %v10215_v17, 0.0 }
 0x251   : > { %v10447_v41 = vadd.f32 %v3365_v30, %v15407_v43  ;;  %3751 = vmatprep.subr.bf16.mxu1 %v3578_v23  ;;  %v7506_v40 = vpop.eup %7505  ;;  %v3169_v19 = vand.u32 2147483647, %v10367_v11  ;;  %v2182_v61 = vadd.f32 1.0, %v10428_v62  ;;  %v15413_v30 = vpack.c.bf16 %v15411_v54, %v15412_v55  ;;  %v15415_v43 = vld [vmem:[#allocation18_spill] sm:$0xff] }
 0x252   : > { %v10452_v15 = vadd.f32 %v3381_v34, %v15409_v12  ;;  %v15416_v6 = vpack.c.bf16 %v15414_v52, %v15415_v43  ;;  %v10462_v28 = vpop.eup %7507  ;;  %v3366_v13 = vmul.f32 0.01, %v3045_v36  ;;  %v3167_v3 = vadd.f32 1.0, %v3166_v7  ;;  %v15417_v36 = vld [vmem:[#allocation59_spill] sm:$0xff]  ;;  %v10476_v43 = vpop.f32.mrb[49].mxu1 }
 0x253   : > { %15408 = vst [vmem:[#allocation15_spill] sm:$0xff] %v10447_v41  ;;  %3679 = vmatpush1.bf16.msra.mxu0 %v15413_v30  ;;  %v3184_v17 = vmul.f32 -0.5, %v10384_v20  ;;  %v1902_v23 = vmul.f32 1.442695, %v1750_v39  ;;  %v3187_v12 = vand.u32 2147483647, %v10384_v20  ;;  %v10474_v7 = vadd.f32 %v15417_v36, %v15398_v18 }
 0x254   : > { %15410 = vst [vmem:[#allocation49_spill] sm:$0xff] %v10452_v15  ;;  %3752 = vmatpush1.bf16.msra.mxu1 %v15416_v6  ;;  %v2200_v24 = vadd.f32 1.0, %v10462_v28  ;;  %v1367_v54 = vmul.f32 100.0, %v10443_v47  ;;  %v10470_v55 = vpop.eup %7509  ;;  %v3165_v30 = vmul.f32 0.6931472, %v7506_v40  ;;  %v15418_v39 = vmax.f32 %v10153_v5, 0.0 }
 0x255   : > { %7515 = vpow2.f32 %v1902_v23  ;;  %v1906_v52 = vmul.f32 1.442695, %v1752_v37  ;;  %v2185_v34 = vmul.f32 -0.5, %v10428_v62  ;;  %v3168_v40 = vmul.f32 %v10367_v11, %v3167_v3  ;;  %v10502_v3 = vpop.f32.mrb[50].mxu0 }
 0x256   : > { %v10480_v6 = vadd.f32 %v3364_v27, %v15418_v39  ;;  %7517 = vlog2.f32 %v2182_v61  ;;  %v7512_v41 = vpop.eup %7511  ;;  %vm10485_vm0 = vcmp.lt.f32.partialorder %v3169_v19, 0.0004427343  ;;  %v2191_v23 = vadd.f32 1.0, %v10470_v55  ;;  %15426 = vst [vmem:[#allocation52_spill] sm:$0xff] %v10502_v3 }
 0x257   : > { %v15422_v5 = vmax.f32 %v10176_v50, 0.0  ;;  %v3185_v61 = vadd.f32 1.0, %v3184_v17  ;;  %7519 = vlog2.f32 %v2200_v24  ;;  %v1623_v39 = vand.u32 2147483647, %v1367_v54 }
 0x258   : > { %15419 = vst [vmem:[#allocation48_spill] sm:$0xff] %v10480_v6  ;;  %v3171_v48 = vsel %vm10485_vm0, %v3168_v40, %v3165_v30  ;;  %vm10497_vm1 = vcmp.lt.f32.partialorder %v3187_v12, 0.0004427343  ;;  %7521 = vpow2.f32 %v1906_v52  ;;  %v1369_v19 = vmul.f32 100.0, %v10474_v7  ;;  %v10504_v36 = vpop.eup %7513 }
 0x259   : > { %v10493_v27 = vadd.f32 %v3366_v13, %v15422_v5  ;;  %v3183_v50 = vmul.f32 0.6931472, %v7512_v41  ;;  %v2186_v13 = vadd.f32 1.0, %v2185_v34  ;;  %v2188_v17 = vand.u32 2147483647, %v10428_v62  ;;  %v15427_v5 = vld [vmem:[#allocation9_spill] sm:$0xff] }
 0x25a   : > { %v2203_v54 = vmul.f32 -0.5, %v10462_v28  ;;  %7523 = vlog2.f32 %v2191_v23  ;;  %v1751_v12 = vsub.f32 0.0, %v1623_v39  ;;  %v1625_v30 = vand.u32 2147483647, %v1369_v19  ;;  %v10515_v41 = vpop.f32.mrb[50].mxu1 }
 0x25b   : > { %15423 = vst [vmem:[#allocation53_spill] sm:$0xff] %v10493_v27  ;;  %v3380_v40 = vmul.f32 0.01, %v3171_v48  ;;  %v3186_v52 = vmul.f32 %v10384_v20, %v3185_v61  ;;  %v10513_v15 = vadd.f32 %v9810_v16, %v15427_v5  ;;  %15428 = vst [vmem:[#allocation20_spill] sm:$0xff] %v10515_v41  ;;  %v2209_v34 = vadd.f32 1.0, %v10504_v36  ;;  %v10583_v48 = vpop.f32.mrb[51].mxu1 }
 0x25c   : > { %v1904_v10 = vmul.f32 1.442695, %v1751_v12  ;;  %v10521_v23 = vadd.f32 %v9812_v8, %v15427_v5  ;;  %vm10523_vm2 = vcmp.lt.f32.partialorder %v2188_v17, 0.0004427343  ;;  %v2206_v20 = vand.u32 2147483647, %v10462_v28 }
 0x25d   : > { %v2194_v16 = vmul.f32 -0.5, %v10470_v55  ;;  %v1753_v61 = vsub.f32 0.0, %v1625_v30  ;;  %v1382_v39 = vmul.f32 100.0, %v10513_v15  ;;  %v3189_v12 = vsel %vm10497_vm1, %v3186_v52, %v3183_v50  ;;  %15438 = vst [vmem:[#allocation8_spill] sm:$0xff] %v10583_v48 }
 0x25e   : > { %v2187_v24 = vmul.f32 %v10428_v62, %v2186_v13  ;;  %v2204_v8 = vadd.f32 1.0, %v2203_v54  ;;  %7525 = vpow2.f32 %v1904_v10  ;;  %v15431_v37 = vmax.f32 %v10252_v21, 0.0 }
 0x25f   : > { %v10530_v19 = vpop.eup %7515  ;;  %v2197_v27 = vand.u32 2147483647, %v10470_v55  ;;  %v2212_v30 = vmul.f32 -0.5, %v10504_v36  ;;  %7527 = vlog2.f32 %v2209_v34  ;;  %v1908_v41 = vmul.f32 1.442695, %v1753_v61 }
 0x260   : > { %v7518_v17 = vpop.eup %7517  ;;  %v10537_v44 = vadd.f32 %v3380_v40, %v15431_v37  ;;  %v2326_v6 = vadd.f32 1.0, %v10530_v19  ;;  %v1638_v3 = vand.u32 2147483647, %v1382_v39  ;;  %v1384_v11 = vmul.f32 100.0, %v10521_v23 }
 0x261   : > { %v7520_v50 = vpop.eup %7519  ;;  %v3382_v62 = vmul.f32 0.01, %v3189_v12  ;;  %vm10543_vm3 = vcmp.lt.f32.partialorder %v2206_v20, 0.0004427343  ;;  %v2195_v21 = vadd.f32 1.0, %v2194_v16  ;;  %v2205_v40 = vmul.f32 %v10462_v28, %v2204_v8 }
 0x262   : > { %7529 = vlog2.f32 %v2326_v6  ;;  %v10547_v13 = vpop.eup %7521  ;;  %v2184_v54 = vmul.f32 0.6931472, %v7518_v17  ;;  %v1766_v52 = vsub.f32 0.0, %v1638_v3  ;;  %vm10550_vm4 = vcmp.lt.f32.partialorder %v2197_v27, 0.0004427343  ;;  %v10569_v17 = vpop.f32.mrb[51].mxu0 }
 0x263   : > { %7531 = vpow2.f32 %v1908_v41  ;;  %v2329_v34 = vmul.f32 -0.5, %v10530_v19  ;;  %v2344_v20 = vadd.f32 1.0, %v10547_v13  ;;  %v10558_v61 = vadd.f32 %v9848_v42, %v15427_v5 }
 0x264   : > { %v7524_v6 = vpop.eup %7523  ;;  %v2213_v16 = vadd.f32 1.0, %v2212_v30  ;;  %v1934_v39 = vmul.f32 1.442695, %v1766_v52  ;;  %v1640_v12 = vand.u32 2147483647, %v1384_v11  ;;  %v10562_v28 = vadd.f32 %v9864_v56, %v15427_v5 }
 0x265   : > { %v15436_v27 = vmax.f32 %v10256_v33, 0.0  ;;  %v2202_v41 = vmul.f32 0.6931472, %v7520_v50  ;;  %v2196_v8 = vmul.f32 %v10470_v55, %v2195_v21  ;;  %7533 = vlog2.f32 %v2344_v20 }
 0x266   : > { %v2190_v42 = vsel %vm10523_vm2, %v2187_v24, %v2184_v54  ;;  %v2215_v30 = vand.u32 2147483647, %v10504_v36  ;;  %7535 = vpow2.f32 %v1934_v39  ;;  %v1768_v11 = vsub.f32 0.0, %v1640_v12 }
 0x267   : > { %v10566_v3 = vadd.f32 %v3382_v62, %v15436_v27  ;;  %v2193_v52 = vmul.f32 0.6931472, %v7524_v6  ;;  %v2330_v56 = vadd.f32 1.0, %v2329_v34  ;;  %v2347_v5 = vmul.f32 -0.5, %v10547_v13 }
 0x268   : > { %v1383_v33 = vmul.f32 100.0, %v10558_v61  ;;  %v10576_v62 = vpop.eup %7525  ;;  %v10579_v55 = vmul.f32 %v10504_v36, %v2213_v16  ;;  %v1938_v21 = vmul.f32 1.442695, %v1768_v11  ;;  %v1385_v24 = vmul.f32 100.0, %v10562_v28 }
 0x269   : > { %15437 = vst [vmem:[#allocation21_spill] sm:$0xff] %v10566_v3  ;;  %v3271_v54 = vmul.f32 0.01, %v2190_v42  ;;  %v2208_v34 = vsel %vm10543_vm3, %v2205_v40, %v2202_v41  ;;  %v2332_v20 = vand.u32 2147483647, %v10530_v19  ;;  %v2335_v6 = vadd.f32 1.0, %v10576_v62  ;;  %v7528_v39 = vpop.eup %7527 }
 0x26a   : > { %7537 = vpow2.f32 %v1938_v21  ;;  %v1639_v12 = vand.u32 2147483647, %v1383_v33  ;;  %v1641_v36 = vand.u32 2147483647, %v1385_v24  ;;  %v10591_v16 = vadd.f32 %v9894_v35, %v8922_v45  ;;  %v10656_v41 = vpop.f32.mrb[52].mxu1 }
 0x26b   : > { %v2199_v11 = vsel %vm10550_vm4, %v2196_v8, %v2193_v52  ;;  %v2331_v42 = vmul.f32 %v10530_v19, %v2330_v56  ;;  %v2348_v10 = vadd.f32 1.0, %v2347_v5  ;;  %7539 = vlog2.f32 %v2335_v6  ;;  %15451 = vst [vmem:[#allocation58_spill] sm:$0xff] %v10656_v41 }
 0x26c   : > { %v7530_v27 = vpop.eup %7529  ;;  %vm10598_vm5 = vcmp.lt.f32.partialorder %v2215_v30, 0.0004427343  ;;  %v1767_v21 = vsub.f32 0.0, %v1639_v12  ;;  %v1769_v24 = vsub.f32 0.0, %v1641_v36  ;;  %v1398_v35 = vmul.f32 100.0, %v10591_v16 }
 0x26d   : > { %v10596_v40 = vpop.eup %7531  ;;  %v2328_v33 = vmul.f32 0.6931472, %v7530_v27  ;;  %v15441_v50 = vmax.f32 %v10327_v31, 0.0  ;;  %vm2333_vm6 = vcmp.lt.f32.partialorder %v2332_v20, 0.0004427343  ;;  %v2349_v36 = vmul.f32 %v10547_v13, %v2348_v10 }
 0x26e   : > { %v2350_v19 = vand.u32 2147483647, %v10547_v13  ;;  %v2353_v5 = vadd.f32 1.0, %v10596_v40  ;;  %v3273_v37 = vmul.f32 0.01, %v2208_v34  ;;  %v15443_v34 = vmax.f32 %v10406_v4, 0.0 }
 0x26f   : > { %v10605_v48 = vadd.f32 %v3271_v54, %v15441_v50  ;;  %v2334_v8 = vsel %vm2333_vm6, %v2331_v42, %v2328_v33  ;;  %v1936_v30 = vmul.f32 1.442695, %v1767_v21  ;;  %v1940_v52 = vmul.f32 1.442695, %v1769_v24  ;;  %v7534_v56 = vpop.eup %7533 }
 0x270   : > { %v3272_v6 = vmul.f32 0.01, %v2199_v11  ;;  %v2211_v27 = vmul.f32 0.6931472, %v7528_v39  ;;  %v3287_v12 = vmul.f32 0.01, %v2334_v8  ;;  %v10610_v3 = vpop.eup %7535  ;;  %v10614_v54 = vadd.f32 %v9906_v58, %v8922_v45 }
 0x271   : > { %15442 = vst [vmem:[#allocation55_spill] sm:$0xff] %v10605_v48  ;;  %v2346_v31 = vmul.f32 0.6931472, %v7534_v56  ;;  %7541 = vpow2.f32 %v1936_v30  ;;  %v1654_v50 = vand.u32 2147483647, %v1398_v35  ;;  %v2470_v39 = vadd.f32 1.0, %v10610_v3 }
 0x272   : > { %v10618_v20 = vadd.f32 %v3287_v12, %v15443_v34  ;;  %vm2351_vm7 = vcmp.lt.f32.partialorder %v2350_v19, 0.0004427343  ;;  %7543 = vlog2.f32 %v2353_v5  ;;  %v2338_v58 = vmul.f32 -0.5, %v10576_v62 }
 0x273   : > { %v2352_v11 = vsel %vm2351_vm7, %v2349_v36, %v2346_v31  ;;  %7545 = vpow2.f32 %v1940_v52  ;;  %v1782_v42 = vsub.f32 0.0, %v1654_v50  ;;  %v15445_v24 = vmax.f32 %v10334_v25, 0.0 }
 0x274   : > { %15444 = vst [vmem:[#allocation56_spill] sm:$0xff] %v10618_v20  ;;  %v3289_v33 = vmul.f32 0.01, %v2352_v11  ;;  %v10626_v4 = vpop.eup %7537  ;;  %7547 = vlog2.f32 %v2470_v39  ;;  %v1400_v5 = vmul.f32 100.0, %v10614_v54  ;;  %v15447_v30 = vmax.f32 %v10338_v14, 0.0 }
 0x275   : > { %v10630_v35 = vadd.f32 %v3273_v37, %v15445_v24  ;;  %v1966_v19 = vmul.f32 1.442695, %v1782_v42  ;;  %v7540_v8 = vpop.eup %7539  ;;  %v2217_v56 = vsel %vm10598_vm5, %v10579_v55, %v2211_v27  ;;  %v15449_v12 = vmax.f32 %v10410_v63, 0.0  ;;  %v10654_v63 = vpop.f32.mrb[52].mxu0 }
 0x276   : > { %v10635_v52 = vadd.f32 %v3272_v6, %v15447_v30  ;;  %v2488_v25 = vadd.f32 1.0, %v10626_v4  ;;  %v2341_v37 = vand.u32 2147483647, %v10576_v62  ;;  %v1656_v50 = vand.u32 2147483647, %v1400_v5 }
 0x277   : > { %15446 = vst [vmem:[#allocation22_spill] sm:$0xff] %v10630_v35  ;;  %v10642_v36 = vadd.f32 %v3289_v33, %v15449_v12  ;;  %7549 = vpow2.f32 %v1966_v19  ;;  %v2339_v6 = vadd.f32 1.0, %v2338_v58  ;;  %v2356_v34 = vmul.f32 -0.5, %v10596_v40  ;;  %v10663_v33 = vpop.f32.mrb[53].mxu0  ;;  %v10665_v58 = vpop.f32.mrb[53].mxu1 }
 0x278   : > { %15448 = vst [vmem:[#allocation57_spill] sm:$0xff] %v10635_v52  ;;  %v10652_v55 = vadd.f32 %v9941_v53, %v8922_v45  ;;  %v3274_v27 = vmul.f32 0.01, %v2217_v56  ;;  %v2473_v39 = vmul.f32 -0.5, %v10610_v3  ;;  %v1784_v11 = vsub.f32 0.0, %v1656_v50  ;;  %15452 = vst [vmem:[#allocation17_spill] sm:$0xff] %v10663_v33 }
 0x279   : > { %15450 = vst [vmem:[#allocation23_spill] sm:$0xff] %v10642_v36  ;;  %v10661_v42 = vadd.f32 %v9989_v29, %v8922_v45  ;;  %15453 = vst [vmem:[#allocation16_spill] sm:$0xff] %v10665_v58  ;;  %v2337_v24 = vmul.f32 0.6931472, %v7540_v8  ;;  %7551 = vlog2.f32 %v2488_v25  ;;  %v2491_v53 = vmul.f32 -0.5, %v10626_v4  ;;  %v15492_v33 = vld [vmem:[#allocation31_spill] sm:$0xff] }
 0x27a   : > { %v1399_v19 = vmul.f32 100.0, %v10652_v55  ;;  %v2359_v30 = vand.u32 2147483647, %v10596_v40  ;;  %v1970_v12 = vmul.f32 1.442695, %v1784_v11  ;;  %v2340_v14 = vmul.f32 %v10576_v62, %v2339_v6 }
 0x27b   : > { %v10669_v5 = vpop.eup %7541  ;;  %v1401_v29 = vmul.f32 100.0, %v10661_v42  ;;  %vm10675_vm8 = vcmp.lt.f32.partialorder %v2341_v37, 0.0004427343  ;;  %v2357_v8 = vadd.f32 1.0, %v2356_v34  ;;  %v2476_v25 = vand.u32 2147483647, %v10610_v3 }
 0x27c   : > { %v7544_v50 = vpop.eup %7543  ;;  %v2474_v21 = vadd.f32 1.0, %v2473_v39  ;;  %7553 = vpow2.f32 %v1970_v12  ;;  %v1655_v13 = vand.u32 2147483647, %v1399_v19  ;;  %v2343_v11 = vsel %vm10675_vm8, %v2340_v14, %v2337_v24  ;;  %v10697_v12 = vpop.f32.mrb[54].mxu0 }
 0x27d   : > { %v10680_v31 = vpop.eup %7545  ;;  %v1657_v35 = vand.u32 2147483647, %v1401_v29  ;;  %v2492_v56 = vadd.f32 1.0, %v2491_v53  ;;  %v2494_v36 = vand.u32 2147483647, %v10626_v4  ;;  %v2479_v62 = vadd.f32 1.0, %v10669_v5 }
 0x27e   : > { %v7548_v37 = vpop.eup %7547  ;;  %v15456_v6 = vmax.f32 %v10363_v22, 0.0  ;;  %vm10690_vm9 = vcmp.lt.f32.partialorder %v2359_v30, 0.0004427343  ;;  %v2497_v39 = vadd.f32 1.0, %v10680_v31  ;;  %v2355_v10 = vmul.f32 0.6931472, %v7544_v50 }
 0x27f   : > { %v2358_v14 = vmul.f32 %v10596_v40, %v2357_v8  ;;  %v1783_v24 = vsub.f32 0.0, %v1655_v13  ;;  %v1785_v53 = vsub.f32 0.0, %v1657_v35  ;;  %15460 = vst [vmem:[#allocation18_spill] sm:$0xff] %v10697_v12  ;;  %v10701_v22 = vmul.f32 0.01, %v2343_v11  ;;  %v10725_v11 = vpop.f32.mrb[54].mxu1 }
 0x280   : > { %v10688_v34 = vadd.f32 %v3274_v27, %v15456_v6  ;;  %v2475_v27 = vmul.f32 %v10610_v3, %v2474_v21  ;;  %vm10704_vm10 = vcmp.lt.f32.partialorder %v2476_v25, 0.0004427343  ;;  %v2472_v19 = vmul.f32 0.6931472, %v7548_v37  ;;  %v7247_v3 = vld [vmem:[%s14932_s3] sm:$0xff]   ;;  %15465 = vst [vmem:[#allocation59_spill] sm:$0xff] %v10725_v11 }
 0x281   : > { %v10699_v29 = vpop.eup %7549  ;;  %v10710_v50 = vmul.f32 %v10626_v4, %v2492_v56  ;;  %vm10712_vm11 = vcmp.lt.f32.partialorder %v2494_v36, 0.0004427343  ;;  %7555 = vlog2.f32 %v2479_v62  ;;  %v1968_v35 = vmul.f32 1.442695, %v1783_v24  ;;  %v15466_v37 = vld [vmem:[#allocation64_spill] sm:$0xff]  ;;  %v10788_v40 = vpop.f32.mrb[55].mxu1 }
 0x282   : > { %15457 = vst [vmem:[#allocation19_spill] sm:$0xff] %v10688_v34  ;;  %v2614_v13 = vadd.f32 1.0, %v10699_v29  ;;  %7557 = vlog2.f32 %v2497_v39  ;;  %v1972_v8 = vmul.f32 1.442695, %v1785_v53  ;;  %v2361_v4 = vsel %vm10690_vm9, %v2358_v14, %v2355_v10  ;;  %v15467_v39 = vld [vmem:[#allocation30_spill] sm:$0xff]  ;;  %v15468_v10 = vld [vmem:[#allocation65_spill] sm:$0xff] }
 0x283   : > { %v7552_v25 = vpop.eup %7551  ;;  %v2482_v36 = vmul.f32 -0.5, %v10669_v5  ;;  %v2485_v56 = vand.u32 2147483647, %v10669_v5  ;;  %v2500_v62 = vmul.f32 -0.5, %v10680_v31  ;;  %vm3659_vm12 = vcmask 523264   ;;  %v15469_v14 = vld [vmem:[#allocation29_spill] sm:$0xff] }
 0x284   : > { %7559 = vlog2.f32 %v2614_v13  ;;  %v3532_v21 = vpack.c.bf16 %v15467_v39, %v15466_v37  ;;  %v2478_v24 = vsel %vm10704_vm10, %v2475_v27, %v2472_v19  ;;  %v2617_v48 = vmul.f32 -0.5, %v10699_v29  ;;  %7143 = vmatmul.mubr.msk.bf16.vlgmr.msra.gmra.mrb[64].mxu0 %vm3659_vm12, %v7247_v3  ;;  %7147 = vmatmul.mubr.msk.bf16.vlgmr.msra.gmra.mrb[64].mxu1 %vm3659_vm12, %v7247_v3  ;;  %v15470_v6 = vld [vmem:[#allocation28_spill] sm:$0xff]  ;;  %v15471_v27 = vld [vmem:[#allocation38_spill] sm:$0xff]  ;;  %v15476_v34 = vld [vmem:[#allocation63_spill] sm:$0xff]  ;;  %15483 = vst [vmem:[#allocation30_spill] sm:$0xff] %v10788_v40 }
 0x285   : > { %7561 = vpow2.f32 %v1968_v35  ;;  %v3534_v53 = vpack.c.bf16 %v15469_v14, %v15468_v10  ;;  %v2490_v35 = vmul.f32 0.6931472, %v7552_v25  ;;  %v10741_v37 = vadd.f32 %v10061_v60, %v15470_v6  ;;  %v15473_v10 = vld [vmem:[#allocation60_spill] sm:$0xff]  ;;  %v10758_v14 = vpop.f32.mrb[55].mxu0 }
 0x286   : > { %7563 = vpow2.f32 %v1972_v8  ;;  %v10737_v13 = vpop.eup %7553  ;;  %3818 = vmatprep.subr.bf16.mxu0 %v3532_v21  ;;  %v10745_v19 = vadd.f32 %v10063_v57, %v15470_v6  ;;  %v10749_v30 = vadd.f32 %v15471_v27, %v15470_v6  ;;  %v10751_v3 = vmul.f32 0.01, %v2361_v4  ;;  %v15472_v21 = vld [vmem:[#allocation61_spill] sm:$0xff]  ;;  %15475 = vst [vmem:[#allocation64_spill] sm:$0xff] %v10758_v14 }
 0x287   : > { %v2483_v8 = vadd.f32 1.0, %v2482_v36  ;;  %v2632_v39 = vadd.f32 1.0, %v10737_v13  ;;  %3891 = vmatprep.subr.bf16.mxu1 %v3534_v53  ;;  %v15474_v60 = vpack.c.bf16 %v15472_v21, %v15473_v10  ;;  %v2501_v57 = vadd.f32 1.0, %v2500_v62  ;;  %v15477_v36 = vld [vmem:[#allocation62_spill] sm:$0xff]  ;;  %v7248_v62 = vld [vmem:[%s14932_s3 + $0x8] sm:$0xff]   ;;  %v15482_v14 = vld [vmem:[#allocation41_spill] sm:$0xff] }
 0x288   : > { %v2503_v20 = vand.u32 2147483647, %v10680_v31  ;;  %v1414_v27 = vmul.f32 100.0, %v10741_v37  ;;  %v1416_v4 = vmul.f32 100.0, %v10745_v19  ;;  %v15478_v52 = vpack.c.bf16 %v15476_v34, %v15477_v36 }
 0x289   : > { %3819 = vmatpush1.bf16.msra.mxu0 %v15474_v60  ;;  %v15479_v11 = vmov 0   ;;  %v3303_v53 = vmul.f32 0.01, %v2478_v24  ;;  %v2618_v25 = vadd.f32 1.0, %v2617_v48  ;;  %v2620_v21 = vand.u32 2147483647, %v10699_v29 }
 0x28a   : > { %3892 = vmatpush1.bf16.msra.mxu1 %v15478_v52  ;;  %3714 = vmatprep.mubr.bf16.mxu0 %v15479_v11  ;;  %7565 = vlog2.f32 %v2632_v39  ;;  %v2496_v10 = vsel %vm10712_vm11, %v10710_v50, %v2490_v35  ;;  %v1670_v60 = vand.u32 2147483647, %v1414_v27  ;;  %v1672_v34 = vand.u32 2147483647, %v1416_v4 }
 0x28b   : > { %3787 = vmatprep.mubr.bf16.mxu1 %v15479_v11  ;;  %v1415_v52 = vmul.f32 100.0, %v10749_v30  ;;  %v7556_v36 = vpop.eup %7555  ;;  %v10777_v24 = vmul.f32 %v10669_v5, %v2483_v8  ;;  %vm10779_vm13 = vcmp.lt.f32.partialorder %v2485_v56, 0.0004427343  ;;  %v2635_v39 = vmul.f32 -0.5, %v10737_v13 }
 0x28c   : > { %v10786_v12 = vadd.f32 %v15482_v14, %v15470_v6  ;;  %v7558_v50 = vpop.eup %7557  ;;  %v10791_v35 = vmul.f32 %v10680_v31, %v2501_v57  ;;  %vm10793_vm14 = vcmp.lt.f32.partialorder %v2503_v20, 0.0004427343  ;;  %v1798_v5 = vsub.f32 0.0, %v1670_v60  ;;  %7144 = vmatmul.mubr.msk.bf16.gmra.mrb[68].mxu0 %vm3659_vm12, %v7248_v62  ;;  %7148 = vmatmul.mubr.msk.bf16.gmra.mrb[68].mxu1 %vm3659_vm12, %v7248_v62 }
 0x28d   : > { %v1800_v56 = vsub.f32 0.0, %v1672_v34  ;;  %v15486_v4 = vmax.f32 %v10513_v15, 0.0  ;;  %v3305_v58 = vmul.f32 0.01, %v2496_v10  ;;  %vm10801_vm15 = vcmp.lt.f32.partialorder %v2620_v21, 0.0004427343  ;;  %3724 = vmatprep.mubr.bf16.mxu0 %v15479_v11  ;;  %3797 = vmatprep.mubr.bf16.mxu1 %v15479_v11 }
 0x28e   : > { %v7560_v8 = vpop.eup %7559  ;;  %v2638_v6 = vand.u32 2147483647, %v10737_v13  ;;  %v2481_v31 = vmul.f32 0.6931472, %v7556_v36  ;;  %v2619_v60 = vmul.f32 %v10699_v29, %v2618_v25  ;;  %v1671_v15 = vand.u32 2147483647, %v1415_v52 }
 0x28f   : > { %v10799_v45 = vadd.f32 %v3303_v53, %v15486_v4  ;;  %v10808_v20 = vpop.eup %7561  ;;  %v2616_v57 = vmul.f32 0.6931472, %v7560_v8  ;;  %v2636_v21 = vadd.f32 1.0, %v2635_v39  ;;  %v1998_v34 = vmul.f32 1.442695, %v1798_v5  ;;  %v15493_v39 = vld [vmem:[#allocation42_spill] sm:$0xff] }
 0x290   : > { %v10813_v53 = vpop.eup %7563  ;;  %v2623_v10 = vadd.f32 1.0, %v10808_v20  ;;  %v1417_v4 = vmul.f32 100.0, %v10786_v12  ;;  %v2499_v62 = vmul.f32 0.6931472, %v7558_v50  ;;  %v2002_v29 = vmul.f32 1.442695, %v1800_v56 }
 0x291   : > { %15487 = vst [vmem:[#allocation65_spill] sm:$0xff] %v10799_v45  ;;  %v2622_v36 = vsel %vm10801_vm15, %v2619_v60, %v2616_v57  ;;  %v2641_v8 = vadd.f32 1.0, %v10813_v53  ;;  %v15490_v25 = vmax.f32 %v10521_v23, 0.0  ;;  %v10826_v41 = vadd.f32 %v15493_v39, %v15492_v33  ;;  %v7249_v50 = vld [vmem:[%s14932_s3 + $0x10] sm:$0xff]   ;;  %v10852_v39 = vpop.f32.mrb[56].mxu1 }
 0x292   : > { %v3319_v40 = vmul.f32 0.01, %v2622_v36  ;;  %7567 = vlog2.f32 %v2623_v10  ;;  %vm10831_vm0 = vcmp.lt.f32.partialorder %v2638_v6, 0.0004427343  ;;  %v1799_v56 = vsub.f32 0.0, %v1671_v15  ;;  %v15496_v23 = vld [vmem:[#allocation37_spill] sm:$0xff] }
 0x293   : > { %v10822_v52 = vadd.f32 %v3305_v58, %v15490_v25  ;;  %7569 = vlog2.f32 %v2641_v8  ;;  %v10837_v58 = vadd.f32 %v15496_v23, %v15492_v33  ;;  %v2487_v57 = vsel %vm10779_vm13, %v10777_v24, %v2481_v31  ;;  %v10850_v25 = vpop.f32.mrb[56].mxu0  ;;  %v15500_v5 = vld [vmem:[#allocation40_spill] sm:$0xff] }
 0x294   : > { %v7566_v14 = vpop.eup %7565  ;;  %v15497_v60 = vmax.f32 %v10591_v16, 0.0  ;;  %7571 = vpow2.f32 %v1998_v34  ;;  %v1673_v6 = vand.u32 2147483647, %v1417_v4  ;;  %v2505_v36 = vsel %vm10793_vm14, %v10791_v35, %v2499_v62  ;;  %7145 = vmatmul.mubr.msk.bf16.gmra.mrb[72].mxu0 %vm3659_vm12, %v7249_v50  ;;  %7149 = vmatmul.mubr.msk.bf16.gmra.mrb[72].mxu1 %vm3659_vm12, %v7249_v50  ;;  %v15501_v23 = vld [vmem:[#allocation36_spill] sm:$0xff] }
 0x295   : > { %15491 = vst [vmem:[#allocation29_spill] sm:$0xff] %v10822_v52  ;;  %v2634_v15 = vmul.f32 0.6931472, %v7566_v14  ;;  %v2637_v8 = vmul.f32 %v10737_v13, %v2636_v21  ;;  %7573 = vpow2.f32 %v2002_v29  ;;  %v2000_v16 = vmul.f32 1.442695, %v1799_v56  ;;  %3734 = vmatprep.mubr.bf16.mxu0 %v15479_v11  ;;  %3807 = vmatprep.mubr.bf16.mxu1 %v15479_v11  ;;  %v15499_v29 = vld [vmem:[#allocation33_spill] sm:$0xff] }
 0x296   : > { %v10844_v10 = vadd.f32 %v3319_v40, %v15497_v60  ;;  %v1801_v48 = vsub.f32 0.0, %v1673_v6  ;;  %v1430_v40 = vmul.f32 100.0, %v10826_v41  ;;  %v2626_v13 = vmul.f32 -0.5, %v10808_v20  ;;  %v15502_v14 = vld [vmem:[#allocation43_spill] sm:$0xff] }
 0x297   : > { %v2640_v35 = vsel %vm10831_vm0, %v2637_v8, %v2634_v15  ;;  %v2644_v27 = vmul.f32 -0.5, %v10813_v53  ;;  %v1432_v31 = vmul.f32 100.0, %v10837_v58  ;;  %7575 = vpow2.f32 %v2000_v16  ;;  %v15505_v16 = vld [vmem:[#allocation44_spill] sm:$0xff] }
 0x298   : > { %15498 = vst [vmem:[#allocation38_spill] sm:$0xff] %v10844_v10  ;;  %v3321_v21 = vmul.f32 0.01, %v2640_v35  ;;  %v2004_v34 = vmul.f32 1.442695, %v1801_v48  ;;  %v10868_v50 = vadd.f32 %v15499_v29, %v15492_v33  ;;  %v10872_v56 = vadd.f32 %v15500_v5, %v15492_v33  ;;  %v15506_v48 = vld [vmem:[#allocation32_spill] sm:$0xff] }
 0x299   : > { %v1686_v4 = vand.u32 2147483647, %v1430_v40  ;;  %v1688_v62 = vand.u32 2147483647, %v1432_v31  ;;  %v3548_v60 = vpack.c.bf16 %v15502_v14, %v15501_v23  ;;  %v15503_v6 = vmax.f32 %v10614_v54, 0.0  ;;  %v7250_v35 = vld [vmem:[%s14932_s3 + $0x18] sm:$0xff]  }
 0x29a   : > { %7577 = vpow2.f32 %v2004_v34  ;;  %v3550_v40 = vpack.c.bf16 %v15506_v48, %v15505_v16  ;;  %v15507_v31 = vmax.f32 %v10443_v47, 0.0  ;;  %v15508_v5 = vmax.f32 %v10474_v7, 0.0  ;;  %v15509_v47 = vld [vmem:[#allocation24_spill] sm:$0xff] }
 0x29b   : > { %v10878_v15 = vadd.f32 %v3321_v21, %v15503_v6  ;;  %v1814_v8 = vsub.f32 0.0, %v1686_v4  ;;  %v3304_v21 = vmul.f32 0.01, %v2487_v57  ;;  %3820 = vmatprep.subr.bf16.mxu0 %v3548_v60  ;;  %v3306_v23 = vmul.f32 0.01, %v2505_v36  ;;  %v15513_v36 = vld [vmem:[#allocation27_spill] sm:$0xff] }
 0x29c   : > { %v10888_v29 = vadd.f32 %v10701_v22, %v15507_v31  ;;  %v10893_v54 = vadd.f32 %v10751_v3, %v15508_v5  ;;  %v7568_v4 = vpop.eup %7567  ;;  %v1816_v16 = vsub.f32 0.0, %v1688_v62  ;;  %3893 = vmatprep.subr.bf16.mxu1 %v3550_v40  ;;  %v15510_v22 = vld [vmem:[#allocation25_spill] sm:$0xff]  ;;  %v2627_v31 = vadd.f32 1.0, %v2626_v13  ;;  %v15512_v5 = vld [vmem:[#allocation26_spill] sm:$0xff]  ;;  %7146 = vmatmul.mubr.msk.bf16.gmra.mrb[76].mxu0 %vm3659_vm12, %v7250_v35  ;;  %v10913_v13 = vpop.f32.mrb[57].mxu0 }
 0x29d   : > { %15504 = vst [vmem:[#allocation61_spill] sm:$0xff] %v10878_v15  ;;  %v2030_v6 = vmul.f32 1.442695, %v1814_v8  ;;  %v15511_v48 = vpack.c.bf16 %v15509_v47, %v15510_v22  ;;  %v7570_v7 = vpop.eup %7569  ;;  %v2629_v3 = vand.u32 2147483647, %v10808_v20  ;;  %v15514_v24 = vpack.c.bf16 %v15512_v5, %v15513_v36  ;;  %7150 = vmatmul.mubr.msk.bf16.gmra.mrb[76].mxu1 %vm3659_vm12, %v7250_v35  ;;  %3850 = vmatprep.mubr.bf16.mxu0 %v15479_v11 }
 0x29e   : > { %v10907_v14 = vpop.eup %7571  ;;  %v2645_v62 = vadd.f32 1.0, %v2644_v27  ;;  %v1431_v8 = vmul.f32 100.0, %v10868_v50  ;;  %v1433_v40 = vmul.f32 100.0, %v10872_v56  ;;  %v15515_v22 = vmax.f32 %v10558_v61, 0.0  ;;  %3923 = vmatprep.mubr.bf16.mxu1 %v15479_v11 }
 0x29f   : > { %3821 = vmatpush1.bf16.msra.mxu0 %v15511_v48  ;;  %3894 = vmatpush1.bf16.msra.mxu1 %v15514_v24  ;;  %7579 = vpow2.f32 %v2030_v6  ;;  %v10915_v47 = vpop.eup %7573  ;;  %v2647_v24 = vand.u32 2147483647, %v10813_v53  ;;  %v2758_v27 = vadd.f32 1.0, %v10907_v14  ;;  %v15517_v35 = vmax.f32 %v10562_v28, 0.0  ;;  %v15521_v6 = vld [vmem:[#allocation39_spill] sm:$0xff] }
 0x2a0   : > { %v10919_v48 = vadd.f32 %v3304_v21, %v15515_v22  ;;  %v2625_v36 = vmul.f32 0.6931472, %v7568_v4  ;;  %v2776_v60 = vadd.f32 1.0, %v10915_v47  ;;  %v2034_v61 = vmul.f32 1.442695, %v1816_v16  ;;  %v10931_v21 = vpop.f32.mrb[57].mxu1 }
 0x2a1   : > { %v10928_v5 = vadd.f32 %v3306_v23, %v15517_v35  ;;  %vm10933_vm1 = vcmp.lt.f32.partialorder %v2629_v3, 0.0004427343  ;;  %v2643_v57 = vmul.f32 0.6931472, %v7570_v7  ;;  %7581 = vlog2.f32 %v2758_v27  ;;  %v10941_v52 = vpop.eup %7575  ;;  %v10969_v35 = vpop.f32.mrb[58].mxu0 }
 0x2a2   : > { %15516 = vst [vmem:[#allocation60_spill] sm:$0xff] %v10919_v48  ;;  %v10939_v34 = vadd.f32 %v10217_v49, %v15521_v6  ;;  %v2628_v28 = vmul.f32 %v10808_v20, %v2627_v31  ;;  %v2646_v4 = vmul.f32 %v10813_v53, %v2645_v62  ;;  %v1687_v23 = vand.u32 2147483647, %v1431_v8 }
 0x2a3   : > { %15518 = vst [vmem:[#allocation63_spill] sm:$0xff] %v10928_v5  ;;  %v1689_v16 = vand.u32 2147483647, %v1433_v40  ;;  %vm10945_vm2 = vcmp.lt.f32.partialorder %v2647_v24, 0.0004427343  ;;  %7583 = vlog2.f32 %v2776_v60  ;;  %v2767_v7 = vadd.f32 1.0, %v10941_v52 }
 0x2a4   : > { %v10951_v27 = vpop.eup %7577  ;;  %v2631_v49 = vsel %vm10933_vm1, %v2628_v28, %v2625_v36  ;;  %7585 = vpow2.f32 %v2034_v61  ;;  %v10958_v53 = vadd.f32 %v10219_v2, %v15521_v6  ;;  %v2649_v31 = vsel %vm10945_vm2, %v2646_v4, %v2643_v57 }
 0x2a5   : > { %v2761_v60 = vmul.f32 -0.5, %v10907_v14  ;;  %v2785_v62 = vadd.f32 1.0, %v10951_v27  ;;  %v1446_v8 = vmul.f32 100.0, %v10939_v34  ;;  %v2764_v40 = vand.u32 2147483647, %v10907_v14 }
 0x2a6   : > { %7587 = vlog2.f32 %v2767_v7  ;;  %v1815_v24 = vsub.f32 0.0, %v1687_v23  ;;  %v1817_v36 = vsub.f32 0.0, %v1689_v16  ;;  %v3320_v22 = vmul.f32 0.01, %v2631_v49  ;;  %v10979_v49 = vpop.f32.mrb[58].mxu1 }
 0x2a7   : > { %v2779_v61 = vmul.f32 -0.5, %v10915_v47  ;;  %v3322_v4 = vmul.f32 0.01, %v2649_v31  ;;  %v10975_v15 = vadd.f32 %v10229_v1, %v15521_v6  ;;  %v2762_v23 = vadd.f32 1.0, %v2761_v60  ;;  %15524 = vst [vmem:[#allocation62_spill] sm:$0xff] %v10979_v49 }
 0x2a8   : > { %v2032_v20 = vmul.f32 1.442695, %v1815_v24  ;;  %v2036_v3 = vmul.f32 1.442695, %v1817_v36  ;;  %v2782_v16 = vand.u32 2147483647, %v10915_v47  ;;  %7589 = vlog2.f32 %v2785_v62 }
 0x2a9   : > { %v10971_v57 = vpop.eup %7579  ;;  %vm10981_vm3 = vcmp.lt.f32.partialorder %v2764_v40, 0.0004427343  ;;  %v1702_v31 = vand.u32 2147483647, %v1446_v8  ;;  %v1448_v24 = vmul.f32 100.0, %v10958_v53  ;;  %v2780_v2 = vadd.f32 1.0, %v2779_v61 }
 0x2aa   : > { %v2902_v7 = vadd.f32 1.0, %v10971_v57  ;;  %7591 = vpow2.f32 %v2032_v20  ;;  %v2770_v1 = vmul.f32 -0.5, %v10941_v52  ;;  %v1447_v60 = vmul.f32 100.0, %v10975_v15 }
 0x2ab   : > { %v7582_v36 = vpop.eup %7581  ;;  %v15527_v62 = vmax.f32 %v10652_v55, 0.0  ;;  %v1830_v40 = vsub.f32 0.0, %v1702_v31  ;;  %v1704_v10 = vand.u32 2147483647, %v1448_v24  ;;  %v15529_v20 = vmax.f32 %v10661_v42, 0.0 }
 0x2ac   : > { %7593 = vlog2.f32 %v2902_v7  ;;  %v2763_v48 = vmul.f32 %v10907_v14, %v2762_v23  ;;  %vm10997_vm4 = vcmp.lt.f32.partialorder %v2782_v16, 0.0004427343  ;;  %v2773_v7 = vand.u32 2147483647, %v10941_v52  ;;  %v11007_v14 = vpop.f32.mrb[59].mxu0 }
 0x2ad   : > { %v10990_v45 = vadd.f32 %v3320_v22, %v15527_v62  ;;  %7595 = vpow2.f32 %v2036_v3  ;;  %v7584_v5 = vpop.eup %7583  ;;  %v10994_v8 = vadd.f32 %v3322_v4, %v15529_v20  ;;  %v2760_v55 = vmul.f32 0.6931472, %v7582_v36 }
 0x2ae   : > { %v11002_v49 = vpop.eup %7585  ;;  %v2905_v3 = vmul.f32 -0.5, %v10971_v57  ;;  %v2062_v22 = vmul.f32 1.442695, %v1830_v40  ;;  %v1832_v31 = vsub.f32 0.0, %v1704_v10  ;;  %v2781_v24 = vmul.f32 %v10915_v47, %v2780_v2  ;;  %v11016_v47 = vpop.f32.mrb[59].mxu1 }
 0x2af   : > { %15528 = vst [vmem:[#allocation41_spill] sm:$0xff] %v10990_v45  ;;  %15530 = vst [vmem:[#allocation31_spill] sm:$0xff] %v10994_v8  ;;  %v2771_v42 = vadd.f32 1.0, %v2770_v1  ;;  %v2920_v4 = vadd.f32 1.0, %v11002_v49  ;;  %v1703_v62 = vand.u32 2147483647, %v1447_v60  ;;  %v11014_v10 = vadd.f32 %v10267_v0, %v15521_v6 }
 0x2b0   : > { %v7588_v23 = vpop.eup %7587  ;;  %v2788_v16 = vmul.f32 -0.5, %v10951_v27  ;;  %v2791_v20 = vand.u32 2147483647, %v10951_v27  ;;  %v2908_v8 = vand.u32 2147483647, %v10971_v57  ;;  %7597 = vpow2.f32 %v2062_v22  ;;  %15533 = vst [vmem:[#allocation42_spill] sm:$0xff] %v11016_v47 }
 0x2b1   : > { %v2778_v36 = vmul.f32 0.6931472, %v7584_v5  ;;  %7599 = vlog2.f32 %v2920_v4  ;;  %v2066_v40 = vmul.f32 1.442695, %v1832_v31  ;;  %v2766_v2 = vsel %vm10981_vm3, %v2763_v48, %v2760_v55 }
 0x2b2   : > { %vm11020_vm5 = vcmp.lt.f32.partialorder %v2773_v7, 0.0004427343  ;;  %v2906_v60 = vadd.f32 1.0, %v2905_v3  ;;  %v2923_v45 = vmul.f32 -0.5, %v11002_v49  ;;  %v7590_v22 = vpop.eup %7589  ;;  %v2769_v5 = vmul.f32 0.6931472, %v7588_v23 }
 0x2b3   : > { %v2772_v31 = vmul.f32 %v10941_v52, %v2771_v42  ;;  %7601 = vpow2.f32 %v2066_v40  ;;  %v1831_v4 = vsub.f32 0.0, %v1703_v62  ;;  %v2789_v6 = vadd.f32 1.0, %v2788_v16 }
 0x2b4   : > { %v11026_v0 = vpop.eup %7591  ;;  %vm11028_vm6 = vcmp.lt.f32.partialorder %v2791_v20, 0.0004427343  ;;  %vm11032_vm7 = vcmp.lt.f32.partialorder %v2908_v8, 0.0004427343  ;;  %v3335_v55 = vmul.f32 0.01, %v2766_v2  ;;  %v2784_v52 = vsel %vm10997_vm4, %v2781_v24, %v2778_v36 }
 0x2b5   : > { %v2911_v3 = vadd.f32 1.0, %v11026_v0  ;;  %v1449_v42 = vmul.f32 100.0, %v11014_v10  ;;  %v2907_v16 = vmul.f32 %v10971_v57, %v2906_v60  ;;  %v2924_v8 = vadd.f32 1.0, %v2923_v45 }
 0x2b6   : > { %v7594_v7 = vpop.eup %7593  ;;  %v2064_v20 = vmul.f32 1.442695, %v1831_v4  ;;  %v2775_v40 = vsel %vm11020_vm5, %v2772_v31, %v2769_v5  ;;  %v2787_v28 = vmul.f32 0.6931472, %v7590_v22  ;;  %v11049_v61 = vadd.f32 %v10300_v9, %v15348_v32 }
 0x2b7   : > { %v11041_v62 = vpop.eup %7595  ;;  %v2904_v23 = vmul.f32 0.6931472, %v7594_v7  ;;  %v3337_v24 = vmul.f32 0.01, %v2784_v52  ;;  %v2790_v36 = vmul.f32 %v10951_v27, %v2789_v6  ;;  %7603 = vlog2.f32 %v2911_v3 }
 0x2b8   : > { %v2929_v2 = vadd.f32 1.0, %v11041_v62  ;;  %v2926_v45 = vand.u32 2147483647, %v11002_v49  ;;  %v1705_v1 = vand.u32 2147483647, %v1449_v42  ;;  %v15540_v22 = vmax.f32 %v10741_v37, 0.0 }
 0x2b9   : > { %v2910_v7 = vsel %vm11032_vm7, %v2907_v16, %v2904_v23  ;;  %v3336_v9 = vmul.f32 0.01, %v2775_v40  ;;  %v2793_v27 = vsel %vm11028_vm6, %v2790_v36, %v2787_v28  ;;  %v15542_v4 = vmax.f32 %v10826_v41, 0.0  ;;  %v11070_v42 = vpop.f32.mrb[60].mxu0  ;;  %v11072_v37 = vpop.f32.mrb[60].mxu1 }
 0x2ba   : > { %v3351_v57 = vmul.f32 0.01, %v2910_v7  ;;  %7605 = vlog2.f32 %v2929_v2  ;;  %v11055_v60 = vpop.eup %7597  ;;  %v11059_v5 = vadd.f32 %v3335_v55, %v15540_v22  ;;  %v2925_v52 = vmul.f32 %v11002_v49, %v2924_v8  ;;  %v11113_v49 = vpop.f32.mrb[61].mxu1  ;;  %v15554_v7 = vld [vmem:[#allocation51_spill] sm:$0xff] }
 0x2bb   : > { %7607 = vpow2.f32 %v2064_v20  ;;  %v7600_v6 = vpop.eup %7599  ;;  %v1462_v3 = vmul.f32 100.0, %v11049_v61  ;;  %v3046_v23 = vadd.f32 1.0, %v11055_v60  ;;  %v1833_v16 = vsub.f32 0.0, %v1705_v1 }
 0x2bc   : > { %15541 = vst [vmem:[#allocation37_spill] sm:$0xff] %v11059_v5  ;;  %v11066_v48 = vadd.f32 %v3351_v57, %v15542_v4  ;;  %v2922_v55 = vmul.f32 0.6931472, %v7600_v6  ;;  %v11077_v47 = vadd.f32 %v10329_v46, %v15348_v32  ;;  %v15544_v41 = vmax.f32 %v10745_v19, 0.0 }
 0x2bd   : > { %v11079_v28 = vpop.eup %7601  ;;  %vm2927_vm8 = vcmp.lt.f32.partialorder %v2926_v45, 0.0004427343  ;;  %v3338_v40 = vmul.f32 0.01, %v2793_v27  ;;  %v2914_v36 = vmul.f32 -0.5, %v11026_v0  ;;  %v15546_v46 = vmax.f32 %v10749_v30, 0.0 }
 0x2be   : > { %15543 = vst [vmem:[#allocation33_spill] sm:$0xff] %v11066_v48  ;;  %v11083_v20 = vadd.f32 %v3337_v24, %v15544_v41  ;;  %v2928_v2 = vsel %vm2927_vm8, %v2925_v52, %v2922_v55  ;;  %v2068_v19 = vmul.f32 1.442695, %v1833_v16  ;;  %v1718_v24 = vand.u32 2147483647, %v1462_v3  ;;  %v11097_v27 = vpop.f32.mrb[61].mxu0 }
 0x2bf   : > { %v11092_v57 = vadd.f32 %v3336_v9, %v15546_v46  ;;  %v3353_v1 = vmul.f32 0.01, %v2928_v2  ;;  %v2932_v22 = vmul.f32 -0.5, %v11041_v62  ;;  %7609 = vlog2.f32 %v3046_v23  ;;  %v15552_v2 = vld [vmem:[#allocation45_spill] sm:$0xff]  ;;  %v15555_v48 = vld [vmem:[#allocation12_spill] sm:$0xff] }
 0x2c0   : > { %15545 = vst [vmem:[#allocation40_spill] sm:$0xff] %v11083_v20  ;;  %v3064_v45 = vadd.f32 1.0, %v11079_v28  ;;  %v1464_v6 = vmul.f32 100.0, %v11077_v47  ;;  %v15548_v4 = vmax.f32 %v10837_v58, 0.0  ;;  %v2917_v30 = vand.u32 2147483647, %v11026_v0 }
 0x2c1   : > { %15547 = vst [vmem:[#allocation36_spill] sm:$0xff] %v11092_v57  ;;  %7611 = vpow2.f32 %v2068_v19  ;;  %v1846_v9 = vsub.f32 0.0, %v1718_v24  ;;  %v7604_v55 = vpop.eup %7603  ;;  %v15550_v3 = vmax.f32 %v10786_v12, 0.0  ;;  %v2935_v23 = vand.u32 2147483647, %v11041_v62 }
 0x2c2   : > { %v11101_v52 = vadd.f32 %v3353_v1, %v15548_v4  ;;  %v1720_v41 = vand.u32 2147483647, %v1464_v6  ;;  %v11111_v46 = vadd.f32 %v15552_v2, %v15348_v32  ;;  %v2915_v19 = vadd.f32 1.0, %v2914_v36  ;;  %v15553_v4 = vld [vmem:[#allocation34_spill] sm:$0xff] }
 0x2c3   : > { %v11106_v16 = vadd.f32 %v3338_v40, %v15550_v3  ;;  %v2094_v24 = vmul.f32 1.442695, %v1846_v9  ;;  %v3564_v12 = vpack.c.bf16 %v15554_v7, %v15553_v4  ;;  %v2933_v3 = vadd.f32 1.0, %v2932_v22  ;;  %v15561_v9 = vld [vmem:[#allocation46_spill] sm:$0xff] }
 0x2c4   : > { %15549 = vst [vmem:[#allocation43_spill] sm:$0xff] %v11101_v52  ;;  %v7606_v58 = vpop.eup %7605  ;;  %7613 = vlog2.f32 %v3064_v45  ;;  %v1848_v6 = vsub.f32 0.0, %v1720_v41  ;;  %v1463_v8 = vmul.f32 100.0, %v11111_v46  ;;  %v2913_v2 = vmul.f32 0.6931472, %v7604_v55  ;;  %v15560_v45 = vld [vmem:[#allocation11_spill] sm:$0xff] }
 0x2c5   : > { %15551 = vst [vmem:[#allocation44_spill] sm:$0xff] %v11106_v16  ;;  %v11119_v40 = vpop.eup %7607  ;;  %v3049_v31 = vmul.f32 -0.5, %v11055_v60  ;;  %v11126_v1 = vadd.f32 %v15555_v48, %v15348_v32  ;;  %3822 = vmatprep.subr.bf16.mxu0 %v3564_v12  ;;  %vm11128_vm9 = vcmp.lt.f32.partialorder %v2917_v30, 0.0004427343  ;;  %vm11132_vm10 = vcmp.lt.f32.partialorder %v2935_v23, 0.0004427343 }
 0x2c6   : > { %v3055_v5 = vadd.f32 1.0, %v11119_v40  ;;  %7615 = vpow2.f32 %v2094_v24  ;;  %v2098_v22 = vmul.f32 1.442695, %v1848_v6  ;;  %v15562_v55 = vpack.c.bf16 %v15560_v45, %v15561_v9  ;;  %v15564_v52 = vld [vmem:[#allocation7_spill] sm:$0xff] }
 0x2c7   : > { %v2916_v41 = vmul.f32 %v11026_v0, %v2915_v19  ;;  %v2931_v4 = vmul.f32 0.6931472, %v7606_v58  ;;  %v3052_v48 = vand.u32 2147483647, %v11055_v60  ;;  %v3067_v30 = vmul.f32 -0.5, %v11079_v28  ;;  %v15563_v19 = vld [vmem:[#allocation50_spill] sm:$0xff] }
 0x2c8   : > { %3823 = vmatpush1.bf16.msra.mxu0 %v15562_v55  ;;  %v2934_v12 = vmul.f32 %v11041_v62, %v2933_v3  ;;  %v3070_v23 = vand.u32 2147483647, %v11079_v28  ;;  %7617 = vpow2.f32 %v2098_v22  ;;  %v1719_v20 = vand.u32 2147483647, %v1463_v8 }
 0x2c9   : > { %v2919_v24 = vsel %vm11128_vm9, %v2916_v41, %v2913_v2  ;;  %v3050_v6 = vadd.f32 1.0, %v3049_v31  ;;  %7619 = vlog2.f32 %v3055_v5  ;;  %v1465_v45 = vmul.f32 100.0, %v11126_v1  ;;  %v7610_v9 = vpop.eup %7609 }
 0x2ca   : > { %v1847_v58 = vsub.f32 0.0, %v1719_v20  ;;  %v3566_v55 = vpack.c.bf16 %v10381_v26, %v15563_v19  ;;  %v11152_v62 = vadd.f32 %v10421_v38, %v15564_v52  ;;  %v2937_v8 = vsel %vm11132_vm10, %v2934_v12, %v2931_v4  ;;  %v15570_v12 = vld [vmem:[#allocation47_spill] sm:$0xff] }
 0x2cb   : > { %v11154_v3 = vpop.eup %7611  ;;  %vm11158_vm11 = vcmp.lt.f32.partialorder %v3052_v48, 0.0004427343  ;;  %v3068_v31 = vadd.f32 1.0, %v3067_v30  ;;  %v1721_v2 = vand.u32 2147483647, %v1465_v45  ;;  %v3058_v26 = vmul.f32 -0.5, %v11119_v40 }
 0x2cc   : > { %v3352_v36 = vmul.f32 0.01, %v2919_v24  ;;  %vm11162_vm13 = vcmp.lt.f32.partialorder %v3070_v23, 0.0004427343  ;;  %v2096_v38 = vmul.f32 1.442695, %v1847_v58  ;;  %3895 = vmatprep.subr.bf16.mxu1 %v3566_v55  ;;  %v11169_v22 = vadd.f32 %v10426_v51, %v15564_v52 }
 0x2cd   : > { %v3048_v7 = vmul.f32 0.6931472, %v7610_v9  ;;  %v3051_v41 = vmul.f32 %v11055_v60, %v3050_v6  ;;  %v1849_v4 = vsub.f32 0.0, %v1721_v2  ;;  %v1354_v48 = vmul.f32 100.0, %v11152_v62  ;;  %v15569_v30 = vld [vmem:[#allocation35_spill] sm:$0xff]  ;;  %v11176_v24 = vpop.f32.mrb[62].mxu0 }
 0x2ce   : > { %v15571_v23 = vpack.c.bf16 %v15569_v30, %v15570_v12  ;;  %v7614_v45 = vpop.eup %7613  ;;  %v3354_v19 = vmul.f32 0.01, %v2937_v8  ;;  %v3061_v58 = vand.u32 2147483647, %v11119_v40  ;;  %v3073_v55 = vadd.f32 1.0, %v11154_v3  ;;  %v11182_v2 = vpop.f32.mrb[62].mxu1 }
 0x2cf   : > { %v3069_v9 = vmul.f32 %v11079_v28, %v3068_v31  ;;  %7621 = vpow2.f32 %v2096_v38  ;;  %v2100_v60 = vmul.f32 1.442695, %v1849_v4  ;;  %v1610_v6 = vand.u32 2147483647, %v1354_v48  ;;  %v11225_v20 = vpop.f32.mrb[63].mxu1 }
 0x2d0   : > { %3896 = vmatpush1.bf16.msra.mxu1 %v15571_v23  ;;  %v11184_v0 = vpop.eup %7615  ;;  %v15572_v30 = vmax.f32 %v10868_v50, 0.0  ;;  %v3059_v8 = vadd.f32 1.0, %v3058_v26  ;;  %v1356_v16 = vmul.f32 100.0, %v11169_v22  ;;  %v3054_v51 = vsel %vm11158_vm11, %v3051_v41, %v3048_v7  ;;  %15579 = vst [vmem:[#allocation26_spill] sm:$0xff] %v11225_v20  ;;  %v15602_v23 = vld [vmem:[#allocation15_spill] sm:$0xff] }
 0x2d1   : > { %v3066_v28 = vmul.f32 0.6931472, %v7614_v45  ;;  %v3190_v31 = vadd.f32 1.0, %v11184_v0  ;;  %7623 = vpow2.f32 %v2100_v60  ;;  %v1738_v4 = vsub.f32 0.0, %v1610_v6 }
 0x2d2   : > { %v11188_v12 = vadd.f32 %v3352_v36, %v15572_v30  ;;  %v11195_v38 = vpop.eup %7617  ;;  %7625 = vlog2.f32 %v3073_v55  ;;  %v1612_v48 = vand.u32 2147483647, %v1356_v16  ;;  %v11199_v50 = vadd.f32 %v10437_v59, %v15564_v52 }
 0x2d3   : > { %v7620_v36 = vpop.eup %7619  ;;  %v15574_v26 = vmax.f32 %v10872_v56, 0.0  ;;  %vm11205_vm14 = vcmp.lt.f32.partialorder %v3061_v58, 0.0004427343  ;;  %7627 = vlog2.f32 %v3190_v31  ;;  %v3208_v7 = vadd.f32 1.0, %v11195_v38  ;;  %v11215_v58 = vpop.f32.mrb[63].mxu0 }
 0x2d4   : > { %15573 = vst [vmem:[#allocation32_spill] sm:$0xff] %v11188_v12  ;;  %v3060_v41 = vmul.f32 %v11119_v40, %v3059_v8  ;;  %v3076_v16 = vmul.f32 -0.5, %v11154_v3  ;;  %v1878_v59 = vmul.f32 1.442695, %v1738_v4  ;;  %v3367_v55 = vmul.f32 0.01, %v3054_v51 }
 0x2d5   : > { %v11203_v30 = vadd.f32 %v3354_v19, %v15574_v26  ;;  %v3072_v56 = vsel %vm11162_vm13, %v3069_v9, %v3066_v28  ;;  %7629 = vlog2.f32 %v3208_v7  ;;  %v1740_v19 = vsub.f32 0.0, %v1612_v48  ;;  %15578 = vst [vmem:[#allocation25_spill] sm:$0xff] %v11215_v58  ;;  %v15580_v48 = vld [vmem:[#allocation52_spill] sm:$0xff] }
 0x2d6   : > { %v3057_v60 = vmul.f32 0.6931472, %v7620_v36  ;;  %v3193_v6 = vmul.f32 -0.5, %v11184_v0  ;;  %7631 = vpow2.f32 %v1878_v59  ;;  %v1355_v31 = vmul.f32 100.0, %v11199_v50 }
 0x2d7   : > { %15575 = vst [vmem:[#allocation24_spill] sm:$0xff] %v11203_v30  ;;  %v3079_v40 = vand.u32 2147483647, %v11154_v3  ;;  %v3211_v8 = vmul.f32 -0.5, %v11195_v38  ;;  %v1882_v26 = vmul.f32 1.442695, %v1740_v19  ;;  %v11223_v51 = vadd.f32 %v10476_v43, %v15564_v52 }
 0x2d8   : > { %v3369_v9 = vmul.f32 0.01, %v3072_v56  ;;  %v3077_v28 = vadd.f32 1.0, %v3076_v16  ;;  %v1611_v4 = vand.u32 2147483647, %v1355_v31  ;;  %v11229_v36 = vadd.f32 %v15580_v48, %v15398_v18 }
 0x2d9   : > { %v11231_v7 = vpop.eup %7621  ;;  %v15581_v59 = vmax.f32 %v10939_v34, 0.0  ;;  %v3196_v19 = vand.u32 2147483647, %v11184_v0  ;;  %7633 = vpow2.f32 %v1882_v26  ;;  %v1357_v43 = vmul.f32 100.0, %v11223_v51 }
 0x2da   : > { %v3063_v52 = vsel %vm11205_vm14, %v3060_v41, %v3057_v60  ;;  %v3194_v16 = vadd.f32 1.0, %v3193_v6  ;;  %v3199_v56 = vadd.f32 1.0, %v11231_v7  ;;  %v1739_v31 = vsub.f32 0.0, %v1611_v4 }
 0x2db   : > { %v11235_v45 = vadd.f32 %v3367_v55, %v15581_v59  ;;  %v11242_v48 = vpop.eup %7623  ;;  %vm11244_vm15 = vcmp.lt.f32.partialorder %v3079_v40, 0.0004427343  ;;  %v3212_v34 = vadd.f32 1.0, %v3211_v8  ;;  %v1613_v59 = vand.u32 2147483647, %v1357_v43 }
 0x2dc   : > { %v1370_v26 = vmul.f32 100.0, %v11229_v36  ;;  %v7626_v30 = vpop.eup %7625  ;;  %v15585_v5 = vmax.f32 %v10958_v53, 0.0  ;;  %v3078_v60 = vmul.f32 %v11154_v3, %v3077_v28  ;;  %v3214_v6 = vand.u32 2147483647, %v11195_v38 }
 0x2dd   : > { %15582 = vst [vmem:[#allocation27_spill] sm:$0xff] %v11235_v45  ;;  %v7628_v4 = vpop.eup %7627  ;;  %v3368_v12 = vmul.f32 0.01, %v3063_v52  ;;  %7635 = vlog2.f32 %v3199_v56  ;;  %v3217_v8 = vadd.f32 1.0, %v11242_v48  ;;  %v1880_v55 = vmul.f32 1.442695, %v1739_v31 }
 0x2de   : > { %v11252_v41 = vadd.f32 %v3369_v9, %v15585_v5  ;;  %v3192_v43 = vmul.f32 0.6931472, %v7628_v4  ;;  %v3195_v57 = vmul.f32 %v11184_v0, %v3194_v16  ;;  %vm3197_vm0 = vcmp.lt.f32.partialorder %v3196_v19, 0.0004427343 }
 0x2df   : > { %v1741_v20 = vsub.f32 0.0, %v1613_v59  ;;  %v7630_v53 = vpop.eup %7629  ;;  %v3075_v9 = vmul.f32 0.6931472, %v7626_v30  ;;  %v3213_v5 = vmul.f32 %v11195_v38, %v3212_v34  ;;  %7637 = vlog2.f32 %v3217_v8  ;;  %v15588_v38 = vld [vmem:[#allocation20_spill] sm:$0xff] }
 0x2e0   : > { %15586 = vst [vmem:[#allocation45_spill] sm:$0xff] %v11252_v41  ;;  %v1626_v3 = vand.u32 2147483647, %v1370_v26  ;;  %v11260_v28 = vpop.eup %7631  ;;  %v3198_v40 = vsel %vm3197_vm0, %v3195_v57, %v3192_v43  ;;  %v3210_v58 = vmul.f32 0.6931472, %v7630_v53  ;;  %7639 = vpow2.f32 %v1880_v55 }
 0x2e1   : > { %v1884_v52 = vmul.f32 1.442695, %v1741_v20  ;;  %v15587_v56 = vmax.f32 %v10975_v15, 0.0  ;;  %v3383_v4 = vmul.f32 0.01, %v3198_v40  ;;  %v2218_v0 = vadd.f32 1.0, %v11260_v28 }
 0x2e2   : > { %vm3215_vm1 = vcmp.lt.f32.partialorder %v3214_v6, 0.0004427343  ;;  %v1754_v30 = vsub.f32 0.0, %v1626_v3  ;;  %v11269_v16 = vadd.f32 %v15588_v38, %v15398_v18  ;;  %v15589_v57 = vmax.f32 %v11049_v61, 0.0 }
 0x2e3   : > { %v11264_v31 = vadd.f32 %v3368_v12, %v15587_v56  ;;  %v3216_v19 = vsel %vm3215_vm1, %v3213_v5, %v3210_v58  ;;  %7641 = vpow2.f32 %v1884_v52  ;;  %v11271_v34 = vpop.eup %7633  ;;  %v3081_v58 = vsel %vm11244_vm15, %v3078_v60, %v3075_v9 }
 0x2e4   : > { %v11275_v20 = vadd.f32 %v3383_v4, %v15589_v57  ;;  %v3385_v15 = vmul.f32 0.01, %v3216_v19  ;;  %v3202_v59 = vmul.f32 -0.5, %v11231_v7  ;;  %v3220_v26 = vmul.f32 -0.5, %v11242_v48  ;;  %v15592_v57 = vld [vmem:[#allocation48_spill] sm:$0xff] }
 0x2e5   : > { %v2236_v6 = vadd.f32 1.0, %v11271_v34  ;;  %v15590_v61 = vmax.f32 %v11077_v47, 0.0  ;;  %7643 = vlog2.f32 %v2218_v0  ;;  %v1910_v43 = vmul.f32 1.442695, %v1754_v30 }
 0x2e6   : > { %v3205_v53 = vand.u32 2147483647, %v11231_v7  ;;  %v1372_v60 = vmul.f32 100.0, %v11269_v16  ;;  %v3370_v5 = vmul.f32 0.01, %v3081_v58  ;;  %v2221_v52 = vmul.f32 -0.5, %v11260_v28 }
 0x2e7   : > { %v11288_v8 = vadd.f32 %v3385_v15, %v15590_v61  ;;  %7645 = vlog2.f32 %v2236_v6  ;;  %v7636_v9 = vpop.eup %7635  ;;  %v3203_v47 = vadd.f32 1.0, %v3202_v59  ;;  %v3223_v56 = vand.u32 2147483647, %v11242_v48  ;;  %v15593_v58 = vld [vmem:[#allocation53_spill] sm:$0xff] }
 0x2e8   : > { %7647 = vpow2.f32 %v1910_v43  ;;  %v1628_v4 = vand.u32 2147483647, %v1372_v60  ;;  %v11299_v0 = vadd.f32 %v10569_v17, %v15398_v18  ;;  %v3221_v30 = vadd.f32 1.0, %v3220_v26  ;;  %v15594_v6 = vld [vmem:[#allocation21_spill] sm:$0xff] }
 0x2e9   : > { %15591 = vst [vmem:[#allocation34_spill] sm:$0xff] %v11288_v8  ;;  %v7638_v19 = vpop.eup %7637  ;;  %v2224_v38 = vand.u32 2147483647, %v11260_v28  ;;  %v3580_v15 = vpack.c.bf16 %v10537_v44, %v15592_v57  ;;  %v3582_v61 = vpack.c.bf16 %v15594_v6, %v15593_v58  ;;  %v3201_v59 = vmul.f32 0.6931472, %v7636_v9 }
 0x2ea   : > { %v11306_v3 = vpop.eup %7639  ;;  %v2239_v43 = vmul.f32 -0.5, %v11271_v34  ;;  %v1756_v60 = vsub.f32 0.0, %v1628_v4  ;;  %v1371_v40 = vmul.f32 100.0, %v11299_v0  ;;  %v15595_v17 = vmax.f32 %v11014_v10, 0.0  ;;  %v15598_v10 = vld [vmem:[#allocation14_spill] sm:$0xff] }
 0x2eb   : > { %vm11314_vm2 = vcmp.lt.f32.partialorder %v3205_v53, 0.0004427343  ;;  %v2222_v44 = vadd.f32 1.0, %v2221_v52  ;;  %v2227_v57 = vadd.f32 1.0, %v11306_v3  ;;  %3824 = vmatprep.subr.bf16.mxu0 %v3580_v15  ;;  %3897 = vmatprep.subr.bf16.mxu1 %v3582_v61  ;;  %v3204_v9 = vmul.f32 %v11231_v7, %v3203_v47  ;;  %v15601_v53 = vld [vmem:[#allocation49_spill] sm:$0xff]  ;;  %v8276_v7 = vld [vmem:[%s14932_s3 + $0x8] sm:$0xff]  }
 0x2ec   : > { %v11312_v55 = vadd.f32 %v3370_v5, %v15595_v17  ;;  %v2242_v4 = vand.u32 2147483647, %v11271_v34  ;;  %v1914_v6 = vmul.f32 1.442695, %v1756_v60  ;;  %v1627_v12 = vand.u32 2147483647, %v1371_v40 }
 0x2ed   : > { %v11319_v58 = vpop.eup %7641  ;;  %v15599_v5 = vld [vmem:[#allocation54_spill] sm:$0xff]  ;;  %v15603_v41 = vpack.c.bf16 %v15601_v53, %v15602_v23  ;;  %v3219_v52 = vmul.f32 0.6931472, %v7638_v19  ;;  %v3222_v15 = vmul.f32 %v11242_v48, %v3221_v30  ;;  %vm11330_vm3 = vcmp.lt.f32.partialorder %v3223_v56, 0.0004427343  ;;  %v15608_v56 = vld [vmem:[#allocation8_spill] sm:$0xff] }
 0x2ee   : > { %v15600_v17 = vpack.c.bf16 %v15598_v10, %v15599_v5  ;;  %vm11334_vm4 = vcmp.lt.f32.partialorder %v2224_v38, 0.0004427343  ;;  %v3207_v40 = vsel %vm11314_vm2, %v3204_v9, %v3201_v59  ;;  %v2240_v47 = vadd.f32 1.0, %v2239_v43  ;;  %v8275_v30 = vld [vmem:[%s14932_s3] sm:$0xff]  }
 0x2ef   : > { %3898 = vmatpush1.bf16.msra.mxu1 %v15603_v41  ;;  %7649 = vlog2.f32 %v2227_v57  ;;  %v2245_v60 = vadd.f32 1.0, %v11319_v58  ;;  %v7644_v23 = vpop.eup %7643  ;;  %v2223_v41 = vmul.f32 %v11260_v28, %v2222_v44  ;;  %v1755_v48 = vsub.f32 0.0, %v1627_v12  ;;  %v15611_v12 = vld [vmem:[#allocation9_spill] sm:$0xff] }
 0x2f0   : > { %3825 = vmatpush1.bf16.msra.mxu0 %v15600_v17  ;;  %7651 = vpow2.f32 %v1914_v6  ;;  %v11344_v19 = vadd.f32 %v15608_v56, %v15398_v18  ;;  %vm11351_vm5 = vcmp.lt.f32.partialorder %v2242_v4, 0.0004427343  ;;  %v11358_v18 = vadd.f32 %v10654_v63, %v15611_v12  ;;  %v15612_v63 = vld [vmem:[#allocation58_spill] sm:$0xff] }
 0x2f1   : > { %v7646_v38 = vpop.eup %7645  ;;  %7653 = vlog2.f32 %v2245_v60  ;;  %v3384_v26 = vmul.f32 0.01, %v3207_v40  ;;  %v3225_v44 = vsel %vm11330_vm3, %v3222_v15, %v3219_v52  ;;  %v2230_v57 = vmul.f32 -0.5, %v11306_v3 }
 0x2f2   : > { %7155 = vmatmul.mubr.msk.bf16.vlgmr.msra.gmra.mrb[80].mxu1 %vm3659_vm12, %v8275_v30  ;;  %v11362_v43 = vpop.eup %7647  ;;  %v1912_v9 = vmul.f32 1.442695, %v1755_v48  ;;  %v2220_v4 = vmul.f32 0.6931472, %v7644_v23  ;;  %v2241_v6 = vmul.f32 %v11271_v34, %v2240_v47  ;;  %v11371_v5 = vadd.f32 %v15612_v63, %v15611_v12 }
 0x2f3   : > { %7151 = vmatmul.mubr.msk.bf16.vlgmr.msra.gmra.mrb[80].mxu0 %vm3659_vm12, %v8275_v30  ;;  %3933 = vmatprep.mubr.bf16.mxu1 %v15479_v11  ;;  %v2362_v10 = vadd.f32 1.0, %v11362_v43  ;;  %v2233_v17 = vand.u32 2147483647, %v11306_v3  ;;  %v2248_v53 = vmul.f32 -0.5, %v11319_v58  ;;  %v1373_v61 = vmul.f32 100.0, %v11344_v19 }
 0x2f4   : > { %3860 = vmatprep.mubr.bf16.mxu0 %v15479_v11  ;;  %7655 = vpow2.f32 %v1912_v9  ;;  %v3386_v52 = vmul.f32 0.01, %v3225_v44  ;;  %v2238_v15 = vmul.f32 0.6931472, %v7646_v38  ;;  %v15613_v34 = vmax.f32 %v11111_v46, 0.0 }
 0x2f5   : > { %7657 = vlog2.f32 %v2362_v10  ;;  %v2231_v60 = vadd.f32 1.0, %v2230_v57  ;;  %v1629_v23 = vand.u32 2147483647, %v1373_v61  ;;  %v1386_v48 = vmul.f32 100.0, %v11358_v18  ;;  %v15616_v57 = vld [vmem:[#allocation17_spill] sm:$0xff] }
 0x2f6   : > { %v11379_v47 = vadd.f32 %v3384_v26, %v15613_v34  ;;  %v2226_v56 = vsel %vm11334_vm4, %v2223_v41, %v2220_v4  ;;  %v2251_v30 = vand.u32 2147483647, %v11319_v58  ;;  %v2365_v9 = vmul.f32 -0.5, %v11362_v43 }
 0x2f7   : > { %v1388_v38 = vmul.f32 100.0, %v11371_v5  ;;  %vm11387_vm6 = vcmp.lt.f32.partialorder %v2233_v17, 0.0004427343  ;;  %v2249_v46 = vadd.f32 1.0, %v2248_v53  ;;  %v1757_v26 = vsub.f32 0.0, %v1629_v23 }
 0x2f8   : > { %v1642_v10 = vand.u32 2147483647, %v1386_v48  ;;  %v11393_v63 = vadd.f32 %v15616_v57, %v15611_v12  ;;  %v15617_v4 = vmax.f32 %v11126_v1, 0.0  ;;  %v2244_v53 = vsel %vm11351_vm5, %v2241_v6, %v2238_v15 }
 0x2f9   : > { %v7650_v41 = vpop.eup %7649  ;;  %v2368_v61 = vand.u32 2147483647, %v11362_v43  ;;  %v1644_v34 = vand.u32 2147483647, %v1388_v38  ;;  %v2232_v48 = vmul.f32 %v11306_v3, %v2231_v60  ;;  %v1916_v57 = vmul.f32 1.442695, %v1757_v26 }
 0x2fa   : > { %7156 = vmatmul.mubr.msk.bf16.gmra.mrb[84].mxu1 %vm3659_vm12, %v8276_v7  ;;  %v11402_v17 = vadd.f32 %v3386_v52, %v15617_v4  ;;  %v11409_v23 = vpop.eup %7651  ;;  %v1387_v1 = vmul.f32 100.0, %v11393_v63  ;;  %v3275_v4 = vmul.f32 0.01, %v2226_v56  ;;  %vm11413_vm7 = vcmp.lt.f32.partialorder %v2251_v30, 0.0004427343 }
 0x2fb   : > { %7152 = vmatmul.mubr.msk.bf16.gmra.mrb[84].mxu0 %vm3659_vm12, %v8276_v7  ;;  %3943 = vmatprep.mubr.bf16.mxu1 %v15479_v11  ;;  %v1770_v7 = vsub.f32 0.0, %v1642_v10  ;;  %v7654_v52 = vpop.eup %7653  ;;  %v2366_v6 = vadd.f32 1.0, %v2365_v9  ;;  %v2380_v15 = vadd.f32 1.0, %v11409_v23  ;;  %v3277_v38 = vmul.f32 0.01, %v2244_v53  ;;  %v15622_v9 = vld [vmem:[#allocation16_spill] sm:$0xff] }
 0x2fc   : > { %3870 = vmatprep.mubr.bf16.mxu0 %v15479_v11  ;;  %v2250_v40 = vmul.f32 %v11319_v58, %v2249_v46  ;;  %7659 = vpow2.f32 %v1916_v57  ;;  %v2229_v8 = vmul.f32 0.6931472, %v7650_v41  ;;  %vm11419_vm8 = vcmp.lt.f32.partialorder %v2368_v61, 0.0004427343  ;;  %v15623_v61 = vld [vmem:[#allocation13_spill] sm:$0xff]  ;;  %v15624_v57 = vld [vmem:[#allocation18_spill] sm:$0xff] }
 0x2fd   : > { %v1942_v28 = vmul.f32 1.442695, %v1770_v7  ;;  %7661 = vlog2.f32 %v2380_v15  ;;  %v1772_v60 = vsub.f32 0.0, %v1644_v34  ;;  %v2247_v30 = vmul.f32 0.6931472, %v7654_v52 }
 0x2fe   : > { %v11423_v56 = vpop.eup %7655  ;;  %v1643_v26 = vand.u32 2147483647, %v1387_v1  ;;  %v11427_v10 = vadd.f32 %v15622_v9, %v15611_v12  ;;  %v2367_v58 = vmul.f32 %v11362_v43, %v2366_v6  ;;  %v11434_v7 = vadd.f32 %v15624_v57, %v15623_v61  ;;  %v15625_v1 = vld [vmem:[#allocation59_spill] sm:$0xff]  ;;  %v8277_v12 = vld [vmem:[%s14932_s3 + $0x10] sm:$0xff]  }
 0x2ff   : > { %7663 = vpow2.f32 %v1942_v28  ;;  %v7658_v53 = vpop.eup %7657  ;;  %v2371_v46 = vadd.f32 1.0, %v11423_v56  ;;  %v2383_v52 = vmul.f32 -0.5, %v11409_v23  ;;  %v1946_v28 = vmul.f32 1.442695, %v1772_v60 }
 0x300   : > { %v2364_v34 = vmul.f32 0.6931472, %v7658_v53  ;;  %v11439_v15 = vadd.f32 %v15625_v1, %v15623_v61  ;;  %v2235_v43 = vsel %vm11387_vm6, %v2232_v48, %v2229_v8  ;;  %v1771_v9 = vsub.f32 0.0, %v1643_v26 }
 0x301   : > { %7665 = vlog2.f32 %v2371_v46  ;;  %v2253_v60 = vsel %vm11413_vm7, %v2250_v40, %v2247_v30  ;;  %v1389_v57 = vmul.f32 100.0, %v11427_v10  ;;  %v15626_v44 = vmax.f32 %v11152_v62, 0.0 }
 0x302   : > { %7157 = vmatmul.mubr.msk.bf16.gmra.mrb[88].mxu1 %vm3659_vm12, %v8277_v12  ;;  %v2370_v53 = vsel %vm11419_vm8, %v2367_v58, %v2364_v34  ;;  %7667 = vpow2.f32 %v1946_v28  ;;  %v2386_v26 = vand.u32 2147483647, %v11409_v23  ;;  %v1944_v46 = vmul.f32 1.442695, %v1771_v9 }
 0x303   : > { %7153 = vmatmul.mubr.msk.bf16.gmra.mrb[88].mxu0 %vm3659_vm12, %v8277_v12  ;;  %3953 = vmatprep.mubr.bf16.mxu1 %v15479_v11  ;;  %v11458_v8 = vadd.f32 %v3275_v4, %v15626_v44  ;;  %v3291_v48 = vmul.f32 0.01, %v2370_v53  ;;  %v2384_v1 = vadd.f32 1.0, %v2383_v52  ;;  %v1645_v12 = vand.u32 2147483647, %v1389_v57 }
 0x304   : > { %3880 = vmatprep.mubr.bf16.mxu0 %v15479_v11  ;;  %v1402_v6 = vmul.f32 100.0, %v11434_v7  ;;  %v1404_v40 = vmul.f32 100.0, %v11439_v15  ;;  %v3276_v59 = vmul.f32 0.01, %v2235_v43  ;;  %v3278_v3 = vmul.f32 0.01, %v2253_v60 }
 0x305   : > { %15627 = vst [vmem:[#allocation51_spill] sm:$0xff] %v11458_v8  ;;  %v15628_v30 = vmax.f32 %v11229_v36, 0.0  ;;  %7669 = vpow2.f32 %v1944_v46  ;;  %v15630_v4 = vmax.f32 %v11169_v22, 0.0  ;;  %v1773_v28 = vsub.f32 0.0, %v1645_v12 }
 0x306   : > { %v11467_v62 = vpop.eup %7659  ;;  %v1658_v52 = vand.u32 2147483647, %v1402_v6  ;;  %v1660_v9 = vand.u32 2147483647, %v1404_v40  ;;  %v2374_v43 = vmul.f32 -0.5, %v11423_v56  ;;  %v2385_v22 = vmul.f32 %v11409_v23, %v2384_v1  ;;  %v8278_v6 = vld [vmem:[%s14932_s3 + $0x18] sm:$0xff]  }
 0x307   : > { %v11465_v58 = vadd.f32 %v3291_v48, %v15628_v30  ;;  %v11471_v34 = vadd.f32 %v3277_v38, %v15630_v4  ;;  %v7662_v53 = vpop.eup %7661  ;;  %v2377_v36 = vand.u32 2147483647, %v11423_v56  ;;  %v2389_v60 = vadd.f32 1.0, %v11467_v62  ;;  %v15632_v30 = vld [vmem:[#allocation64_spill] sm:$0xff] }
 0x308   : > { %v2382_v48 = vmul.f32 0.6931472, %v7662_v53  ;;  %v1948_v38 = vmul.f32 1.442695, %v1773_v28  ;;  %v1786_v46 = vsub.f32 0.0, %v1658_v52  ;;  %v11490_v4 = vadd.f32 %v15632_v30, %v15623_v61 }
 0x309   : > { %15629 = vst [vmem:[#allocation12_spill] sm:$0xff] %v11465_v58  ;;  %15631 = vst [vmem:[#allocation11_spill] sm:$0xff] %v11471_v34  ;;  %v11478_v44 = vpop.eup %7663  ;;  %vm2387_vm9 = vcmp.lt.f32.partialorder %v2386_v26, 0.0004427343  ;;  %v1788_v28 = vsub.f32 0.0, %v1660_v9  ;;  %v2375_v26 = vadd.f32 1.0, %v2374_v43 }
 0x30a   : > { %7158 = vmatmul.mubr.msk.bf16.gmra.mrb[92].mxu1 %vm3659_vm12, %v8278_v6  ;;  %v2506_v12 = vadd.f32 1.0, %v11478_v44  ;;  %v2388_v23 = vsel %vm2387_vm9, %v2385_v22, %v2382_v48  ;;  %7671 = vpow2.f32 %v1948_v38  ;;  %v15633_v40 = vmax.f32 %v11199_v50, 0.0  ;;  %v15648_v34 = vld [vmem:[#allocation23_spill] sm:$0xff] }
 0x30b   : > { %7154 = vmatmul.mubr.msk.bf16.gmra.mrb[92].mxu0 %vm3659_vm12, %v8278_v6  ;;  %4069 = vmatprep.mubr.bf16.mxu1 %v15479_v11  ;;  %v7666_v52 = vpop.eup %7665  ;;  %v3293_v53 = vmul.f32 0.01, %v2388_v23  ;;  %7673 = vlog2.f32 %v2389_v60  ;;  %v1974_v6 = vmul.f32 1.442695, %v1786_v46  ;;  %v15634_v41 = vmax.f32 %v11223_v51, 0.0  ;;  %v15641_v23 = vld [vmem:[#allocation19_spill] sm:$0xff] }
 0x30c   : > { %3996 = vmatprep.mubr.bf16.mxu0 %v15479_v11  ;;  %v11495_v57 = vpop.eup %7667  ;;  %v11499_v30 = vadd.f32 %v3276_v59, %v15633_v40  ;;  %vm11505_vm10 = vcmp.lt.f32.partialorder %v2377_v36, 0.0004427343  ;;  %7675 = vlog2.f32 %v2506_v12  ;;  %v15637_v9 = vmax.f32 %v11269_v16, 0.0  ;;  %v15646_v11 = vld [vmem:[#allocation55_spill] sm:$0xff] }
 0x30d   : > { %v11503_v8 = vadd.f32 %v3278_v3, %v15634_v41  ;;  %v2392_v60 = vmul.f32 -0.5, %v11467_v62  ;;  %v2524_v22 = vadd.f32 1.0, %v11495_v57  ;;  %v1403_v50 = vmul.f32 100.0, %v11490_v4  ;;  %v15639_v41 = vld [vmem:[#allocation30_spill] sm:$0xff] }
 0x30e   : > { %v11511_v43 = vadd.f32 %v3293_v53, %v15637_v9  ;;  %v2509_v59 = vmul.f32 -0.5, %v11478_v44  ;;  %7677 = vpow2.f32 %v1974_v6  ;;  %v1978_v51 = vmul.f32 1.442695, %v1788_v28  ;;  %v15645_v28 = vld [vmem:[#allocation56_spill] sm:$0xff] }
 0x30f   : > { %v11519_v3 = vadd.f32 %v15639_v41, %v15623_v61  ;;  %v11521_v36 = vpop.eup %7669  ;;  %v2373_v38 = vmul.f32 0.6931472, %v7666_v52  ;;  %v2376_v46 = vmul.f32 %v11423_v56, %v2375_v26  ;;  %7679 = vlog2.f32 %v2524_v22  ;;  %v15640_v22 = vld [vmem:[#allocation57_spill] sm:$0xff] }
 0x310   : > { %15638 = vst [vmem:[#allocation46_spill] sm:$0xff] %v11511_v43  ;;  %v2395_v12 = vand.u32 2147483647, %v11467_v62  ;;  %v2515_v40 = vadd.f32 1.0, %v11521_v36  ;;  %v2393_v53 = vadd.f32 1.0, %v2392_v60  ;;  %7681 = vpow2.f32 %v1978_v51  ;;  %v15649_v43 = vld [vmem:[#allocation22_spill] sm:$0xff] }
 0x311   : > { %v2512_v61 = vand.u32 2147483647, %v11478_v44  ;;  %v1659_v6 = vand.u32 2147483647, %v1403_v50  ;;  %v2510_v9 = vadd.f32 1.0, %v2509_v59  ;;  %v2527_v41 = vmul.f32 -0.5, %v11495_v57 }
 0x312   : > { %7683 = vlog2.f32 %v2515_v40  ;;  %v1405_v56 = vmul.f32 100.0, %v11519_v3  ;;  %v2379_v52 = vsel %vm11505_vm10, %v2376_v46, %v2373_v38  ;;  %v3536_v16 = vpack.c.bf16 %v10888_v29, %v15640_v22  ;;  %v15644_v40 = vld [vmem:[#allocation28_spill] sm:$0xff] }
 0x313   : > { %v1787_v26 = vsub.f32 0.0, %v1659_v6  ;;  %v3538_v60 = vpack.c.bf16 %v10893_v54, %v15641_v23  ;;  %vm11541_vm11 = vcmp.lt.f32.partialorder %v2395_v12, 0.0004427343  ;;  %v11548_v48 = vadd.f32 %v10850_v25, %v15644_v40 }
 0x314   : > { %v11539_v1 = vpop.eup %7671  ;;  %v1661_v51 = vand.u32 2147483647, %v1405_v56  ;;  %v2530_v46 = vand.u32 2147483647, %v11495_v57  ;;  %v1531_v54 = vmax.f32 %v11490_v4, 0.0  ;;  %3964 = vmatprep.subr.bf16.mxu0 %v3536_v16  ;;  %v2528_v22 = vadd.f32 1.0, %v2527_v41 }
 0x315   : > { %v7674_v38 = vpop.eup %7673  ;;  %v2533_v29 = vadd.f32 1.0, %v11539_v1  ;;  %v1976_v23 = vmul.f32 1.442695, %v1787_v26  ;;  %4037 = vmatprep.subr.bf16.mxu1 %v3538_v60  ;;  %v3292_v6 = vmul.f32 0.01, %v2379_v52  ;;  %v2518_v59 = vmul.f32 -0.5, %v11521_v36 }
 0x316   : > { %v7676_v12 = vpop.eup %7675  ;;  %v1789_v56 = vsub.f32 0.0, %v1661_v51  ;;  %v15647_v25 = vpack.c.bf16 %v15645_v28, %v15646_v11  ;;  %v15650_v58 = vpack.c.bf16 %v15648_v34, %v15649_v43  ;;  %v2394_v45 = vmul.f32 %v11467_v62, %v2393_v53 }
 0x317   : > { %v2511_v26 = vmul.f32 %v11478_v44, %v2510_v9  ;;  %vm11562_vm13 = vcmp.lt.f32.partialorder %v2512_v61, 0.0004427343  ;;  %v1418_v41 = vmul.f32 100.0, %v11548_v48  ;;  %v2391_v60 = vmul.f32 0.6931472, %v7674_v38 }
 0x318   : > { %3965 = vmatpush1.bf16.msra.mxu0 %v15647_v25  ;;  %4038 = vmatpush1.bf16.msra.mxu1 %v15650_v58  ;;  %v11567_v52 = vpop.eup %7677  ;;  %v2521_v11 = vand.u32 2147483647, %v11521_v36  ;;  %7685 = vpow2.f32 %v1976_v23  ;;  %v1980_v28 = vmul.f32 1.442695, %v1789_v56  ;;  %v2508_v34 = vmul.f32 0.6931472, %v7676_v12 }
 0x319   : > { %v7680_v51 = vpop.eup %7679  ;;  %vm11570_vm14 = vcmp.lt.f32.partialorder %v2530_v46, 0.0004427343  ;;  %7687 = vlog2.f32 %v2533_v29  ;;  %v2650_v62 = vadd.f32 1.0, %v11567_v52  ;;  %v15655_v44 = vmax.f32 %v11299_v0, 0.0 }
 0x31a   : > { %v2529_v53 = vmul.f32 %v11495_v57, %v2528_v22  ;;  %v2519_v61 = vadd.f32 1.0, %v2518_v59  ;;  %7689 = vpow2.f32 %v1980_v28  ;;  %v11580_v9 = vpop.eup %7681  ;;  %v2526_v38 = vmul.f32 0.6931472, %v7680_v51 }
 0x31b   : > { %v11577_v43 = vadd.f32 %v3292_v6, %v15655_v44  ;;  %7691 = vlog2.f32 %v2650_v62  ;;  %v1674_v23 = vand.u32 2147483647, %v1418_v41  ;;  %v11584_v46 = vadd.f32 %v10852_v39, %v15644_v40 }
 0x31c   : > { %v7684_v29 = vpop.eup %7683  ;;  %v2397_v12 = vsel %vm11541_vm11, %v2394_v45, %v2391_v60  ;;  %vm11588_vm15 = vcmp.lt.f32.partialorder %v2521_v11, 0.0004427343  ;;  %v2536_v57 = vmul.f32 -0.5, %v11539_v1  ;;  %v2668_v59 = vadd.f32 1.0, %v11580_v9 }
 0x31d   : > { %v2514_v6 = vsel %vm11562_vm13, %v2511_v26, %v2508_v34  ;;  %v2653_v22 = vmul.f32 -0.5, %v11567_v52  ;;  %v1533_v39 = vmax.f32 %v11519_v3, 0.0  ;;  %v1802_v56 = vsub.f32 0.0, %v1674_v23 }
 0x31e   : > { %v2520_v25 = vmul.f32 %v11521_v36, %v2519_v61  ;;  %v2539_v45 = vand.u32 2147483647, %v11539_v1  ;;  %7693 = vlog2.f32 %v2668_v59  ;;  %v1420_v50 = vmul.f32 100.0, %v11584_v46 }
 0x31f   : > { %v3294_v41 = vmul.f32 0.01, %v2397_v12  ;;  %v2532_v60 = vsel %vm11570_vm14, %v2529_v53, %v2526_v38  ;;  %v2517_v11 = vmul.f32 0.6931472, %v7684_v29  ;;  %v2006_v28 = vmul.f32 1.442695, %v1802_v56 }
 0x320   : > { %v3307_v16 = vmul.f32 0.01, %v2514_v6  ;;  %v2537_v26 = vadd.f32 1.0, %v2536_v57  ;;  %v2671_v51 = vmul.f32 -0.5, %v11580_v9  ;;  %v11606_v34 = vadd.f32 %v10913_v13, %v15644_v40 }
 0x321   : > { %v2654_v36 = vadd.f32 1.0, %v2653_v22  ;;  %v2656_v62 = vand.u32 2147483647, %v11567_v52  ;;  %7695 = vpow2.f32 %v2006_v28  ;;  %v1676_v44 = vand.u32 2147483647, %v1420_v50 }
 0x322   : > { %v11609_v61 = vpop.eup %7685  ;;  %v3309_v23 = vmul.f32 0.01, %v2532_v60  ;;  %v1546_v58 = vmax.f32 %v11548_v48, 0.0  ;;  %v1419_v53 = vmul.f32 100.0, %v11606_v34  ;;  %v11615_v38 = vadd.f32 %v10931_v21, %v15644_v40 }
 0x323   : > { %v7688_v29 = vpop.eup %7687  ;;  %v2523_v13 = vsel %vm11588_vm15, %v2520_v25, %v2517_v11  ;;  %v2674_v12 = vand.u32 2147483647, %v11580_v9  ;;  %v2659_v57 = vadd.f32 1.0, %v11609_v61  ;;  %v1804_v59 = vsub.f32 0.0, %v1676_v44 }
 0x324   : > { %v11621_v6 = vpop.eup %7689  ;;  %v15658_v22 = vmax.f32 %v11344_v19, 0.0  ;;  %v2538_v50 = vmul.f32 %v11539_v1, %v2537_v26  ;;  %vm11628_vm0 = vcmp.lt.f32.partialorder %v2539_v45, 0.0004427343  ;;  %v2672_v40 = vadd.f32 1.0, %v2671_v51 }
 0x325   : > { %v1675_v0 = vand.u32 2147483647, %v1419_v53  ;;  %v7692_v25 = vpop.eup %7691  ;;  %v15661_v60 = vmax.f32 %v11358_v18, 0.0  ;;  %v2655_v28 = vmul.f32 %v11567_v52, %v2654_v36  ;;  %vm2657_vm1 = vcmp.lt.f32.partialorder %v2656_v62, 0.0004427343 }
 0x326   : > { %v11625_v56 = vadd.f32 %v3294_v41, %v15658_v22  ;;  %7697 = vlog2.f32 %v2659_v57  ;;  %v3308_v19 = vmul.f32 0.01, %v2523_v13  ;;  %v2652_v41 = vmul.f32 0.6931472, %v7692_v25 }
 0x327   : > { %v11634_v11 = vadd.f32 %v3307_v16, %v15661_v60  ;;  %v2677_v44 = vadd.f32 1.0, %v11621_v6  ;;  %v1421_v1 = vmul.f32 100.0, %v11615_v38  ;;  %v15662_v45 = vmax.f32 %v11371_v5, 0.0 }
 0x328   : > { %vm11643_vm2 = vcmp.lt.f32.partialorder %v2674_v12, 0.0004427343  ;;  %v2010_v18 = vmul.f32 1.442695, %v1804_v59  ;;  %v1803_v16 = vsub.f32 0.0, %v1675_v0  ;;  %v7694_v53 = vpop.eup %7693  ;;  %v2658_v36 = vsel %vm2657_vm1, %v2655_v28, %v2652_v41 }
 0x329   : > { %v11641_v26 = vadd.f32 %v3309_v23, %v15662_v45  ;;  %v2535_v52 = vmul.f32 0.6931472, %v7688_v29  ;;  %v2673_v62 = vmul.f32 %v11580_v9, %v2672_v40  ;;  %7699 = vlog2.f32 %v2677_v44  ;;  %v15666_v40 = vld [vmem:[#allocation62_spill] sm:$0xff] }
 0x32a   : > { %v3323_v13 = vmul.f32 0.01, %v2658_v36  ;;  %v2670_v57 = vmul.f32 0.6931472, %v7694_v53  ;;  %7701 = vpow2.f32 %v2010_v18  ;;  %v2008_v22 = vmul.f32 1.442695, %v1803_v16 }
 0x32b   : > { %v2662_v5 = vmul.f32 -0.5, %v11609_v61  ;;  %v1677_v12 = vand.u32 2147483647, %v1421_v1  ;;  %v11652_v25 = vadd.f32 %v10969_v35, %v15492_v33  ;;  %v11654_v59 = vpop.eup %7695  ;;  %v15665_v29 = vmax.f32 %v11434_v7, 0.0  ;;  %v15674_v1 = vld [vmem:[#allocation31_spill] sm:$0xff] }
 0x32c   : > { %v2676_v9 = vsel %vm11643_vm2, %v2673_v62, %v2670_v57  ;;  %7703 = vpow2.f32 %v2008_v22  ;;  %v11664_v60 = vadd.f32 %v15666_v40, %v15492_v33  ;;  %v2665_v41 = vand.u32 2147483647, %v11609_v61  ;;  %v15673_v22 = vld [vmem:[#allocation63_spill] sm:$0xff] }
 0x32d   : > { %v11658_v0 = vadd.f32 %v3323_v13, %v15665_v29  ;;  %v3325_v28 = vmul.f32 0.01, %v2676_v9  ;;  %v2794_v35 = vadd.f32 1.0, %v11654_v59  ;;  %v11670_v44 = vadd.f32 %v11007_v14, %v15492_v33 }
 0x32e   : > { %v2541_v7 = vsel %vm11628_vm0, %v2538_v50, %v2535_v52  ;;  %v1805_v45 = vsub.f32 0.0, %v1677_v12  ;;  %v1434_v51 = vmul.f32 100.0, %v11652_v25  ;;  %v15667_v18 = vmax.f32 %v11393_v63, 0.0 }
 0x32f   : > { %v15668_v53 = vmax.f32 %v11439_v15, 0.0  ;;  %v2663_v62 = vadd.f32 1.0, %v2662_v5  ;;  %v2680_v14 = vmul.f32 -0.5, %v11621_v6  ;;  %7705 = vlog2.f32 %v2794_v35  ;;  %v15671_v35 = vld [vmem:[#allocation60_spill] sm:$0xff] }
 0x330   : > { %v11679_v16 = vadd.f32 %v3308_v19, %v15667_v18  ;;  %v7698_v13 = vpop.eup %7697  ;;  %v2012_v50 = vmul.f32 1.442695, %v1805_v45  ;;  %v1690_v21 = vand.u32 2147483647, %v1434_v51  ;;  %v1436_v52 = vmul.f32 100.0, %v11664_v60 }
 0x331   : > { %v11683_v36 = vadd.f32 %v3325_v28, %v15668_v53  ;;  %v3310_v57 = vmul.f32 0.01, %v2541_v7  ;;  %v1435_v19 = vmul.f32 100.0, %v11670_v44  ;;  %vm11691_vm3 = vcmp.lt.f32.partialorder %v2665_v41, 0.0004427343  ;;  %v15672_v7 = vld [vmem:[#allocation41_spill] sm:$0xff] }
 0x332   : > { %7707 = vpow2.f32 %v2012_v50  ;;  %v1818_v5 = vsub.f32 0.0, %v1690_v21  ;;  %v1692_v12 = vand.u32 2147483647, %v1436_v52  ;;  %v2661_v9 = vmul.f32 0.6931472, %v7698_v13  ;;  %v15675_v52 = vld [vmem:[#allocation42_spill] sm:$0xff] }
 0x333   : > { %v7700_v29 = vpop.eup %7699  ;;  %v2683_v40 = vand.u32 2147483647, %v11621_v6  ;;  %v1691_v28 = vand.u32 2147483647, %v1435_v19  ;;  %v3552_v45 = vpack.c.bf16 %v15672_v7, %v15671_v35  ;;  %v2664_v18 = vmul.f32 %v11609_v61, %v2663_v62 }
 0x334   : > { %v11698_v51 = vpop.eup %7701  ;;  %v2681_v53 = vadd.f32 1.0, %v2680_v14  ;;  %v2038_v41 = vmul.f32 1.442695, %v1818_v5  ;;  %v3554_v63 = vpack.c.bf16 %v15674_v1, %v15673_v22  ;;  %v2797_v50 = vmul.f32 -0.5, %v11654_v59  ;;  %v15676_v14 = vld [vmem:[#allocation38_spill] sm:$0xff]  ;;  %v15677_v1 = vld [vmem:[#allocation65_spill] sm:$0xff] }
 0x335   : > { %v2812_v21 = vadd.f32 1.0, %v11698_v51  ;;  %v1820_v13 = vsub.f32 0.0, %v1692_v12  ;;  %v11707_v19 = vadd.f32 %v15675_v52, %v15492_v33  ;;  %3966 = vmatprep.subr.bf16.mxu0 %v3552_v45  ;;  %v2679_v7 = vmul.f32 0.6931472, %v7700_v29  ;;  %v15680_v29 = vld [vmem:[#allocation61_spill] sm:$0xff] }
 0x336   : > { %v11709_v35 = vpop.eup %7703  ;;  %v2800_v61 = vand.u32 2147483647, %v11654_v59  ;;  %7709 = vpow2.f32 %v2038_v41  ;;  %v1819_v62 = vsub.f32 0.0, %v1691_v28  ;;  %4039 = vmatprep.subr.bf16.mxu1 %v3554_v63  ;;  %v15678_v22 = vpack.c.bf16 %v15676_v14, %v15677_v1  ;;  %v15681_v52 = vld [vmem:[#allocation29_spill] sm:$0xff] }
 0x337   : > { %v15679_v5 = vmax.f32 %v11427_v10, 0.0  ;;  %v2667_v33 = vsel %vm11691_vm3, %v2664_v18, %v2661_v9  ;;  %7711 = vlog2.f32 %v2812_v21  ;;  %v15682_v23 = vpack.c.bf16 %v15680_v29, %v15681_v52 }
 0x338   : > { %3967 = vmatpush1.bf16.msra.mxu0 %v15678_v22  ;;  %v2682_v63 = vmul.f32 %v11621_v6, %v2681_v53  ;;  %vm11726_vm4 = vcmp.lt.f32.partialorder %v2683_v40, 0.0004427343  ;;  %v2803_v10 = vadd.f32 1.0, %v11709_v35  ;;  %v2798_v41 = vadd.f32 1.0, %v2797_v50  ;;  %v15687_v50 = vld [vmem:[#allocation39_spill] sm:$0xff] }
 0x339   : > { %v11717_v12 = vadd.f32 %v3310_v57, %v15679_v5  ;;  %4040 = vmatpush1.bf16.msra.mxu1 %v15682_v23  ;;  %v2042_v57 = vmul.f32 1.442695, %v1820_v13  ;;  %v1562_v15 = vmax.f32 %v11652_v25, 0.0  ;;  %v2040_v9 = vmul.f32 1.442695, %v1819_v62  ;;  %v7706_v21 = vpop.eup %7705 }
 0x33a   : > { %v1437_v18 = vmul.f32 100.0, %v11707_v19  ;;  %v3324_v14 = vmul.f32 0.01, %v2667_v33  ;;  %v2685_v23 = vsel %vm11726_vm4, %v2682_v63, %v2679_v7  ;;  %vm11735_vm5 = vcmp.lt.f32.partialorder %v2800_v61, 0.0004427343 }
 0x33b   : > { %7713 = vlog2.f32 %v2803_v10  ;;  %v2815_v40 = vmul.f32 -0.5, %v11698_v51  ;;  %v11742_v13 = vadd.f32 %v11070_v42, %v15687_v50  ;;  %v2818_v1 = vand.u32 2147483647, %v11698_v51 }
 0x33c   : > { %7715 = vpow2.f32 %v2042_v57  ;;  %v1693_v53 = vand.u32 2147483647, %v1437_v18  ;;  %v11744_v62 = vpop.eup %7707  ;;  %v11750_v7 = vadd.f32 %v11072_v37, %v15687_v50  ;;  %v3326_v61 = vmul.f32 0.01, %v2685_v23 }
 0x33d   : > { %7717 = vpow2.f32 %v2040_v9  ;;  %v2796_v5 = vmul.f32 0.6931472, %v7706_v21  ;;  %v2799_v33 = vmul.f32 %v11654_v59, %v2798_v41  ;;  %v2821_v29 = vadd.f32 1.0, %v11744_v62 }
 0x33e   : > { %v1821_v52 = vsub.f32 0.0, %v1693_v53  ;;  %v1450_v63 = vmul.f32 100.0, %v11742_v13  ;;  %v1452_v28 = vmul.f32 100.0, %v11750_v7  ;;  %v11759_v10 = vadd.f32 %v3324_v14, %v1531_v54 }
 0x33f   : > { %v2816_v57 = vadd.f32 1.0, %v2815_v40  ;;  %v2806_v37 = vmul.f32 -0.5, %v11709_v35  ;;  %v2809_v9 = vand.u32 2147483647, %v11709_v35  ;;  %7719 = vlog2.f32 %v2821_v29 }
 0x340   : > { %v7710_v18 = vpop.eup %7709  ;;  %v2044_v59 = vmul.f32 1.442695, %v1821_v52  ;;  %v1706_v41 = vand.u32 2147483647, %v1450_v63  ;;  %v11765_v21 = vadd.f32 %v11097_v27, %v15687_v50  ;;  %v11769_v53 = vadd.f32 %v3326_v61, %v1533_v39 }
 0x341   : > { %v7712_v23 = vpop.eup %7711  ;;  %v2802_v4 = vsel %vm11735_vm5, %v2799_v33, %v2796_v5  ;;  %vm11773_vm6 = vcmp.lt.f32.partialorder %v2818_v1, 0.0004427343  ;;  %v2938_v14 = vadd.f32 1.0, %v7710_v18  ;;  %v2824_v40 = vmul.f32 -0.5, %v11744_v62 }
 0x342   : > { %7721 = vpow2.f32 %v2044_v59  ;;  %v1834_v29 = vsub.f32 0.0, %v1706_v41  ;;  %v1708_v52 = vand.u32 2147483647, %v1452_v28  ;;  %v2807_v27 = vadd.f32 1.0, %v2806_v37 }
 0x343   : > { %vm11778_vm7 = vcmp.lt.f32.partialorder %v2809_v9, 0.0004427343  ;;  %7723 = vlog2.f32 %v2938_v14  ;;  %v1451_v3 = vmul.f32 100.0, %v11765_v21  ;;  %v3339_v6 = vmul.f32 0.01, %v2802_v4 }
 0x344   : > { %v2814_v1 = vmul.f32 0.6931472, %v7712_v23  ;;  %v2817_v61 = vmul.f32 %v11698_v51, %v2816_v57  ;;  %v2070_v5 = vmul.f32 1.442695, %v1834_v29  ;;  %v2827_v42 = vand.u32 2147483647, %v11744_v62 }
 0x345   : > { %v7714_v39 = vpop.eup %7713  ;;  %v2941_v59 = vmul.f32 -0.5, %v7710_v18  ;;  %v1836_v37 = vsub.f32 0.0, %v1708_v52  ;;  %v2825_v41 = vadd.f32 1.0, %v2824_v40  ;;  %v1707_v14 = vand.u32 2147483647, %v1451_v3 }
 0x346   : > { %v7716_v33 = vpop.eup %7715  ;;  %7725 = vpow2.f32 %v2070_v5  ;;  %v2808_v22 = vmul.f32 %v11709_v35, %v2807_v27  ;;  %v2944_v4 = vand.u32 2147483647, %v7710_v18  ;;  %v11793_v57 = vadd.f32 %v3339_v6, %v1546_v58 }
 0x347   : > { %v11786_v9 = vpop.eup %7717  ;;  %v2956_v45 = vadd.f32 1.0, %v7716_v33  ;;  %v2820_v29 = vsel %vm11773_vm6, %v2817_v61, %v2814_v1  ;;  %v2805_v52 = vmul.f32 0.6931472, %v7714_v39  ;;  %vm11797_vm8 = vcmp.lt.f32.partialorder %v2827_v42, 0.0004427343 }
 0x348   : > { %v2947_v23 = vadd.f32 1.0, %v11786_v9  ;;  %v2942_v3 = vadd.f32 1.0, %v2941_v59  ;;  %v2074_v27 = vmul.f32 1.442695, %v1836_v37  ;;  %v2826_v51 = vmul.f32 %v11744_v62, %v2825_v41 }
 0x349   : > { %7727 = vlog2.f32 %v2956_v45  ;;  %v7720_v5 = vpop.eup %7719  ;;  %v2959_v28 = vmul.f32 -0.5, %v7716_v33  ;;  %v1835_v48 = vsub.f32 0.0, %v1707_v14  ;;  %v3341_v58 = vmul.f32 0.01, %v2820_v29 }
 0x34a   : > { %7729 = vlog2.f32 %v2947_v23  ;;  %vm11803_vm9 = vcmp.lt.f32.partialorder %v2944_v4, 0.0004427343  ;;  %v11809_v45 = vadd.f32 %v11113_v49, %v15687_v50  ;;  %v2811_v39 = vsel %vm11778_vm7, %v2808_v22, %v2805_v52 }
 0x34b   : > { %7731 = vpow2.f32 %v2074_v27  ;;  %v2962_v6 = vand.u32 2147483647, %v7716_v33  ;;  %v2072_v62 = vmul.f32 1.442695, %v1835_v48  ;;  %v11817_v1 = vadd.f32 %v11176_v24, %v15348_v32 }
 0x34c   : > { %15696 = vst [vmem:[#allocation50_spill] sm:$0xff] %v11809_v45  ;;  %v11811_v42 = vpop.eup %7721  ;;  %v2823_v59 = vmul.f32 0.6931472, %v7720_v5  ;;  %v2943_v37 = vmul.f32 %v7710_v18, %v2942_v3  ;;  %v2950_v41 = vmul.f32 -0.5, %v11786_v9  ;;  %v2960_v50 = vadd.f32 1.0, %v2959_v28 }
 0x34d   : > { %v7724_v61 = vpop.eup %7723  ;;  %v2965_v14 = vadd.f32 1.0, %v11811_v42  ;;  %7733 = vpow2.f32 %v2072_v62  ;;  %v1453_v4 = vmul.f32 100.0, %v11809_v45  ;;  %v15697_v22 = vmax.f32 %v11584_v46, 0.0 }
 0x34e   : > { %v2940_v49 = vmul.f32 0.6931472, %v7724_v61  ;;  %v3340_v23 = vmul.f32 0.01, %v2811_v39  ;;  %vm11831_vm10 = vcmp.lt.f32.partialorder %v2962_v6, 0.0004427343  ;;  %v2829_v46 = vsel %vm11797_vm8, %v2826_v51, %v2823_v59 }
 0x34f   : > { %v11824_v63 = vadd.f32 %v3341_v58, %v15697_v22  ;;  %7735 = vlog2.f32 %v2965_v14  ;;  %v1709_v28 = vand.u32 2147483647, %v1453_v4  ;;  %v1466_v3 = vmul.f32 100.0, %v11817_v1 }
 0x350   : > { %v11827_v29 = vpop.eup %7725  ;;  %v2946_v18 = vsel %vm11803_vm9, %v2943_v37, %v2940_v49  ;;  %v2951_v5 = vadd.f32 1.0, %v2950_v41  ;;  %v2961_v39 = vmul.f32 %v7716_v33, %v2960_v50  ;;  %v2953_v62 = vand.u32 2147483647, %v11786_v9 }
 0x351   : > { %v3355_v27 = vmul.f32 0.01, %v2946_v18  ;;  %v3082_v48 = vadd.f32 1.0, %v11827_v29  ;;  %v1837_v54 = vsub.f32 0.0, %v1709_v28  ;;  %v1722_v61 = vand.u32 2147483647, %v1466_v3 }
 0x352   : > { %v2968_v14 = vmul.f32 -0.5, %v11811_v42  ;;  %v11847_v51 = vadd.f32 %v11182_v2, %v15348_v32  ;;  %v15700_v59 = vmax.f32 %v11606_v34, 0.0  ;;  %v3342_v33 = vmul.f32 0.01, %v2829_v46  ;;  %v15701_v46 = vld [vmem:[#allocation25_spill] sm:$0xff] }
 0x353   : > { %v7728_v58 = vpop.eup %7727  ;;  %v11842_v6 = vadd.f32 %v3355_v27, %v1562_v15  ;;  %v3085_v49 = vmul.f32 -0.5, %v11827_v29  ;;  %v2076_v50 = vmul.f32 1.442695, %v1837_v54  ;;  %7737 = vlog2.f32 %v3082_v48  ;;  %v15710_v54 = vld [vmem:[#allocation26_spill] sm:$0xff] }
 0x354   : > { %v2958_v37 = vmul.f32 0.6931472, %v7728_v58  ;;  %v7730_v40 = vpop.eup %7729  ;;  %v11851_v41 = vadd.f32 %v3340_v23, %v15700_v59  ;;  %v1850_v2 = vsub.f32 0.0, %v1722_v61  ;;  %v2952_v18 = vmul.f32 %v11786_v9, %v2951_v5 }
 0x355   : > { %v11854_v4 = vpop.eup %7731  ;;  %v2971_v34 = vand.u32 2147483647, %v11811_v42  ;;  %v2969_v28 = vadd.f32 1.0, %v2968_v14  ;;  %7739 = vpow2.f32 %v2076_v50  ;;  %v1468_v3 = vmul.f32 100.0, %v11847_v51 }
 0x356   : > { %v2964_v15 = vsel %vm11831_vm10, %v2961_v39, %v2958_v37  ;;  %v3100_v23 = vadd.f32 1.0, %v11854_v4  ;;  %v11866_v27 = vadd.f32 %v15701_v46, %v15348_v32  ;;  %v15702_v52 = vmax.f32 %v11664_v60, 0.0 }
 0x357   : > { %v3357_v22 = vmul.f32 0.01, %v2964_v15  ;;  %v11868_v58 = vpop.eup %7733  ;;  %v2949_v39 = vmul.f32 0.6931472, %v7730_v40  ;;  %v2102_v9 = vmul.f32 1.442695, %v1850_v2  ;;  %v3584_v60 = vpack.c.bf16 %v11379_v47, %v11264_v31 }
 0x358   : > { %7741 = vlog2.f32 %v3100_v23  ;;  %vm11874_vm11 = vcmp.lt.f32.partialorder %v2953_v62, 0.0004427343  ;;  %v3086_v61 = vadd.f32 1.0, %v3085_v49  ;;  %v3088_v37 = vand.u32 2147483647, %v11827_v29  ;;  %v11891_v23 = vpop.f32.mrb[64].mxu1 }
 0x359   : > { %v11872_v48 = vadd.f32 %v3357_v22, %v15702_v52  ;;  %v7736_v5 = vpop.eup %7735  ;;  %v3091_v14 = vadd.f32 1.0, %v11868_v58  ;;  %v15705_v59 = vmax.f32 %v11615_v38, 0.0  ;;  %v2970_v62 = vmul.f32 %v11811_v42, %v2969_v28  ;;  %v11889_v22 = vpop.f32.mrb[64].mxu0  ;;  %v15717_v31 = vld [vmem:[#allocation37_spill] sm:$0xff] }
 0x35a   : > { %v2967_v40 = vmul.f32 0.6931472, %v7736_v5  ;;  %v1724_v2 = vand.u32 2147483647, %v1468_v3  ;;  %v1467_v49 = vmul.f32 100.0, %v11866_v27  ;;  %v2955_v38 = vsel %vm11874_vm11, %v2952_v18, %v2949_v39  ;;  %v11900_v52 = vpop.f32.mrb[65].mxu0 }
 0x35b   : > { %v11882_v50 = vadd.f32 %v3342_v33, %v15705_v59  ;;  %7743 = vlog2.f32 %v3091_v14  ;;  %vm11895_vm13 = vcmp.lt.f32.partialorder %v2971_v34, 0.0004427343  ;;  %v11902_v42 = vpop.f32.mrb[65].mxu1  ;;  %v11907_v3 = vmul.f32 %v11827_v29, %v3086_v61  ;;  %v11913_v39 = vpop.f32.mrb[66].mxu0  ;;  %v15711_v59 = vld [vmem:[#allocation36_spill] sm:$0xff] }
 0x35c   : > { %7745 = vpow2.f32 %v2102_v9  ;;  %v2973_v28 = vsel %vm11895_vm13, %v2970_v62, %v2967_v40  ;;  %vm11909_vm14 = vcmp.lt.f32.partialorder %v3088_v37, 0.0004427343  ;;  %v1852_v18 = vsub.f32 0.0, %v1724_v2  ;;  %v15712_v33 = vld [vmem:[#allocation32_spill] sm:$0xff]  ;;  %v11924_v37 = vpop.f32.mrb[66].mxu1  ;;  %v11926_v15 = vpop.f32.mrb[67].mxu0 }
 0x35d   : > { %v1723_v34 = vand.u32 2147483647, %v1467_v49  ;;  %v3103_v9 = vmul.f32 -0.5, %v11854_v4  ;;  %v11918_v14 = vadd.f32 %v15710_v54, %v15348_v32  ;;  %v3568_v40 = vpack.c.bf16 %v15712_v33, %v15711_v59  ;;  %v15713_v62 = vld [vmem:[#allocation44_spill] sm:$0xff]  ;;  %v7738_v2 = vpop.eup %7737  ;;  %v11930_v25 = vpop.f32.mrb[67].mxu1 }
 0x35e   : > { %v15714_v29 = vld [vmem:[#allocation24_spill] sm:$0xff]  ;;  %v3356_v49 = vmul.f32 0.01, %v2955_v38  ;;  %v2106_v46 = vmul.f32 1.442695, %v1852_v18  ;;  %15715 = vst [vmem:[#allocation7_spill] sm:$0xff] %v11930_v25  ;;  %v3586_v33 = vpack.c.bf16 %v11402_v17, %v11312_v55 }
 0x35f   : > { %v3570_v61 = vpack.c.bf16 %v15714_v29, %v15713_v62  ;;  %v1851_v24 = vsub.f32 0.0, %v1723_v34  ;;  %v3358_v32 = vmul.f32 0.01, %v2973_v28  ;;  %v3106_v54 = vand.u32 2147483647, %v11854_v4  ;;  %3968 = vmatprep.subr.bf16.mxu0 %v3568_v40  ;;  %v11936_v62 = vpop.eup %7739  ;;  %v15716_v34 = vld [vmem:[#allocation33_spill] sm:$0xff] }
 0x360   : > { %v1469_v59 = vmul.f32 100.0, %v11918_v14  ;;  %v3094_v38 = vmul.f32 -0.5, %v11868_v58  ;;  %7747 = vpow2.f32 %v2106_v46  ;;  %v15718_v47 = vpack.c.bf16 %v15716_v34, %v15717_v31  ;;  %v15719_v28 = vld [vmem:[#allocation43_spill] sm:$0xff]  ;;  %v15720_v29 = vld [vmem:[#allocation40_spill] sm:$0xff]  ;;  %v11955_v31 = vpop.f32.mrb[68].mxu0 }
 0x361   : > { %4041 = vmatprep.subr.bf16.mxu1 %v3570_v61  ;;  %v2104_v18 = vmul.f32 1.442695, %v1851_v24  ;;  %v15721_v35 = vpack.c.bf16 %v15719_v28, %v15720_v29  ;;  %v3540_v40 = vpack.c.bf16 %v11577_v43, %v11499_v30  ;;  %v3084_v45 = vmul.f32 0.6931472, %v7738_v2  ;;  %v11957_v30 = vpop.f32.mrb[68].mxu1  ;;  %v11964_v2 = vpop.f32.mrb[69].mxu0 }
 0x362   : > { %3969 = vmatpush1.bf16.msra.mxu0 %v15718_v47  ;;  %v7742_v61 = vpop.eup %7741  ;;  %v3104_v55 = vadd.f32 1.0, %v3103_v9  ;;  %v3109_v17 = vadd.f32 1.0, %v11936_v62  ;;  %v1725_v25 = vand.u32 2147483647, %v1469_v59  ;;  %v15722_v24 = vmax.f32 %v11670_v44, 0.0  ;;  %v15726_v47 = vld [vmem:[#allocation34_spill] sm:$0xff] }
 0x363   : > { %4042 = vmatpush1.bf16.msra.mxu1 %v15721_v35  ;;  %3970 = vmatprep.subr.bf16.mxu0 %v3584_v60  ;;  %v3097_v34 = vand.u32 2147483647, %v11868_v58  ;;  %7749 = vpow2.f32 %v2104_v18  ;;  %v3542_v35 = vpack.c.bf16 %v11625_v56, %v11503_v8  ;;  %v15723_v43 = vmax.f32 %v11707_v19, 0.0  ;;  %v15724_v8 = vld [vmem:[#allocation27_spill] sm:$0xff]  ;;  %v15727_v28 = vld [vmem:[#allocation45_spill] sm:$0xff]  ;;  %v11978_v29 = vpop.f32.mrb[70].mxu0 }
 0x364   : > { %4043 = vmatprep.subr.bf16.mxu1 %v3586_v33  ;;  %v11950_v46 = vadd.f32 %v3356_v49, %v15722_v24  ;;  %7751 = vlog2.f32 %v3109_v17  ;;  %v1596_v60 = vmax.f32 %v11847_v51, 0.0  ;;  %v1853_v44 = vsub.f32 0.0, %v1725_v25  ;;  %v11966_v49 = vpop.f32.mrb[69].mxu1 }
 0x365   : > { %v11961_v9 = vadd.f32 %v3358_v32, %v15723_v43  ;;  %v7744_v59 = vpop.eup %7743  ;;  %v3102_v33 = vmul.f32 0.6931472, %v7742_v61  ;;  %v3095_v18 = vadd.f32 1.0, %v3094_v38  ;;  %v15725_v56 = vpack.c.bf16 %v11275_v20, %v15724_v8  ;;  %v11980_v17 = vpop.f32.mrb[70].mxu1  ;;  %v15734_v43 = vld [vmem:[#allocation12_spill] sm:$0xff]  ;;  %v15737_v8 = vld [vmem:[#allocation46_spill] sm:$0xff] }
 0x366   : > { %v15728_v19 = vpack.c.bf16 %v15726_v47, %v15727_v28  ;;  %v3556_v32 = vpack.c.bf16 %v11759_v10, %v11679_v16  ;;  %v3558_v25 = vpack.c.bf16 %v11769_v53, %v11717_v12  ;;  %v11982_v61 = vpop.eup %7745  ;;  %v3090_v20 = vsel %vm11909_vm14, %v11907_v3, %v3084_v45  ;;  %v12000_v3 = vpop.f32.mrb[71].mxu0 }
 0x367   : > { %3971 = vmatpush1.bf16.msra.mxu0 %v15725_v56  ;;  %v3105_v38 = vmul.f32 %v11854_v4, %v3104_v55  ;;  %vm11988_vm15 = vcmp.lt.f32.partialorder %v3106_v54, 0.0004427343  ;;  %v2108_v16 = vmul.f32 1.442695, %v1853_v44  ;;  %vm11992_vm0 = vcmp.lt.f32.partialorder %v3097_v34, 0.0004427343  ;;  %v12016_v55 = vpop.permute.xlu0 %3601 }
 0x368   : > { %4044 = vmatpush1.bf16.msra.mxu1 %v15728_v19  ;;  %4110 = vmatprep.subr.bf16.mxu0 %v3540_v40  ;;  %v3112_v10 = vmul.f32 -0.5, %v11936_v62  ;;  %v3226_v53 = vadd.f32 1.0, %v11982_v61  ;;  %v3572_v45 = vpack.c.bf16 %v11950_v46, %v11851_v41  ;;  %v12002_v4 = vpop.f32.mrb[71].mxu1  ;;  %v3093_v5 = vmul.f32 0.6931472, %v7744_v59  ;;  %v12008_v40 = vld [vmem:[%s14932_s3] sm:$0xff]  }
 0x369   : > { %4183 = vmatprep.subr.bf16.mxu1 %v3542_v35  ;;  %v3115_v54 = vand.u32 2147483647, %v11936_v62  ;;  %7753 = vpow2.f32 %v2108_v16  ;;  %v3574_v41 = vpack.c.bf16 %v11961_v9, %v11882_v50  ;;  %15733 = vst [vmem:[#allocation35_spill] sm:$0xff] %v12016_v55  ;;  %v3371_v46 = vmul.f32 0.01, %v3090_v20  ;;  %v15735_v44 = vld [vmem:[#allocation51_spill] sm:$0xff] }
 0x36a   : > { %7159 = vmatmul.mubr.msk.bf16.vlgmr.msra.gmra.mrb[96].mxu0 %vm3659_vm12, %v12008_v40  ;;  %v3108_v34 = vsel %vm11988_vm15, %v3105_v38, %v3102_v33  ;;  %v3096_v35 = vmul.f32 %v11868_v58, %v3095_v18  ;;  %7755 = vlog2.f32 %v3226_v53  ;;  %v15736_v59 = vpack.c.bf16 %v15734_v43, %v15735_v44  ;;  %v15738_v56 = vld [vmem:[#allocation11_spill] sm:$0xff]  ;;  %v12042_v18 = vpop.eup %7747  ;;  %v12046_v24 = vpop.f32.mrb[72].mxu0 }
 0x36b   : > { %7163 = vmatmul.mubr.msk.bf16.vlgmr.msra.gmra.mrb[96].mxu1 %vm3659_vm12, %v12008_v40  ;;  %v15739_v47 = vpack.c.bf16 %v15737_v8, %v15738_v56  ;;  %v1595_v28 = vmax.f32 %v11866_v27, 0.0  ;;  %v15740_v50 = vmov 0   ;;  %v12032_v9 = vadd.f32 %v11889_v22, %v12016_v55  ;;  %v12048_v22 = vpop.f32.mrb[72].mxu1  ;;  %v12059_v43 = vpop.f32.mrb[73].mxu0 }
 0x36c   : > { %4111 = vmatpush1.bf16.msra.mxu0 %v15736_v59  ;;  %4006 = vmatprep.mubr.bf16.mxu0 %v15740_v50  ;;  %v12036_v58 = vadd.f32 %v11891_v23, %v12016_v55  ;;  %v12040_v33 = vadd.f32 %v11900_v52, %v12016_v55  ;;  %v3113_v19 = vadd.f32 1.0, %v3112_v10  ;;  %v3232_v20 = vand.u32 2147483647, %v11982_v61  ;;  %v12075_v8 = vpop.f32.mrb[73].mxu1  ;;  %v12077_v56 = vpop.f32.mrb[74].mxu0 }
 0x36d   : > { %4184 = vmatpush1.bf16.msra.mxu1 %v15739_v47  ;;  %4079 = vmatprep.mubr.bf16.mxu1 %v15740_v50  ;;  %v3099_v23 = vsel %vm11992_vm0, %v3096_v35, %v3093_v5  ;;  %vm12052_vm1 = vcmp.lt.f32.partialorder %v3115_v54, 0.0004427343  ;;  %v3229_v52 = vmul.f32 -0.5, %v11982_v61  ;;  %v3244_v10 = vadd.f32 1.0, %v12042_v18 }
 0x36e   : > { %4112 = vmatprep.subr.bf16.mxu0 %v3556_v32  ;;  %4185 = vmatprep.subr.bf16.mxu1 %v3558_v25  ;;  %v4256_v53 = vmul.f32 100.0, %v12032_v9  ;;  %v12061_v32 = vpop.eup %7749  ;;  %v15743_v25 = vmax.f32 %v11742_v13, 0.0  ;;  %v3373_v12 = vmul.f32 0.01, %v3108_v34  ;;  %v15744_v5 = vpack.c.bf16 %v11658_v0, %v11634_v11 }
 0x36f   : > { %v15745_v54 = vpack.c.bf16 %v11683_v36, %v11641_v26  ;;  %v4258_v35 = vmul.f32 100.0, %v12036_v58  ;;  %v4257_v59 = vmul.f32 100.0, %v12040_v33  ;;  %v7752_v13 = vpop.eup %7751  ;;  %7757 = vlog2.f32 %v3244_v10 }
 0x370   : > { %v12065_v44 = vadd.f32 %v3371_v46, %v15743_v25  ;;  %4113 = vmatpush1.bf16.msra.mxu0 %v15744_v5  ;;  %v3247_v46 = vmul.f32 -0.5, %v12042_v18  ;;  %v3235_v34 = vadd.f32 1.0, %v12061_v32  ;;  %v12083_v11 = vadd.f32 %v11902_v42, %v12016_v55 }
 0x371   : > { %4186 = vmatpush1.bf16.msra.mxu1 %v15745_v54  ;;  %4114 = vmatprep.subr.bf16.mxu0 %v3572_v45  ;;  %v3372_v26 = vmul.f32 0.01, %v3099_v23  ;;  %v3114_v0 = vmul.f32 %v11936_v62, %v3113_v19  ;;  %vm12086_vm2 = vcmp.lt.f32.partialorder %v3232_v20, 0.0004427343  ;;  %v3250_v47 = vand.u32 2147483647, %v12042_v18 }
 0x372   : > { %4187 = vmatprep.subr.bf16.mxu1 %v3574_v41  ;;  %v3230_v10 = vadd.f32 1.0, %v3229_v52  ;;  %7759 = vlog2.f32 %v3235_v34  ;;  %v12094_v45 = vld [vmem:[%s14932_s3 + $0x8] sm:$0xff]   ;;  %v4512_v42 = vand.u32 2147483647, %v4256_v53  ;;  %v4514_v62 = vand.u32 2147483647, %v4258_v35 }
 0x373   : > { %7160 = vmatmul.mubr.msk.bf16.gmra.mrb[100].mxu0 %vm3659_vm12, %v12094_v45  ;;  %7164 = vmatmul.mubr.msk.bf16.gmra.mrb[100].mxu1 %vm3659_vm12, %v12094_v45  ;;  %v12100_v41 = vpop.f32.mrb[74].mxu1  ;;  %v15748_v19 = vmax.f32 %v11750_v7, 0.0  ;;  %v3111_v23 = vmul.f32 0.6931472, %v7752_v13  ;;  %v3238_v52 = vmul.f32 -0.5, %v12061_v32  ;;  %v12109_v5 = vpop.eup %7753  ;;  %v3248_v54 = vadd.f32 1.0, %v3247_v46 }
 0x374   : > { %4016 = vmatprep.mubr.bf16.mxu0 %v15740_v50  ;;  %4089 = vmatprep.mubr.bf16.mxu1 %v15740_v50  ;;  %v4513_v25 = vand.u32 2147483647, %v4257_v59  ;;  %v15749_v53 = vpack.c.bf16 %v11842_v6, %v11793_v57  ;;  %v15750_v7 = vpack.c.bf16 %v11872_v48, %v11824_v63  ;;  %v4642_v35 = vsub.f32 0.0, %v4514_v62  ;;  %v7756_v34 = vpop.eup %7755 }
 0x375   : > { %v12104_v20 = vadd.f32 %v3373_v12, %v15748_v19  ;;  %v4640_v12 = vsub.f32 0.0, %v4512_v42  ;;  %v4259_v13 = vmul.f32 100.0, %v12083_v11  ;;  %v15751_v19 = vmax.f32 %v11765_v21, 0.0 }
 0x376   : > { %4115 = vmatpush1.bf16.msra.mxu0 %v15749_v53  ;;  %4188 = vmatpush1.bf16.msra.mxu1 %v15750_v7  ;;  %vm12122_vm3 = vcmp.lt.f32.partialorder %v3250_v47, 0.0004427343  ;;  %v3241_v57 = vand.u32 2147483647, %v12061_v32  ;;  %v3253_v6 = vadd.f32 1.0, %v12109_v5  ;;  %v3231_v63 = vmul.f32 %v11982_v61, %v3230_v10 }
 0x377   : > { %v12120_v38 = vadd.f32 %v3372_v26, %v15751_v19  ;;  %v3228_v46 = vmul.f32 0.6931472, %v7756_v34  ;;  %v4768_v48 = vmul.f32 1.442695, %v4640_v12  ;;  %v4772_v42 = vmul.f32 1.442695, %v4642_v35  ;;  %v12134_v19 = vpop.permute.xlu1 %3606 }
 0x378   : > { %v3117_v62 = vsel %vm12052_vm1, %v3114_v0, %v3111_v23  ;;  %v3239_v53 = vadd.f32 1.0, %v3238_v52  ;;  %7761 = vlog2.f32 %v3253_v6  ;;  %v4641_v21 = vsub.f32 0.0, %v4513_v25  ;;  %15754 = vst [vmem:[#allocation47_spill] sm:$0xff] %v12134_v19  ;;  %v12140_v0 = vld [vmem:[%s14932_s3 + $0x10] sm:$0xff]  }
 0x379   : > { %v3234_v26 = vsel %vm12086_vm2, %v3231_v63, %v3228_v46  ;;  %v3249_v47 = vmul.f32 %v12042_v18, %v3248_v54  ;;  %7763 = vpow2.f32 %v4768_v48  ;;  %v4515_v7 = vand.u32 2147483647, %v4259_v13  ;;  %v7758_v12 = vpop.eup %7757  ;;  %v12161_v13 = vpop.f32.mrb[75].mxu0 }
 0x37a   : > { %v3387_v34 = vmul.f32 0.01, %v3234_v26  ;;  %v3256_v61 = vmul.f32 -0.5, %v12109_v5  ;;  %7765 = vpow2.f32 %v4772_v42  ;;  %v4770_v10 = vmul.f32 1.442695, %v4641_v21 }
 0x37b   : > { %v3374_v16 = vmul.f32 0.01, %v3117_v62  ;;  %7161 = vmatmul.mubr.msk.bf16.gmra.mrb[104].mxu0 %vm3659_vm12, %v12140_v0  ;;  %7165 = vmatmul.mubr.msk.bf16.gmra.mrb[104].mxu1 %vm3659_vm12, %v12140_v0  ;;  %v4643_v18 = vsub.f32 0.0, %v4515_v7  ;;  %v12148_v36 = vadd.f32 %v11913_v39, %v12134_v19  ;;  %v12152_v23 = vadd.f32 %v11924_v37, %v12134_v19 }
 0x37c   : > { %v15755_v52 = vmax.f32 %v11817_v1, 0.0  ;;  %v3246_v54 = vmul.f32 0.6931472, %v7758_v12  ;;  %v3240_v35 = vmul.f32 %v12061_v32, %v3239_v53  ;;  %4026 = vmatprep.mubr.bf16.mxu0 %v15740_v50  ;;  %4099 = vmatprep.mubr.bf16.mxu1 %v15740_v50  ;;  %7767 = vpow2.f32 %v4770_v10  ;;  %v7760_v39 = vpop.eup %7759  ;;  %v12178_v10 = vpop.f32.mrb[75].mxu1  ;;  %v15757_v12 = vld [vmem:[#allocation50_spill] sm:$0xff] }
 0x37d   : > { %v4774_v6 = vmul.f32 1.442695, %v4643_v18  ;;  %v4272_v46 = vmul.f32 100.0, %v12148_v36  ;;  %v4274_v37 = vmul.f32 100.0, %v12152_v23  ;;  %v12167_v1 = vadd.f32 %v11926_v15, %v12134_v19 }
 0x37e   : > { %v12156_v25 = vadd.f32 %v3387_v34, %v15755_v52  ;;  %v3252_v63 = vsel %vm12122_vm3, %v3249_v47, %v3246_v54  ;;  %v3237_v48 = vmul.f32 0.6931472, %v7760_v39  ;;  %v3257_v42 = vadd.f32 1.0, %v3256_v61  ;;  %v15756_v34 = vld [vmem:[#allocation7_spill] sm:$0xff] }
 0x37f   : > { %v3389_v62 = vmul.f32 0.01, %v3252_v63  ;;  %vm3242_vm4 = vcmp.lt.f32.partialorder %v3241_v57, 0.0004427343  ;;  %7769 = vpow2.f32 %v4774_v6  ;;  %v4528_v53 = vand.u32 2147483647, %v4272_v46 }
 0x380   : > { %v3587_v32 = vpack.c.bf16 %v12156_v25, %v12065_v44  ;;  %v3243_v21 = vsel %vm3242_vm4, %v3240_v35, %v3237_v48  ;;  %v3259_v26 = vand.u32 2147483647, %v12109_v5  ;;  %v4530_v7 = vand.u32 2147483647, %v4274_v37  ;;  %v12200_v46 = vld [vmem:[%s14932_s3 + $0x18] sm:$0xff]  }
 0x381   : > { %v12176_v15 = vadd.f32 %v15756_v34, %v12134_v19  ;;  %v12182_v44 = vadd.f32 %v3389_v62, %v1596_v60  ;;  %v3388_v59 = vmul.f32 0.01, %v3243_v21  ;;  %v4384_v47 = vmax.f32 %v12032_v9, 0.0  ;;  %v12214_v62 = vpop.f32.mrb[76].mxu0 }
 0x382   : > { %v4273_v57 = vmul.f32 100.0, %v12167_v1  ;;  %v7762_v61 = vpop.eup %7761  ;;  %v15758_v18 = vmax.f32 %v15757_v12, 0.0  ;;  %v3258_v25 = vmul.f32 %v12109_v5, %v3257_v42  ;;  %v4386_v54 = vmax.f32 %v12036_v58, 0.0 }
 0x383   : > { %v4385_v35 = vmax.f32 %v12040_v33, 0.0  ;;  %v12191_v39 = vpop.eup %7763  ;;  %v3589_v51 = vpack.c.bf16 %v12182_v44, %v12104_v20  ;;  %v3516_v60 = vadd.f32 %v3388_v59, %v1595_v28  ;;  %v3255_v6 = vmul.f32 0.6931472, %v7762_v61  ;;  %7162 = vmatmul.mubr.msk.bf16.gmra.mrb[108].mxu0 %vm3659_vm12, %v12200_v46  ;;  %7166 = vmatmul.mubr.msk.bf16.gmra.mrb[108].mxu1 %vm3659_vm12, %v12200_v46  ;;  %v12220_v44 = vpop.permute.xlu0 %3611 }
 0x384   : > { %v3502_v52 = vadd.f32 %v3374_v16, %v15758_v18  ;;  %v4656_v5 = vsub.f32 0.0, %v4528_v53  ;;  %v12206_v16 = vpop.eup %7765  ;;  %vm3260_vm5 = vcmp.lt.f32.partialorder %v3259_v26, 0.0004427343  ;;  %4142 = vmatprep.mubr.bf16.mxu0 %v15740_v50  ;;  %4215 = vmatprep.mubr.bf16.mxu1 %v15740_v50  ;;  %v5024_v27 = vadd.f32 1.0, %v12191_v39  ;;  %15759 = vst [vmem:[#allocation52_spill] sm:$0xff] %v12220_v44 }
 0x385   : > { %v4658_v28 = vsub.f32 0.0, %v4530_v7  ;;  %v4275_v20 = vmul.f32 100.0, %v12176_v15  ;;  %v3261_v37 = vsel %vm3260_vm5, %v3258_v25, %v3255_v6  ;;  %v3588_v63 = vpack.c.bf16 %v3516_v60, %v12120_v38 }
 0x386   : > { %v5042_v48 = vadd.f32 1.0, %v12206_v16  ;;  %v4529_v42 = vand.u32 2147483647, %v4273_v57  ;;  %v12216_v53 = vpop.eup %7767  ;;  %v3390_v21 = vmul.f32 0.01, %v3261_v37  ;;  %7771 = vlog2.f32 %v5024_v27 }
 0x387   : > { %4116 = vmatprep.subr.bf16.mxu0 %v3588_v63  ;;  %v5033_v7 = vadd.f32 1.0, %v12216_v53  ;;  %v4800_v38 = vmul.f32 1.442695, %v4656_v5  ;;  %v15760_v57 = vmax.f32 %v11918_v14, 0.0  ;;  %v5027_v12 = vmul.f32 -0.5, %v12191_v39 }
 0x388   : > { %7773 = vlog2.f32 %v5042_v48  ;;  %4117 = vmatpush1.bf16.msra.mxu0 %v3587_v32  ;;  %v4531_v18 = vand.u32 2147483647, %v4275_v20  ;;  %v12229_v25 = vadd.f32 %v11955_v31, %v12220_v44  ;;  %v5045_v6 = vmul.f32 -0.5, %v12206_v16 }
 0x389   : > { %v3518_v61 = vadd.f32 %v3390_v21, %v15760_v57  ;;  %v12231_v60 = vpop.eup %7769  ;;  %7775 = vlog2.f32 %v5033_v7  ;;  %v4804_v27 = vmul.f32 1.442695, %v4658_v28  ;;  %v4657_v5 = vsub.f32 0.0, %v4529_v42 }
 0x38a   : > { %v5051_v63 = vadd.f32 1.0, %v12231_v60  ;;  %v5030_v31 = vand.u32 2147483647, %v12191_v39  ;;  %v5036_v20 = vmul.f32 -0.5, %v12216_v53  ;;  %7777 = vpow2.f32 %v4800_v38 }
 0x38b   : > { %v3590_v37 = vpack.c.bf16 %v3518_v61, %v3502_v52  ;;  %7167 = vmatmul.mubr.msk.bf16.vlgmr.msra.gmra.mrb[112].mxu0 %vm3659_vm12, %v12008_v40  ;;  %v4802_v48 = vmul.f32 1.442695, %v4657_v5  ;;  %v5048_v52 = vand.u32 2147483647, %v12206_v16  ;;  %v4659_v28 = vsub.f32 0.0, %v4531_v18  ;;  %v12245_v61 = vpop.f32.mrb[76].mxu1 }
 0x38c   : > { %4152 = vmatprep.mubr.bf16.mxu0 %v15740_v50  ;;  %7779 = vlog2.f32 %v5051_v63  ;;  %v4288_v42 = vmul.f32 100.0, %v12229_v25  ;;  %v5028_v21 = vadd.f32 1.0, %v5027_v12  ;;  %v5046_v7 = vadd.f32 1.0, %v5045_v6 }
 0x38d   : > { %4189 = vmatprep.subr.bf16.mxu1 %v3590_v37  ;;  %v5054_v57 = vmul.f32 -0.5, %v12231_v60  ;;  %7781 = vpow2.f32 %v4804_v27  ;;  %v4806_v38 = vmul.f32 1.442695, %v4659_v28  ;;  %v12249_v37 = vadd.f32 %v11957_v30, %v12220_v44  ;;  %v12260_v27 = vpop.permute.xlu0 %3621 }
 0x38e   : > { %4190 = vmatpush1.bf16.msra.mxu1 %v3589_v51  ;;  %7783 = vpow2.f32 %v4802_v48  ;;  %v4544_v5 = vand.u32 2147483647, %v4288_v42  ;;  %vm12251_vm6 = vcmp.lt.f32.partialorder %v5030_v31, 0.0004427343  ;;  %v5037_v18 = vadd.f32 1.0, %v5036_v20  ;;  %15763 = vst [vmem:[#allocation20_spill] sm:$0xff] %v12260_v27 }
 0x38f   : > { %v5039_v51 = vand.u32 2147483647, %v12216_v53  ;;  %v12258_v12 = vadd.f32 %v11964_v2, %v12220_v44  ;;  %vm12264_vm7 = vcmp.lt.f32.partialorder %v5048_v52, 0.0004427343  ;;  %7785 = vpow2.f32 %v4806_v38  ;;  %v12272_v48 = vpop.f32.mrb[77].mxu0 }
 0x390   : > { %v7772_v6 = vpop.eup %7771  ;;  %v4672_v31 = vsub.f32 0.0, %v4544_v5  ;;  %v12270_v20 = vadd.f32 %v11966_v49, %v12220_v44  ;;  %v5029_v42 = vmul.f32 %v12191_v39, %v5028_v21  ;;  %v5055_v32 = vadd.f32 1.0, %v5054_v57  ;;  %v12307_v34 = vpop.f32.mrb[78].mxu0 }
 0x391   : > { %7171 = vmatmul.mubr.msk.bf16.vlgmr.msra.gmra.mrb[112].mxu1 %vm3659_vm12, %v12008_v40  ;;  %v5026_v28 = vmul.f32 0.6931472, %v7772_v6  ;;  %v5057_v40 = vand.u32 2147483647, %v12231_v60  ;;  %v5047_v14 = vmul.f32 %v12206_v16, %v5046_v7  ;;  %v4290_v5 = vmul.f32 100.0, %v12249_v37 }
 0x392   : > { %v7774_v2 = vpop.eup %7773  ;;  %4225 = vmatprep.mubr.bf16.mxu1 %v15740_v50  ;;  %v4832_v38 = vmul.f32 1.442695, %v4672_v31  ;;  %v5038_v6 = vmul.f32 %v12216_v53, %v5037_v18  ;;  %vm12284_vm8 = vcmp.lt.f32.partialorder %v5039_v51, 0.0004427343  ;;  %v4289_v21 = vmul.f32 100.0, %v12258_v12  ;;  %v12293_v31 = vpop.f32.mrb[77].mxu1 }
 0x393   : > { %v5044_v52 = vmul.f32 0.6931472, %v7774_v2  ;;  %v7776_v59 = vpop.eup %7775  ;;  %7168 = vmatmul.mubr.msk.bf16.gmra.mrb[116].mxu0 %vm3659_vm12, %v12094_v45  ;;  %v5032_v49 = vsel %vm12251_vm6, %v5029_v42, %v5026_v28  ;;  %v4291_v57 = vmul.f32 100.0, %v12270_v20  ;;  %v12295_v2 = vpop.permute.xlu1 %3616  ;;  %v5056_v18 = vmul.f32 %v12231_v60, %v5055_v32 }
 0x394   : > { %4162 = vmatprep.mubr.bf16.mxu0 %v15740_v50  ;;  %v5035_v7 = vmul.f32 0.6931472, %v7776_v59  ;;  %7787 = vpow2.f32 %v4832_v38  ;;  %v7778_v63 = vpop.eup %7777  ;;  %15768 = vst [vmem:[#allocation48_spill] sm:$0xff] %v12295_v2  ;;  %v6176_v53 = vmul.f32 0.01, %v5032_v49 }
 0x395   : > { %v5050_v16 = vsel %vm12264_vm7, %v5047_v14, %v5044_v52  ;;  %vm12298_vm9 = vcmp.lt.f32.partialorder %v5057_v40, 0.0004427343  ;;  %v12303_v14 = vpop.permute.xlu0 %3631  ;;  %v5168_v52 = vadd.f32 1.0, %v7778_v63  ;;  %v4546_v38 = vand.u32 2147483647, %v4290_v5 }
 0x396   : > { %v7780_v30 = vpop.eup %7779  ;;  %15771 = vst [vmem:[#allocation53_spill] sm:$0xff] %v12303_v14  ;;  %v6178_v59 = vmul.f32 0.01, %v5050_v16  ;;  %v5041_v42 = vsel %vm12284_vm8, %v5038_v6, %v5035_v7  ;;  %v5171_v32 = vmul.f32 -0.5, %v7778_v63  ;;  %v12311_v40 = vadd.f32 %v11978_v29, %v12295_v2 }
 0x397   : > { %v7782_v49 = vpop.eup %7781  ;;  %v6177_v26 = vmul.f32 0.01, %v5041_v42  ;;  %v5053_v60 = vmul.f32 0.6931472, %v7780_v30  ;;  %7789 = vlog2.f32 %v5168_v52  ;;  %v4545_v6 = vand.u32 2147483647, %v4289_v21  ;;  %v12340_v52 = vpop.permute.xlu1 %3626 }
 0x398   : > { %v12313_v28 = vpop.eup %7783  ;;  %v5186_v39 = vadd.f32 1.0, %v7782_v49  ;;  %v4547_v16 = vand.u32 2147483647, %v4291_v57  ;;  %v6304_v5 = vadd.f32 %v6176_v53, %v4384_v47  ;;  %v12325_v30 = vadd.f32 %v11980_v17, %v12295_v2  ;;  %15773 = vst [vmem:[#allocation14_spill] sm:$0xff] %v12340_v52 }
 0x399   : > { %7172 = vmatmul.mubr.msk.bf16.gmra.mrb[116].mxu1 %vm3659_vm12, %v12094_v45  ;;  %v5059_v7 = vsel %vm12298_vm9, %v5056_v18, %v5053_v60  ;;  %v12327_v42 = vpop.eup %7785  ;;  %v6306_v45 = vadd.f32 %v6178_v59, %v4386_v54  ;;  %v5189_v21 = vmul.f32 -0.5, %v7782_v49  ;;  %v4674_v57 = vsub.f32 0.0, %v4546_v38  ;;  %v12336_v17 = vpop.permute.xlu0 %6442 }
 0x39a   : > { %4235 = vmatprep.mubr.bf16.mxu1 %v15740_v50  ;;  %7791 = vlog2.f32 %v5186_v39  ;;  %v6305_v9 = vadd.f32 %v6177_v26, %v4385_v35  ;;  %v5172_v47 = vadd.f32 1.0, %v5171_v32  ;;  %v5174_v53 = vand.u32 2147483647, %v7778_v63  ;;  %15772 = vst [vmem:[#allocation21_spill] sm:$0xff] %v12336_v17  ;;  %v12346_v26 = vpop.f32.mrb[78].mxu1 }
 0x39b   : > { %7169 = vmatmul.mubr.msk.bf16.gmra.mrb[120].mxu0 %vm3659_vm12, %v12140_v0  ;;  %v5177_v18 = vadd.f32 1.0, %v12313_v28  ;;  %v6179_v51 = vmul.f32 0.01, %v5059_v7  ;;  %v5195_v58 = vadd.f32 1.0, %v12327_v42  ;;  %v4673_v54 = vsub.f32 0.0, %v4545_v6  ;;  %v12356_v7 = vpop.f32.mrb[79].mxu1 }
 0x39c   : > { %4172 = vmatprep.mubr.bf16.mxu0 %v15740_v50  ;;  %v4675_v59 = vsub.f32 0.0, %v4547_v16  ;;  %v12343_v38 = vmul.f32 %v12336_v17, %v6304_v5  ;;  %v5192_v33 = vand.u32 2147483647, %v7782_v49  ;;  %v5180_v35 = vmul.f32 -0.5, %v12313_v28  ;;  %v12354_v16 = vpop.f32.mrb[79].mxu0  ;;  %15775 = vst [vmem:[#allocation49_spill] sm:$0xff] %v12356_v7 }
 0x39d   : > { %7793 = vlog2.f32 %v5177_v18  ;;  %v12351_v32 = vmul.f32 %v12336_v17, %v6306_v45  ;;  %v5190_v39 = vadd.f32 1.0, %v5189_v21  ;;  %v5198_v6 = vmul.f32 -0.5, %v12327_v42  ;;  %15774 = vst [vmem:[#allocation54_spill] sm:$0xff] %v12354_v16 }
 0x39e   : > { %v12348_v60 = vpop.eup %7787  ;;  %7795 = vlog2.f32 %v5195_v58  ;;  %v12359_v5 = vmul.f32 %v12336_v17, %v6305_v9  ;;  %v5173_v18 = vmul.f32 %v7778_v63, %v5172_v47  ;;  %vm12361_vm10 = vcmp.lt.f32.partialorder %v5174_v53, 0.0004427343 }
 0x39f   : > { %v5312_v44 = vadd.f32 1.0, %v12348_v60  ;;  %v15778_v45 = vmax.f32 %v12083_v11, 0.0  ;;  %v5183_v58 = vand.u32 2147483647, %v12313_v28  ;;  %v4836_v19 = vmul.f32 1.442695, %v4674_v57 }
 0x3a0   : > { %v4304_v9 = vmul.f32 100.0, %v12311_v40  ;;  %vm12375_vm11 = vcmp.lt.f32.partialorder %v5192_v33, 0.0004427343  ;;  %v5181_v47 = vadd.f32 1.0, %v5180_v35  ;;  %v4834_v53 = vmul.f32 1.442695, %v4673_v54 }
 0x3a1   : > { %7173 = vmatmul.mubr.msk.bf16.gmra.mrb[120].mxu1 %vm3659_vm12, %v12140_v0  ;;  %v12370_v21 = vadd.f32 %v6179_v51, %v15778_v45  ;;  %7797 = vlog2.f32 %v5312_v44  ;;  %v7790_v55 = vpop.eup %7789  ;;  %v5191_v0 = vmul.f32 %v7782_v49, %v5190_v39  ;;  %v5199_v7 = vadd.f32 1.0, %v5198_v6  ;;  %v12379_v51 = vpop.permute.xlu1 %3636 }
 0x3a2   : > { %4245 = vmatprep.mubr.bf16.mxu1 %v15740_v50  ;;  %7799 = vpow2.f32 %v4836_v19  ;;  %v4838_v11 = vmul.f32 1.442695, %v4675_v59  ;;  %15781 = vst [vmem:[#allocation15_spill] sm:$0xff] %v12379_v51  ;;  %v5170_v57 = vmul.f32 0.6931472, %v7790_v55  ;;  %v5315_v50 = vmul.f32 -0.5, %v12348_v60 }
 0x3a3   : > { %7170 = vmatmul.mubr.msk.bf16.gmra.mrb[124].mxu0 %vm3659_vm12, %v12200_v46  ;;  %7801 = vpow2.f32 %v4834_v53  ;;  %v4560_v33 = vand.u32 2147483647, %v4304_v9  ;;  %vm12384_vm13 = vcmp.lt.f32.partialorder %v5183_v58, 0.0004427343  ;;  %v5201_v44 = vand.u32 2147483647, %v12327_v42 }
 0x3a4   : > { %v7792_v45 = vpop.eup %7791  ;;  %7803 = vpow2.f32 %v4838_v11  ;;  %v4306_v19 = vmul.f32 100.0, %v12325_v30  ;;  %v5176_v49 = vsel %vm12361_vm10, %v5173_v18, %v5170_v57  ;;  %v12394_v55 = vadd.f32 %v12000_v3, %v12295_v2 }
 0x3a5   : > { %v5188_v54 = vmul.f32 0.6931472, %v7792_v45  ;;  %v4688_v59 = vsub.f32 0.0, %v4560_v33  ;;  %v6192_v39 = vmul.f32 0.01, %v5176_v49  ;;  %v5182_v6 = vmul.f32 %v12313_v28, %v5181_v47 }
 0x3a6   : > { %v5318_v58 = vand.u32 2147483647, %v12348_v60  ;;  %v4562_v9 = vand.u32 2147483647, %v4306_v19  ;;  %v5200_v16 = vmul.f32 %v12327_v42, %v5199_v7  ;;  %v5316_v29 = vadd.f32 1.0, %v5315_v50  ;;  %v12409_v19 = vpop.permute.xlu1 %6447 }
 0x3a7   : > { %v7794_v53 = vpop.eup %7793  ;;  %v5194_v11 = vsel %vm12375_vm11, %v5191_v0, %v5188_v54  ;;  %v4864_v18 = vmul.f32 1.442695, %v4688_v59  ;;  %v15784_v3 = vmax.f32 %v12148_v36, 0.0  ;;  %vm12405_vm14 = vcmp.lt.f32.partialorder %v5201_v44, 0.0004427343  ;;  %15787 = vst [vmem:[#allocation8_spill] sm:$0xff] %v12409_v19  ;;  %v12451_v44 = vpop.permute.xlu0 %6452 }
 0x3a8   : > { %v7796_v57 = vpop.eup %7795  ;;  %v6194_v45 = vmul.f32 0.01, %v5194_v11  ;;  %v5179_v28 = vmul.f32 0.6931472, %v7794_v53  ;;  %v4690_v42 = vsub.f32 0.0, %v4562_v9  ;;  %v4305_v7 = vmul.f32 100.0, %v12394_v55 }
 0x3a9   : > { %7174 = vmatmul.mubr.msk.bf16.gmra.mrb[124].mxu1 %vm3659_vm12, %v12200_v46  ;;  %v6320_v33 = vadd.f32 %v6192_v39, %v15784_v3  ;;  %v5197_v63 = vmul.f32 0.6931472, %v7796_v57  ;;  %7805 = vpow2.f32 %v4864_v18  ;;  %v15788_v46 = vmax.f32 %v12152_v23, 0.0  ;;  %15794 = vst [vmem:[#allocation9_spill] sm:$0xff] %v12451_v44 }
 0x3aa   : > { %v5185_v36 = vsel %vm12384_vm13, %v5182_v6, %v5179_v28  ;;  %vm12417_vm12 = vcmp.lt.f32.partialorder %v5318_v58, 0.0004427343  ;;  %v5317_v39 = vmul.f32 %v12348_v60, %v5316_v29  ;;  %v12426_v9 = vadd.f32 %v12002_v4, %v12295_v2 }
 0x3ab   : > { %v6496_v0 = vmul.f32 %v12409_v19, %v6320_v33  ;;  %v6322_v50 = vadd.f32 %v6194_v45, %v15788_v46  ;;  %v7798_v49 = vpop.eup %7797  ;;  %v6193_v54 = vmul.f32 0.01, %v5185_v36  ;;  %v5203_v59 = vsel %vm12405_vm14, %v5200_v16, %v5197_v63 }
 0x3ac   : > { %v7800_v23 = vpop.eup %7799  ;;  %v6195_v6 = vmul.f32 0.01, %v5203_v59  ;;  %v5314_v58 = vmul.f32 0.6931472, %v7798_v49  ;;  %v15791_v18 = vmax.f32 %v12167_v1, 0.0  ;;  %v15792_v4 = vmax.f32 %v12176_v15, 0.0 }
 0x3ad   : > { %v6608_v53 = vadd.f32 %v6496_v0, %v12343_v38  ;;  %v6498_v35 = vmul.f32 %v12409_v19, %v6322_v50  ;;  %v7802_v11 = vpop.eup %7801  ;;  %v5330_v3 = vadd.f32 1.0, %v7800_v23  ;;  %v4868_v33 = vmul.f32 1.442695, %v4690_v42 }
 0x3ae   : > { %v6321_v57 = vadd.f32 %v6193_v54, %v15791_v18  ;;  %v4561_v16 = vand.u32 2147483647, %v4305_v7  ;;  %v12432_v45 = vpop.eup %7803  ;;  %v6323_v29 = vadd.f32 %v6195_v6, %v15792_v4  ;;  %v5320_v38 = vsel %vm12417_vm12, %v5317_v39, %v5314_v58 }
 0x3af   : > { %v12435_v60 = vadd.f32 %v6498_v35, %v12351_v32  ;;  %v5321_v28 = vadd.f32 1.0, %v7802_v11  ;;  %v6208_v63 = vmul.f32 0.01, %v5320_v38  ;;  %7807 = vlog2.f32 %v5330_v3 }
 0x3b0   : > { %v6497_v47 = vmul.f32 %v12409_v19, %v6321_v57  ;;  %v5333_v1 = vmul.f32 -0.5, %v7800_v23  ;;  %v6483_v42 = vmul.f32 %v12336_v17, %v12370_v21  ;;  %v6499_v7 = vmul.f32 %v12409_v19, %v6323_v29 }
 0x3b1   : > { %v4417_v32 = vmax.f32 %v12258_v12, 0.0  ;;  %7809 = vlog2.f32 %v5321_v28  ;;  %v15793_v0 = vmax.f32 %v12229_v25, 0.0  ;;  %v5336_v50 = vand.u32 2147483647, %v7800_v23 }
 0x3b2   : > { %v12447_v15 = vadd.f32 %v6497_v47, %v12359_v5  ;;  %v5324_v36 = vmul.f32 -0.5, %v7802_v11  ;;  %v12453_v49 = vadd.f32 %v6499_v7, %v6483_v42  ;;  %v5339_v54 = vadd.f32 1.0, %v12432_v45 }
 0x3b3   : > { %v6336_v46 = vadd.f32 %v6208_v63, %v15793_v0  ;;  %v4689_v21 = vsub.f32 0.0, %v4561_v16  ;;  %v4307_v59 = vmul.f32 100.0, %v12426_v9  ;;  %v7806_v39 = vpop.eup %7805  ;;  %v5334_v6 = vadd.f32 1.0, %v5333_v1 }
 0x3b4   : > { %7811 = vpow2.f32 %v4868_v33  ;;  %v12460_v25 = vadd.f32 %v12046_v24, %v12260_v27  ;;  %v4419_v5 = vmax.f32 %v12270_v20, 0.0  ;;  %v4432_v58 = vmax.f32 %v12311_v40, 0.0 }
 0x3b5   : > { %v6512_v35 = vmul.f32 %v12451_v44, %v6336_v46  ;;  %7813 = vlog2.f32 %v5339_v54  ;;  %v5456_v18 = vadd.f32 1.0, %v7806_v39  ;;  %vm12466_vm15 = vcmp.lt.f32.partialorder %v5336_v50, 0.0004427343 }
 0x3b6   : > { %v5325_v16 = vadd.f32 1.0, %v5324_v36  ;;  %v5327_v4 = vand.u32 2147483647, %v7802_v11  ;;  %v5342_v33 = vmul.f32 -0.5, %v12432_v45  ;;  %v4866_v29 = vmul.f32 1.442695, %v4689_v21 }
 0x3b7   : > { %v12464_v57 = vadd.f32 %v6608_v53, %v6512_v35  ;;  %7815 = vlog2.f32 %v5456_v18  ;;  %v4563_v24 = vand.u32 2147483647, %v4307_v59  ;;  %v5335_v38 = vmul.f32 %v7800_v23, %v5334_v6 }
 0x3b8   : > { %v5345_v28 = vand.u32 2147483647, %v12432_v45  ;;  %v5459_v47 = vmul.f32 -0.5, %v7806_v39  ;;  %v4320_v63 = vmul.f32 100.0, %v12460_v25  ;;  %7817 = vpow2.f32 %v4866_v29 }
 0x3b9   : > { %v4691_v53 = vsub.f32 0.0, %v4563_v24  ;;  %v12475_v1 = vadd.f32 %v12048_v22, %v12260_v27  ;;  %v12479_v42 = vadd.f32 %v12059_v43, %v12260_v27  ;;  %v7808_v7 = vpop.eup %7807  ;;  %v5326_v0 = vmul.f32 %v7802_v11, %v5325_v16 }
 0x3ba   : > { %vm12481_vm0 = vcmp.lt.f32.partialorder %v5327_v4, 0.0004427343  ;;  %v5462_v23 = vand.u32 2147483647, %v7806_v39  ;;  %v4576_v50 = vand.u32 2147483647, %v4320_v63  ;;  %v12526_v6 = vadd.f32 %v12077_v56, %v12340_v52 }
 0x3bb   : > { %v7810_v36 = vpop.eup %7809  ;;  %v5332_v54 = vmul.f32 0.6931472, %v7808_v7  ;;  %v5343_v21 = vadd.f32 1.0, %v5342_v33  ;;  %v4870_v59 = vmul.f32 1.442695, %v4691_v53  ;;  %v4322_v35 = vmul.f32 100.0, %v12475_v1 }
 0x3bc   : > { %v5323_v22 = vmul.f32 0.6931472, %v7810_v36  ;;  %vm12486_vm1 = vcmp.lt.f32.partialorder %v5345_v28, 0.0004427343  ;;  %v4704_v43 = vsub.f32 0.0, %v4576_v50  ;;  %v4321_v11 = vmul.f32 100.0, %v12479_v42 }
 0x3bd   : > { %v5338_v18 = vsel %vm12466_vm15, %v5335_v38, %v5332_v54  ;;  %v5460_v16 = vadd.f32 1.0, %v5459_v47  ;;  %7819 = vpow2.f32 %v4870_v59  ;;  %v4578_v4 = vand.u32 2147483647, %v4322_v35 }
 0x3be   : > { %v12493_v29 = vpop.eup %7811  ;;  %v6210_v33 = vmul.f32 0.01, %v5338_v18  ;;  %v5329_v24 = vsel %vm12481_vm0, %v5326_v0, %v5323_v22  ;;  %vm12497_vm2 = vcmp.lt.f32.partialorder %v5462_v23, 0.0004427343  ;;  %v4896_v63 = vmul.f32 1.442695, %v4704_v43 }
 0x3bf   : > { %v7814_v53 = vpop.eup %7813  ;;  %v6209_v7 = vmul.f32 0.01, %v5329_v24  ;;  %v5344_v50 = vmul.f32 %v12432_v45, %v5343_v21  ;;  %v5474_v3 = vadd.f32 1.0, %v12493_v29  ;;  %v4577_v38 = vand.u32 2147483647, %v4321_v11 }
 0x3c0   : > { %v15803_v47 = vmax.f32 %v12249_v37, 0.0  ;;  %v5341_v54 = vmul.f32 0.6931472, %v7814_v53  ;;  %7821 = vpow2.f32 %v4896_v63  ;;  %v4706_v59 = vsub.f32 0.0, %v4578_v4 }
 0x3c1   : > { %v7816_v46 = vpop.eup %7815  ;;  %v6337_v0 = vadd.f32 %v6209_v7, %v4417_v32  ;;  %v5461_v23 = vmul.f32 %v7806_v39, %v5460_v16  ;;  %7823 = vlog2.f32 %v5474_v3  ;;  %v12509_v35 = vadd.f32 %v12075_v8, %v12260_v27 }
 0x3c2   : > { %v6338_v36 = vadd.f32 %v6210_v33, %v15803_v47  ;;  %v5347_v21 = vsel %vm12486_vm1, %v5344_v50, %v5341_v54  ;;  %v5458_v37 = vmul.f32 0.6931472, %v7816_v46  ;;  %v5477_v22 = vmul.f32 -0.5, %v12493_v29  ;;  %v12515_v43 = vpop.eup %7817  ;;  %v12537_v50 = vpop.permute.xlu1 %6457 }
 0x3c3   : > { %v6513_v11 = vmul.f32 %v12451_v44, %v6337_v0  ;;  %v6211_v12 = vmul.f32 0.01, %v5347_v21  ;;  %v4900_v32 = vmul.f32 1.442695, %v4706_v59  ;;  %v4705_v39 = vsub.f32 0.0, %v4577_v38 }
 0x3c4   : > { %v6514_v45 = vmul.f32 %v12451_v44, %v6338_v36  ;;  %v5464_v8 = vsel %vm12497_vm2, %v5461_v23, %v5458_v37  ;;  %v5465_v16 = vadd.f32 1.0, %v12515_v43  ;;  %v4323_v63 = vmul.f32 100.0, %v12509_v35 }
 0x3c5   : > { %v12529_v4 = vadd.f32 %v12447_v15, %v6513_v11  ;;  %v6339_v33 = vadd.f32 %v6211_v12, %v4419_v5  ;;  %v6224_v24 = vmul.f32 0.01, %v5464_v8  ;;  %v5480_v53 = vand.u32 2147483647, %v12493_v29  ;;  %v12550_v59 = vpop.f32.mrb[80].mxu1 }
 0x3c6   : > { %v12519_v18 = vadd.f32 %v12435_v60, %v6514_v45  ;;  %v5478_v60 = vadd.f32 1.0, %v5477_v22  ;;  %7825 = vlog2.f32 %v5465_v16  ;;  %v4898_v28 = vmul.f32 1.442695, %v4705_v39  ;;  %v12548_v54 = vpop.f32.mrb[80].mxu0  ;;  %v12558_v23 = vpop.f32.mrb[81].mxu1 }
 0x3c7   : > { %v12535_v7 = vpop.eup %7819  ;;  %v6515_v56 = vmul.f32 %v12451_v44, %v6339_v33  ;;  %v6352_v15 = vadd.f32 %v6224_v24, %v4432_v58  ;;  %v5468_v20 = vmul.f32 -0.5, %v12515_v43  ;;  %7827 = vpow2.f32 %v4900_v32  ;;  %v12556_v0 = vpop.f32.mrb[81].mxu0 }
 0x3c8   : > { %v8348_v5 = vmov 1966171168   ;;  %v5471_v38 = vand.u32 2147483647, %v12515_v43  ;;  %v5483_v47 = vadd.f32 1.0, %v12535_v7  ;;  %v5486_v36 = vmul.f32 -0.5, %v12535_v7 }
 0x3c9   : > { %v12543_v3 = vunpack.c.l.s4 %v8348_v5  ;;  %v12553_v46 = vadd.f32 %v12453_v49, %v6515_v56  ;;  %v6528_v40 = vmul.f32 %v12537_v50, %v6352_v15  ;;  %7829 = vpow2.f32 %v4898_v28  ;;  %v12565_v11 = vpop.f32.mrb[82].mxu0  ;;  %v12567_v49 = vpop.f32.mrb[82].mxu1 }
 0x3ca   : > { %v4579_v58 = vand.u32 2147483647, %v4323_v63  ;;  %v12560_v45 = vpop.eup %7821  ;;  %v4434_v21 = vmax.f32 %v12325_v30, 0.0  ;;  %7831 = vlog2.f32 %v5483_v47  ;;  %v4336_v22 = vmul.f32 100.0, %v12526_v6  ;;  %v12578_v16 = vpop.f32.mrb[83].mxu0 }
 0x3cb   : > { %v7824_v12 = vpop.eup %7823  ;;  %v12570_v32 = vadd.f32 %v12464_v57, %v6528_v40  ;;  %vm12572_vm3 = vcmp.lt.f32.partialorder %v5480_v53, 0.0004427343  ;;  %v5600_v30 = vadd.f32 1.0, %v12560_v45  ;;  %v12580_v33 = vpop.f32.mrb[83].mxu1  ;;  %v5479_v63 = vmul.f32 %v12493_v29, %v5478_v60 }
 0x3cc   : > { %v5476_v24 = vmul.f32 0.6931472, %v7824_v12  ;;  %v5469_v28 = vadd.f32 1.0, %v5468_v20  ;;  %v4707_v56 = vsub.f32 0.0, %v4579_v58  ;;  %vm12583_vm4 = vcmp.lt.f32.partialorder %v5471_v38, 0.0004427343 }
 0x3cd   : > { %v5487_v53 = vadd.f32 1.0, %v5486_v36  ;;  %7833 = vlog2.f32 %v5600_v30  ;;  %v4592_v15 = vand.u32 2147483647, %v4336_v22  ;;  %v12591_v40 = vadd.f32 %v12100_v41, %v12340_v52  ;;  %v12604_v30 = vpop.f32.mrb[84].mxu1 }
 0x3ce   : > { %v5482_v5 = vsel %vm12572_vm3, %v5479_v63, %v5476_v24  ;;  %v4902_v47 = vmul.f32 1.442695, %v4707_v56  ;;  %v12595_v29 = vadd.f32 %v12161_v13, %v12340_v52  ;;  %v5489_v20 = vand.u32 2147483647, %v12535_v7  ;;  %v12602_v41 = vpop.f32.mrb[84].mxu0 }
 0x3cf   : > { %v6226_v60 = vmul.f32 0.01, %v5482_v5  ;;  %v4720_v36 = vsub.f32 0.0, %v4592_v15  ;;  %v5603_v22 = vmul.f32 -0.5, %v12560_v45  ;;  %v4338_v12 = vmul.f32 100.0, %v12591_v40  ;;  %v12609_v15 = vpop.f32.mrb[85].mxu0 }
 0x3d0   : > { %v7826_v58 = vpop.eup %7825  ;;  %7835 = vpow2.f32 %v4902_v47  ;;  %v4337_v39 = vmul.f32 100.0, %v12595_v29  ;;  %v5470_v56 = vmul.f32 %v12515_v43, %v5469_v28  ;;  %v5488_v38 = vmul.f32 %v12535_v7, %v5487_v53  ;;  %v12619_v43 = vpop.f32.mrb[85].mxu1 }
 0x3d1   : > { %v12606_v13 = vpop.eup %7827  ;;  %v6354_v24 = vadd.f32 %v6226_v60, %v4434_v21  ;;  %v5467_v63 = vmul.f32 0.6931472, %v7826_v58  ;;  %v4928_v5 = vmul.f32 1.442695, %v4720_v36  ;;  %v5606_v47 = vand.u32 2147483647, %v12560_v45 }
 0x3d2   : > { %v5618_v8 = vadd.f32 1.0, %v12606_v13  ;;  %v4594_v37 = vand.u32 2147483647, %v4338_v12  ;;  %v4593_v60 = vand.u32 2147483647, %v4337_v39  ;;  %v12621_v28 = vpop.f32.mrb[86].mxu0  ;;  %v12625_v58 = vadd.f32 %v12178_v10, %v12340_v52 }
 0x3d3   : > { %v12614_v44 = vpop.eup %7829  ;;  %v6530_v27 = vmul.f32 %v12537_v50, %v6354_v24  ;;  %v5473_v21 = vsel %vm12583_vm4, %v5470_v56, %v5467_v63  ;;  %7837 = vpow2.f32 %v4928_v5  ;;  %15808 = vst [vmem:[#allocation58_spill] sm:$0xff] %v12621_v28  ;;  %v5604_v53 = vadd.f32 1.0, %v5603_v22  ;;  %v12627_v12 = vpop.f32.mrb[86].mxu1 }
 0x3d4   : > { %v7832_v36 = vpop.eup %7831  ;;  %v6225_v7 = vmul.f32 0.01, %v5473_v21  ;;  %7839 = vlog2.f32 %v5618_v8  ;;  %15809 = vst [vmem:[#allocation17_spill] sm:$0xff] %v12627_v12  ;;  %v5621_v39 = vmul.f32 -0.5, %v12606_v13  ;;  %v5609_v63 = vadd.f32 1.0, %v12614_v44  ;;  %v12634_v56 = vpop.f32.mrb[87].mxu0 }
 0x3d5   : > { %v12630_v24 = vadd.f32 %v12519_v18, %v6530_v27  ;;  %v5485_v57 = vmul.f32 0.6931472, %v7832_v36  ;;  %15810 = vst [vmem:[#allocation16_spill] sm:$0xff] %v12634_v56  ;;  %v12636_v5 = vpop.f32.mrb[87].mxu1  ;;  %v15812_v8 = vmax.f32 %v12394_v55, 0.0  ;;  %v4450_v10 = vmax.f32 %v12475_v1, 0.0 }
 0x3d6   : > { %15811 = vst [vmem:[#allocation13_spill] sm:$0xff] %v12636_v5  ;;  %vm5490_vm5 = vcmp.lt.f32.partialorder %v5489_v20, 0.0004427343  ;;  %v4722_v21 = vsub.f32 0.0, %v4594_v37  ;;  %v4449_v27 = vmax.f32 %v12479_v42, 0.0  ;;  %7841 = vlog2.f32 %v5609_v63 }
 0x3d7   : > { %v6353_v22 = vadd.f32 %v6225_v7, %v15812_v8  ;;  %v7834_v52 = vpop.eup %7833  ;;  %v5491_v19 = vsel %vm5490_vm5, %v5488_v38, %v5485_v57  ;;  %v4721_v18 = vsub.f32 0.0, %v4593_v60  ;;  %v5605_v56 = vmul.f32 %v12560_v45, %v5604_v53 }
 0x3d8   : > { %v6227_v12 = vmul.f32 0.01, %v5491_v19  ;;  %v5602_v28 = vmul.f32 0.6931472, %v7834_v52  ;;  %vm5607_vm6 = vcmp.lt.f32.partialorder %v5606_v47, 0.0004427343 }
 0x3d9   : > { %v6529_v36 = vmul.f32 %v12537_v50, %v6353_v22  ;;  %v5622_v5 = vadd.f32 1.0, %v5621_v39  ;;  %v4932_v55 = vmul.f32 1.442695, %v4722_v21  ;;  %v4339_v20 = vmul.f32 100.0, %v12625_v58  ;;  %v12664_v21 = vpop.permute.xlu0 %6462 }
 0x3da   : > { %v7836_v7 = vpop.eup %7835  ;;  %v15813_v37 = vmax.f32 %v12426_v9, 0.0  ;;  %v5608_v57 = vsel %vm5607_vm6, %v5605_v56, %v5602_v28  ;;  %v5612_v60 = vmul.f32 -0.5, %v12614_v44  ;;  %v4451_v52 = vmax.f32 %v12509_v35, 0.0  ;;  %v12662_v56 = vpop.f32.mrb[88].mxu0  ;;  %15815 = vst [vmem:[#allocation18_spill] sm:$0xff] %v12664_v21 }
 0x3db   : > { %v12646_v1 = vadd.f32 %v12529_v4, %v6529_v36  ;;  %v6240_v63 = vmul.f32 0.01, %v5608_v57  ;;  %v5627_v19 = vadd.f32 1.0, %v7836_v7  ;;  %v4930_v45 = vmul.f32 1.442695, %v4721_v18 }
 0x3dc   : > { %v6355_v38 = vadd.f32 %v6227_v12, %v15813_v37  ;;  %v5624_v53 = vand.u32 2147483647, %v12606_v13  ;;  %7843 = vpow2.f32 %v4932_v55  ;;  %v4595_v39 = vand.u32 2147483647, %v4339_v20 }
 0x3dd   : > { %v12654_v8 = vpop.eup %7837  ;;  %v15814_v4 = vmax.f32 %v12460_v25, 0.0  ;;  %7845 = vlog2.f32 %v5627_v19  ;;  %v5630_v28 = vmul.f32 -0.5, %v7836_v7  ;;  %v12660_v12 = vadd.f32 %v12214_v62, %v12303_v14 }
 0x3de   : > { %v6531_v47 = vmul.f32 %v12537_v50, %v6355_v38  ;;  %v7840_v22 = vpop.eup %7839  ;;  %v5623_v36 = vmul.f32 %v12606_v13, %v5622_v5  ;;  %v5613_v55 = vadd.f32 1.0, %v5612_v60  ;;  %v5744_v25 = vadd.f32 1.0, %v12654_v8 }
 0x3df   : > { %v6368_v9 = vadd.f32 %v6240_v63, %v15814_v4  ;;  %v5620_v37 = vmul.f32 0.6931472, %v7840_v22  ;;  %v5615_v38 = vand.u32 2147483647, %v12614_v44  ;;  %7847 = vpow2.f32 %v4930_v45  ;;  %v12673_v63 = vpop.f32.mrb[88].mxu1 }
 0x3e0   : > { %v12667_v18 = vadd.f32 %v12553_v46, %v6531_v47  ;;  %vm5625_vm7 = vcmp.lt.f32.partialorder %v5624_v53, 0.0004427343  ;;  %v5633_v62 = vand.u32 2147483647, %v7836_v7  ;;  %7849 = vlog2.f32 %v5744_v25  ;;  %v7842_v19 = vpop.eup %7841 }
 0x3e1   : > { %v6544_v20 = vmul.f32 %v12664_v21, %v6368_v9  ;;  %v4723_v57 = vsub.f32 0.0, %v4595_v39  ;;  %v5626_v13 = vsel %vm5625_vm7, %v5623_v36, %v5620_v37  ;;  %v5631_v5 = vadd.f32 1.0, %v5630_v28  ;;  %v12686_v28 = vpop.f32.mrb[89].mxu0 }
 0x3e2   : > { %v4352_v60 = vmul.f32 100.0, %v12660_v12  ;;  %v6242_v47 = vmul.f32 0.01, %v5626_v13  ;;  %v5611_v4 = vmul.f32 0.6931472, %v7842_v19  ;;  %v5614_v9 = vmul.f32 %v12614_v44, %v5613_v55 }
 0x3e3   : > { %v12676_v46 = vadd.f32 %v12570_v32, %v6544_v20  ;;  %v4934_v22 = vmul.f32 1.442695, %v4723_v57  ;;  %vm5616_vm8 = vcmp.lt.f32.partialorder %v5615_v38, 0.0004427343  ;;  %v5747_v45 = vmul.f32 -0.5, %v12654_v8 }
 0x3e4   : > { %v4608_v53 = vand.u32 2147483647, %v4352_v60  ;;  %v12683_v39 = vadd.f32 %v12245_v61, %v12303_v14  ;;  %v6370_v25 = vadd.f32 %v6242_v47, %v4450_v10  ;;  %v5617_v32 = vsel %vm5616_vm8, %v5614_v9, %v5611_v4 }
 0x3e5   : > { %v4464_v36 = vmax.f32 %v12526_v6, 0.0  ;;  %7851 = vpow2.f32 %v4934_v22  ;;  %v6241_v20 = vmul.f32 0.01, %v5617_v32  ;;  %v12691_v55 = vadd.f32 %v12272_v48, %v12303_v14 }
 0x3e6   : > { %v4736_v37 = vsub.f32 0.0, %v4608_v53  ;;  %v4354_v44 = vmul.f32 100.0, %v12683_v39  ;;  %v12693_v38 = vpop.eup %7843  ;;  %v6546_v61 = vmul.f32 %v12664_v21, %v6370_v25  ;;  %v5632_v57 = vmul.f32 %v7836_v7, %v5631_v5 }
 0x3e7   : > { %vm12696_vm9 = vcmp.lt.f32.partialorder %v5633_v62, 0.0004427343  ;;  %v5750_v6 = vand.u32 2147483647, %v12654_v8  ;;  %v7846_v19 = vpop.eup %7845  ;;  %v6369_v13 = vadd.f32 %v6241_v20, %v4449_v27  ;;  %v5748_v60 = vadd.f32 1.0, %v5747_v45  ;;  %v12716_v45 = vpop.f32.mrb[89].mxu1 }
 0x3e8   : > { %v5762_v47 = vadd.f32 1.0, %v12693_v38  ;;  %v12706_v48 = vadd.f32 %v12293_v31, %v12303_v14  ;;  %v12709_v4 = vadd.f32 %v12630_v24, %v6546_v61  ;;  %v5629_v7 = vmul.f32 0.6931472, %v7846_v19  ;;  %v12748_v24 = vpop.permute.xlu1 %6467 }
 0x3e9   : > { %v5765_v62 = vmul.f32 -0.5, %v12693_v38  ;;  %v4610_v5 = vand.u32 2147483647, %v4354_v44  ;;  %v12712_v9 = vpop.eup %7847  ;;  %v6545_v22 = vmul.f32 %v12664_v21, %v6369_v13  ;;  %v4960_v42 = vmul.f32 1.442695, %v4736_v37  ;;  %15820 = vst [vmem:[#allocation59_spill] sm:$0xff] %v12748_v24 }
 0x3ea   : > { %7853 = vlog2.f32 %v5762_v47  ;;  %v4353_v27 = vmul.f32 100.0, %v12691_v55  ;;  %v7850_v53 = vpop.eup %7849  ;;  %v5635_v31 = vsel %vm12696_vm9, %v5632_v57, %v5629_v7  ;;  %vm12720_vm10 = vcmp.lt.f32.partialorder %v5750_v6, 0.0004427343  ;;  %v12735_v7 = vpop.f32.mrb[90].mxu0 }
 0x3eb   : > { %v4466_v25 = vmax.f32 %v12591_v40, 0.0  ;;  %v5753_v32 = vadd.f32 1.0, %v12712_v9  ;;  %v12727_v20 = vadd.f32 %v12646_v1, %v6545_v22  ;;  %v6243_v37 = vmul.f32 0.01, %v5635_v31 }
 0x3ec   : > { %v5746_v44 = vmul.f32 0.6931472, %v7850_v53  ;;  %v5749_v61 = vmul.f32 %v12654_v8, %v5748_v60  ;;  %v5766_v19 = vadd.f32 1.0, %v5765_v62  ;;  %v4738_v13 = vsub.f32 0.0, %v4610_v5 }
 0x3ed   : > { %7855 = vlog2.f32 %v5753_v32  ;;  %v4355_v57 = vmul.f32 100.0, %v12706_v48  ;;  %v6371_v10 = vadd.f32 %v6243_v37, %v4451_v52  ;;  %v4609_v47 = vand.u32 2147483647, %v4353_v27 }
 0x3ee   : > { %v5752_v6 = vsel %vm12720_vm10, %v5749_v61, %v5746_v44  ;;  %7857 = vpow2.f32 %v4960_v42  ;;  %v4964_v60 = vmul.f32 1.442695, %v4738_v13  ;;  %v12742_v62 = vadd.f32 %v12307_v34, %v12379_v51  ;;  %v12755_v44 = vpop.f32.mrb[90].mxu1 }
 0x3ef   : > { %v12737_v1 = vpop.eup %7851  ;;  %v6256_v22 = vmul.f32 0.01, %v5752_v6  ;;  %v6547_v35 = vmul.f32 %v12664_v21, %v6371_v10  ;;  %v5768_v52 = vand.u32 2147483647, %v12693_v38  ;;  %v5756_v5 = vmul.f32 -0.5, %v12712_v9  ;;  %v12785_v21 = vpop.f32.mrb[91].mxu1 }
 0x3f0   : > { %v5771_v42 = vadd.f32 1.0, %v12737_v1  ;;  %7859 = vpow2.f32 %v4964_v60  ;;  %v4737_v53 = vsub.f32 0.0, %v4609_v47  ;;  %v4611_v31 = vand.u32 2147483647, %v4355_v57 }
 0x3f1   : > { %v6384_v27 = vadd.f32 %v6256_v22, %v4464_v36  ;;  %v12751_v32 = vadd.f32 %v12667_v18, %v6547_v35  ;;  %v5767_v34 = vmul.f32 %v12693_v38, %v5766_v19  ;;  %v5759_v37 = vand.u32 2147483647, %v12712_v9  ;;  %v15821_v38 = vld [vmem:[#allocation54_spill] sm:$0xff] }
 0x3f2   : > { %7861 = vlog2.f32 %v5771_v42  ;;  %v4962_v13 = vmul.f32 1.442695, %v4737_v53  ;;  %v4739_v10 = vsub.f32 0.0, %v4611_v31  ;;  %v4368_v36 = vmul.f32 100.0, %v12742_v62  ;;  %v12773_v53 = vpop.f32.mrb[91].mxu0 }
 0x3f3   : > { %v6560_v61 = vmul.f32 %v12748_v24, %v6384_v27  ;;  %v5757_v57 = vadd.f32 1.0, %v5756_v5  ;;  %v5774_v47 = vmul.f32 -0.5, %v12737_v1  ;;  %v12762_v18 = vadd.f32 %v12346_v26, %v12379_v51 }
 0x3f4   : > { %v7854_v6 = vpop.eup %7853  ;;  %v12766_v19 = vadd.f32 %v15821_v38, %v12379_v51  ;;  %7863 = vpow2.f32 %v4962_v13  ;;  %v4966_v35 = vmul.f32 1.442695, %v4739_v10  ;;  %vm5769_vm11 = vcmp.lt.f32.partialorder %v5768_v52, 0.0004427343 }
 0x3f5   : > { %v12769_v22 = vadd.f32 %v12676_v46, %v6560_v61  ;;  %v5764_v60 = vmul.f32 0.6931472, %v7854_v6  ;;  %v4467_v5 = vmax.f32 %v12625_v58, 0.0  ;;  %v4624_v27 = vand.u32 2147483647, %v4368_v36 }
 0x3f6   : > { %7865 = vpow2.f32 %v4966_v35  ;;  %v4370_v38 = vmul.f32 100.0, %v12762_v18  ;;  %v4369_v8 = vmul.f32 100.0, %v12766_v19  ;;  %v5758_v10 = vmul.f32 %v12712_v9, %v5757_v57 }
 0x3f7   : > { %v7856_v26 = vpop.eup %7855  ;;  %v5770_v31 = vsel %vm5769_vm11, %v5767_v34, %v5764_v60  ;;  %v4752_v6 = vsub.f32 0.0, %v4624_v27  ;;  %vm5760_vm13 = vcmp.lt.f32.partialorder %v5759_v37, 0.0004427343  ;;  %v5775_v52 = vadd.f32 1.0, %v5774_v47 }
 0x3f8   : > { %v12777_v46 = vpop.eup %7857  ;;  %v6258_v61 = vmul.f32 0.01, %v5770_v31  ;;  %v5755_v13 = vmul.f32 0.6931472, %v7856_v26  ;;  %v5777_v58 = vand.u32 2147483647, %v12737_v1 }
 0x3f9   : > { %v5888_v36 = vadd.f32 1.0, %v12777_v46  ;;  %v5891_v35 = vmul.f32 -0.5, %v12777_v46  ;;  %v4992_v42 = vmul.f32 1.442695, %v4752_v6  ;;  %v4626_v9 = vand.u32 2147483647, %v4370_v38 }
 0x3fa   : > { %v6386_v34 = vadd.f32 %v6258_v61, %v4466_v25  ;;  %v5761_v60 = vsel %vm5760_vm13, %v5758_v10, %v5755_v13  ;;  %v12787_v31 = vpop.eup %7859  ;;  %v4625_v37 = vand.u32 2147483647, %v4369_v8  ;;  %v15822_v61 = vmax.f32 %v12595_v29, 0.0 }
 0x3fb   : > { %v6257_v26 = vmul.f32 0.01, %v5761_v60  ;;  %7867 = vlog2.f32 %v5888_v36  ;;  %v5906_v25 = vadd.f32 1.0, %v12787_v31  ;;  %v5776_v6 = vmul.f32 %v12737_v1, %v5775_v52 }
 0x3fc   : > { %v7862_v57 = vpop.eup %7861  ;;  %v6562_v47 = vmul.f32 %v12748_v24, %v6386_v34  ;;  %7869 = vpow2.f32 %v4992_v42  ;;  %vm5778_vm14 = vcmp.lt.f32.partialorder %v5777_v58, 0.0004427343  ;;  %v5892_v8 = vadd.f32 1.0, %v5891_v35 }
 0x3fd   : > { %v6385_v13 = vadd.f32 %v6257_v26, %v15822_v61  ;;  %v5773_v10 = vmul.f32 0.6931472, %v7862_v57  ;;  %7871 = vlog2.f32 %v5906_v25  ;;  %v4754_v40 = vsub.f32 0.0, %v4626_v9  ;;  %v15823_v57 = vld [vmem:[#allocation49_spill] sm:$0xff]  ;;  %v15824_v9 = vld [vmem:[#allocation35_spill] sm:$0xff] }
 0x3fe   : > { %v12797_v36 = vadd.f32 %v12709_v4, %v6562_v47  ;;  %v7864_v38 = vpop.eup %7863  ;;  %v4753_v27 = vsub.f32 0.0, %v4625_v37  ;;  %v5909_v29 = vmul.f32 -0.5, %v12787_v31  ;;  %v12803_v1 = vadd.f32 %v15823_v57, %v12379_v51 }
 0x3ff   : > { %v6561_v34 = vmul.f32 %v12748_v24, %v6385_v13  ;;  %v5779_v60 = vsel %vm5778_vm14, %v5776_v6, %v5773_v10  ;;  %v5897_v26 = vadd.f32 1.0, %v7864_v38  ;;  %v5900_v52 = vmul.f32 -0.5, %v7864_v38  ;;  %v12815_v6 = vpop.f32.mrb[92].mxu0 }
 0x400   : > { %v6259_v14 = vmul.f32 0.01, %v5779_v60  ;;  %v7866_v42 = vpop.eup %7865  ;;  %v4996_v58 = vmul.f32 1.442695, %v4754_v40  ;;  %v4994_v35 = vmul.f32 1.442695, %v4753_v27  ;;  %v12810_v37 = vadd.f32 %v12548_v54, %v15824_v9 }
 0x401   : > { %v12806_v4 = vadd.f32 %v12727_v20, %v6561_v34  ;;  %7873 = vlog2.f32 %v5897_v26  ;;  %v5915_v25 = vadd.f32 1.0, %v7866_v42  ;;  %v5893_v61 = vmul.f32 %v12777_v46, %v5892_v8 }
 0x402   : > { %v6387_v47 = vadd.f32 %v6259_v14, %v4467_v5  ;;  %v5894_v13 = vand.u32 2147483647, %v12777_v46  ;;  %v5912_v10 = vand.u32 2147483647, %v12787_v31  ;;  %7875 = vpow2.f32 %v4996_v58  ;;  %v12819_v5 = vpop.f32.mrb[92].mxu1 }
 0x403   : > { %7877 = vlog2.f32 %v5915_v25  ;;  %v5918_v27 = vmul.f32 -0.5, %v7866_v42  ;;  %v4371_v14 = vmul.f32 100.0, %v12803_v1  ;;  %15825 = vst [vmem:[#allocation64_spill] sm:$0xff] %v12819_v5  ;;  %v5910_v54 = vadd.f32 1.0, %v5909_v29 }
 0x404   : > { %v6563_v20 = vmul.f32 %v12748_v24, %v6387_v47  ;;  %v5901_v34 = vadd.f32 1.0, %v5900_v52  ;;  %v5903_v60 = vand.u32 2147483647, %v7864_v38  ;;  %7879 = vpow2.f32 %v4994_v35 }
 0x405   : > { %v7868_v40 = vpop.eup %7867  ;;  %v4627_v26 = vand.u32 2147483647, %v4371_v14  ;;  %v4260_v57 = vmul.f32 100.0, %v12810_v37  ;;  %vm5895_vm12 = vcmp.lt.f32.partialorder %v5894_v13, 0.0004427343  ;;  %v4481_v25 = vmax.f32 %v12691_v55, 0.0 }
 0x406   : > { %v12822_v46 = vadd.f32 %v12751_v32, %v6563_v20  ;;  %v5890_v8 = vmul.f32 0.6931472, %v7868_v40  ;;  %v12825_v58 = vpop.eup %7869  ;;  %vm12827_vm15 = vcmp.lt.f32.partialorder %v5912_v10, 0.0004427343  ;;  %v12834_v29 = vadd.f32 %v12550_v59, %v15824_v9  ;;  %v12842_v59 = vpop.f32.mrb[93].mxu0 }
 0x407   : > { %v7872_v52 = vpop.eup %7871  ;;  %v5919_v35 = vadd.f32 1.0, %v5918_v27  ;;  %v5921_v20 = vand.u32 2147483647, %v7866_v42  ;;  %v6032_v14 = vadd.f32 1.0, %v12825_v58  ;;  %v5911_v13 = vmul.f32 %v12787_v31, %v5910_v54  ;;  %15830 = vst [vmem:[#allocation30_spill] sm:$0xff] %v12842_v59  ;;  %v12849_v54 = vpop.permute.xlu0 %6472 }
 0x408   : > { %v5896_v32 = vsel %vm5895_vm12, %v5893_v61, %v5890_v8  ;;  %v5908_v24 = vmul.f32 0.6931472, %v7872_v52  ;;  %v4755_v10 = vsub.f32 0.0, %v4627_v26  ;;  %v5902_v51 = vmul.f32 %v7864_v38, %v5901_v34  ;;  %15832 = vst [vmem:[#allocation57_spill] sm:$0xff] %v12849_v54 }
 0x409   : > { %v6272_v40 = vmul.f32 0.01, %v5896_v32  ;;  %vm12838_vm0 = vcmp.lt.f32.partialorder %v5903_v60, 0.0004427343  ;;  %7881 = vlog2.f32 %v6032_v14  ;;  %v4516_v55 = vand.u32 2147483647, %v4260_v57 }
 0x40a   : > { %v15831_v61 = vmax.f32 %v12660_v12, 0.0  ;;  %v5914_v8 = vsel %vm12827_vm15, %v5911_v13, %v5908_v24  ;;  %v4998_v32 = vmul.f32 1.442695, %v4755_v10  ;;  %v4262_v52 = vmul.f32 100.0, %v12834_v29 }
 0x40b   : > { %v7874_v31 = vpop.eup %7873  ;;  %v6274_v38 = vmul.f32 0.01, %v5914_v8  ;;  %v5920_v34 = vmul.f32 %v7866_v42, %v5919_v35  ;;  %vm12851_vm1 = vcmp.lt.f32.partialorder %v5921_v20, 0.0004427343  ;;  %v4644_v26 = vsub.f32 0.0, %v4516_v55 }
 0x40c   : > { %v6400_v27 = vadd.f32 %v6272_v40, %v15831_v61  ;;  %v12855_v57 = vpop.eup %7875  ;;  %v5899_v14 = vmul.f32 0.6931472, %v7874_v31  ;;  %v6035_v24 = vmul.f32 -0.5, %v12825_v58  ;;  %7883 = vpow2.f32 %v4998_v32 }
 0x40d   : > { %v7878_v47 = vpop.eup %7877  ;;  %v15835_v40 = vmax.f32 %v12683_v39, 0.0  ;;  %v6038_v10 = vand.u32 2147483647, %v12825_v58  ;;  %v6050_v42 = vadd.f32 1.0, %v12855_v57  ;;  %v12865_v35 = vadd.f32 %v12556_v0, %v15824_v9 }
 0x40e   : > { %v6576_v12 = vmul.f32 %v12849_v54, %v6400_v27  ;;  %v12867_v20 = vpop.eup %7879  ;;  %v5905_v61 = vsel %vm12838_vm0, %v5902_v51, %v5899_v14  ;;  %v5917_v27 = vmul.f32 0.6931472, %v7878_v47  ;;  %v4518_v8 = vand.u32 2147483647, %v4262_v52 }
 0x40f   : > { %v6402_v13 = vadd.f32 %v6274_v38, %v15835_v40  ;;  %v6273_v32 = vmul.f32 0.01, %v5905_v61  ;;  %7885 = vlog2.f32 %v6050_v42  ;;  %v4776_v31 = vmul.f32 1.442695, %v4644_v26  ;;  %v12875_v38 = vpop.f32.mrb[93].mxu1 }
 0x410   : > { %v12870_v55 = vadd.f32 %v12769_v22, %v6576_v12  ;;  %v4483_v0 = vmax.f32 %v12706_v48, 0.0  ;;  %v5923_v40 = vsel %vm12851_vm1, %v5920_v34, %v5917_v27  ;;  %v6036_v59 = vadd.f32 1.0, %v6035_v24 }
 0x411   : > { %v6578_v39 = vmul.f32 %v12849_v54, %v6402_v13  ;;  %v6041_v22 = vadd.f32 1.0, %v12867_v20  ;;  %v6401_v51 = vadd.f32 %v6273_v32, %v4481_v25  ;;  %v6275_v52 = vmul.f32 0.01, %v5923_v40  ;;  %v15838_v32 = vld [vmem:[#allocation47_spill] sm:$0xff] }
 0x412   : > { %v4261_v12 = vmul.f32 100.0, %v12865_v35  ;;  %v4496_v14 = vmax.f32 %v12742_v62, 0.0  ;;  %v6053_v26 = vmul.f32 -0.5, %v12855_v57  ;;  %v4646_v47 = vsub.f32 0.0, %v4518_v8 }
 0x413   : > { %v12882_v5 = vadd.f32 %v12797_v36, %v6578_v39  ;;  %7887 = vlog2.f32 %v6041_v22  ;;  %v7882_v48 = vpop.eup %7881  ;;  %v6577_v60 = vmul.f32 %v12849_v54, %v6401_v51  ;;  %v6403_v34 = vadd.f32 %v6275_v52, %v4483_v0  ;;  %v15839_v22 = vld [vmem:[#allocation10_spill] sm:$0xff] }
 0x414   : > { %vm12888_vm2 = vcmp.lt.f32.partialorder %v6038_v10, 0.0004427343  ;;  %7889 = vpow2.f32 %v4776_v31  ;;  %v6034_v36 = vmul.f32 0.6931472, %v7882_v48  ;;  %v6037_v25 = vmul.f32 %v12825_v58, %v6036_v59  ;;  %v12902_v10 = vpop.f32.mrb[94].mxu0 }
 0x415   : > { %v6044_v13 = vmul.f32 -0.5, %v12867_v20  ;;  %v4780_v42 = vmul.f32 1.442695, %v4646_v47  ;;  %v12895_v62 = vadd.f32 %v12806_v4, %v6577_v60  ;;  %v6579_v61 = vmul.f32 %v12849_v54, %v6403_v34 }
 0x416   : > { %v4517_v27 = vand.u32 2147483647, %v4261_v12  ;;  %v12900_v8 = vadd.f32 %v12558_v23, %v15824_v9  ;;  %v12904_v39 = vpop.eup %7883  ;;  %v6040_v58 = vsel %vm12888_vm2, %v6037_v25, %v6034_v36  ;;  %v6054_v59 = vadd.f32 1.0, %v6053_v26 }
 0x417   : > { %7891 = vpow2.f32 %v4780_v42  ;;  %v12910_v4 = vadd.f32 %v12565_v11, %v15838_v32  ;;  %v12913_v31 = vadd.f32 %v12822_v46, %v6579_v61  ;;  %v6288_v0 = vmul.f32 0.01, %v6040_v58  ;;  %v12921_v46 = vpop.permute.xlu1 %6477 }
 0x418   : > { %v6056_v23 = vand.u32 2147483647, %v12855_v57  ;;  %v6059_v40 = vadd.f32 1.0, %v12904_v39  ;;  %v6824_v51 = vsub.s32 0, %v15839_v22  ;;  %v6045_v52 = vadd.f32 1.0, %v6044_v13  ;;  %15840 = vst [vmem:[#allocation19_spill] sm:$0xff] %v12921_v46 }
 0x419   : > { %v4645_v12 = vsub.f32 0.0, %v4517_v27  ;;  %v4263_v47 = vmul.f32 100.0, %v12900_v8  ;;  %v7886_v26 = vpop.eup %7885  ;;  %v6416_v48 = vadd.f32 %v6288_v0, %v4496_v14  ;;  %v6047_v60 = vand.u32 2147483647, %v12867_v20  ;;  %v12927_v14 = vpop.f32.mrb[94].mxu1 }
 0x41a   : > { %7893 = vlog2.f32 %v6059_v40  ;;  %v4276_v11 = vmul.f32 100.0, %v12910_v4  ;;  %v6052_v34 = vmul.f32 0.6931472, %v7886_v26  ;;  %v6055_v24 = vmul.f32 %v12855_v57, %v6054_v59 }
 0x41b   : > { %v6062_v36 = vmul.f32 -0.5, %v12904_v39  ;;  %v4778_v25 = vmul.f32 1.442695, %v4645_v12  ;;  %v6592_v13 = vmul.f32 %v12921_v46, %v6416_v48  ;;  %v4498_v42 = vmax.f32 %v12762_v18, 0.0 }
 0x41c   : > { %vm6057_vm3 = vcmp.lt.f32.partialorder %v6056_v23, 0.0004427343  ;;  %v4519_v61 = vand.u32 2147483647, %v4263_v47  ;;  %v6046_v0 = vmul.f32 %v12867_v20, %v6045_v52  ;;  %v4532_v40 = vand.u32 2147483647, %v4276_v11 }
 0x41d   : > { %v7888_v27 = vpop.eup %7887  ;;  %v6058_v58 = vsel %vm6057_vm3, %v6055_v24, %v6052_v34  ;;  %7895 = vpow2.f32 %v4778_v25  ;;  %v6614_v57 = vadd.f32 %v12870_v55, %v6592_v13  ;;  %vm6048_vm4 = vcmp.lt.f32.partialorder %v6047_v60, 0.0004427343 }
 0x41e   : > { %v12930_v26 = vpop.eup %7889  ;;  %v6290_v59 = vmul.f32 0.01, %v6058_v58  ;;  %v6043_v12 = vmul.f32 0.6931472, %v7888_v27  ;;  %v4647_v54 = vsub.f32 0.0, %v4519_v61  ;;  %v6063_v48 = vadd.f32 1.0, %v6062_v36  ;;  %v6820_v27 = vpop.permute.xlu0 %6819 }
 0x41f   : > { %v5060_v18 = vadd.f32 1.0, %v12930_v26  ;;  %v12936_v23 = vadd.f32 %v12567_v49, %v15838_v32  ;;  %v6615_v47 = vrot.slane %v6614_v57, 4  ;;  %v4497_v24 = vmax.f32 %v12766_v19, 0.0  ;;  %v12944_v49 = vpop.f32.mrb[95].mxu0 }
 0x420   : > { %v6418_v34 = vadd.f32 %v6290_v59, %v4498_v42  ;;  %v6049_v20 = vsel %vm6048_vm4, %v6046_v0, %v6043_v12  ;;  %v4782_v52 = vmul.f32 1.442695, %v4647_v54  ;;  %v4660_v25 = vsub.f32 0.0, %v4532_v40  ;;  %15841 = vst [vmem:[#allocation28_spill] sm:$0xff] %v12944_v49  ;;  %v12952_v0 = vpop.f32.mrb[95].mxu1 }
 0x421   : > { %v12938_v11 = vpop.eup %7891  ;;  %v6289_v55 = vmul.f32 0.01, %v6049_v20  ;;  %7897 = vlog2.f32 %v5060_v18  ;;  %v6616_v13 = vadd.f32 %v6615_v47, %v6614_v57  ;;  %v6065_v36 = vand.u32 2147483647, %v12904_v39  ;;  %15844 = vst [vmem:[#allocation55_spill] sm:$0xff] %v12952_v0 }
 0x422   : > { %v6594_v60 = vmul.f32 %v12921_v46, %v6418_v34  ;;  %v5078_v61 = vadd.f32 1.0, %v12938_v11  ;;  %v15842_v42 = vunpack.c.0.s8 %v12543_v3  ;;  %7899 = vpow2.f32 %v4782_v52 }
 0x423   : > { %v6417_v58 = vadd.f32 %v6289_v55, %v4497_v24  ;;  %v4278_v19 = vmul.f32 100.0, %v12936_v23  ;;  %v6064_v59 = vmul.f32 %v12904_v39, %v6063_v48  ;;  %v5063_v12 = vmul.f32 -0.5, %v12930_v26 }
 0x424   : > { %v12949_v54 = vsub.s32 %v15842_v42, %v15839_v22  ;;  %v7894_v40 = vpop.eup %7893  ;;  %v6640_v57 = vadd.f32 %v12882_v5, %v6594_v60  ;;  %7901 = vlog2.f32 %v5078_v61  ;;  %v6617_v18 = vrot.slane %v6616_v13, 2 }
 0x425   : > { %v6593_v3 = vmul.f32 %v12921_v46, %v6417_v58  ;;  %v6061_v22 = vmul.f32 0.6931472, %v7894_v40  ;;  %v4808_v47 = vmul.f32 1.442695, %v4660_v25  ;;  %v12958_v34 = vrot.slane %v6820_v27, %v6824_v51 }
 0x426   : > { %15843 = vst [vmem:[#allocation56_spill] sm:$0xff] %v12949_v54  ;;  %v6641_v20 = vrot.slane %v6640_v57, 4  ;;  %vm6066_vm5 = vcmp.lt.f32.partialorder %v6065_v36, 0.0004427343  ;;  %v5081_v52 = vmul.f32 -0.5, %v12938_v11  ;;  %v4499_v60 = vmax.f32 %v12803_v1, 0.0 }
 0x427   : > { %15845 = vst [vmem:[#allocation23_spill] sm:$0xff] %v12958_v34  ;;  %v12961_v24 = vpop.eup %7895  ;;  %v6627_v5 = vadd.f32 %v12895_v62, %v6593_v3  ;;  %v6067_v55 = vsel %vm6066_vm5, %v6064_v59, %v6061_v22  ;;  %7903 = vpow2.f32 %v4808_v47  ;;  %v4534_v39 = vand.u32 2147483647, %v4278_v19 }
 0x428   : > { %v6642_v48 = vadd.f32 %v6641_v20, %v6640_v57  ;;  %v6291_v61 = vmul.f32 0.01, %v6067_v55  ;;  %v5069_v42 = vadd.f32 1.0, %v12961_v24  ;;  %v6618_v25 = vadd.f32 %v6617_v18, %v6616_v13 }
 0x429   : > { %v6628_v51 = vrot.slane %v6627_v5, 4  ;;  %v5064_v27 = vadd.f32 1.0, %v5063_v12  ;;  %v4662_v58 = vsub.f32 0.0, %v4534_v39  ;;  %v5066_v54 = vand.u32 2147483647, %v12930_v26 }
 0x42a   : > { %v6643_v36 = vrot.slane %v6642_v48, 2  ;;  %v6419_v40 = vadd.f32 %v6291_v61, %v4499_v60  ;;  %7905 = vlog2.f32 %v5069_v42  ;;  %v4388_v62 = vmax.f32 %v12810_v37, 0.0 }
 0x42b   : > { %v7898_v9 = vpop.eup %7897  ;;  %v5082_v59 = vadd.f32 1.0, %v5081_v52  ;;  %v5084_v19 = vand.u32 2147483647, %v12938_v11  ;;  %v4812_v57 = vmul.f32 1.442695, %v4662_v58  ;;  %v6629_v3 = vadd.f32 %v6628_v51, %v6627_v5 }
 0x42c   : > { %v6644_v1 = vadd.f32 %v6643_v36, %v6642_v48  ;;  %v6595_v22 = vmul.f32 %v12921_v46, %v6419_v40  ;;  %v5062_v13 = vmul.f32 0.6931472, %v7898_v9  ;;  %v7900_v18 = vpop.eup %7899  ;;  %v6619_v12 = vrot.slane %v6618_v25, 1 }
 0x42d   : > { %v5065_v47 = vmul.f32 %v12930_v26, %v5064_v27  ;;  %v4390_v20 = vmax.f32 %v12834_v29, 0.0  ;;  %7907 = vpow2.f32 %v4812_v57  ;;  %vm12973_vm6 = vcmp.lt.f32.partialorder %v5066_v54, 0.0004427343 }
 0x42e   : > { %v7902_v55 = vpop.eup %7901  ;;  %v6653_v39 = vadd.f32 %v12913_v31, %v6595_v22  ;;  %v5072_v52 = vmul.f32 -0.5, %v12961_v24  ;;  %v5087_v5 = vadd.f32 1.0, %v7900_v18  ;;  %v5083_v60 = vmul.f32 %v12938_v11, %v5082_v59 }
 0x42f   : > { %v5068_v9 = vsel %vm12973_vm6, %v5065_v47, %v5062_v13  ;;  %v5080_v48 = vmul.f32 0.6931472, %v7902_v55  ;;  %v12983_v29 = vadd.f32 %v12578_v16, %v15838_v32  ;;  %v6645_v26 = vrot.slane %v6644_v1, 1 }
 0x430   : > { %v6630_v61 = vrot.slane %v6629_v3, 2  ;;  %vm12985_vm7 = vcmp.lt.f32.partialorder %v5084_v19, 0.0004427343  ;;  %v5075_v54 = vand.u32 2147483647, %v12961_v24  ;;  %v6620_v51 = vadd.f32 %v6619_v12, %v6618_v25 }
 0x431   : > { %v12990_v42 = vpop.eup %7903  ;;  %v5086_v27 = vsel %vm12985_vm7, %v5083_v60, %v5080_v48  ;;  %v4389_v11 = vmax.f32 %v12865_v35, 0.0  ;;  %7909 = vlog2.f32 %v5087_v5  ;;  %v6180_v58 = vmul.f32 0.01, %v5068_v9 }
 0x432   : > { %v5073_v16 = vadd.f32 1.0, %v5072_v52  ;;  %v5090_v59 = vmul.f32 -0.5, %v7900_v18  ;;  %v5204_v19 = vadd.f32 1.0, %v12990_v42  ;;  %v4277_v22 = vmul.f32 100.0, %v12983_v29 }
 0x433   : > { %v6646_v13 = vadd.f32 %v6645_v26, %v6644_v1  ;;  %v13000_v12 = vadd.f32 %v6630_v61, %v6629_v3  ;;  %v6182_v47 = vmul.f32 0.01, %v5086_v27  ;;  %vm13002_vm8 = vcmp.lt.f32.partialorder %v5075_v54, 0.0004427343  ;;  %v15853_v54 = vld [vmem:[#allocation52_spill] sm:$0xff] }
 0x434   : > { %v7906_v25 = vpop.eup %7905  ;;  %v13007_v37 = vadd.f32 %v12958_v34, %v6620_v51  ;;  %v6654_v52 = vrot.slane %v6653_v39, 4  ;;  %7911 = vlog2.f32 %v5204_v19  ;;  %v5207_v5 = vmul.f32 -0.5, %v12990_v42 }
 0x435   : > { %v6308_v9 = vadd.f32 %v6180_v58, %v4388_v62  ;;  %v5071_v48 = vmul.f32 0.6931472, %v7906_v25  ;;  %v5074_v60 = vmul.f32 %v12961_v24, %v5073_v16  ;;  %v5093_v31 = vand.u32 2147483647, %v7900_v18 }
 0x436   : > { %15852 = vst [vmem:[#allocation22_spill] sm:$0xff] %v13007_v37  ;;  %v5091_v3 = vadd.f32 1.0, %v5090_v59  ;;  %v4533_v26 = vand.u32 2147483647, %v4277_v22  ;;  %v13013_v61 = vadd.f32 %v12580_v33, %v15838_v32  ;;  %v13017_v51 = vadd.f32 %v12602_v41, %v15853_v54 }
 0x437   : > { %v7908_v1 = vpop.eup %7907  ;;  %v13020_v27 = vadd.f32 %v12958_v34, %v6646_v13  ;;  %v6310_v58 = vadd.f32 %v6182_v47, %v4390_v20  ;;  %v13023_v24 = vadd.f32 %v6654_v52, %v6653_v39  ;;  %v5208_v16 = vadd.f32 1.0, %v5207_v5 }
 0x438   : > { %v5222_v19 = vadd.f32 1.0, %v7908_v1  ;;  %v4661_v59 = vsub.f32 0.0, %v4533_v26  ;;  %v4279_v22 = vmul.f32 100.0, %v13013_v61  ;;  %v13027_v33 = vmul.f32 %v12336_v17, %v6308_v9 }
 0x439   : > { %15854 = vst [vmem:[#allocation62_spill] sm:$0xff] %v13020_v27  ;;  %v5077_v41 = vsel %vm13002_vm8, %v5074_v60, %v5071_v48  ;;  %vm13031_vm9 = vcmp.lt.f32.partialorder %v5093_v31, 0.0004427343  ;;  %v5092_v20 = vmul.f32 %v7900_v18, %v5091_v3  ;;  %v5210_v39 = vand.u32 2147483647, %v12990_v42 }
 0x43a   : > { %7913 = vlog2.f32 %v5222_v19  ;;  %v5225_v47 = vmul.f32 -0.5, %v7908_v1  ;;  %v4292_v52 = vmul.f32 100.0, %v13017_v51  ;;  %v13038_v5 = vmul.f32 %v12336_v17, %v6310_v58 }
 0x43b   : > { %v7910_v13 = vpop.eup %7909  ;;  %v4810_v26 = vmul.f32 1.442695, %v4661_v59  ;;  %v4535_v55 = vand.u32 2147483647, %v4279_v22  ;;  %v6181_v48 = vmul.f32 0.01, %v5077_v41  ;;  %v5209_v60 = vmul.f32 %v12990_v42, %v5208_v16 }
 0x43c   : > { %v5228_v31 = vand.u32 2147483647, %v7908_v1  ;;  %v4548_v62 = vand.u32 2147483647, %v4292_v52  ;;  %v5089_v19 = vmul.f32 0.6931472, %v7910_v13  ;;  %v13044_v3 = vadd.f32 %v12604_v30, %v15853_v54 }
 0x43d   : > { %7915 = vpow2.f32 %v4810_v26  ;;  %v4663_v18 = vsub.f32 0.0, %v4535_v55  ;;  %v5226_v57 = vadd.f32 1.0, %v5225_v47  ;;  %v13048_v9 = vadd.f32 %v12609_v15, %v15853_v54  ;;  %v15857_v41 = vld [vmem:[#allocation58_spill] sm:$0xff]  ;;  %v13059_v30 = vpop.f32.mrb[96].mxu0 }
 0x43e   : > { %v7912_v36 = vpop.eup %7911  ;;  %v4676_v58 = vsub.f32 0.0, %v4548_v62  ;;  %v13052_v59 = vadd.f32 %v12619_v43, %v15853_v54  ;;  %v4294_v22 = vmul.f32 100.0, %v13044_v3  ;;  %v13057_v13 = vadd.f32 %v15857_v41, %v12295_v2  ;;  %15858 = vst [vmem:[#allocation60_spill] sm:$0xff] %v13059_v30  ;;  %v13064_v52 = vpop.f32.mrb[96].mxu1 }
 0x43f   : > { %v5206_v42 = vmul.f32 0.6931472, %v7912_v36  ;;  %v4814_v16 = vmul.f32 1.442695, %v4663_v18  ;;  %v6309_v62 = vadd.f32 %v6181_v48, %v4389_v11  ;;  %vm5211_vm10 = vcmp.lt.f32.partialorder %v5210_v39, 0.0004427343 }
 0x440   : > { %v4840_v15 = vmul.f32 1.442695, %v4676_v58  ;;  %v4293_v47 = vmul.f32 100.0, %v13048_v9  ;;  %15859 = vst [vmem:[#allocation41_spill] sm:$0xff] %v13064_v52  ;;  %v5095_v43 = vsel %vm13031_vm9, %v5092_v20, %v5089_v19  ;;  %v4550_v26 = vand.u32 2147483647, %v4294_v22 }
 0x441   : > { %v5212_v36 = vsel %vm5211_vm10, %v5209_v60, %v5206_v42  ;;  %7917 = vpow2.f32 %v4814_v16  ;;  %v13068_v55 = vpop.f32.mrb[97].mxu0  ;;  %v13070_v18 = vpop.f32.mrb[97].mxu1  ;;  %v4295_v11 = vmul.f32 100.0, %v13052_v59  ;;  %v5227_v58 = vmul.f32 %v7908_v1, %v5226_v57  ;;  %v15867_v57 = vld [vmem:[#allocation17_spill] sm:$0xff] }
 0x442   : > { %15860 = vst [vmem:[#allocation63_spill] sm:$0xff] %v13068_v55  ;;  %15861 = vst [vmem:[#allocation31_spill] sm:$0xff] %v13070_v18  ;;  %v6196_v41 = vmul.f32 0.01, %v5212_v36  ;;  %7919 = vpow2.f32 %v4840_v15  ;;  %v4549_v35 = vand.u32 2147483647, %v4293_v47  ;;  %v13086_v1 = vadd.f32 %v15867_v57, %v12295_v2 }
 0x443   : > { %v13073_v39 = vpop.f32.mrb[98].mxu0  ;;  %vm13075_vm11 = vcmp.lt.f32.partialorder %v5228_v31, 0.0004427343  ;;  %v4678_v25 = vsub.f32 0.0, %v4550_v26  ;;  %v4308_v20 = vmul.f32 100.0, %v13057_v13  ;;  %v13080_v60 = vpop.f32.mrb[98].mxu1  ;;  %v13101_v40 = vmul.f32 %v12336_v17, %v6309_v62 }
 0x444   : > { %15862 = vst [vmem:[#allocation42_spill] sm:$0xff] %v13073_v39  ;;  %v7914_v48 = vpop.eup %7913  ;;  %15865 = vst [vmem:[#allocation38_spill] sm:$0xff] %v13080_v60  ;;  %v15866_v19 = vmax.f32 %v12910_v4, 0.0  ;;  %v4677_v22 = vsub.f32 0.0, %v4549_v35  ;;  %v4551_v15 = vand.u32 2147483647, %v4295_v11 }
 0x445   : > { %v5224_v16 = vmul.f32 0.6931472, %v7914_v48  ;;  %v6183_v47 = vmul.f32 0.01, %v5095_v43  ;;  %v4844_v36 = vmul.f32 1.442695, %v4678_v25 }
 0x446   : > { %v6324_v42 = vadd.f32 %v6196_v41, %v15866_v19  ;;  %v4564_v27 = vand.u32 2147483647, %v4308_v20  ;;  %v15868_v31 = vld [vmem:[#allocation8_spill] sm:$0xff]  ;;  %v4842_v34 = vmul.f32 1.442695, %v4677_v22  ;;  %v4679_v54 = vsub.f32 0.0, %v4551_v15 }
 0x447   : > { %v5230_v26 = vsel %vm13075_vm11, %v5227_v58, %v5224_v16  ;;  %v7916_v60 = vpop.eup %7915  ;;  %7921 = vpow2.f32 %v4844_v36  ;;  %v4310_v43 = vmul.f32 100.0, %v13086_v1  ;;  %v15869_v25 = vld [vmem:[#allocation16_spill] sm:$0xff]  ;;  %v15870_v58 = vmax.f32 %v12936_v23, 0.0 }
 0x448   : > { %v6500_v37 = vmul.f32 %v15868_v31, %v6324_v42  ;;  %v6198_v4 = vmul.f32 0.01, %v5230_v26  ;;  %v5213_v11 = vadd.f32 1.0, %v7916_v60  ;;  %v4692_v48 = vsub.f32 0.0, %v4564_v27 }
 0x449   : > { %v13098_v20 = vadd.f32 %v15869_v25, %v12295_v2  ;;  %7923 = vpow2.f32 %v4842_v34  ;;  %v4846_v42 = vmul.f32 1.442695, %v4679_v54  ;;  %v15871_v16 = vmax.f32 %v12900_v8, 0.0 }
 0x44a   : > { %v13094_v35 = vadd.f32 %v6500_v37, %v13027_v33  ;;  %v6326_v19 = vadd.f32 %v6198_v4, %v15870_v58  ;;  %7925 = vlog2.f32 %v5213_v11  ;;  %v5216_v36 = vmul.f32 -0.5, %v7916_v60 }
 0x44b   : > { %v6311_v22 = vadd.f32 %v6183_v47, %v15871_v16  ;;  %v7918_v33 = vpop.eup %7917  ;;  %7927 = vpow2.f32 %v4846_v42  ;;  %v4566_v62 = vand.u32 2147483647, %v4310_v43  ;;  %v4872_v34 = vmul.f32 1.442695, %v4692_v48 }
 0x44c   : > { %v6502_v15 = vmul.f32 %v15868_v31, %v6326_v19  ;;  %v7920_v57 = vpop.eup %7919  ;;  %v5231_v26 = vadd.f32 1.0, %v7918_v33  ;;  %v4309_v54 = vmul.f32 100.0, %v13098_v20  ;;  %v5219_v47 = vand.u32 2147483647, %v7916_v60 }
 0x44d   : > { %v5234_v4 = vmul.f32 -0.5, %v7918_v33  ;;  %v5348_v11 = vadd.f32 1.0, %v7920_v57  ;;  %v13116_v25 = vmul.f32 %v12336_v17, %v6311_v22  ;;  %v5351_v58 = vmul.f32 -0.5, %v7920_v57 }
 0x44e   : > { %v13113_v8 = vadd.f32 %v6502_v15, %v13038_v5  ;;  %7929 = vlog2.f32 %v5231_v26  ;;  %v4694_v19 = vsub.f32 0.0, %v4566_v62  ;;  %v5217_v43 = vadd.f32 1.0, %v5216_v36  ;;  %v15874_v26 = vld [vmem:[#allocation13_spill] sm:$0xff]  ;;  %v13128_v36 = vpop.f32.mrb[99].mxu0 }
 0x44f   : > { %v5237_v42 = vand.u32 2147483647, %v7918_v33  ;;  %7931 = vlog2.f32 %v5348_v11  ;;  %v5354_v16 = vand.u32 2147483647, %v7920_v57  ;;  %v4565_v27 = vand.u32 2147483647, %v4309_v54 }
 0x450   : > { %7933 = vpow2.f32 %v4872_v34  ;;  %v4876_v23 = vmul.f32 1.442695, %v4694_v19  ;;  %vm13119_vm13 = vcmp.lt.f32.partialorder %v5219_v47, 0.0004427343  ;;  %v5235_v37 = vadd.f32 1.0, %v5234_v4  ;;  %15875 = vst [vmem:[#allocation65_spill] sm:$0xff] %v13128_v36 }
 0x451   : > { %v7922_v5 = vpop.eup %7921  ;;  %v13126_v62 = vadd.f32 %v15874_v26, %v12295_v2  ;;  %v5352_v11 = vadd.f32 1.0, %v5351_v58  ;;  %v5218_v54 = vmul.f32 %v7916_v60, %v5217_v43  ;;  %vm13130_vm14 = vcmp.lt.f32.partialorder %v5237_v42, 0.0004427343  ;;  %v15880_v19 = vld [vmem:[#allocation20_spill] sm:$0xff] }
 0x452   : > { %v5366_v41 = vadd.f32 1.0, %v7922_v5  ;;  %v5369_v48 = vmul.f32 -0.5, %v7922_v5  ;;  %7935 = vpow2.f32 %v4876_v23  ;;  %vm13134_vm12 = vcmp.lt.f32.partialorder %v5354_v16, 0.0004427343 }
 0x453   : > { %v7924_v34 = vpop.eup %7923  ;;  %v13140_v26 = vadd.f32 %v12662_v56, %v15880_v19  ;;  %v5372_v58 = vand.u32 2147483647, %v7922_v5  ;;  %v4693_v17 = vsub.f32 0.0, %v4565_v27  ;;  %v4311_v42 = vmul.f32 100.0, %v13126_v62 }
 0x454   : > { %v7926_v22 = vpop.eup %7925  ;;  %7937 = vlog2.f32 %v5366_v41  ;;  %v5357_v2 = vadd.f32 1.0, %v7924_v34  ;;  %v5370_v60 = vadd.f32 1.0, %v5369_v48  ;;  %v5360_v43 = vmul.f32 -0.5, %v7924_v34 }
 0x455   : > { %v7928_v23 = vpop.eup %7927  ;;  %v5215_v36 = vmul.f32 0.6931472, %v7926_v22  ;;  %v5236_v46 = vmul.f32 %v7918_v33, %v5235_v37  ;;  %v5353_v16 = vmul.f32 %v7920_v57, %v5352_v11  ;;  %v13146_v18 = vmul.f32 100.0, %v13140_v26 }
 0x456   : > { %7939 = vlog2.f32 %v5357_v2  ;;  %v5375_v39 = vadd.f32 1.0, %v7928_v23  ;;  %v5378_v56 = vmul.f32 -0.5, %v7928_v23  ;;  %v13150_v41 = vadd.f32 %v12673_v63, %v15880_v19 }
 0x457   : > { %v5221_v32 = vsel %vm13119_vm13, %v5218_v54, %v5215_v36  ;;  %vm13152_vm15 = vcmp.lt.f32.partialorder %v5372_v58, 0.0004427343  ;;  %v5363_v37 = vand.u32 2147483647, %v7924_v34  ;;  %v4874_v2 = vmul.f32 1.442695, %v4693_v17 }
 0x458   : > { %v7930_v27 = vpop.eup %7929  ;;  %v6197_v48 = vmul.f32 0.01, %v5221_v32  ;;  %7941 = vlog2.f32 %v5375_v39  ;;  %v5371_v15 = vmul.f32 %v7922_v5, %v5370_v60  ;;  %v5361_v36 = vadd.f32 1.0, %v5360_v43  ;;  %v13158_v32 = vpop.f32.mrb[99].mxu1 }
 0x459   : > { %v7932_v33 = vpop.eup %7931  ;;  %v5233_v57 = vmul.f32 0.6931472, %v7930_v27  ;;  %v4567_v11 = vand.u32 2147483647, %v4311_v42  ;;  %v15883_v55 = vmax.f32 %v12983_v29, 0.0  ;;  %7943 = vpow2.f32 %v4874_v2 }
 0x45a   : > { %v7934_v54 = vpop.eup %7933  ;;  %v5350_v63 = vmul.f32 0.6931472, %v7932_v33  ;;  %v5381_v30 = vand.u32 2147483647, %v7928_v23  ;;  %v5379_v0 = vadd.f32 1.0, %v5378_v56  ;;  %v5362_v42 = vmul.f32 %v7924_v34, %v5361_v36 }
 0x45b   : > { %v6325_v52 = vadd.f32 %v6197_v48, %v15883_v55  ;;  %v5239_v58 = vsel %vm13130_vm14, %v5236_v46, %v5233_v57  ;;  %v5492_v39 = vadd.f32 1.0, %v7934_v54  ;;  %v5495_v17 = vmul.f32 -0.5, %v7934_v54 }
 0x45c   : > { %v13162_v49 = vpop.eup %7935  ;;  %v6199_v60 = vmul.f32 0.01, %v5239_v58  ;;  %v5356_v29 = vsel %vm13134_vm12, %v5353_v16, %v5350_v63  ;;  %v4695_v55 = vsub.f32 0.0, %v4567_v11  ;;  %vm13167_vm0 = vcmp.lt.f32.partialorder %v5363_v37, 0.0004427343 }
 0x45d   : > { %v6501_v5 = vmul.f32 %v15868_v31, %v6325_v52  ;;  %v6212_v43 = vmul.f32 0.01, %v5356_v29  ;;  %7945 = vlog2.f32 %v5492_v39  ;;  %v15886_v56 = vmax.f32 %v13013_v61, 0.0  ;;  %v15890_v61 = vld [vmem:[#allocation9_spill] sm:$0xff] }
 0x45e   : > { %v7938_v46 = vpop.eup %7937  ;;  %vm13174_vm1 = vcmp.lt.f32.partialorder %v5381_v30, 0.0004427343  ;;  %v5510_v4 = vadd.f32 1.0, %v13162_v49  ;;  %v15889_v16 = vmax.f32 %v13017_v51, 0.0  ;;  %v5380_v2 = vmul.f32 %v7928_v23, %v5379_v0  ;;  %v13188_v23 = vpop.f32.mrb[100].mxu0 }
 0x45f   : > { %v6673_v47 = vadd.f32 %v6501_v5, %v13101_v40  ;;  %v6327_v48 = vadd.f32 %v6199_v60, %v15886_v56  ;;  %v5368_v37 = vmul.f32 0.6931472, %v7938_v46  ;;  %v5498_v33 = vand.u32 2147483647, %v7934_v54 }
 0x460   : > { %v6340_v34 = vadd.f32 %v6212_v43, %v15889_v16  ;;  %v7940_v57 = vpop.eup %7939  ;;  %v5496_v11 = vadd.f32 1.0, %v5495_v17  ;;  %7947 = vlog2.f32 %v5510_v4  ;;  %v4878_v40 = vmul.f32 1.442695, %v4695_v55  ;;  %v13190_v17 = vpop.f32.mrb[100].mxu1 }
 0x461   : > { %v6503_v36 = vmul.f32 %v15868_v31, %v6327_v48  ;;  %v5374_v30 = vsel %vm13152_vm15, %v5371_v15, %v5368_v37  ;;  %v5359_v58 = vmul.f32 0.6931472, %v7940_v57  ;;  %v5513_v39 = vmul.f32 -0.5, %v13162_v49  ;;  %v13198_v43 = vpop.f32.mrb[101].mxu0 }
 0x462   : > { %v6516_v63 = vmul.f32 %v15890_v61, %v6340_v34  ;;  %v7942_v5 = vpop.eup %7941  ;;  %v6214_v60 = vmul.f32 0.01, %v5374_v30  ;;  %v5516_v0 = vand.u32 2147483647, %v13162_v49  ;;  %7949 = vpow2.f32 %v4878_v40 }
 0x463   : > { %v6699_v51 = vadd.f32 %v6503_v36, %v13116_v25  ;;  %v5365_v22 = vsel %vm13167_vm0, %v5362_v42, %v5359_v58  ;;  %v5377_v15 = vmul.f32 0.6931472, %v7942_v5  ;;  %v4580_v55 = vand.u32 2147483647, %v13146_v18  ;;  %v13200_v25 = vpop.f32.mrb[101].mxu1  ;;  %v13202_v46 = vpop.eup %7943 }
 0x464   : > { %v13193_v29 = vadd.f32 %v13094_v35, %v6516_v63  ;;  %v15891_v56 = vmax.f32 %v13044_v3, 0.0  ;;  %v6213_v4 = vmul.f32 0.01, %v5365_v22  ;;  %vm13206_vm2 = vcmp.lt.f32.partialorder %v5498_v33, 0.0004427343 }
 0x465   : > { %v4326_v35 = vmul.f32 100.0, %v13150_v41  ;;  %v5383_v42 = vsel %vm13174_vm1, %v5380_v2, %v5377_v15  ;;  %v5497_v18 = vmul.f32 %v7934_v54, %v5496_v11  ;;  %v5514_v27 = vadd.f32 1.0, %v5513_v39  ;;  %v13226_v39 = vpop.f32.mrb[102].mxu0 }
 0x466   : > { %v6342_v48 = vadd.f32 %v6214_v60, %v15891_v56  ;;  %v5501_v34 = vadd.f32 1.0, %v13202_v46  ;;  %v15894_v57 = vmax.f32 %v13048_v9, 0.0  ;;  %v6215_v36 = vmul.f32 0.01, %v5383_v42 }
 0x467   : > { %v4708_v40 = vsub.f32 0.0, %v4580_v55  ;;  %v7946_v33 = vpop.eup %7945  ;;  %vm13217_vm3 = vcmp.lt.f32.partialorder %v5516_v0, 0.0004427343  ;;  %v5504_v52 = vmul.f32 -0.5, %v13202_v46  ;;  %v4582_v2 = vand.u32 2147483647, %v4326_v35 }
 0x468   : > { %v6518_v37 = vmul.f32 %v15890_v61, %v6342_v48  ;;  %v6341_v3 = vadd.f32 %v6213_v4, %v15894_v57  ;;  %7951 = vlog2.f32 %v5501_v34  ;;  %v15897_v30 = vmax.f32 %v13052_v59, 0.0  ;;  %v13242_v48 = vpop.f32.mrb[102].mxu1 }
 0x469   : > { %v5494_v9 = vmul.f32 0.6931472, %v7946_v33  ;;  %v5515_v5 = vmul.f32 %v13162_v49, %v5514_v27  ;;  %v4904_v60 = vmul.f32 1.442695, %v4708_v40  ;;  %v4710_v0 = vsub.f32 0.0, %v4582_v2 }
 0x46a   : > { %v6687_v54 = vadd.f32 %v13113_v8, %v6518_v37  ;;  %v6517_v11 = vmul.f32 %v15890_v61, %v6341_v3  ;;  %v6343_v58 = vadd.f32 %v6215_v36, %v15897_v30  ;;  %v13231_v22 = vadd.f32 %v12686_v28, %v15880_v19  ;;  %v7948_v15 = vpop.eup %7947 }
 0x46b   : > { %v5500_v59 = vsel %vm13206_vm2, %v5497_v18, %v5494_v9  ;;  %v13240_v56 = vadd.f32 %v12716_v45, %v15880_v19  ;;  %v5512_v4 = vmul.f32 0.6931472, %v7948_v15  ;;  %7953 = vpow2.f32 %v4904_v60  ;;  %v15901_v9 = vld [vmem:[#allocation14_spill] sm:$0xff]  ;;  %v13277_v60 = vpop.f32.mrb[103].mxu0 }
 0x46c   : > { %v13233_v55 = vadd.f32 %v6673_v47, %v6517_v11  ;;  %v6519_v8 = vmul.f32 %v15890_v61, %v6343_v58  ;;  %v6228_v49 = vmul.f32 0.01, %v5500_v59  ;;  %v4908_v35 = vmul.f32 1.442695, %v4710_v0  ;;  %v13244_v28 = vpop.eup %7949 }
 0x46d   : > { %v5505_v47 = vadd.f32 1.0, %v5504_v52  ;;  %v4325_v27 = vmul.f32 100.0, %v13231_v22  ;;  %v4327_v16 = vmul.f32 100.0, %v13240_v56  ;;  %v15898_v18 = vrot.slane %v13000_v12, 1 }
 0x46e   : > { %v13246_v42 = vadd.f32 %v6699_v51, %v6519_v8  ;;  %v15900_v34 = vmax.f32 %v13057_v13, 0.0  ;;  %v5518_v57 = vsel %vm13217_vm3, %v5515_v5, %v5512_v4  ;;  %v5519_v3 = vadd.f32 1.0, %v13244_v28 }
 0x46f   : > { %v13253_v45 = vadd.f32 %v15898_v18, %v13000_v12  ;;  %v4438_v51 = vmax.f32 %v13086_v1, 0.0  ;;  %v6230_v36 = vmul.f32 0.01, %v5518_v57  ;;  %7955 = vpow2.f32 %v4908_v35  ;;  %v13285_v35 = vpop.f32.mrb[103].mxu1 }
 0x470   : > { %v6356_v37 = vadd.f32 %v6228_v49, %v15900_v34  ;;  %v4581_v40 = vand.u32 2147483647, %v4325_v27  ;;  %v4437_v52 = vmax.f32 %v13098_v20, 0.0  ;;  %v5507_v12 = vand.u32 2147483647, %v13202_v46 }
 0x471   : > { %15899 = vst [vmem:[#allocation61_spill] sm:$0xff] %v13253_v45  ;;  %7957 = vlog2.f32 %v5519_v3  ;;  %v6358_v2 = vadd.f32 %v6230_v36, %v4438_v51  ;;  %v5506_v13 = vmul.f32 %v13202_v46, %v5505_v47  ;;  %v4583_v63 = vand.u32 2147483647, %v4327_v16 }
 0x472   : > { %v6532_v33 = vmul.f32 %v12537_v50, %v6356_v37  ;;  %v4709_v11 = vsub.f32 0.0, %v4581_v40  ;;  %v7952_v30 = vpop.eup %7951  ;;  %v5522_v1 = vmul.f32 -0.5, %v13244_v28  ;;  %v13271_v5 = vadd.f32 %v12735_v7, %v15901_v9 }
 0x473   : > { %v13275_v20 = vadd.f32 %v12755_v44, %v15901_v9  ;;  %v6534_v46 = vmul.f32 %v12537_v50, %v6358_v2  ;;  %v5503_v0 = vmul.f32 0.6931472, %v7952_v30  ;;  %v4711_v8 = vsub.f32 0.0, %v4583_v63 }
 0x474   : > { %v13266_v58 = vadd.f32 %v13193_v29, %v6532_v33  ;;  %v4906_v15 = vmul.f32 1.442695, %v4709_v11  ;;  %vm5508_vm4 = vcmp.lt.f32.partialorder %v5507_v12, 0.0004427343  ;;  %v5525_v29 = vand.u32 2147483647, %v13244_v28 }
 0x475   : > { %v4340_v59 = vmul.f32 100.0, %v13271_v5  ;;  %v4342_v49 = vmul.f32 100.0, %v13275_v20  ;;  %v13283_v7 = vadd.f32 %v6687_v54, %v6534_v46  ;;  %v5509_v4 = vsel %vm5508_vm4, %v5506_v13, %v5503_v0  ;;  %v7954_v47 = vpop.eup %7953 }
 0x476   : > { %7959 = vpow2.f32 %v4906_v15  ;;  %v4910_v44 = vmul.f32 1.442695, %v4711_v8  ;;  %v6229_v27 = vmul.f32 0.01, %v5509_v4  ;;  %v13289_v34 = vadd.f32 %v12773_v53, %v15901_v9 }
 0x477   : > { %v4596_v16 = vand.u32 2147483647, %v4340_v59  ;;  %v4598_v18 = vand.u32 2147483647, %v4342_v49  ;;  %v5523_v57 = vadd.f32 1.0, %v5522_v1  ;;  %v5636_v3 = vadd.f32 1.0, %v7954_v47 }
 0x478   : > { %7961 = vpow2.f32 %v4910_v44  ;;  %v6357_v54 = vadd.f32 %v6229_v27, %v4437_v52  ;;  %v4439_v51 = vmax.f32 %v13126_v62, 0.0  ;;  %v4452_v12 = vmax.f32 %v13140_v26, 0.0  ;;  %v15902_v27 = vld [vmem:[#allocation53_spill] sm:$0xff] }
 0x479   : > { %v4724_v36 = vsub.f32 0.0, %v4596_v16  ;;  %v4726_v40 = vsub.f32 0.0, %v4598_v18  ;;  %v7956_v33 = vpop.eup %7955  ;;  %7963 = vlog2.f32 %v5636_v3  ;;  %v4454_v2 = vmax.f32 %v13150_v41, 0.0 }
 0x47a   : > { %v4341_v13 = vmul.f32 100.0, %v13289_v34  ;;  %v6533_v11 = vmul.f32 %v12537_v50, %v6357_v54  ;;  %vm5526_vm5 = vcmp.lt.f32.partialorder %v5525_v29, 0.0004427343  ;;  %v5639_v63 = vmul.f32 -0.5, %v7954_v47 }
 0x47b   : > { %v7958_v53 = vpop.eup %7957  ;;  %v5654_v30 = vadd.f32 1.0, %v7956_v33  ;;  %v5524_v52 = vmul.f32 %v13244_v28, %v5523_v57  ;;  %v4936_v62 = vmul.f32 1.442695, %v4724_v36  ;;  %v4940_v46 = vmul.f32 1.442695, %v4726_v40 }
 0x47c   : > { %v5521_v1 = vmul.f32 0.6931472, %v7958_v53  ;;  %v13299_v0 = vadd.f32 %v13233_v55, %v6533_v11  ;;  %v5642_v15 = vand.u32 2147483647, %v7954_v47  ;;  %v5657_v8 = vmul.f32 -0.5, %v7956_v33 }
 0x47d   : > { %7965 = vlog2.f32 %v5654_v30  ;;  %v4597_v49 = vand.u32 2147483647, %v4341_v13  ;;  %v13303_v4 = vadd.f32 %v12785_v21, %v15901_v9  ;;  %v5640_v44 = vadd.f32 1.0, %v5639_v63 }
 0x47e   : > { %v5527_v59 = vsel %vm5526_vm5, %v5524_v52, %v5521_v1  ;;  %7967 = vpow2.f32 %v4936_v62  ;;  %v13307_v28 = vadd.f32 %v12815_v6, %v15902_v27  ;;  %v5660_v36 = vand.u32 2147483647, %v7956_v33 }
 0x47f   : > { %v6231_v29 = vmul.f32 0.01, %v5527_v59  ;;  %7969 = vpow2.f32 %v4940_v46  ;;  %v4725_v57 = vsub.f32 0.0, %v4597_v49  ;;  %v4343_v3 = vmul.f32 100.0, %v13303_v4 }
 0x480   : > { %v7960_v16 = vpop.eup %7959  ;;  %v5658_v53 = vadd.f32 1.0, %v5657_v8  ;;  %v4356_v6 = vmul.f32 100.0, %v13307_v28  ;;  %v5641_v1 = vmul.f32 %v7954_v47, %v5640_v44  ;;  %vm13315_vm6 = vcmp.lt.f32.partialorder %v5642_v15, 0.0004427343 }
 0x481   : > { %v6359_v54 = vadd.f32 %v6231_v29, %v4439_v51  ;;  %v5645_v40 = vadd.f32 1.0, %v7960_v16  ;;  %v4938_v11 = vmul.f32 1.442695, %v4725_v57  ;;  %v4599_v63 = vand.u32 2147483647, %v4343_v3  ;;  %v15905_v57 = vld [vmem:[#allocation64_spill] sm:$0xff] }
 0x482   : > { %v7962_v13 = vpop.eup %7961  ;;  %v5648_v51 = vmul.f32 -0.5, %v7960_v16  ;;  %v13324_v3 = vadd.f32 %v15905_v57, %v15902_v27  ;;  %v5659_v47 = vmul.f32 %v7956_v33, %v5658_v53  ;;  %vm13326_vm7 = vcmp.lt.f32.partialorder %v5660_v36, 0.0004427343 }
 0x483   : > { %v6535_v30 = vmul.f32 %v12537_v50, %v6359_v54  ;;  %7971 = vlog2.f32 %v5645_v40  ;;  %v7964_v62 = vpop.eup %7963  ;;  %v5663_v46 = vadd.f32 1.0, %v7962_v13  ;;  %v5666_v59 = vmul.f32 -0.5, %v7962_v13 }
 0x484   : > { %7973 = vpow2.f32 %v4938_v11  ;;  %v5638_v8 = vmul.f32 0.6931472, %v7964_v62  ;;  %v4727_v29 = vsub.f32 0.0, %v4599_v63  ;;  %v4612_v44 = vand.u32 2147483647, %v4356_v6  ;;  %v13335_v6 = vpop.f32.mrb[104].mxu0 }
 0x485   : > { %v13320_v49 = vadd.f32 %v13246_v42, %v6535_v30  ;;  %7975 = vlog2.f32 %v5663_v46  ;;  %v5651_v11 = vand.u32 2147483647, %v7960_v16  ;;  %v5669_v42 = vand.u32 2147483647, %v7962_v13  ;;  %v13364_v41 = vpop.f32.mrb[105].mxu0 }
 0x486   : > { %v5644_v40 = vsel %vm13315_vm6, %v5641_v1, %v5638_v8  ;;  %v4942_v30 = vmul.f32 1.442695, %v4727_v29  ;;  %v5649_v21 = vadd.f32 1.0, %v5648_v51  ;;  %v5667_v57 = vadd.f32 1.0, %v5666_v59 }
 0x487   : > { %v7966_v54 = vpop.eup %7965  ;;  %v6244_v63 = vmul.f32 0.01, %v5644_v40  ;;  %v4740_v36 = vsub.f32 0.0, %v4612_v44  ;;  %v4358_v53 = vmul.f32 100.0, %v13324_v3  ;;  %vm13342_vm8 = vcmp.lt.f32.partialorder %v5651_v11, 0.0004427343 }
 0x488   : > { %v7968_v62 = vpop.eup %7967  ;;  %v5656_v37 = vmul.f32 0.6931472, %v7966_v54  ;;  %7977 = vpow2.f32 %v4942_v30  ;;  %v15910_v44 = vld [vmem:[#allocation18_spill] sm:$0xff]  ;;  %v5650_v40 = vmul.f32 %v7960_v16, %v5649_v21  ;;  %vm13348_vm9 = vcmp.lt.f32.partialorder %v5669_v42, 0.0004427343 }
 0x489   : > { %v13332_v18 = vpop.eup %7969  ;;  %v5780_v33 = vadd.f32 1.0, %v7968_v62  ;;  %v6372_v1 = vadd.f32 %v6244_v63, %v4452_v12  ;;  %v5783_v46 = vmul.f32 -0.5, %v7968_v62  ;;  %v5668_v15 = vmul.f32 %v7962_v13, %v5667_v57 }
 0x48a   : > { %v5662_v52 = vsel %vm13326_vm7, %v5659_v47, %v5656_v37  ;;  %v5798_v8 = vadd.f32 1.0, %v13332_v18  ;;  %v5801_v29 = vmul.f32 -0.5, %v13332_v18  ;;  %v13352_v37 = vpop.f32.mrb[104].mxu1  ;;  %v4968_v11 = vmul.f32 1.442695, %v4740_v36 }
 0x48b   : > { %v6246_v51 = vmul.f32 0.01, %v5662_v52  ;;  %7979 = vlog2.f32 %v5780_v33  ;;  %v6548_v54 = vmul.f32 %v15910_v44, %v6372_v1  ;;  %v4614_v30 = vand.u32 2147483647, %v4358_v53 }
 0x48c   : > { %7981 = vlog2.f32 %v5798_v8  ;;  %v5784_v21 = vadd.f32 1.0, %v5783_v46  ;;  %v5786_v42 = vand.u32 2147483647, %v7968_v62  ;;  %v5802_v52 = vadd.f32 1.0, %v5801_v29  ;;  %v13375_v29 = vpop.f32.mrb[105].mxu1 }
 0x48d   : > { %v7972_v12 = vpop.eup %7971  ;;  %v6374_v47 = vadd.f32 %v6246_v51, %v4454_v2  ;;  %v13359_v33 = vadd.f32 %v13266_v58, %v6548_v54  ;;  %7983 = vpow2.f32 %v4968_v11  ;;  %v4742_v57 = vsub.f32 0.0, %v4614_v30  ;;  %v15913_v58 = vld [vmem:[#allocation30_spill] sm:$0xff] }
 0x48e   : > { %v13356_v63 = vpop.eup %7973  ;;  %v5647_v16 = vmul.f32 0.6931472, %v7972_v12  ;;  %v13370_v36 = vadd.f32 %v15913_v58, %v15902_v27  ;;  %v4470_v54 = vmax.f32 %v13275_v20, 0.0  ;;  %v5804_v12 = vand.u32 2147483647, %v13332_v18 }
 0x48f   : > { %v6550_v1 = vmul.f32 %v15910_v44, %v6374_v47  ;;  %v5789_v8 = vadd.f32 1.0, %v13356_v63  ;;  %v5792_v55 = vmul.f32 -0.5, %v13356_v63  ;;  %v7976_v2 = vpop.eup %7975  ;;  %v4972_v59 = vmul.f32 1.442695, %v4742_v57  ;;  %v13396_v57 = vpop.f32.mrb[106].mxu0 }
 0x490   : > { %v5653_v13 = vsel %vm13342_vm8, %v5650_v40, %v5647_v16  ;;  %v5665_v51 = vmul.f32 0.6931472, %v7976_v2  ;;  %v4357_v40 = vmul.f32 100.0, %v13370_v36  ;;  %v15914_v11 = vmax.f32 %v13231_v22, 0.0 }
 0x491   : > { %v13373_v53 = vadd.f32 %v13283_v7, %v6550_v1  ;;  %v6245_v46 = vmul.f32 0.01, %v5653_v13  ;;  %7985 = vlog2.f32 %v5789_v8  ;;  %v5785_v16 = vmul.f32 %v7968_v62, %v5784_v21 }
 0x492   : > { %v13380_v47 = vpop.eup %7977  ;;  %v5671_v7 = vsel %vm13348_vm9, %v5668_v15, %v5665_v51  ;;  %vm13386_vm10 = vcmp.lt.f32.partialorder %v5786_v42, 0.0004427343  ;;  %v5803_v20 = vmul.f32 %v13332_v18, %v5802_v52  ;;  %v13394_v13 = vadd.f32 %v12875_v38, %v15902_v27  ;;  %v13405_v38 = vpop.f32.mrb[106].mxu1 }
 0x493   : > { %v6373_v30 = vadd.f32 %v6245_v46, %v15914_v11  ;;  %v6247_v8 = vmul.f32 0.01, %v5671_v7  ;;  %v5807_v2 = vadd.f32 1.0, %v13380_v47  ;;  %v5793_v15 = vadd.f32 1.0, %v5792_v55 }
 0x494   : > { %7987 = vpow2.f32 %v4972_v59  ;;  %v4613_v62 = vand.u32 2147483647, %v4357_v40  ;;  %v15917_v42 = vmax.f32 %v13240_v56, 0.0  ;;  %vm13401_vm11 = vcmp.lt.f32.partialorder %v5804_v12, 0.0004427343 }
 0x495   : > { %v7980_v22 = vpop.eup %7979  ;;  %v6549_v26 = vmul.f32 %v15910_v44, %v6373_v30  ;;  %7989 = vlog2.f32 %v5807_v2  ;;  %v5810_v11 = vmul.f32 -0.5, %v13380_v47  ;;  %v5795_v40 = vand.u32 2147483647, %v13356_v63 }
 0x496   : > { %v7982_v21 = vpop.eup %7981  ;;  %v6375_v58 = vadd.f32 %v6247_v8, %v15917_v42  ;;  %v5782_v46 = vmul.f32 0.6931472, %v7980_v22  ;;  %v4741_v55 = vsub.f32 0.0, %v4613_v62  ;;  %v4359_v12 = vmul.f32 100.0, %v13394_v13 }
 0x497   : > { %v6676_v52 = vadd.f32 %v13299_v0, %v6549_v26  ;;  %v5800_v51 = vmul.f32 0.6931472, %v7982_v21  ;;  %v5794_v8 = vmul.f32 %v13356_v63, %v5793_v15  ;;  %v7984_v2 = vpop.eup %7983  ;;  %v15920_v21 = vld [vmem:[#allocation15_spill] sm:$0xff]  ;;  %v15921_v42 = vmax.f32 %v13271_v5, 0.0 }
 0x498   : > { %v6551_v59 = vmul.f32 %v15910_v44, %v6375_v58  ;;  %v5788_v56 = vsel %vm13386_vm10, %v5785_v16, %v5782_v46  ;;  %v4970_v0 = vmul.f32 1.442695, %v4741_v55  ;;  %v4615_v62 = vand.u32 2147483647, %v4359_v12  ;;  %v15922_v55 = vld [vmem:[#allocation59_spill] sm:$0xff] }
 0x499   : > { %v6260_v30 = vmul.f32 0.01, %v5788_v56  ;;  %v5806_v7 = vsel %vm13401_vm11, %v5803_v20, %v5800_v51  ;;  %v13422_v16 = vadd.f32 %v12902_v10, %v15920_v21  ;;  %v5811_v46 = vadd.f32 1.0, %v5810_v11 }
 0x49a   : > { %v13418_v22 = vadd.f32 %v13320_v49, %v6551_v59  ;;  %v6262_v26 = vmul.f32 0.01, %v5806_v7  ;;  %v5813_v20 = vand.u32 2147483647, %v13380_v47  ;;  %v5924_v18 = vadd.f32 1.0, %v7984_v2  ;;  %v13427_v49 = vpop.f32.mrb[107].mxu0 }
 0x49b   : > { %v7986_v1 = vpop.eup %7985  ;;  %v6388_v58 = vadd.f32 %v6260_v30, %v15921_v42  ;;  %7991 = vpow2.f32 %v4970_v0  ;;  %v4743_v51 = vsub.f32 0.0, %v4615_v62  ;;  %vm5796_vm13 = vcmp.lt.f32.partialorder %v5795_v40, 0.0004427343  ;;  %v13440_v40 = vpop.f32.mrb[107].mxu1 }
 0x49c   : > { %v6390_v63 = vadd.f32 %v6262_v26, %v4470_v54  ;;  %v5791_v15 = vmul.f32 0.6931472, %v7986_v1  ;;  %7993 = vlog2.f32 %v5924_v18  ;;  %v5927_v10 = vmul.f32 -0.5, %v7984_v2 }
 0x49d   : > { %v6564_v59 = vmul.f32 %v15922_v55, %v6388_v58  ;;  %v4974_v5 = vmul.f32 1.442695, %v4743_v51  ;;  %v4372_v11 = vmul.f32 100.0, %v13422_v16  ;;  %v4469_v54 = vmax.f32 %v13289_v34, 0.0 }
 0x49e   : > { %v6566_v56 = vmul.f32 %v15922_v55, %v6390_v63  ;;  %v5797_v12 = vsel %vm5796_vm13, %v5794_v8, %v5791_v15  ;;  %v7988_v30 = vpop.eup %7987  ;;  %vm13436_vm14 = vcmp.lt.f32.partialorder %v5813_v20, 0.0004427343  ;;  %v5812_v8 = vmul.f32 %v13380_v47, %v5811_v46  ;;  %v15925_v47 = vld [vmem:[#allocation28_spill] sm:$0xff] }
 0x49f   : > { %v13433_v7 = vadd.f32 %v13359_v33, %v6564_v59  ;;  %v6261_v0 = vmul.f32 0.01, %v5797_v12  ;;  %v7990_v62 = vpop.eup %7989  ;;  %v5930_v42 = vand.u32 2147483647, %v7984_v2  ;;  %v5942_v58 = vadd.f32 1.0, %v7988_v30 }
 0x4a0   : > { %v13443_v1 = vadd.f32 %v13373_v53, %v6566_v56  ;;  %v5809_v33 = vmul.f32 0.6931472, %v7990_v62  ;;  %7995 = vpow2.f32 %v4974_v5  ;;  %v4628_v63 = vand.u32 2147483647, %v4372_v11 }
 0x4a1   : > { %v6389_v18 = vadd.f32 %v6261_v0, %v4469_v54  ;;  %v5928_v34 = vadd.f32 1.0, %v5927_v10  ;;  %7997 = vlog2.f32 %v5942_v58  ;;  %v5945_v20 = vmul.f32 -0.5, %v7988_v30 }
 0x4a2   : > { %v13448_v15 = vadd.f32 %v12927_v14, %v15920_v21  ;;  %v5815_v53 = vsel %vm13436_vm14, %v5812_v8, %v5809_v33  ;;  %v4756_v59 = vsub.f32 0.0, %v4628_v63  ;;  %v13455_v46 = vadd.f32 %v15925_v47, %v15920_v21 }
 0x4a3   : > { %v6565_v51 = vmul.f32 %v15922_v55, %v6389_v18  ;;  %v15926_v56 = vrot.slane %v13023_v24, 2  ;;  %v4471_v12 = vmax.f32 %v13303_v4, 0.0  ;;  %v6263_v5 = vmul.f32 0.01, %v5815_v53 }
 0x4a4   : > { %v4374_v14 = vmul.f32 100.0, %v13448_v15  ;;  %vm13464_vm12 = vcmp.lt.f32.partialorder %v5930_v42, 0.0004427343  ;;  %v5000_v0 = vmul.f32 1.442695, %v4756_v59  ;;  %v4373_v26 = vmul.f32 100.0, %v13455_v46 }
 0x4a5   : > { %v6657_v10 = vadd.f32 %v15926_v56, %v13023_v24  ;;  %v13462_v11 = vadd.f32 %v6676_v52, %v6565_v51  ;;  %v7992_v62 = vpop.eup %7991  ;;  %v6391_v8 = vadd.f32 %v6263_v5, %v4471_v12  ;;  %v5929_v58 = vmul.f32 %v7984_v2, %v5928_v34  ;;  %v15929_v24 = vld [vmem:[#allocation55_spill] sm:$0xff]  ;;  %v13474_v56 = vpop.f32.mrb[108].mxu0  ;;  %v15932_v5 = vld [vmem:[#allocation60_spill] sm:$0xff] }
 0x4a6   : > { %v4630_v18 = vand.u32 2147483647, %v4374_v14  ;;  %v13471_v33 = vadd.f32 %v15929_v24, %v15920_v21  ;;  %v7994_v4 = vpop.eup %7993  ;;  %v5946_v63 = vadd.f32 1.0, %v5945_v20  ;;  %v5948_v53 = vand.u32 2147483647, %v7988_v30  ;;  %15930 = vst [vmem:[#allocation29_spill] sm:$0xff] %v13474_v56 }
 0x4a7   : > { %v5933_v52 = vadd.f32 1.0, %v7992_v62  ;;  %7999 = vpow2.f32 %v5000_v0  ;;  %v6567_v42 = vmul.f32 %v15922_v55, %v6391_v8  ;;  %v5926_v51 = vmul.f32 0.6931472, %v7994_v4  ;;  %v15931_v34 = vld [vmem:[#allocation35_spill] sm:$0xff] }
 0x4a8   : > { %v4758_v47 = vsub.f32 0.0, %v4630_v18  ;;  %v4629_v59 = vand.u32 2147483647, %v4373_v26  ;;  %v5936_v12 = vmul.f32 -0.5, %v7992_v62  ;;  %v4375_v2 = vmul.f32 100.0, %v13471_v33 }
 0x4a9   : > { %8001 = vlog2.f32 %v5933_v52  ;;  %v13479_v14 = vadd.f32 %v15932_v5, %v15931_v34  ;;  %v13482_v20 = vadd.f32 %v13418_v22, %v6567_v42  ;;  %v5932_v0 = vsel %vm13464_vm12, %v5929_v58, %v5926_v51 }
 0x4aa   : > { %v5004_v8 = vmul.f32 1.442695, %v4758_v47  ;;  %v4757_v24 = vsub.f32 0.0, %v4629_v59  ;;  %v13486_v18 = vpop.eup %7995  ;;  %v6658_v26 = vrot.slane %v6657_v10, 1  ;;  %v4484_v4 = vmax.f32 %v13307_v28, 0.0 }
 0x4ab   : > { %v6276_v52 = vmul.f32 0.01, %v5932_v0  ;;  %v4631_v45 = vand.u32 2147483647, %v4375_v2  ;;  %v7998_v21 = vpop.eup %7997  ;;  %v5947_v55 = vmul.f32 %v7988_v30, %v5946_v63  ;;  %vm13489_vm15 = vcmp.lt.f32.partialorder %v5948_v53, 0.0004427343 }
 0x4ac   : > { %v5951_v22 = vadd.f32 1.0, %v13486_v18  ;;  %8003 = vpow2.f32 %v5004_v8  ;;  %v5944_v58 = vmul.f32 0.6931472, %v7998_v21  ;;  %v5002_v42 = vmul.f32 1.442695, %v4757_v24  ;;  %v15935_v0 = vld [vmem:[#allocation57_spill] sm:$0xff] }
 0x4ad   : > { %v6404_v54 = vadd.f32 %v6276_v52, %v4484_v4  ;;  %v4759_v51 = vsub.f32 0.0, %v4631_v45  ;;  %v5937_v47 = vadd.f32 1.0, %v5936_v12  ;;  %v5939_v59 = vand.u32 2147483647, %v7992_v62  ;;  %v15937_v52 = vld [vmem:[#allocation41_spill] sm:$0xff] }
 0x4ae   : > { %8005 = vlog2.f32 %v5951_v22  ;;  %v4264_v28 = vmul.f32 100.0, %v13479_v14  ;;  %v5950_v30 = vsel %vm13489_vm15, %v5947_v55, %v5944_v58  ;;  %v13498_v53 = vadd.f32 %v6658_v26, %v6657_v10  ;;  %v13511_v55 = vpop.f32.mrb[108].mxu1  ;;  %v15939_v22 = vld [vmem:[#allocation63_spill] sm:$0xff] }
 0x4af   : > { %v6580_v2 = vmul.f32 %v15935_v0, %v6404_v54  ;;  %8007 = vpow2.f32 %v5002_v42  ;;  %v5006_v63 = vmul.f32 1.442695, %v4759_v51  ;;  %v4486_v8 = vmax.f32 %v13324_v3, 0.0  ;;  %15938 = vst [vmem:[#allocation25_spill] sm:$0xff] %v13511_v55 }
 0x4b0   : > { %15936 = vst [vmem:[#allocation39_spill] sm:$0xff] %v13498_v53  ;;  %v6278_v4 = vmul.f32 0.01, %v5950_v30  ;;  %v4520_v21 = vand.u32 2147483647, %v4264_v28  ;;  %v5954_v12 = vmul.f32 -0.5, %v13486_v18  ;;  %v13509_v5 = vadd.f32 %v15937_v52, %v15931_v34 }
 0x4b1   : > { %v13501_v24 = vpop.eup %7999  ;;  %v13504_v45 = vadd.f32 %v13433_v7, %v6580_v2  ;;  %8009 = vpow2.f32 %v5006_v63  ;;  %v4485_v26 = vmax.f32 %v13370_v36, 0.0  ;;  %v13517_v54 = vadd.f32 %v15939_v22, %v15931_v34 }
 0x4b2   : > { %v6406_v10 = vadd.f32 %v6278_v4, %v4486_v8  ;;  %v6068_v3 = vadd.f32 1.0, %v13501_v24  ;;  %v5938_v58 = vmul.f32 %v7992_v62, %v5937_v47  ;;  %vm13519_vm0 = vcmp.lt.f32.partialorder %v5939_v59, 0.0004427343 }
 0x4b3   : > { %v8002_v7 = vpop.eup %8001  ;;  %v4648_v51 = vsub.f32 0.0, %v4520_v21  ;;  %v4266_v28 = vmul.f32 100.0, %v13509_v5  ;;  %v5957_v36 = vand.u32 2147483647, %v13486_v18  ;;  %v4487_v63 = vmax.f32 %v13394_v13, 0.0 }
 0x4b4   : > { %v6582_v2 = vmul.f32 %v15935_v0, %v6406_v10  ;;  %v5935_v30 = vmul.f32 0.6931472, %v8002_v7  ;;  %8011 = vlog2.f32 %v6068_v3  ;;  %v5955_v8 = vadd.f32 1.0, %v5954_v12 }
 0x4b5   : > { %v4784_v4 = vmul.f32 1.442695, %v4648_v51  ;;  %v4522_v52 = vand.u32 2147483647, %v4266_v28  ;;  %v4265_v21 = vmul.f32 100.0, %v13517_v54  ;;  %v6071_v3 = vmul.f32 -0.5, %v13501_v24 }
 0x4b6   : > { %v13527_v22 = vpop.eup %8003  ;;  %v13530_v62 = vadd.f32 %v13443_v1, %v6582_v2  ;;  %v5941_v47 = vsel %vm13519_vm0, %v5938_v58, %v5935_v30  ;;  %vm13539_vm1 = vcmp.lt.f32.partialorder %v5957_v36, 0.0004427343  ;;  %v15944_v58 = vld [vmem:[#allocation31_spill] sm:$0xff]  ;;  %v13547_v28 = vpop.f32.mrb[109].mxu0  ;;  %v5956_v13 = vmul.f32 %v13486_v18, %v5955_v8 }
 0x4b7   : > { %v6277_v10 = vmul.f32 0.01, %v5941_v47  ;;  %v6086_v12 = vadd.f32 1.0, %v13527_v22  ;;  %8013 = vpow2.f32 %v4784_v4  ;;  %v4650_v1 = vsub.f32 0.0, %v4522_v52  ;;  %15945 = vst [vmem:[#allocation26_spill] sm:$0xff] %v13547_v28 }
 0x4b8   : > { %v8006_v7 = vpop.eup %8005  ;;  %v13545_v42 = vadd.f32 %v15944_v58, %v15931_v34  ;;  %v6074_v36 = vand.u32 2147483647, %v13501_v24  ;;  %v4521_v52 = vand.u32 2147483647, %v4265_v21  ;;  %v6072_v44 = vadd.f32 1.0, %v6071_v3 }
 0x4b9   : > { %v13549_v2 = vpop.eup %8007  ;;  %v6405_v30 = vadd.f32 %v6277_v10, %v4485_v26  ;;  %v5953_v47 = vmul.f32 0.6931472, %v8006_v7  ;;  %8015 = vlog2.f32 %v6086_v12  ;;  %v4788_v26 = vmul.f32 1.442695, %v4650_v1  ;;  %v13560_v10 = vpop.f32.mrb[109].mxu1 }
 0x4ba   : > { %v6077_v4 = vadd.f32 1.0, %v13549_v2  ;;  %15946 = vst [vmem:[#allocation36_spill] sm:$0xff] %v13560_v10  ;;  %v6089_v8 = vmul.f32 -0.5, %v13527_v22  ;;  %v4267_v12 = vmul.f32 100.0, %v13545_v42  ;;  %vm13570_vm2 = vcmp.lt.f32.partialorder %v6074_v36, 0.0004427343 }
 0x4bb   : > { %v13555_v53 = vpop.eup %8009  ;;  %v6581_v58 = vmul.f32 %v15935_v0, %v6405_v30  ;;  %v5959_v34 = vsel %vm13539_vm1, %v5956_v13, %v5953_v47  ;;  %v13574_v47 = vpop.f32.mrb[110].mxu0  ;;  %v6092_v36 = vand.u32 2147483647, %v13527_v22 }
 0x4bc   : > { %v6279_v18 = vmul.f32 0.01, %v5959_v34  ;;  %8017 = vlog2.f32 %v6077_v4  ;;  %v6095_v30 = vadd.f32 1.0, %v13555_v53  ;;  %v4649_v34 = vsub.f32 0.0, %v4521_v52  ;;  %15949 = vst [vmem:[#allocation32_spill] sm:$0xff] %v13574_v47  ;;  %v13602_v56 = vpop.f32.mrb[111].mxu0 }
 0x4bd   : > { %v13565_v7 = vadd.f32 %v13462_v11, %v6581_v58  ;;  %8019 = vpow2.f32 %v4788_v26  ;;  %v6073_v11 = vmul.f32 %v13501_v24, %v6072_v44  ;;  %v6080_v58 = vmul.f32 -0.5, %v13549_v2  ;;  %v15950_v26 = vld [vmem:[#allocation47_spill] sm:$0xff]  ;;  %v13587_v44 = vpop.f32.mrb[110].mxu1 }
 0x4be   : > { %v8012_v13 = vpop.eup %8011  ;;  %v6407_v3 = vadd.f32 %v6279_v18, %v4487_v63  ;;  %8021 = vlog2.f32 %v6095_v30  ;;  %v6090_v59 = vadd.f32 1.0, %v6089_v8  ;;  %v4786_v51 = vmul.f32 1.442695, %v4649_v34  ;;  %v15951_v18 = vld [vmem:[#allocation42_spill] sm:$0xff]  ;;  %15952 = vst [vmem:[#allocation44_spill] sm:$0xff] %v13587_v44 }
 0x4bf   : > { %v6070_v4 = vmul.f32 0.6931472, %v8012_v13  ;;  %v4523_v10 = vand.u32 2147483647, %v4267_v12  ;;  %v6098_v52 = vmul.f32 -0.5, %v13555_v53  ;;  %v13585_v13 = vadd.f32 %v15951_v18, %v15950_v26 }
 0x4c0   : > { %v6583_v21 = vmul.f32 %v15935_v0, %v6407_v3  ;;  %8023 = vpow2.f32 %v4786_v51  ;;  %v6081_v1 = vadd.f32 1.0, %v6080_v58  ;;  %v6083_v34 = vand.u32 2147483647, %v13549_v2  ;;  %v15954_v51 = vld [vmem:[#allocation19_spill] sm:$0xff] }
 0x4c1   : > { %v6076_v63 = vsel %vm13570_vm2, %v6073_v11, %v6070_v4  ;;  %v13589_v24 = vpop.eup %8013  ;;  %v4651_v12 = vsub.f32 0.0, %v4523_v10  ;;  %v4280_v11 = vmul.f32 100.0, %v13585_v13  ;;  %v15953_v18 = vmax.f32 %v13422_v16, 0.0 }
 0x4c2   : > { %v13592_v30 = vadd.f32 %v13482_v20, %v6583_v21  ;;  %v6292_v8 = vmul.f32 0.01, %v6076_v63  ;;  %v5096_v4 = vadd.f32 1.0, %v13589_v24  ;;  %v6091_v47 = vmul.f32 %v13527_v22, %v6090_v59 }
 0x4c3   : > { %v8016_v3 = vpop.eup %8015  ;;  %v4790_v28 = vmul.f32 1.442695, %v4651_v12  ;;  %vm6093_vm3 = vcmp.lt.f32.partialorder %v6092_v36, 0.0004427343  ;;  %v6101_v20 = vand.u32 2147483647, %v13555_v53 }
 0x4c4   : > { %v6420_v0 = vadd.f32 %v6292_v8, %v15953_v18  ;;  %v6088_v44 = vmul.f32 0.6931472, %v8016_v3  ;;  %8025 = vlog2.f32 %v5096_v4  ;;  %v4536_v10 = vand.u32 2147483647, %v4280_v11  ;;  %v15955_v3 = vld [vmem:[#allocation38_spill] sm:$0xff] }
 0x4c5   : > { %v6099_v55 = vadd.f32 1.0, %v6098_v52  ;;  %8027 = vpow2.f32 %v4790_v28  ;;  %v6082_v8 = vmul.f32 %v13549_v2, %v6081_v1  ;;  %v5099_v22 = vmul.f32 -0.5, %v13589_v24  ;;  %v13617_v1 = vpop.f32.mrb[111].mxu1 }
 0x4c6   : > { %v8018_v21 = vpop.eup %8017  ;;  %v6596_v58 = vmul.f32 %v15954_v51, %v6420_v0  ;;  %v6094_v63 = vsel %vm6093_vm3, %v6091_v47, %v6088_v44  ;;  %vm6084_vm4 = vcmp.lt.f32.partialorder %v6083_v34, 0.0004427343  ;;  %v4664_v12 = vsub.f32 0.0, %v4536_v10 }
 0x4c7   : > { %v6294_v27 = vmul.f32 0.01, %v6094_v63  ;;  %v6079_v16 = vmul.f32 0.6931472, %v8018_v21  ;;  %v13606_v59 = vpop.eup %8019  ;;  %v13611_v0 = vadd.f32 %v15955_v3, %v15950_v26  ;;  %v15956_v28 = vmax.f32 %v13448_v15, 0.0 }
 0x4c8   : > { %v6666_v36 = vadd.f32 %v13504_v45, %v6596_v58  ;;  %v8022_v47 = vpop.eup %8021  ;;  %v5102_v4 = vand.u32 2147483647, %v13589_v24  ;;  %v5114_v2 = vadd.f32 1.0, %v13606_v59  ;;  %v6100_v34 = vmul.f32 %v13555_v53, %v6099_v55 }
 0x4c9   : > { %v6422_v52 = vadd.f32 %v6294_v27, %v15956_v28  ;;  %v6085_v44 = vsel %vm6084_vm4, %v6082_v8, %v6079_v16  ;;  %v6097_v45 = vmul.f32 0.6931472, %v8022_v47  ;;  %vm6102_vm5 = vcmp.lt.f32.partialorder %v6101_v20, 0.0004427343 }
 0x4ca   : > { %v6667_v11 = vrot.slane %v6666_v36, 4  ;;  %v6293_v18 = vmul.f32 0.01, %v6085_v44  ;;  %v5100_v21 = vadd.f32 1.0, %v5099_v22  ;;  %8029 = vlog2.f32 %v5114_v2  ;;  %v13621_v58 = vpop.eup %8023 }
 0x4cb   : > { %v6598_v10 = vmul.f32 %v15954_v51, %v6422_v52  ;;  %v15957_v15 = vmax.f32 %v13455_v46, 0.0  ;;  %v6103_v16 = vsel %vm6102_vm5, %v6100_v34, %v6097_v45  ;;  %v4816_v8 = vmul.f32 1.442695, %v4664_v12 }
 0x4cc   : > { %v6668_v27 = vadd.f32 %v6667_v11, %v6666_v36  ;;  %v6295_v28 = vmul.f32 0.01, %v6103_v16  ;;  %v5117_v47 = vmul.f32 -0.5, %v13606_v59  ;;  %v4282_v53 = vmul.f32 100.0, %v13611_v0 }
 0x4cd   : > { %v6421_v63 = vadd.f32 %v6293_v18, %v15957_v15  ;;  %v6692_v3 = vadd.f32 %v13530_v62, %v6598_v10  ;;  %vm13629_vm6 = vcmp.lt.f32.partialorder %v5102_v4, 0.0004427343  ;;  %v5105_v46 = vadd.f32 1.0, %v13621_v58 }
 0x4ce   : > { %v8026_v36 = vpop.eup %8025  ;;  %v6669_v52 = vrot.slane %v6668_v27, 2  ;;  %v15960_v62 = vmax.f32 %v13471_v33, 0.0  ;;  %8031 = vpow2.f32 %v4816_v8  ;;  %v5101_v4 = vmul.f32 %v13589_v24, %v5100_v21 }
 0x4cf   : > { %v6597_v55 = vmul.f32 %v15954_v51, %v6421_v63  ;;  %v6693_v12 = vrot.slane %v6692_v3, 4  ;;  %v13637_v2 = vpop.eup %8027  ;;  %v5098_v18 = vmul.f32 0.6931472, %v8026_v36  ;;  %8033 = vlog2.f32 %v5105_v46 }
 0x4d0   : > { %v6423_v44 = vadd.f32 %v6295_v28, %v15960_v62  ;;  %v5118_v10 = vadd.f32 1.0, %v5117_v47  ;;  %v4538_v15 = vand.u32 2147483647, %v4282_v53  ;;  %v5108_v33 = vmul.f32 -0.5, %v13621_v58  ;;  %v13646_v28 = vpop.f32.mrb[112].mxu0 }
 0x4d1   : > { %v6679_v11 = vadd.f32 %v13565_v7, %v6597_v55  ;;  %v6694_v45 = vadd.f32 %v6693_v12, %v6692_v3  ;;  %v5104_v16 = vsel %vm13629_vm6, %v5101_v4, %v5098_v18  ;;  %v5123_v8 = vadd.f32 1.0, %v13637_v2  ;;  %v13648_v7 = vpop.f32.mrb[112].mxu1 }
 0x4d2   : > { %v6599_v34 = vmul.f32 %v15954_v51, %v6423_v44  ;;  %15961 = vst [vmem:[#allocation24_spill] sm:$0xff] %v13648_v7  ;;  %v6670_v55 = vadd.f32 %v6669_v52, %v6668_v27  ;;  %v5120_v21 = vand.u32 2147483647, %v13606_v59  ;;  %v6184_v53 = vmul.f32 0.01, %v5104_v16 }
 0x4d3   : > { %v6680_v63 = vrot.slane %v6679_v11, 4  ;;  %v6695_v47 = vrot.slane %v6694_v45, 2  ;;  %v5111_v20 = vand.u32 2147483647, %v13621_v58  ;;  %8035 = vlog2.f32 %v5123_v8  ;;  %v15964_v8 = vld [vmem:[#allocation65_spill] sm:$0xff] }
 0x4d4   : > { %v6705_v24 = vadd.f32 %v13592_v30, %v6599_v34  ;;  %v8030_v46 = vpop.eup %8029  ;;  %v5119_v12 = vmul.f32 %v13606_v59, %v5118_v10  ;;  %v4666_v44 = vsub.f32 0.0, %v4538_v15  ;;  %v5109_v52 = vadd.f32 1.0, %v5108_v33 }
 0x4d5   : > { %v6681_v36 = vadd.f32 %v6680_v63, %v6679_v11  ;;  %v5116_v27 = vmul.f32 0.6931472, %v8030_v46  ;;  %v5126_v30 = vmul.f32 -0.5, %v13637_v2  ;;  %v6671_v4 = vrot.slane %v6670_v55, 1 }
 0x4d6   : > { %v6706_v18 = vrot.slane %v6705_v24, 4  ;;  %vm13657_vm7 = vcmp.lt.f32.partialorder %v5120_v21, 0.0004427343  ;;  %v13664_v11 = vadd.f32 %v15964_v8, %v15950_v26  ;;  %v6696_v59 = vadd.f32 %v6695_v47, %v6694_v45 }
 0x4d7   : > { %v15965_v10 = vmax.f32 %v13479_v14, 0.0  ;;  %v5122_v63 = vsel %vm13657_vm7, %v5119_v12, %v5116_v27  ;;  %vm13670_vm8 = vcmp.lt.f32.partialorder %v5111_v20, 0.0004427343  ;;  %v6682_v46 = vrot.slane %v6681_v36, 2 }
 0x4d8   : > { %v8032_v21 = vpop.eup %8031  ;;  %v5129_v62 = vand.u32 2147483647, %v13637_v2  ;;  %v4820_v3 = vmul.f32 1.442695, %v4666_v44  ;;  %v6707_v22 = vadd.f32 %v6706_v18, %v6705_v24  ;;  %v5110_v45 = vmul.f32 %v13621_v58, %v5109_v52 }
 0x4d9   : > { %v6312_v15 = vadd.f32 %v6184_v53, %v15965_v10  ;;  %v8034_v8 = vpop.eup %8033  ;;  %v5127_v14 = vadd.f32 1.0, %v5126_v30  ;;  %v5240_v47 = vadd.f32 1.0, %v8032_v21  ;;  %v13677_v53 = vadd.f32 %v6671_v4, %v6670_v55  ;;  %v15969_v10 = vld [vmem:[#allocation21_spill] sm:$0xff] }
 0x4da   : > { %v6186_v12 = vmul.f32 0.01, %v5122_v63  ;;  %v5107_v20 = vmul.f32 0.6931472, %v8034_v8  ;;  %v4281_v27 = vmul.f32 100.0, %v13664_v11  ;;  %v6697_v34 = vrot.slane %v6696_v59, 1 }
 0x4db   : > { %15968 = vst [vmem:[#allocation33_spill] sm:$0xff] %v13677_v53  ;;  %v13681_v51 = vmul.f32 %v15969_v10, %v6312_v15  ;;  %8037 = vlog2.f32 %v5240_v47  ;;  %v5243_v7 = vmul.f32 -0.5, %v8032_v21  ;;  %v13683_v16 = vadd.f32 %v6682_v46, %v6681_v36  ;;  %v15973_v46 = vld [vmem:[#allocation52_spill] sm:$0xff] }
 0x4dc   : > { %v5113_v24 = vsel %vm13670_vm8, %v5110_v45, %v5107_v20  ;;  %vm13687_vm9 = vcmp.lt.f32.partialorder %v5129_v62, 0.0004427343  ;;  %8039 = vpow2.f32 %v4820_v3  ;;  %v6708_v44 = vrot.slane %v6707_v22, 2 }
 0x4dd   : > { %v8036_v55 = vpop.eup %8035  ;;  %v6185_v18 = vmul.f32 0.01, %v5113_v24  ;;  %v5128_v52 = vmul.f32 %v13637_v2, %v5127_v14  ;;  %v5246_v30 = vand.u32 2147483647, %v8032_v21  ;;  %v15972_v4 = vmax.f32 %v13509_v5, 0.0  ;;  %v13710_v5 = vpop.f32.mrb[113].mxu0 }
 0x4de   : > { %v5125_v63 = vmul.f32 0.6931472, %v8036_v55  ;;  %v4537_v36 = vand.u32 2147483647, %v4281_v27  ;;  %v13696_v33 = vadd.f32 %v13158_v32, %v15950_v26  ;;  %v5244_v62 = vadd.f32 1.0, %v5243_v7 }
 0x4df   : > { %v6314_v15 = vadd.f32 %v6186_v12, %v15972_v4  ;;  %v13700_v8 = vadd.f32 %v13188_v23, %v15973_v46  ;;  %v13704_v3 = vadd.f32 %v13190_v17, %v15973_v46  ;;  %v13708_v2 = vadd.f32 %v13198_v43, %v15973_v46 }
 0x4e0   : > { %v13712_v45 = vadd.f32 %v6697_v34, %v6696_v59  ;;  %v4665_v14 = vsub.f32 0.0, %v4537_v36  ;;  %v4283_v7 = vmul.f32 100.0, %v13696_v33  ;;  %v13716_v47 = vadd.f32 %v6708_v44, %v6707_v22  ;;  %v13732_v44 = vpop.f32.mrb[113].mxu1 }
 0x4e1   : > { %v15975_v23 = vmax.f32 %v13517_v54, 0.0  ;;  %vm13720_vm10 = vcmp.lt.f32.partialorder %v5246_v30, 0.0004427343  ;;  %v4296_v43 = vmul.f32 100.0, %v13700_v8  ;;  %v5131_v59 = vsel %vm13687_vm9, %v5128_v52, %v5125_v63 }
 0x4e2   : > { %15974 = vst [vmem:[#allocation37_spill] sm:$0xff] %v13712_v45  ;;  %v4818_v20 = vmul.f32 1.442695, %v4665_v14  ;;  %v4539_v27 = vand.u32 2147483647, %v4283_v7  ;;  %v4298_v34 = vmul.f32 100.0, %v13704_v3  ;;  %v13729_v24 = vmul.f32 %v15969_v10, %v6314_v15 }
 0x4e3   : > { %v6313_v12 = vadd.f32 %v6185_v18, %v15975_v23  ;;  %v5245_v22 = vmul.f32 %v8032_v21, %v5244_v62  ;;  %v4552_v55 = vand.u32 2147483647, %v4296_v43  ;;  %v4297_v54 = vmul.f32 100.0, %v13708_v2 }
 0x4e4   : > { %8041 = vpow2.f32 %v4818_v20  ;;  %v4667_v30 = vsub.f32 0.0, %v4539_v27  ;;  %v4554_v4 = vand.u32 2147483647, %v4298_v34  ;;  %v6187_v63 = vmul.f32 0.01, %v5131_v59  ;;  %v15978_v34 = vld [vmem:[#allocation48_spill] sm:$0xff] }
 0x4e5   : > { %v8038_v58 = vpop.eup %8037  ;;  %v13736_v52 = vmul.f32 %v15969_v10, %v6313_v12  ;;  %v4680_v36 = vsub.f32 0.0, %v4552_v55  ;;  %v4553_v14 = vand.u32 2147483647, %v4297_v54  ;;  %v13740_v23 = vadd.f32 %v13200_v25, %v15973_v46  ;;  %v13749_v54 = vpop.f32.mrb[114].mxu0 }
 0x4e6   : > { %v8040_v15 = vpop.eup %8039  ;;  %v5242_v7 = vmul.f32 0.6931472, %v8038_v58  ;;  %v4822_v21 = vmul.f32 1.442695, %v4667_v30  ;;  %v4682_v62 = vsub.f32 0.0, %v4554_v4  ;;  %v13745_v32 = vadd.f32 %v13226_v39, %v15978_v34  ;;  %15979 = vst [vmem:[#allocation43_spill] sm:$0xff] %v13749_v54 }
 0x4e7   : > { %v5258_v43 = vadd.f32 1.0, %v8040_v15  ;;  %v4848_v27 = vmul.f32 1.442695, %v4680_v36  ;;  %v4681_v55 = vsub.f32 0.0, %v4553_v14  ;;  %v13751_v30 = vpop.f32.mrb[114].mxu1  ;;  %v5261_v4 = vmul.f32 -0.5, %v8040_v15 }
 0x4e8   : > { %v5248_v12 = vsel %vm13720_vm10, %v5245_v22, %v5242_v7  ;;  %8043 = vpow2.f32 %v4822_v21  ;;  %v4852_v59 = vmul.f32 1.442695, %v4682_v62  ;;  %15980 = vst [vmem:[#allocation40_spill] sm:$0xff] %v13751_v30  ;;  %v15981_v36 = vmax.f32 %v13545_v42, 0.0 }
 0x4e9   : > { %v6200_v25 = vmul.f32 0.01, %v5248_v12  ;;  %8045 = vlog2.f32 %v5258_v43  ;;  %v4850_v39 = vmul.f32 1.442695, %v4681_v55  ;;  %v4299_v17 = vmul.f32 100.0, %v13740_v23 }
 0x4ea   : > { %v6315_v20 = vadd.f32 %v6187_v63, %v15981_v36  ;;  %8047 = vpow2.f32 %v4848_v27  ;;  %v15982_v22 = vmax.f32 %v13585_v13, 0.0  ;;  %v5264_v14 = vand.u32 2147483647, %v8040_v15 }
 0x4eb   : > { %8049 = vpow2.f32 %v4852_v59  ;;  %v4312_v21 = vmul.f32 100.0, %v13745_v32  ;;  %v4555_v43 = vand.u32 2147483647, %v4299_v17  ;;  %v13763_v12 = vadd.f32 %v13242_v48, %v15978_v34 }
 0x4ec   : > { %v6328_v7 = vadd.f32 %v6200_v25, %v15982_v22  ;;  %8051 = vpow2.f32 %v4850_v39  ;;  %v5262_v63 = vadd.f32 1.0, %v5261_v4  ;;  %v13768_v13 = vadd.f32 %v13277_v60, %v15978_v34 }
 0x4ed   : > { %v4568_v27 = vand.u32 2147483647, %v4312_v21  ;;  %v13771_v59 = vmul.f32 %v15969_v10, %v6315_v20  ;;  %v4683_v36 = vsub.f32 0.0, %v4555_v43  ;;  %v4314_v39 = vmul.f32 100.0, %v13763_v12 }
 0x4ee   : > { %v6504_v42 = vmul.f32 %v15868_v31, %v6328_v7  ;;  %v8042_v55 = vpop.eup %8041  ;;  %vm13778_vm11 = vcmp.lt.f32.partialorder %v5264_v14, 0.0004427343  ;;  %v4313_v20 = vmul.f32 100.0, %v13768_v13  ;;  %v5263_v62 = vmul.f32 %v8040_v15, %v5262_v63 }
 0x4ef   : > { %v5249_v4 = vadd.f32 1.0, %v8042_v55  ;;  %v5252_v22 = vmul.f32 -0.5, %v8042_v55  ;;  %v4854_v60 = vmul.f32 1.442695, %v4683_v36  ;;  %v4696_v7 = vsub.f32 0.0, %v4568_v27 }
 0x4f0   : > { %v13776_v48 = vadd.f32 %v6504_v42, %v13681_v51  ;;  %v4570_v21 = vand.u32 2147483647, %v4314_v39  ;;  %v13787_v42 = vadd.f32 %v13285_v35, %v15978_v34  ;;  %v5255_v36 = vand.u32 2147483647, %v8042_v55 }
 0x4f1   : > { %8053 = vlog2.f32 %v5249_v4  ;;  %v4880_v51 = vmul.f32 1.442695, %v4696_v7  ;;  %v5253_v4 = vadd.f32 1.0, %v5252_v22  ;;  %v4569_v43 = vand.u32 2147483647, %v4313_v20 }
 0x4f2   : > { %v8044_v58 = vpop.eup %8043  ;;  %8055 = vpow2.f32 %v4854_v60  ;;  %v4698_v14 = vsub.f32 0.0, %v4570_v21  ;;  %vm13800_vm13 = vcmp.lt.f32.partialorder %v5255_v36, 0.0004427343 }
 0x4f3   : > { %v8046_v18 = vpop.eup %8045  ;;  %v5267_v27 = vadd.f32 1.0, %v8044_v58  ;;  %v5270_v39 = vmul.f32 -0.5, %v8044_v58  ;;  %8057 = vpow2.f32 %v4880_v51  ;;  %v5273_v60 = vand.u32 2147483647, %v8044_v58 }
 0x4f4   : > { %v8048_v15 = vpop.eup %8047  ;;  %v5260_v63 = vmul.f32 0.6931472, %v8046_v18  ;;  %v4884_v21 = vmul.f32 1.442695, %v4698_v14  ;;  %v13794_v18 = vadd.f32 %v13335_v6, %v15880_v19  ;;  %v4697_v51 = vsub.f32 0.0, %v4569_v43 }
 0x4f5   : > { %v8050_v25 = vpop.eup %8049  ;;  %8059 = vlog2.f32 %v5267_v27  ;;  %v5384_v7 = vadd.f32 1.0, %v8048_v15  ;;  %v5271_v34 = vadd.f32 1.0, %v5270_v39  ;;  %v5387_v45 = vmul.f32 -0.5, %v8048_v15  ;;  %v13796_v27 = vpop.f32.mrb[115].mxu0 }
 0x4f6   : > { %v8052_v10 = vpop.eup %8051  ;;  %v5266_v35 = vsel %vm13778_vm11, %v5263_v62, %v5260_v63  ;;  %v5402_v53 = vadd.f32 1.0, %v8050_v25  ;;  %v5390_v46 = vand.u32 2147483647, %v8048_v15  ;;  %v5405_v20 = vmul.f32 -0.5, %v8050_v25  ;;  %15985 = vst [vmem:[#allocation27_spill] sm:$0xff] %v13796_v27  ;;  %v13857_v26 = vpop.f32.mrb[116].mxu0 }
 0x4f7   : > { %v6202_v30 = vmul.f32 0.01, %v5266_v35  ;;  %8061 = vlog2.f32 %v5384_v7  ;;  %v5388_v22 = vadd.f32 1.0, %v5387_v45  ;;  %v15986_v14 = vmax.f32 %v13611_v0, 0.0 }
 0x4f8   : > { %8063 = vlog2.f32 %v5402_v53  ;;  %v5254_v62 = vmul.f32 %v8042_v55, %v5253_v4  ;;  %v5393_v63 = vadd.f32 1.0, %v8052_v10  ;;  %v5272_v7 = vmul.f32 %v8044_v58, %v5271_v34 }
 0x4f9   : > { %v6330_v17 = vadd.f32 %v6202_v30, %v15986_v14  ;;  %vm13804_vm14 = vcmp.lt.f32.partialorder %v5273_v60, 0.0004427343  ;;  %v5396_v6 = vmul.f32 -0.5, %v8052_v10  ;;  %8065 = vpow2.f32 %v4884_v21 }
 0x4fa   : > { %vm13809_vm12 = vcmp.lt.f32.partialorder %v5390_v46, 0.0004427343  ;;  %v5408_v0 = vand.u32 2147483647, %v8050_v25  ;;  %8067 = vlog2.f32 %v5393_v63  ;;  %v5389_v36 = vmul.f32 %v8048_v15, %v5388_v22  ;;  %v13826_v22 = vpop.f32.mrb[115].mxu1 }
 0x4fb   : > { %v8054_v53 = vpop.eup %8053  ;;  %v6506_v45 = vmul.f32 %v15868_v31, %v6330_v17  ;;  %v5406_v4 = vadd.f32 1.0, %v5405_v20  ;;  %v4882_v34 = vmul.f32 1.442695, %v4697_v51  ;;  %v5399_v60 = vand.u32 2147483647, %v8052_v10  ;;  %15995 = vst [vmem:[#allocation34_spill] sm:$0xff] %v13826_v22 }
 0x4fc   : > { %v8056_v30 = vpop.eup %8055  ;;  %v5251_v55 = vmul.f32 0.6931472, %v8054_v53  ;;  %v5397_v17 = vadd.f32 1.0, %v5396_v6  ;;  %v4315_v63 = vmul.f32 100.0, %v13787_v42  ;;  %vm13821_vm15 = vcmp.lt.f32.partialorder %v5408_v0, 0.0004427343 }
 0x4fd   : > { %v13814_v58 = vadd.f32 %v6506_v45, %v13729_v24  ;;  %v5411_v14 = vadd.f32 1.0, %v8056_v30  ;;  %v5414_v21 = vmul.f32 -0.5, %v8056_v30  ;;  %v13816_v27 = vpop.eup %8057  ;;  %8069 = vpow2.f32 %v4882_v34 }
 0x4fe   : > { %v5257_v46 = vsel %vm13800_vm13, %v5254_v62, %v5251_v55  ;;  %v5528_v24 = vadd.f32 1.0, %v13816_v27  ;;  %v5407_v51 = vmul.f32 %v8050_v25, %v5406_v4  ;;  %v5417_v39 = vand.u32 2147483647, %v8056_v30 }
 0x4ff   : > { %v8060_v54 = vpop.eup %8059  ;;  %v6201_v53 = vmul.f32 0.01, %v5257_v46  ;;  %8071 = vlog2.f32 %v5411_v14  ;;  %v5415_v45 = vadd.f32 1.0, %v5414_v21  ;;  %v15996_v6 = vmax.f32 %v13664_v11, 0.0 }
 0x500   : > { %v5269_v20 = vmul.f32 0.6931472, %v8060_v54  ;;  %vm13830_vm0 = vcmp.lt.f32.partialorder %v5399_v60, 0.0004427343  ;;  %8073 = vlog2.f32 %v5528_v24  ;;  %v13836_v0 = vadd.f32 %v13352_v37, %v15880_v19 }
 0x501   : > { %v8062_v62 = vpop.eup %8061  ;;  %v6329_v55 = vadd.f32 %v6201_v53, %v15996_v6  ;;  %v5398_v4 = vmul.f32 %v8052_v10, %v5397_v17  ;;  %v4571_v21 = vand.u32 2147483647, %v4315_v63  ;;  %v5531_v60 = vmul.f32 -0.5, %v13816_v27 }
 0x502   : > { %v8064_v14 = vpop.eup %8063  ;;  %v5275_v54 = vsel %vm13804_vm14, %v5272_v7, %v5269_v20  ;;  %v5386_v25 = vmul.f32 0.6931472, %v8062_v62  ;;  %v5416_v22 = vmul.f32 %v8056_v30, %v5415_v45  ;;  %vm13844_vm1 = vcmp.lt.f32.partialorder %v5417_v39, 0.0004427343 }
 0x503   : > { %v6505_v46 = vmul.f32 %v15868_v31, %v6329_v55  ;;  %v6203_v11 = vmul.f32 0.01, %v5275_v54  ;;  %v5404_v53 = vmul.f32 0.6931472, %v8064_v14  ;;  %v8066_v6 = vpop.eup %8065  ;;  %v5534_v7 = vand.u32 2147483647, %v13816_v27 }
 0x504   : > { %v5392_v24 = vsel %vm13809_vm12, %v5389_v36, %v5386_v25  ;;  %v8068_v35 = vpop.eup %8067  ;;  %v16001_v17 = vmax.f32 %v13696_v33, 0.0  ;;  %v5546_v36 = vadd.f32 1.0, %v8066_v6  ;;  %v4699_v30 = vsub.f32 0.0, %v4571_v21 }
 0x505   : > { %v6725_v10 = vadd.f32 %v6505_v46, %v13736_v52  ;;  %v6216_v20 = vmul.f32 0.01, %v5392_v24  ;;  %v5410_v62 = vsel %vm13821_vm15, %v5407_v51, %v5404_v53  ;;  %v5395_v43 = vmul.f32 0.6931472, %v8068_v35  ;;  %v13859_v52 = vpop.f32.mrb[116].mxu1 }
 0x506   : > { %v6331_v63 = vadd.f32 %v6203_v11, %v16001_v17  ;;  %v6218_v55 = vmul.f32 0.01, %v5410_v62  ;;  %v16002_v39 = vmax.f32 %v13700_v8, 0.0  ;;  %v5532_v54 = vadd.f32 1.0, %v5531_v60  ;;  %v13868_v11 = vpop.f32.mrb[117].mxu0  ;;  %v13872_v17 = vpop.f32.mrb[117].mxu1 }
 0x507   : > { %v5549_v25 = vmul.f32 -0.5, %v8066_v6  ;;  %v13861_v33 = vpop.eup %8069  ;;  %v16003_v15 = vmax.f32 %v13704_v3, 0.0  ;;  %v5401_v46 = vsel %vm13830_vm0, %v5398_v4, %v5395_v43  ;;  %8075 = vlog2.f32 %v5546_v36 }
 0x508   : > { %v6507_v45 = vmul.f32 %v15868_v31, %v6331_v63  ;;  %v6344_v14 = vadd.f32 %v6216_v20, %v16002_v39  ;;  %v4328_v21 = vmul.f32 100.0, %v13794_v18  ;;  %v6217_v24 = vmul.f32 0.01, %v5401_v46  ;;  %v13895_v46 = vpop.f32.mrb[118].mxu0 }
 0x509   : > { %v6346_v51 = vadd.f32 %v6218_v55, %v16003_v15  ;;  %v8072_v8 = vpop.eup %8071  ;;  %v5552_v35 = vand.u32 2147483647, %v8066_v6  ;;  %v5537_v34 = vadd.f32 1.0, %v13861_v33  ;;  %v4886_v4 = vmul.f32 1.442695, %v4699_v30 }
 0x50a   : > { %v6751_v53 = vadd.f32 %v6507_v45, %v13771_v59  ;;  %v6520_v60 = vmul.f32 %v15890_v61, %v6344_v14  ;;  %v5413_v63 = vmul.f32 0.6931472, %v8072_v8  ;;  %v8074_v20 = vpop.eup %8073  ;;  %v16004_v55 = vmax.f32 %v13708_v2, 0.0 }
 0x50b   : > { %v6522_v3 = vmul.f32 %v15890_v61, %v6346_v51  ;;  %v5533_v59 = vmul.f32 %v13816_v27, %v5532_v54  ;;  %v5550_v36 = vadd.f32 1.0, %v5549_v25  ;;  %v5530_v14 = vmul.f32 0.6931472, %v8074_v20 }
 0x50c   : > { %v6713_v62 = vadd.f32 %v13776_v48, %v6520_v60  ;;  %v6345_v43 = vadd.f32 %v6217_v24, %v16004_v55  ;;  %v5419_v39 = vsel %vm13844_vm1, %v5416_v22, %v5413_v63  ;;  %8077 = vlog2.f32 %v5537_v34 }
 0x50d   : > { %v13881_v45 = vadd.f32 %v13814_v58, %v6522_v3  ;;  %v6219_v30 = vmul.f32 0.01, %v5419_v39  ;;  %vm5535_vm2 = vcmp.lt.f32.partialorder %v5534_v7, 0.0004427343  ;;  %vm13886_vm3 = vcmp.lt.f32.partialorder %v5552_v35, 0.0004427343 }
 0x50e   : > { %v6521_v15 = vmul.f32 %v15890_v61, %v6345_v43  ;;  %v5536_v2 = vsel %vm5535_vm2, %v5533_v59, %v5530_v14  ;;  %v5540_v27 = vmul.f32 -0.5, %v13861_v33  ;;  %8079 = vpow2.f32 %v4886_v4 }
 0x50f   : > { %v4584_v54 = vand.u32 2147483647, %v4328_v21  ;;  %v16007_v37 = vmax.f32 %v13740_v23, 0.0  ;;  %v6232_v25 = vmul.f32 0.01, %v5536_v2  ;;  %v5551_v51 = vmul.f32 %v8066_v6, %v5550_v36 }
 0x510   : > { %v13891_v58 = vadd.f32 %v6725_v10, %v6521_v15  ;;  %v5543_v7 = vand.u32 2147483647, %v13861_v33  ;;  %v4330_v60 = vmul.f32 100.0, %v13836_v0  ;;  %v13901_v24 = vadd.f32 %v13364_v41, %v15880_v19 }
 0x511   : > { %v6347_v22 = vadd.f32 %v6219_v30, %v16007_v37  ;;  %v4712_v8 = vsub.f32 0.0, %v4584_v54  ;;  %v16008_v10 = vmax.f32 %v13745_v32, 0.0  ;;  %v13908_v23 = vadd.f32 %v13375_v29, %v15880_v19  ;;  %v8076_v3 = vpop.eup %8075 }
 0x512   : > { %v13912_v6 = vadd.f32 %v13396_v57, %v15901_v9  ;;  %v5541_v63 = vadd.f32 1.0, %v5540_v27  ;;  %v4586_v4 = vand.u32 2147483647, %v4330_v60  ;;  %v4329_v41 = vmul.f32 100.0, %v13901_v24 }
 0x513   : > { %v6523_v21 = vmul.f32 %v15890_v61, %v6347_v22  ;;  %v6360_v35 = vadd.f32 %v6232_v25, %v16008_v10  ;;  %v4912_v34 = vmul.f32 1.442695, %v4712_v8  ;;  %v5548_v32 = vmul.f32 0.6931472, %v8076_v3  ;;  %v13930_v8 = vpop.f32.mrb[118].mxu1 }
 0x514   : > { %v4331_v43 = vmul.f32 100.0, %v13908_v23  ;;  %vm13919_vm4 = vcmp.lt.f32.partialorder %v5543_v7, 0.0004427343  ;;  %v4714_v57 = vsub.f32 0.0, %v4586_v4  ;;  %v4585_v59 = vand.u32 2147483647, %v4329_v41 }
 0x515   : > { %v13915_v20 = vadd.f32 %v6751_v53, %v6523_v21  ;;  %v6536_v55 = vmul.f32 %v12537_v50, %v6360_v35  ;;  %8081 = vpow2.f32 %v4912_v34  ;;  %v5554_v39 = vsel %vm13886_vm3, %v5551_v51, %v5548_v32  ;;  %v13947_v41 = vpop.f32.mrb[119].mxu0 }
 0x516   : > { %v4587_v14 = vand.u32 2147483647, %v4331_v43  ;;  %v4344_v53 = vmul.f32 100.0, %v13912_v6  ;;  %v8078_v15 = vpop.eup %8077  ;;  %v6234_v30 = vmul.f32 0.01, %v5554_v39  ;;  %v4441_v2 = vmax.f32 %v13768_v13, 0.0 }
 0x517   : > { %v13923_v36 = vadd.f32 %v6713_v62, %v6536_v55  ;;  %v4916_v27 = vmul.f32 1.442695, %v4714_v57  ;;  %v4713_v54 = vsub.f32 0.0, %v4585_v59  ;;  %v5539_v37 = vmul.f32 0.6931472, %v8078_v15 }
 0x518   : > { %v5542_v22 = vmul.f32 %v13861_v33, %v5541_v63  ;;  %v4715_v25 = vsub.f32 0.0, %v4587_v14  ;;  %v4600_v7 = vand.u32 2147483647, %v4344_v53  ;;  %v8080_v62 = vpop.eup %8079  ;;  %v16011_v48 = vmax.f32 %v13763_v12, 0.0  ;;  %v13959_v14 = vpop.f32.mrb[119].mxu1 }
 0x519   : > { %8083 = vpow2.f32 %v4916_v27  ;;  %v4914_v60 = vmul.f32 1.442695, %v4713_v54  ;;  %v13936_v21 = vadd.f32 %v13405_v38, %v15901_v9  ;;  %v5555_v33 = vadd.f32 1.0, %v8080_v62  ;;  %v13993_v10 = vpop.f32.mrb[120].mxu1 }
 0x51a   : > { %v6362_v51 = vadd.f32 %v6234_v30, %v16011_v48  ;;  %v5545_v13 = vsel %vm13919_vm4, %v5542_v22, %v5539_v37  ;;  %v13943_v35 = vadd.f32 %v13427_v49, %v15901_v9  ;;  %v4918_v63 = vmul.f32 1.442695, %v4715_v25  ;;  %16019 = vst [vmem:[#allocation45_spill] sm:$0xff] %v13993_v10 }
 0x51b   : > { %v6233_v12 = vmul.f32 0.01, %v5545_v13  ;;  %8085 = vpow2.f32 %v4914_v60  ;;  %v5558_v34 = vmul.f32 -0.5, %v8080_v62  ;;  %v4728_v4 = vsub.f32 0.0, %v4600_v7 }
 0x51c   : > { %v6538_v3 = vmul.f32 %v12537_v50, %v6362_v51  ;;  %8087 = vlog2.f32 %v5555_v33  ;;  %v4346_v49 = vmul.f32 100.0, %v13936_v21  ;;  %v16012_v43 = vrot.slane %v13683_v16, 1 }
 0x51d   : > { %v6361_v32 = vadd.f32 %v6233_v12, %v4441_v2  ;;  %8089 = vpow2.f32 %v4918_v63  ;;  %v5561_v57 = vand.u32 2147483647, %v8080_v62  ;;  %v4944_v59 = vmul.f32 1.442695, %v4728_v4  ;;  %v13984_v4 = vpop.f32.mrb[120].mxu0 }
 0x51e   : > { %v13950_v55 = vadd.f32 %v13881_v45, %v6538_v3  ;;  %v13956_v29 = vadd.f32 %v16012_v43, %v13683_v16  ;;  %v4345_v39 = vmul.f32 100.0, %v13943_v35  ;;  %v4602_v30 = vand.u32 2147483647, %v4346_v49 }
 0x51f   : > { %v8082_v53 = vpop.eup %8081  ;;  %v6537_v15 = vmul.f32 %v12537_v50, %v6361_v32  ;;  %v13965_v2 = vadd.f32 %v13440_v40, %v15901_v9  ;;  %v5559_v27 = vadd.f32 1.0, %v5558_v34  ;;  %8091 = vpow2.f32 %v4944_v59  ;;  %v16016_v59 = vld [vmem:[#allocation29_spill] sm:$0xff] }
 0x520   : > { %v5672_v54 = vadd.f32 1.0, %v8082_v53  ;;  %v4730_v22 = vsub.f32 0.0, %v4602_v30  ;;  %v4601_v25 = vand.u32 2147483647, %v4345_v39  ;;  %vm13972_vm5 = vcmp.lt.f32.partialorder %v5561_v57, 0.0004427343 }
 0x521   : > { %v13969_v37 = vadd.f32 %v13891_v58, %v6537_v15  ;;  %v4347_v7 = vmul.f32 100.0, %v13965_v2  ;;  %v5675_v13 = vmul.f32 -0.5, %v8082_v53  ;;  %v5560_v58 = vmul.f32 %v8080_v62, %v5559_v27  ;;  %v16015_v57 = vld [vmem:[#allocation53_spill] sm:$0xff] }
 0x522   : > { %8093 = vlog2.f32 %v5672_v54  ;;  %v4948_v33 = vmul.f32 1.442695, %v4730_v22  ;;  %v4729_v3 = vsub.f32 0.0, %v4601_v25  ;;  %v5678_v63 = vand.u32 2147483647, %v8082_v53 }
 0x523   : > { %v8084_v60 = vpop.eup %8083  ;;  %v4603_v12 = vand.u32 2147483647, %v4347_v7  ;;  %v13981_v39 = vadd.f32 %v16016_v59, %v16015_v57  ;;  %v5676_v27 = vadd.f32 1.0, %v5675_v13  ;;  %v16020_v9 = vmax.f32 %v13787_v42, 0.0 }
 0x524   : > { %v5690_v34 = vadd.f32 1.0, %v8084_v60  ;;  %v5693_v49 = vmul.f32 -0.5, %v8084_v60  ;;  %8095 = vpow2.f32 %v4948_v33  ;;  %v4946_v43 = vmul.f32 1.442695, %v4729_v3 }
 0x525   : > { %v8086_v32 = vpop.eup %8085  ;;  %v4731_v22 = vsub.f32 0.0, %v4603_v12  ;;  %vm13986_vm6 = vcmp.lt.f32.partialorder %v5678_v63, 0.0004427343  ;;  %v5696_v54 = vand.u32 2147483647, %v8084_v60  ;;  %v4360_v12 = vmul.f32 100.0, %v13981_v39 }
 0x526   : > { %v8088_v15 = vpop.eup %8087  ;;  %8097 = vlog2.f32 %v5690_v34  ;;  %v5681_v30 = vadd.f32 1.0, %v8086_v32  ;;  %v5684_v7 = vmul.f32 -0.5, %v8086_v32  ;;  %v5694_v51 = vadd.f32 1.0, %v5693_v49 }
 0x527   : > { %v8090_v25 = vpop.eup %8089  ;;  %v5557_v62 = vmul.f32 0.6931472, %v8088_v15  ;;  %8099 = vpow2.f32 %v4946_v43  ;;  %v5687_v40 = vand.u32 2147483647, %v8086_v32  ;;  %v4950_v43 = vmul.f32 1.442695, %v4731_v22 }
 0x528   : > { %8101 = vlog2.f32 %v5681_v30  ;;  %v5699_v3 = vadd.f32 1.0, %v8090_v25  ;;  %v5702_v59 = vmul.f32 -0.5, %v8090_v25  ;;  %v5685_v16 = vadd.f32 1.0, %v5684_v7 }
 0x529   : > { %v5563_v34 = vsel %vm13972_vm5, %v5560_v58, %v5557_v62  ;;  %v8092_v15 = vpop.eup %8091  ;;  %v5705_v63 = vand.u32 2147483647, %v8090_v25  ;;  %v5677_v58 = vmul.f32 %v8082_v53, %v5676_v27  ;;  %v5695_v22 = vmul.f32 %v8084_v60, %v5694_v51 }
 0x52a   : > { %v6235_v13 = vmul.f32 0.01, %v5563_v34  ;;  %8103 = vlog2.f32 %v5699_v3  ;;  %v5816_v45 = vadd.f32 1.0, %v8092_v15  ;;  %v5819_v38 = vmul.f32 -0.5, %v8092_v15 }
 0x52b   : > { %v5703_v49 = vadd.f32 1.0, %v5702_v59  ;;  %8105 = vpow2.f32 %v4950_v43  ;;  %v5822_v34 = vand.u32 2147483647, %v8092_v15  ;;  %vm13998_vm7 = vcmp.lt.f32.partialorder %v5696_v54, 0.0004427343 }
 0x52c   : > { %v8094_v30 = vpop.eup %8093  ;;  %v6363_v48 = vadd.f32 %v6235_v13, %v16020_v9  ;;  %8107 = vlog2.f32 %v5816_v45  ;;  %v5820_v61 = vadd.f32 1.0, %v5819_v38  ;;  %vm14002_vm8 = vcmp.lt.f32.partialorder %v5687_v40, 0.0004427343 }
 0x52d   : > { %v5674_v62 = vmul.f32 0.6931472, %v8094_v30  ;;  %v5686_v53 = vmul.f32 %v8086_v32, %v5685_v16  ;;  %vm14008_vm9 = vcmp.lt.f32.partialorder %v5705_v63, 0.0004427343  ;;  %v4616_v38 = vand.u32 2147483647, %v4360_v12 }
 0x52e   : > { %v6539_v3 = vmul.f32 %v12537_v50, %v6363_v48  ;;  %v8096_v42 = vpop.eup %8095  ;;  %v5704_v54 = vmul.f32 %v8090_v25, %v5703_v49  ;;  %v5821_v43 = vmul.f32 %v8092_v15, %v5820_v61  ;;  %vm14015_vm10 = vcmp.lt.f32.partialorder %v5822_v34, 0.0004427343  ;;  %v16029_v32 = vld [vmem:[#allocation25_spill] sm:$0xff]  ;;  %v16031_v25 = vld [vmem:[#allocation26_spill] sm:$0xff] }
 0x52f   : > { %v5680_v9 = vsel %vm13986_vm6, %v5677_v58, %v5674_v62  ;;  %v5834_v40 = vadd.f32 1.0, %v8096_v42  ;;  %v5837_v16 = vmul.f32 -0.5, %v8096_v42  ;;  %v14021_v33 = vadd.f32 %v16029_v32, %v16015_v57 }
 0x530   : > { %v8098_v27 = vpop.eup %8097  ;;  %v14013_v51 = vadd.f32 %v13915_v20, %v6539_v3  ;;  %v6248_v60 = vmul.f32 0.01, %v5680_v9  ;;  %v16030_v63 = vmax.f32 %v13794_v18, 0.0  ;;  %v14027_v58 = vadd.f32 %v16031_v25, %v16015_v57  ;;  %v16032_v3 = vld [vmem:[#allocation18_spill] sm:$0xff]  ;;  %v16033_v18 = vld [vmem:[#allocation36_spill] sm:$0xff] }
 0x531   : > { %v8100_v59 = vpop.eup %8099  ;;  %v5692_v13 = vmul.f32 0.6931472, %v8098_v27  ;;  %8109 = vlog2.f32 %v5834_v40  ;;  %v4744_v62 = vsub.f32 0.0, %v4616_v38  ;;  %v14036_v40 = vpop.f32.mrb[121].mxu0  ;;  %v5838_v7 = vadd.f32 1.0, %v5837_v16 }
 0x532   : > { %v8102_v12 = vpop.eup %8101  ;;  %v6376_v20 = vadd.f32 %v6248_v60, %v16030_v63  ;;  %v5825_v48 = vadd.f32 1.0, %v8100_v59  ;;  %v5828_v49 = vmul.f32 -0.5, %v8100_v59  ;;  %v14034_v60 = vadd.f32 %v16033_v18, %v16015_v57  ;;  %v14049_v16 = vpop.f32.mrb[121].mxu1 }
 0x533   : > { %v5698_v61 = vsel %vm13998_vm7, %v5695_v22, %v5692_v13  ;;  %v5683_v15 = vmul.f32 0.6931472, %v8102_v12  ;;  %v5840_v22 = vand.u32 2147483647, %v8096_v42  ;;  %v16034_v12 = vmax.f32 %v13836_v0, 0.0 }
 0x534   : > { %v8104_v34 = vpop.eup %8103  ;;  %v6552_v9 = vmul.f32 %v16032_v3, %v6376_v20  ;;  %v6250_v27 = vmul.f32 0.01, %v5698_v61  ;;  %8111 = vlog2.f32 %v5825_v48  ;;  %v4362_v25 = vmul.f32 100.0, %v14021_v33 }
 0x535   : > { %v5689_v32 = vsel %vm14002_vm8, %v5686_v53, %v5683_v15  ;;  %v5701_v63 = vmul.f32 0.6931472, %v8104_v34  ;;  %v14040_v13 = vpop.eup %8105  ;;  %v5829_v57 = vadd.f32 1.0, %v5828_v49  ;;  %v4976_v53 = vmul.f32 1.442695, %v4744_v62 }
 0x536   : > { %v6715_v38 = vadd.f32 %v13923_v36, %v6552_v9  ;;  %v6378_v20 = vadd.f32 %v6250_v27, %v16034_v12  ;;  %v6249_v48 = vmul.f32 0.01, %v5689_v32  ;;  %v8108_v61 = vpop.eup %8107  ;;  %v5843_v10 = vadd.f32 1.0, %v14040_v13  ;;  %v14064_v12 = vpop.f32.mrb[122].mxu0  ;;  %v16045_v32 = vld [vmem:[#allocation44_spill] sm:$0xff] }
 0x537   : > { %v5707_v18 = vsel %vm14008_vm9, %v5704_v54, %v5701_v63  ;;  %v16035_v36 = vmax.f32 %v13901_v24, 0.0  ;;  %v5818_v9 = vmul.f32 0.6931472, %v8108_v61  ;;  %v5839_v27 = vmul.f32 %v8096_v42, %v5838_v7 }
 0x538   : > { %v6554_v15 = vmul.f32 %v16032_v3, %v6378_v20  ;;  %v6251_v0 = vmul.f32 0.01, %v5707_v18  ;;  %vm14054_vm11 = vcmp.lt.f32.partialorder %v5840_v22, 0.0004427343  ;;  %v5831_v45 = vand.u32 2147483647, %v8100_v59 }
 0x539   : > { %v6377_v34 = vadd.f32 %v6249_v48, %v16035_v36  ;;  %8113 = vlog2.f32 %v5843_v10  ;;  %v16038_v62 = vmax.f32 %v13908_v23, 0.0  ;;  %v5824_v24 = vsel %vm14015_vm10, %v5821_v43, %v5818_v9  ;;  %v16042_v36 = vld [vmem:[#allocation59_spill] sm:$0xff] }
 0x53a   : > { %v6741_v54 = vadd.f32 %v13950_v55, %v6554_v15  ;;  %v6264_v20 = vmul.f32 0.01, %v5824_v24  ;;  %v5830_v42 = vmul.f32 %v8100_v59, %v5829_v57  ;;  %v5846_v7 = vmul.f32 -0.5, %v14040_v13  ;;  %v16043_v24 = vld [vmem:[#allocation15_spill] sm:$0xff] }
 0x53b   : > { %v6553_v49 = vmul.f32 %v16032_v3, %v6377_v34  ;;  %v6379_v63 = vadd.f32 %v6251_v0, %v16038_v62  ;;  %8115 = vpow2.f32 %v4976_v53  ;;  %v8110_v22 = vpop.eup %8109  ;;  %v4618_v61 = vand.u32 2147483647, %v4362_v25 }
 0x53c   : > { %v4361_v18 = vmul.f32 100.0, %v14027_v58  ;;  %v16039_v23 = vmax.f32 %v13912_v6, 0.0  ;;  %v5836_v30 = vmul.f32 0.6931472, %v8110_v22  ;;  %vm14072_vm13 = vcmp.lt.f32.partialorder %v5831_v45, 0.0004427343 }
 0x53d   : > { %v6728_v48 = vadd.f32 %v13969_v37, %v6553_v49  ;;  %v6555_v55 = vmul.f32 %v16032_v3, %v6379_v63  ;;  %v5849_v57 = vand.u32 2147483647, %v14040_v13  ;;  %v4746_v37 = vsub.f32 0.0, %v4618_v61  ;;  %v14084_v45 = vpop.f32.mrb[122].mxu1 }
 0x53e   : > { %v6392_v10 = vadd.f32 %v6264_v20, %v16039_v23  ;;  %v8112_v59 = vpop.eup %8111  ;;  %v4617_v15 = vand.u32 2147483647, %v4361_v18  ;;  %v4363_v25 = vmul.f32 100.0, %v14034_v60  ;;  %v5842_v6 = vsel %vm14054_vm11, %v5839_v27, %v5836_v30  ;;  %v16044_v20 = vld [vmem:[#allocation32_spill] sm:$0xff] }
 0x53f   : > { %v14078_v53 = vadd.f32 %v14013_v51, %v6555_v55  ;;  %v5827_v0 = vmul.f32 0.6931472, %v8112_v59  ;;  %v5847_v9 = vadd.f32 1.0, %v5846_v7  ;;  %v6266_v49 = vmul.f32 0.01, %v5842_v6 }
 0x540   : > { %v6568_v34 = vmul.f32 %v16042_v36, %v6392_v10  ;;  %v4980_v62 = vmul.f32 1.442695, %v4746_v37  ;;  %v4745_v63 = vsub.f32 0.0, %v4617_v15  ;;  %v14088_v51 = vadd.f32 %v16044_v20, %v16043_v24 }
 0x541   : > { %v5833_v55 = vsel %vm14072_vm13, %v5830_v42, %v5827_v0  ;;  %v4619_v61 = vand.u32 2147483647, %v4363_v25  ;;  %v14096_v27 = vadd.f32 %v16045_v32, %v16043_v24  ;;  %v16046_v7 = vmax.f32 %v13936_v21, 0.0  ;;  %v14103_v42 = vpop.f32.mrb[123].mxu0 }
 0x542   : > { %v14090_v22 = vadd.f32 %v6715_v38, %v6568_v34  ;;  %v6265_v23 = vmul.f32 0.01, %v5833_v55  ;;  %8117 = vpow2.f32 %v4980_v62  ;;  %v4978_v10 = vmul.f32 1.442695, %v4745_v63 }
 0x543   : > { %v6394_v18 = vadd.f32 %v6266_v49, %v16046_v7  ;;  %v8114_v30 = vpop.eup %8113  ;;  %v5848_v59 = vmul.f32 %v14040_v13, %v5847_v9  ;;  %v4747_v37 = vsub.f32 0.0, %v4619_v61  ;;  %v4376_v38 = vmul.f32 100.0, %v14088_v51 }
 0x544   : > { %v4378_v43 = vmul.f32 100.0, %v14096_v27  ;;  %v16047_v25 = vmax.f32 %v13943_v35, 0.0  ;;  %v5845_v21 = vmul.f32 0.6931472, %v8114_v30  ;;  %8119 = vpow2.f32 %v4978_v10 }
 0x545   : > { %v6570_v15 = vmul.f32 %v16042_v36, %v6394_v18  ;;  %v8116_v6 = vpop.eup %8115  ;;  %vm5850_vm14 = vcmp.lt.f32.partialorder %v5849_v57, 0.0004427343  ;;  %v4982_v0 = vmul.f32 1.442695, %v4747_v37  ;;  %v4632_v49 = vand.u32 2147483647, %v4376_v38 }
 0x546   : > { %v6393_v34 = vadd.f32 %v6265_v23, %v16047_v25  ;;  %v14110_v13 = vadd.f32 %v13602_v56, %v16043_v24  ;;  %v5851_v63 = vsel %vm5850_vm14, %v5848_v59, %v5845_v21  ;;  %v5960_v20 = vadd.f32 1.0, %v8116_v6  ;;  %v14119_v18 = vpop.f32.mrb[123].mxu1 }
 0x547   : > { %v14112_v9 = vadd.f32 %v6741_v54, %v6570_v15  ;;  %v4475_v35 = vmax.f32 %v13965_v2, 0.0  ;;  %v6267_v61 = vmul.f32 0.01, %v5851_v63  ;;  %8121 = vpow2.f32 %v4982_v0  ;;  %16048 = vst [vmem:[#allocation12_spill] sm:$0xff] %v14119_v18  ;;  %v16049_v15 = vld [vmem:[#allocation35_spill] sm:$0xff] }
 0x548   : > { %v6569_v62 = vmul.f32 %v16042_v36, %v6393_v34  ;;  %8123 = vlog2.f32 %v5960_v20  ;;  %v4760_v57 = vsub.f32 0.0, %v4632_v49  ;;  %v4634_v7 = vand.u32 2147483647, %v4378_v43 }
 0x549   : > { %v6395_v56 = vadd.f32 %v6267_v61, %v4475_v35  ;;  %v5963_v23 = vmul.f32 -0.5, %v8116_v6  ;;  %v4377_v10 = vmul.f32 100.0, %v14110_v13  ;;  %v14126_v2 = vadd.f32 %v13617_v1, %v16043_v24 }
 0x54a   : > { %v14117_v32 = vadd.f32 %v6728_v48, %v6569_v62  ;;  %v5008_v59 = vmul.f32 1.442695, %v4760_v57  ;;  %v4762_v37 = vsub.f32 0.0, %v4634_v7  ;;  %v5966_v38 = vand.u32 2147483647, %v8116_v6 }
 0x54b   : > { %v6571_v48 = vmul.f32 %v16042_v36, %v6395_v56  ;;  %v4633_v43 = vand.u32 2147483647, %v4377_v10  ;;  %v14131_v25 = vadd.f32 %v13646_v28, %v16049_v15  ;;  %v4379_v49 = vmul.f32 100.0, %v14126_v2 }
 0x54c   : > { %v8118_v34 = vpop.eup %8117  ;;  %8125 = vpow2.f32 %v5008_v59  ;;  %v5012_v0 = vmul.f32 1.442695, %v4762_v37  ;;  %v5964_v1 = vadd.f32 1.0, %v5963_v23  ;;  %vm14139_vm12 = vcmp.lt.f32.partialorder %v5966_v38, 0.0004427343  ;;  %v14148_v38 = vpop.f32.mrb[124].mxu1 }
 0x54d   : > { %v14136_v62 = vadd.f32 %v14078_v53, %v6571_v48  ;;  %v5978_v63 = vadd.f32 1.0, %v8118_v34  ;;  %v5981_v20 = vmul.f32 -0.5, %v8118_v34  ;;  %v4761_v61 = vsub.f32 0.0, %v4633_v43  ;;  %16053 = vst [vmem:[#allocation46_spill] sm:$0xff] %v14148_v38  ;;  %v14192_v24 = vpop.f32.mrb[125].mxu1 }
 0x54e   : > { %v8120_v35 = vpop.eup %8119  ;;  %8127 = vpow2.f32 %v5012_v0  ;;  %v4635_v57 = vand.u32 2147483647, %v4379_v49  ;;  %v4268_v28 = vmul.f32 100.0, %v14131_v25  ;;  %v5984_v59 = vand.u32 2147483647, %v8118_v34  ;;  %v14146_v49 = vpop.f32.mrb[124].mxu0 }
 0x54f   : > { %8129 = vlog2.f32 %v5978_v63  ;;  %v5969_v56 = vadd.f32 1.0, %v8120_v35  ;;  %v5010_v23 = vmul.f32 1.442695, %v4761_v61  ;;  %v5982_v55 = vadd.f32 1.0, %v5981_v20  ;;  %16052 = vst [vmem:[#allocation51_spill] sm:$0xff] %v14146_v49  ;;  %16066 = vst [vmem:[#allocation7_spill] sm:$0xff] %v14192_v24 }
 0x550   : > { %v4763_v37 = vsub.f32 0.0, %v4635_v57  ;;  %v4524_v0 = vand.u32 2147483647, %v4268_v28  ;;  %v5965_v63 = vmul.f32 %v8116_v6, %v5964_v1  ;;  %v5972_v30 = vmul.f32 -0.5, %v8120_v35 }
 0x551   : > { %v8122_v48 = vpop.eup %8121  ;;  %8131 = vlog2.f32 %v5969_v56  ;;  %v5975_v57 = vand.u32 2147483647, %v8120_v35  ;;  %v5983_v43 = vmul.f32 %v8118_v34, %v5982_v55  ;;  %vm14154_vm15 = vcmp.lt.f32.partialorder %v5984_v59, 0.0004427343  ;;  %v14172_v59 = vpop.f32.mrb[125].mxu0 }
 0x552   : > { %v8124_v21 = vpop.eup %8123  ;;  %v5987_v54 = vadd.f32 1.0, %v8122_v48  ;;  %v5990_v53 = vmul.f32 -0.5, %v8122_v48  ;;  %8133 = vpow2.f32 %v5010_v23  ;;  %v5014_v61 = vmul.f32 1.442695, %v4763_v37  ;;  %v16056_v23 = vld [vmem:[#allocation24_spill] sm:$0xff]  ;;  %16060 = vst [vmem:[#allocation11_spill] sm:$0xff] %v14172_v59 }
 0x553   : > { %v5962_v36 = vmul.f32 0.6931472, %v8124_v21  ;;  %v4652_v56 = vsub.f32 0.0, %v4524_v0  ;;  %v5973_v21 = vadd.f32 1.0, %v5972_v30  ;;  %v14160_v37 = vadd.f32 %v16056_v23, %v16049_v15 }
 0x554   : > { %8135 = vlog2.f32 %v5987_v54  ;;  %v5991_v54 = vadd.f32 1.0, %v5990_v53  ;;  %v5993_v20 = vand.u32 2147483647, %v8122_v48  ;;  %vm14164_vm0 = vcmp.lt.f32.partialorder %v5975_v57, 0.0004427343 }
 0x555   : > { %v5968_v28 = vsel %vm14139_vm12, %v5965_v63, %v5962_v36  ;;  %8137 = vpow2.f32 %v5014_v61  ;;  %v4792_v10 = vmul.f32 1.442695, %v4652_v56  ;;  %v16057_v36 = vmax.f32 %v13981_v39, 0.0 }
 0x556   : > { %v8126_v6 = vpop.eup %8125  ;;  %v6280_v1 = vmul.f32 0.01, %v5968_v28  ;;  %v14170_v30 = vadd.f32 %v13710_v5, %v16049_v15  ;;  %v16061_v28 = vld [vmem:[#allocation57_spill] sm:$0xff]  ;;  %v4270_v57 = vmul.f32 100.0, %v14160_v37  ;;  %v5992_v38 = vmul.f32 %v8122_v48, %v5991_v54 }
 0x557   : > { %v6104_v0 = vadd.f32 1.0, %v8126_v6  ;;  %v6107_v3 = vmul.f32 -0.5, %v8126_v6  ;;  %8139 = vpow2.f32 %v4792_v10  ;;  %v6110_v61 = vand.u32 2147483647, %v8126_v6 }
 0x558   : > { %v8128_v7 = vpop.eup %8127  ;;  %v6408_v55 = vadd.f32 %v6280_v1, %v16057_v36  ;;  %v5974_v1 = vmul.f32 %v8120_v35, %v5973_v21  ;;  %vm14176_vm1 = vcmp.lt.f32.partialorder %v5993_v20, 0.0004427343  ;;  %v4269_v48 = vmul.f32 100.0, %v14170_v30 }
 0x559   : > { %v8130_v63 = vpop.eup %8129  ;;  %8141 = vlog2.f32 %v6104_v0  ;;  %v6108_v53 = vadd.f32 1.0, %v6107_v3  ;;  %v6122_v56 = vadd.f32 1.0, %v8128_v7  ;;  %v6125_v5 = vmul.f32 -0.5, %v8128_v7 }
 0x55a   : > { %v6584_v23 = vmul.f32 %v16061_v28, %v6408_v55  ;;  %v5980_v39 = vmul.f32 0.6931472, %v8130_v63  ;;  %v6128_v55 = vand.u32 2147483647, %v8128_v7  ;;  %vm14185_vm2 = vcmp.lt.f32.partialorder %v6110_v61, 0.0004427343 }
 0x55b   : > { %v8132_v36 = vpop.eup %8131  ;;  %8143 = vlog2.f32 %v6122_v56  ;;  %v6109_v21 = vmul.f32 %v8126_v6, %v6108_v53  ;;  %v6126_v61 = vadd.f32 1.0, %v6125_v5 }
 0x55c   : > { %v14181_v59 = vadd.f32 %v14090_v22, %v6584_v23  ;;  %v5986_v3 = vsel %vm14154_vm15, %v5983_v43, %v5980_v39  ;;  %v5971_v0 = vmul.f32 0.6931472, %v8132_v36  ;;  %v8134_v63 = vpop.eup %8133  ;;  %v4526_v23 = vand.u32 2147483647, %v4270_v57 }
 0x55d   : > { %v6282_v35 = vmul.f32 0.01, %v5986_v3  ;;  %v6113_v22 = vadd.f32 1.0, %v8134_v63  ;;  %v6116_v56 = vmul.f32 -0.5, %v8134_v63  ;;  %v16067_v39 = vmax.f32 %v14021_v33, 0.0 }
 0x55e   : > { %v8136_v20 = vpop.eup %8135  ;;  %v5977_v54 = vsel %vm14164_vm0, %v5974_v1, %v5971_v0  ;;  %vm14196_vm3 = vcmp.lt.f32.partialorder %v6128_v55, 0.0004427343  ;;  %v6119_v18 = vand.u32 2147483647, %v8134_v63  ;;  %v16070_v57 = vmax.f32 %v14027_v58, 0.0 }
 0x55f   : > { %v8138_v43 = vpop.eup %8137  ;;  %v6410_v36 = vadd.f32 %v6282_v35, %v16067_v39  ;;  %v6281_v6 = vmul.f32 0.01, %v5977_v54  ;;  %v5989_v53 = vmul.f32 0.6931472, %v8136_v20  ;;  %8145 = vlog2.f32 %v6113_v22 }
 0x560   : > { %v6131_v34 = vadd.f32 1.0, %v8138_v43  ;;  %v6117_v33 = vadd.f32 1.0, %v6116_v56  ;;  %v4654_v5 = vsub.f32 0.0, %v4526_v23  ;;  %v14209_v55 = vadd.f32 %v13732_v44, %v16049_v15  ;;  %v14220_v23 = vpop.f32.mrb[126].mxu0 }
 0x561   : > { %v6586_v1 = vmul.f32 %v16061_v28, %v6410_v36  ;;  %v6409_v0 = vadd.f32 %v6281_v6, %v16070_v57  ;;  %v5995_v24 = vsel %vm14176_vm1, %v5992_v38, %v5989_v53  ;;  %v14205_v35 = vpop.eup %8139  ;;  %v6134_v58 = vmul.f32 -0.5, %v8138_v43 }
 0x562   : > { %v6283_v20 = vmul.f32 0.01, %v5995_v24  ;;  %8147 = vlog2.f32 %v6131_v34  ;;  %v5132_v36 = vadd.f32 1.0, %v14205_v35  ;;  %v16071_v38 = vmax.f32 %v14034_v60, 0.0 }
 0x563   : > { %v8142_v54 = vpop.eup %8141  ;;  %v6743_v22 = vadd.f32 %v14112_v9, %v6586_v1  ;;  %v6585_v39 = vmul.f32 %v16061_v28, %v6409_v0  ;;  %v6127_v6 = vmul.f32 %v8128_v7, %v6126_v61  ;;  %vm14216_vm4 = vcmp.lt.f32.partialorder %v6119_v18, 0.0004427343  ;;  %v14229_v7 = vpop.f32.mrb[126].mxu1 }
 0x564   : > { %v6411_v10 = vadd.f32 %v6283_v20, %v16071_v38  ;;  %v6106_v56 = vmul.f32 0.6931472, %v8142_v54  ;;  %v6118_v9 = vmul.f32 %v8134_v63, %v6117_v33  ;;  %v6137_v53 = vand.u32 2147483647, %v8138_v43  ;;  %v16074_v20 = vld [vmem:[#allocation47_spill] sm:$0xff] }
 0x565   : > { %v8144_v44 = vpop.eup %8143  ;;  %v14223_v15 = vadd.f32 %v14117_v32, %v6585_v39  ;;  %8149 = vlog2.f32 %v5132_v36  ;;  %v5135_v18 = vmul.f32 -0.5, %v14205_v35  ;;  %v6135_v57 = vadd.f32 1.0, %v6134_v58  ;;  %v16075_v54 = vld [vmem:[#allocation43_spill] sm:$0xff] }
 0x566   : > { %v6587_v34 = vmul.f32 %v16061_v28, %v6411_v10  ;;  %v6112_v60 = vsel %vm14185_vm2, %v6109_v21, %v6106_v56  ;;  %v6124_v1 = vmul.f32 0.6931472, %v8144_v44  ;;  %v4796_v0 = vmul.f32 1.442695, %v4654_v5  ;;  %v14273_v10 = vpop.f32.mrb[127].mxu1 }
 0x567   : > { %v6296_v61 = vmul.f32 0.01, %v6112_v60  ;;  %v14233_v32 = vadd.f32 %v16075_v54, %v16074_v20  ;;  %v5138_v49 = vand.u32 2147483647, %v14205_v35  ;;  %v4525_v21 = vand.u32 2147483647, %v4269_v48 }
 0x568   : > { %v14236_v63 = vadd.f32 %v14136_v62, %v6587_v34  ;;  %v6130_v33 = vsel %vm14196_vm3, %v6127_v6, %v6124_v1  ;;  %v16076_v39 = vmax.f32 %v14088_v51, 0.0  ;;  %8151 = vpow2.f32 %v4796_v0  ;;  %v16079_v6 = vld [vmem:[#allocation19_spill] sm:$0xff] }
 0x569   : > { %v6298_v38 = vmul.f32 0.01, %v6130_v33  ;;  %v4271_v5 = vmul.f32 100.0, %v14209_v55  ;;  %v8146_v58 = vpop.eup %8145  ;;  %vm14244_vm5 = vcmp.lt.f32.partialorder %v6137_v53, 0.0004427343  ;;  %v5136_v62 = vadd.f32 1.0, %v5135_v18 }
 0x56a   : > { %v6424_v36 = vadd.f32 %v6296_v61, %v16076_v39  ;;  %v4653_v56 = vsub.f32 0.0, %v4525_v21  ;;  %v4284_v3 = vmul.f32 100.0, %v14233_v32  ;;  %v16080_v48 = vmax.f32 %v14096_v27, 0.0 }
 0x56b   : > { %v6115_v51 = vmul.f32 0.6931472, %v8146_v58  ;;  %v4527_v60 = vand.u32 2147483647, %v4271_v5  ;;  %v6136_v61 = vmul.f32 %v8138_v43, %v6135_v57  ;;  %vm14252_vm6 = vcmp.lt.f32.partialorder %v5138_v49, 0.0004427343 }
 0x56c   : > { %v6600_v44 = vmul.f32 %v16079_v6, %v6424_v36  ;;  %v6426_v34 = vadd.f32 %v6298_v38, %v16080_v48  ;;  %v8148_v1 = vpop.eup %8147  ;;  %v4794_v53 = vmul.f32 1.442695, %v4653_v56  ;;  %v4540_v54 = vand.u32 2147483647, %v4284_v3  ;;  %v16083_v58 = vld [vmem:[#allocation40_spill] sm:$0xff] }
 0x56d   : > { %v6121_v21 = vsel %vm14216_vm4, %v6118_v9, %v6115_v51  ;;  %v6133_v39 = vmul.f32 0.6931472, %v8148_v1  ;;  %v4655_v36 = vsub.f32 0.0, %v4527_v60  ;;  %v14264_v56 = vadd.f32 %v16083_v58, %v16074_v20  ;;  %v14271_v1 = vpop.f32.mrb[127].mxu0  ;;  %v16092_v58 = vld [vmem:[#allocation33_spill] sm:$0xff] }
 0x56e   : > { %v6718_v18 = vadd.f32 %v14181_v59, %v6600_v44  ;;  %v6602_v33 = vmul.f32 %v16079_v6, %v6426_v34  ;;  %v6297_v27 = vmul.f32 0.01, %v6121_v21  ;;  %8153 = vpow2.f32 %v4794_v53 }
 0x56f   : > { %v4668_v38 = vsub.f32 0.0, %v4540_v54  ;;  %v8150_v5 = vpop.eup %8149  ;;  %v6139_v49 = vsel %vm14244_vm5, %v6136_v61, %v6133_v39  ;;  %v16084_v59 = vmax.f32 %v14110_v13, 0.0  ;;  %v4798_v44 = vmul.f32 1.442695, %v4655_v36 }
 0x570   : > { %v6719_v43 = vrot.slane %v6718_v18, 4  ;;  %v6744_v57 = vadd.f32 %v6743_v22, %v6602_v33  ;;  %v6299_v24 = vmul.f32 0.01, %v6139_v49  ;;  %v5134_v9 = vmul.f32 0.6931472, %v8150_v5  ;;  %v16088_v5 = vld [vmem:[#allocation23_spill] sm:$0xff] }
 0x571   : > { %v6425_v3 = vadd.f32 %v6297_v27, %v16084_v59  ;;  %v16085_v48 = vrot.slane %v13716_v47, 1  ;;  %v4824_v22 = vmul.f32 1.442695, %v4668_v38  ;;  %v16086_v53 = vmax.f32 %v14126_v2, 0.0  ;;  %v16087_v38 = vld [vmem:[#allocation61_spill] sm:$0xff] }
 0x572   : > { %v6720_v51 = vadd.f32 %v6719_v43, %v6718_v18  ;;  %v6745_v60 = vrot.slane %v6744_v57, 4  ;;  %v5137_v54 = vmul.f32 %v14205_v35, %v5136_v62  ;;  %8155 = vpow2.f32 %v4798_v44  ;;  %v14279_v33 = vpop.eup %8151  ;;  %v16090_v62 = vld [vmem:[#allocation39_spill] sm:$0xff]  ;;  %v16094_v59 = vld [vmem:[#allocation37_spill] sm:$0xff] }
 0x573   : > { %v6711_v34 = vadd.f32 %v16085_v48, %v13716_v47  ;;  %v6601_v61 = vmul.f32 %v16079_v6, %v6425_v3  ;;  %v6427_v13 = vadd.f32 %v6299_v24, %v16086_v53  ;;  %8157 = vpow2.f32 %v4824_v22 }
 0x574   : > { %v6721_v21 = vrot.slane %v6720_v51, 2  ;;  %v6746_v39 = vadd.f32 %v6745_v60, %v6744_v57  ;;  %v4286_v47 = vmul.f32 100.0, %v14264_v56  ;;  %v5140_v36 = vsel %vm14252_vm6, %v5137_v54, %v5134_v9 }
 0x575   : > { %v6731_v18 = vadd.f32 %v14223_v15, %v6601_v61  ;;  %v6603_v27 = vmul.f32 %v16079_v6, %v6427_v13  ;;  %v5150_v2 = vadd.f32 1.0, %v14279_v33  ;;  %v14289_v35 = vadd.f32 %v16088_v5, %v16087_v38 }
 0x576   : > { %v14293_v43 = vadd.f32 %v16088_v5, %v16090_v62  ;;  %v6722_v57 = vadd.f32 %v6721_v21, %v6720_v51  ;;  %v6747_v49 = vrot.slane %v6746_v39, 2  ;;  %v14297_v15 = vadd.f32 %v16088_v5, %v16092_v58 }
 0x577   : > { %16089 = vst [vmem:[#allocation50_spill] sm:$0xff] %v14289_v35  ;;  %v14301_v0 = vadd.f32 %v16088_v5, %v16094_v59  ;;  %v6732_v3 = vrot.slane %v6731_v18, 4  ;;  %v6757_v24 = vadd.f32 %v14236_v63, %v6603_v27  ;;  %v14306_v9 = vadd.f32 %v16088_v5, %v13956_v29 }
 0x578   : > { %16091 = vst [vmem:[#allocation54_spill] sm:$0xff] %v14293_v43  ;;  %16093 = vst [vmem:[#allocation49_spill] sm:$0xff] %v14297_v15  ;;  %v14309_v44 = vadd.f32 %v16088_v5, %v6711_v34  ;;  %v6748_v48 = vadd.f32 %v6747_v49, %v6746_v39  ;;  %v6188_v51 = vmul.f32 0.01, %v5140_v36  ;;  %v8154_v60 = vpop.eup %8153  ;;  %8159 = vlog2.f32 %v5150_v2 }
 0x579   : > { %16095 = vst [vmem:[#allocation10_spill] sm:$0xff] %v14301_v0  ;;  %16096 = vst [vmem:[#allocation58_spill] sm:$0xff] %v14306_v9  ;;  %v6733_v22 = vadd.f32 %v6732_v3, %v6731_v18  ;;  %v6758_v61 = vrot.slane %v6757_v24, 4  ;;  %v4542_v53 = vand.u32 2147483647, %v4286_v47  ;;  %v6723_v13 = vrot.slane %v6722_v57, 1 }
 0x57a   : > { %16097 = vst [vmem:[#allocation17_spill] sm:$0xff] %v14309_v44  ;;  %v6749_v54 = vrot.slane %v6748_v48, 1  ;;  %v5153_v21 = vmul.f32 -0.5, %v14279_v33  ;;  %v5141_v38 = vadd.f32 1.0, %v8154_v60  ;;  %v4396_v63 = vmax.f32 %v14131_v25, 0.0  ;;  %v16099_v44 = vld [vmem:[#allocation21_spill] sm:$0xff] }
 0x57b   : > { %v4670_v34 = vsub.f32 0.0, %v4542_v53  ;;  %v6734_v62 = vrot.slane %v6733_v22, 2  ;;  %v6759_v39 = vadd.f32 %v6758_v61, %v6757_v24  ;;  %v5144_v36 = vmul.f32 -0.5, %v8154_v60  ;;  %v16098_v24 = vld [vmem:[#allocation27_spill] sm:$0xff] }
 0x57c   : > { %8161 = vlog2.f32 %v5141_v38  ;;  %v8156_v18 = vpop.eup %8155  ;;  %v6316_v49 = vadd.f32 %v6188_v51, %v4396_v63  ;;  %v5156_v47 = vand.u32 2147483647, %v14279_v33  ;;  %v6724_v3 = vadd.f32 %v6723_v13, %v6722_v57 }
 0x57d   : > { %v8158_v59 = vpop.eup %8157  ;;  %v6750_v25 = vadd.f32 %v6749_v54, %v6748_v48  ;;  %v5154_v6 = vadd.f32 1.0, %v5153_v21  ;;  %v5159_v29 = vadd.f32 1.0, %v8156_v18  ;;  %v5147_v0 = vand.u32 2147483647, %v8154_v60 }
 0x57e   : > { %v5276_v27 = vadd.f32 1.0, %v8158_v59  ;;  %v4828_v53 = vmul.f32 1.442695, %v4670_v34  ;;  %v14320_v61 = vadd.f32 %v16098_v24, %v16074_v20  ;;  %v6735_v38 = vadd.f32 %v6734_v62, %v6733_v22 }
 0x57f   : > { %v6760_v51 = vrot.slane %v6759_v39, 2  ;;  %v5145_v63 = vadd.f32 1.0, %v5144_v36  ;;  %8163 = vlog2.f32 %v5159_v29  ;;  %v14323_v2 = vmul.f32 %v16099_v44, %v6316_v49 }
 0x580   : > { %v5162_v58 = vmul.f32 -0.5, %v8156_v18  ;;  %8165 = vlog2.f32 %v5276_v27  ;;  %v14327_v48 = vadd.f32 %v16088_v5, %v6724_v3  ;;  %v14330_v13 = vadd.f32 %v16088_v5, %v6750_v25 }
 0x581   : > { %v5155_v54 = vmul.f32 %v14279_v33, %v5154_v6  ;;  %vm14333_vm7 = vcmp.lt.f32.partialorder %v5156_v47, 0.0004427343  ;;  %vm14337_vm8 = vcmp.lt.f32.partialorder %v5147_v0, 0.0004427343  ;;  %v5165_v27 = vand.u32 2147483647, %v8156_v18 }
 0x582   : > { %16100 = vst [vmem:[#allocation8_spill] sm:$0xff] %v14327_v48  ;;  %16101 = vst [vmem:[#allocation16_spill] sm:$0xff] %v14330_v13  ;;  %v8160_v21 = vpop.eup %8159  ;;  %v5279_v34 = vmul.f32 -0.5, %v8158_v59  ;;  %8167 = vpow2.f32 %v4828_v53  ;;  %v4285_v62 = vmul.f32 100.0, %v14320_v61  ;;  %v6736_v36 = vrot.slane %v6735_v38, 1  ;;  %v16106_v6 = vld [vmem:[#allocation34_spill] sm:$0xff] }
 0x583   : > { %v14342_v49 = vadd.f32 %v6760_v51, %v6759_v39  ;;  %v5146_v3 = vmul.f32 %v8154_v60, %v5145_v63  ;;  %v14346_v33 = vadd.f32 %v16106_v6, %v16074_v20  ;;  %v5163_v47 = vadd.f32 1.0, %v5162_v58  ;;  %v16107_v0 = vld [vmem:[#allocation52_spill] sm:$0xff] }
 0x584   : > { %v5282_v25 = vand.u32 2147483647, %v8158_v59  ;;  %v4541_v24 = vand.u32 2147483647, %v4285_v62  ;;  %v14350_v57 = vadd.f32 %v13857_v26, %v16107_v0  ;;  %v5152_v48 = vmul.f32 0.6931472, %v8160_v21 }
 0x585   : > { %v4287_v53 = vmul.f32 100.0, %v14346_v33  ;;  %v14355_v39 = vadd.f32 %v13859_v52, %v16107_v0  ;;  %v14359_v60 = vadd.f32 %v13868_v11, %v16107_v0  ;;  %vm14361_vm9 = vcmp.lt.f32.partialorder %v5165_v27, 0.0004427343 }
 0x586   : > { %v8162_v13 = vpop.eup %8161  ;;  %v5280_v58 = vadd.f32 1.0, %v5279_v34  ;;  %v4669_v51 = vsub.f32 0.0, %v4541_v24  ;;  %v4300_v26 = vmul.f32 100.0, %v14350_v57  ;;  %v5164_v52 = vmul.f32 %v8156_v18, %v5163_v47 }
 0x587   : > { %v5143_v21 = vmul.f32 0.6931472, %v8162_v13  ;;  %v4543_v62 = vand.u32 2147483647, %v4287_v53  ;;  %v4302_v6 = vmul.f32 100.0, %v14355_v39  ;;  %v5158_v34 = vsel %vm14333_vm7, %v5155_v54, %v5152_v48 }
 0x588   : > { %vm14368_vm10 = vcmp.lt.f32.partialorder %v5282_v25, 0.0004427343  ;;  %v4826_v11 = vmul.f32 1.442695, %v4669_v51  ;;  %v4556_v27 = vand.u32 2147483647, %v4300_v26  ;;  %v5281_v53 = vmul.f32 %v8158_v59, %v5280_v58 }
 0x589   : > { %v8164_v9 = vpop.eup %8163  ;;  %v4671_v24 = vsub.f32 0.0, %v4543_v62  ;;  %v4558_v28 = vand.u32 2147483647, %v4302_v6  ;;  %v4301_v43 = vmul.f32 100.0, %v14359_v60  ;;  %v5149_v18 = vsel %vm14337_vm8, %v5146_v3, %v5143_v21 }
 0x58a   : > { %v8166_v63 = vpop.eup %8165  ;;  %v5161_v13 = vmul.f32 0.6931472, %v8164_v9  ;;  %8169 = vpow2.f32 %v4826_v11  ;;  %v4684_v35 = vsub.f32 0.0, %v4556_v27  ;;  %v14377_v5 = vadd.f32 %v6736_v36, %v6735_v38 }
 0x58b   : > { %v5278_v47 = vmul.f32 0.6931472, %v8166_v63  ;;  %v4830_v25 = vmul.f32 1.442695, %v4671_v24  ;;  %v4686_v51 = vsub.f32 0.0, %v4558_v28  ;;  %v14385_v29 = vadd.f32 %v13872_v17, %v16107_v0  ;;  %v16115_v24 = vld [vmem:[#allocation48_spill] sm:$0xff] }
 0x58c   : > { %v8168_v26 = vpop.eup %8167  ;;  %v6190_v22 = vmul.f32 0.01, %v5158_v34  ;;  %v4856_v48 = vmul.f32 1.442695, %v4684_v35  ;;  %v4557_v54 = vand.u32 2147483647, %v4301_v43  ;;  %v5167_v62 = vsel %vm14361_vm9, %v5164_v52, %v5161_v13 }
 0x58d   : > { %v5284_v9 = vsel %vm14368_vm10, %v5281_v53, %v5278_v47  ;;  %v5294_v59 = vadd.f32 1.0, %v8168_v26  ;;  %v6189_v3 = vmul.f32 0.01, %v5149_v18  ;;  %v4413_v28 = vmax.f32 %v14320_v61, 0.0 }
 0x58e   : > { %v6204_v58 = vmul.f32 0.01, %v5284_v9  ;;  %8171 = vpow2.f32 %v4830_v25  ;;  %v4415_v35 = vmax.f32 %v14346_v33, 0.0  ;;  %v4860_v43 = vmul.f32 1.442695, %v4686_v51 }
 0x58f   : > { %8173 = vlog2.f32 %v5294_v59  ;;  %v4685_v38 = vsub.f32 0.0, %v4557_v54  ;;  %v6191_v36 = vmul.f32 0.01, %v5167_v62  ;;  %v16112_v20 = vmax.f32 %v14233_v32, 0.0 }
 0x590   : > { %v5297_v63 = vmul.f32 -0.5, %v8168_v26  ;;  %8175 = vpow2.f32 %v4856_v48  ;;  %v16113_v21 = vmax.f32 %v14160_v37, 0.0  ;;  %v4303_v6 = vmul.f32 100.0, %v14385_v29 }
 0x591   : > { %v6332_v15 = vadd.f32 %v6204_v58, %v16112_v20  ;;  %8177 = vpow2.f32 %v4860_v43  ;;  %v4858_v0 = vmul.f32 1.442695, %v4685_v38  ;;  %v16114_v52 = vmax.f32 %v14170_v30, 0.0 }
 0x592   : > { %v6318_v17 = vadd.f32 %v6190_v22, %v16113_v21  ;;  %v4428_v34 = vmax.f32 %v14350_v57, 0.0  ;;  %v14400_v32 = vadd.f32 %v13895_v46, %v16115_v24  ;;  %v5300_v13 = vand.u32 2147483647, %v8168_v26 }
 0x593   : > { %v6317_v11 = vadd.f32 %v6189_v3, %v16114_v52  ;;  %v6508_v27 = vmul.f32 %v15868_v31, %v6332_v15  ;;  %8179 = vpow2.f32 %v4858_v0  ;;  %v4559_v53 = vand.u32 2147483647, %v4303_v6 }
 0x594   : > { %v14404_v37 = vadd.f32 %v13930_v8, %v16115_v24  ;;  %v8170_v18 = vpop.eup %8169  ;;  %v16116_v47 = vmax.f32 %v14209_v55, 0.0  ;;  %v5298_v51 = vadd.f32 1.0, %v5297_v63  ;;  %v4316_v22 = vmul.f32 100.0, %v14400_v32 }
 0x595   : > { %v14409_v25 = vadd.f32 %v6508_v27, %v14323_v2  ;;  %v6494_v46 = vmul.f32 %v16099_v44, %v6318_v17  ;;  %v5285_v48 = vadd.f32 1.0, %v8170_v18  ;;  %v4430_v54 = vmax.f32 %v14355_v39, 0.0 }
 0x596   : > { %v6319_v30 = vadd.f32 %v6191_v36, %v16116_v47  ;;  %v4687_v62 = vsub.f32 0.0, %v4559_v53  ;;  %v14415_v9 = vmul.f32 %v16099_v44, %v6317_v11  ;;  %v4429_v8 = vmax.f32 %v14359_v60, 0.0 }
 0x597   : > { %v4572_v59 = vand.u32 2147483647, %v4316_v22  ;;  %v4318_v55 = vmul.f32 100.0, %v14404_v37  ;;  %vm14419_vm11 = vcmp.lt.f32.partialorder %v5300_v13, 0.0004427343  ;;  %8181 = vlog2.f32 %v5285_v48 }
 0x598   : > { %v4862_v3 = vmul.f32 1.442695, %v4687_v62  ;;  %v14425_v58 = vadd.f32 %v13947_v41, %v16115_v24  ;;  %v8172_v43 = vpop.eup %8171  ;;  %v14428_v38 = vmul.f32 %v16099_v44, %v6319_v30  ;;  %v5299_v36 = vmul.f32 %v8168_v26, %v5298_v51 }
 0x599   : > { %v5288_v20 = vmul.f32 -0.5, %v8170_v18  ;;  %v4700_v15 = vsub.f32 0.0, %v4572_v59  ;;  %v8174_v63 = vpop.eup %8173  ;;  %v5303_v21 = vadd.f32 1.0, %v8172_v43  ;;  %v5306_v17 = vmul.f32 -0.5, %v8172_v43 }
 0x59a   : > { %v8176_v52 = vpop.eup %8175  ;;  %v5296_v11 = vmul.f32 0.6931472, %v8174_v63  ;;  %8183 = vpow2.f32 %v4862_v3  ;;  %v4574_v27 = vand.u32 2147483647, %v4318_v55  ;;  %v14434_v41 = vadd.f32 %v13959_v14, %v16115_v24 }
 0x59b   : > { %v8178_v44 = vpop.eup %8177  ;;  %v5291_v13 = vand.u32 2147483647, %v8170_v18  ;;  %8185 = vlog2.f32 %v5303_v21  ;;  %v5420_v26 = vadd.f32 1.0, %v8176_v52  ;;  %v4317_v53 = vmul.f32 100.0, %v14425_v58 }
 0x59c   : > { %v5302_v47 = vsel %vm14419_vm11, %v5299_v36, %v5296_v11  ;;  %v5289_v30 = vadd.f32 1.0, %v5288_v20  ;;  %v5438_v51 = vadd.f32 1.0, %v8178_v44  ;;  %v4888_v22 = vmul.f32 1.442695, %v4700_v15 }
 0x59d   : > { %v14439_v48 = vpop.eup %8179  ;;  %v6206_v62 = vmul.f32 0.01, %v5302_v47  ;;  %v5307_v59 = vadd.f32 1.0, %v5306_v17  ;;  %v5309_v55 = vand.u32 2147483647, %v8172_v43  ;;  %8187 = vlog2.f32 %v5420_v26 }
 0x59e   : > { %v5423_v14 = vmul.f32 -0.5, %v8176_v52  ;;  %8189 = vlog2.f32 %v5438_v51  ;;  %v5441_v24 = vmul.f32 -0.5, %v8178_v44  ;;  %v4702_v3 = vsub.f32 0.0, %v4574_v27 }
 0x59f   : > { %v16119_v63 = vmax.f32 %v14264_v56, 0.0  ;;  %vm14443_vm13 = vcmp.lt.f32.partialorder %v5291_v13, 0.0004427343  ;;  %v5429_v2 = vadd.f32 1.0, %v14439_v48  ;;  %v4573_v36 = vand.u32 2147483647, %v4317_v53 }
 0x5a0   : > { %v5290_v20 = vmul.f32 %v8170_v18, %v5289_v30  ;;  %v5426_v15 = vand.u32 2147483647, %v8176_v52  ;;  %v5444_v11 = vand.u32 2147483647, %v8178_v44  ;;  %8191 = vpow2.f32 %v4888_v22 }
 0x5a1   : > { %v6334_v21 = vadd.f32 %v6206_v62, %v16119_v63  ;;  %v8182_v17 = vpop.eup %8181  ;;  %v5308_v47 = vmul.f32 %v8172_v43, %v5307_v59  ;;  %vm14449_vm14 = vcmp.lt.f32.partialorder %v5309_v55, 0.0004427343  ;;  %8193 = vlog2.f32 %v5429_v2 }
 0x5a2   : > { %v5287_v56 = vmul.f32 0.6931472, %v8182_v17  ;;  %v5424_v13 = vadd.f32 1.0, %v5423_v14  ;;  %v5442_v51 = vadd.f32 1.0, %v5441_v24  ;;  %v4892_v62 = vmul.f32 1.442695, %v4702_v3 }
 0x5a3   : > { %v6510_v26 = vmul.f32 %v15868_v31, %v6334_v21  ;;  %v5432_v18 = vmul.f32 -0.5, %v14439_v48  ;;  %v4701_v53 = vsub.f32 0.0, %v4573_v36  ;;  %v4319_v30 = vmul.f32 100.0, %v14434_v41 }
 0x5a4   : > { %v14457_v22 = vpop.eup %8183  ;;  %v5293_v43 = vsel %vm14443_vm13, %v5290_v20, %v5287_v56  ;;  %vm14461_vm12 = vcmp.lt.f32.partialorder %v5426_v15, 0.0004427343  ;;  %vm14465_vm15 = vcmp.lt.f32.partialorder %v5444_v11, 0.0004427343  ;;  %8195 = vpow2.f32 %v4892_v62 }
 0x5a5   : > { %v14453_v63 = vadd.f32 %v6510_v26, %v6494_v46  ;;  %v8186_v46 = vpop.eup %8185  ;;  %v6205_v14 = vmul.f32 0.01, %v5293_v43  ;;  %v5435_v24 = vand.u32 2147483647, %v14439_v48  ;;  %v5447_v3 = vadd.f32 1.0, %v14457_v22 }
 0x5a6   : > { %v14473_v21 = vadd.f32 %v13984_v4, %v15880_v19  ;;  %v5305_v6 = vmul.f32 0.6931472, %v8186_v46  ;;  %v5425_v2 = vmul.f32 %v8176_v52, %v5424_v13  ;;  %v4890_v36 = vmul.f32 1.442695, %v4701_v53 }
 0x5a7   : > { %v4575_v20 = vand.u32 2147483647, %v4319_v30  ;;  %v8188_v15 = vpop.eup %8187  ;;  %v6333_v11 = vadd.f32 %v6205_v14, %v4413_v28  ;;  %v5443_v17 = vmul.f32 %v8178_v44, %v5442_v51  ;;  %v5433_v26 = vadd.f32 1.0, %v5432_v18 }
 0x5a8   : > { %8197 = vlog2.f32 %v5447_v3  ;;  %v8190_v56 = vpop.eup %8189  ;;  %v5311_v62 = vsel %vm14449_vm14, %v5308_v47, %v5305_v6  ;;  %v5422_v43 = vmul.f32 0.6931472, %v8188_v15  ;;  %v4332_v13 = vmul.f32 100.0, %v14473_v21 }
 0x5a9   : > { %8199 = vpow2.f32 %v4890_v36  ;;  %v4703_v0 = vsub.f32 0.0, %v4575_v20  ;;  %v6509_v4 = vmul.f32 %v15868_v31, %v6333_v11  ;;  %v6207_v46 = vmul.f32 0.01, %v5311_v62  ;;  %v16130_v20 = vld [vmem:[#allocation9_spill] sm:$0xff] }
 0x5aa   : > { %v5440_v52 = vmul.f32 0.6931472, %v8190_v56  ;;  %v14481_v53 = vpop.eup %8191  ;;  %v5428_v61 = vsel %vm14461_vm12, %v5425_v2, %v5422_v43  ;;  %vm14485_vm0 = vcmp.lt.f32.partialorder %v5435_v24, 0.0004427343  ;;  %v5450_v44 = vmul.f32 -0.5, %v14457_v22  ;;  %v16131_v62 = vld [vmem:[#allocation45_spill] sm:$0xff] }
 0x5ab   : > { %v4894_v47 = vmul.f32 1.442695, %v4703_v0  ;;  %v8194_v27 = vpop.eup %8193  ;;  %v6777_v51 = vadd.f32 %v6509_v4, %v14415_v9  ;;  %v6335_v18 = vadd.f32 %v6207_v46, %v4415_v35  ;;  %v6220_v30 = vmul.f32 0.01, %v5428_v61 }
 0x5ac   : > { %v5446_v14 = vsel %vm14465_vm15, %v5443_v17, %v5440_v52  ;;  %v5431_v59 = vmul.f32 0.6931472, %v8194_v27  ;;  %v5434_v24 = vmul.f32 %v14439_v48, %v5433_v26  ;;  %v5564_v6 = vadd.f32 1.0, %v14481_v53 }
 0x5ad   : > { %v6222_v3 = vmul.f32 0.01, %v5446_v14  ;;  %v6511_v2 = vmul.f32 %v15868_v31, %v6335_v18  ;;  %v6348_v0 = vadd.f32 %v6220_v30, %v4428_v34  ;;  %8201 = vpow2.f32 %v4894_v47 }
 0x5ae   : > { %v4588_v9 = vand.u32 2147483647, %v4332_v13  ;;  %v14500_v36 = vpop.eup %8195  ;;  %v5437_v35 = vsel %vm14485_vm0, %v5434_v24, %v5431_v59  ;;  %v5451_v55 = vadd.f32 1.0, %v5450_v44  ;;  %8203 = vlog2.f32 %v5564_v6 }
 0x5af   : > { %v6350_v33 = vadd.f32 %v6222_v3, %v4430_v54  ;;  %v6803_v48 = vadd.f32 %v6511_v2, %v14428_v38  ;;  %v6524_v15 = vmul.f32 %v16130_v20, %v6348_v0  ;;  %v6221_v31 = vmul.f32 0.01, %v5437_v35 }
 0x5b0   : > { %v5453_v57 = vand.u32 2147483647, %v14457_v22  ;;  %v5567_v11 = vmul.f32 -0.5, %v14481_v53  ;;  %v4446_v17 = vmax.f32 %v14404_v37, 0.0  ;;  %v5582_v39 = vadd.f32 1.0, %v14500_v36 }
 0x5b1   : > { %v6526_v34 = vmul.f32 %v16130_v20, %v6350_v33  ;;  %v14514_v26 = vadd.f32 %v14409_v25, %v6524_v15  ;;  %v6349_v38 = vadd.f32 %v6221_v31, %v4429_v8  ;;  %v4716_v56 = vsub.f32 0.0, %v4588_v9 }
 0x5b2   : > { %v8198_v54 = vpop.eup %8197  ;;  %v14520_v43 = vadd.f32 %v16131_v62, %v15880_v19  ;;  %v5452_v13 = vmul.f32 %v14457_v22, %v5451_v55  ;;  %8205 = vlog2.f32 %v5582_v39  ;;  %vm5454_vm1 = vcmp.lt.f32.partialorder %v5453_v57, 0.0004427343 }
 0x5b3   : > { %v8200_v4 = vpop.eup %8199  ;;  %v14523_v46 = vadd.f32 %v14453_v63, %v6526_v34  ;;  %v5449_v52 = vmul.f32 0.6931472, %v8198_v54  ;;  %v6525_v61 = vmul.f32 %v16130_v20, %v6349_v38  ;;  %v5570_v25 = vand.u32 2147483647, %v14481_v53 }
 0x5b4   : > { %v5573_v60 = vadd.f32 1.0, %v8200_v4  ;;  %v5568_v28 = vadd.f32 1.0, %v5567_v11  ;;  %v5585_v44 = vmul.f32 -0.5, %v14500_v36  ;;  %v4920_v47 = vmul.f32 1.442695, %v4716_v56 }
 0x5b5   : > { %v5455_v8 = vsel %vm5454_vm1, %v5452_v13, %v5449_v52  ;;  %v14529_v27 = vadd.f32 %v6777_v51, %v6525_v61  ;;  %v5588_v63 = vand.u32 2147483647, %v14500_v36  ;;  %v5576_v30 = vmul.f32 -0.5, %v8200_v4 }
 0x5b6   : > { %v6223_v18 = vmul.f32 0.01, %v5455_v8  ;;  %8207 = vlog2.f32 %v5573_v60  ;;  %v5579_v22 = vand.u32 2147483647, %v8200_v4  ;;  %v4334_v14 = vmul.f32 100.0, %v14520_v43 }
 0x5b7   : > { %8209 = vpow2.f32 %v4920_v47  ;;  %v14533_v3 = vpop.eup %8201  ;;  %v16132_v59 = vmax.f32 %v14385_v29, 0.0  ;;  %vm14537_vm2 = vcmp.lt.f32.partialorder %v5570_v25, 0.0004427343  ;;  %v14543_v51 = vadd.f32 %v14036_v40, %v15880_v19  ;;  %v16139_v25 = vld [vmem:[#allocation14_spill] sm:$0xff] }
 0x5b8   : > { %v14547_v2 = vadd.f32 %v14049_v16, %v15880_v19  ;;  %v8204_v0 = vpop.eup %8203  ;;  %v5569_v9 = vmul.f32 %v14481_v53, %v5568_v28  ;;  %v5586_v33 = vadd.f32 1.0, %v5585_v44  ;;  %v5591_v35 = vadd.f32 1.0, %v14533_v3 }
 0x5b9   : > { %v6351_v24 = vadd.f32 %v6223_v18, %v16132_v59  ;;  %v4590_v29 = vand.u32 2147483647, %v4334_v14  ;;  %v5566_v15 = vmul.f32 0.6931472, %v8204_v0  ;;  %vm14552_vm3 = vcmp.lt.f32.partialorder %v5588_v63, 0.0004427343 }
 0x5ba   : > { %v4333_v40 = vmul.f32 100.0, %v14543_v51  ;;  %v5577_v57 = vadd.f32 1.0, %v5576_v30  ;;  %vm14557_vm4 = vcmp.lt.f32.partialorder %v5579_v22, 0.0004427343  ;;  %8211 = vlog2.f32 %v5591_v35 }
 0x5bb   : > { %v6527_v55 = vmul.f32 %v16130_v20, %v6351_v24  ;;  %v4718_v16 = vsub.f32 0.0, %v4590_v29  ;;  %v5572_v34 = vsel %vm14537_vm2, %v5569_v9, %v5566_v15  ;;  %v4335_v11 = vmul.f32 100.0, %v14547_v2 }
 0x5bc   : > { %v4589_v20 = vand.u32 2147483647, %v4333_v40  ;;  %v8206_v39 = vpop.eup %8205  ;;  %v6236_v54 = vmul.f32 0.01, %v5572_v34  ;;  %v5587_v38 = vmul.f32 %v14500_v36, %v5586_v33  ;;  %v5594_v56 = vmul.f32 -0.5, %v14533_v3 }
 0x5bd   : > { %v14561_v53 = vadd.f32 %v6803_v48, %v6527_v55  ;;  %v4924_v62 = vmul.f32 1.442695, %v4718_v16  ;;  %v5584_v52 = vmul.f32 0.6931472, %v8206_v39  ;;  %v4591_v61 = vand.u32 2147483647, %v4335_v11 }
 0x5be   : > { %v4717_v13 = vsub.f32 0.0, %v4589_v20  ;;  %v14570_v48 = vadd.f32 %v14064_v12, %v16139_v25  ;;  %v16140_v60 = vmax.f32 %v14400_v32, 0.0  ;;  %v5578_v28 = vmul.f32 %v8200_v4, %v5577_v57 }
 0x5bf   : > { %v5597_v44 = vand.u32 2147483647, %v14533_v3  ;;  %8213 = vpow2.f32 %v4924_v62  ;;  %v5590_v36 = vsel %vm14552_vm3, %v5587_v38, %v5584_v52  ;;  %v4719_v63 = vsub.f32 0.0, %v4591_v61 }
 0x5c0   : > { %v6364_v8 = vadd.f32 %v6236_v54, %v16140_v60  ;;  %v8208_v47 = vpop.eup %8207  ;;  %v4922_v18 = vmul.f32 1.442695, %v4717_v13  ;;  %v14579_v30 = vadd.f32 %v14084_v45, %v16139_v25  ;;  %v6238_v32 = vmul.f32 0.01, %v5590_v36 }
 0x5c1   : > { %v14581_v22 = vpop.eup %8209  ;;  %v5575_v14 = vmul.f32 0.6931472, %v8208_v47  ;;  %v4348_v4 = vmul.f32 100.0, %v14570_v48  ;;  %v5595_v59 = vadd.f32 1.0, %v5594_v56  ;;  %v14588_v6 = vadd.f32 %v14103_v42, %v16139_v25 }
 0x5c2   : > { %v6540_v12 = vmul.f32 %v12537_v50, %v6364_v8  ;;  %v5708_v24 = vadd.f32 1.0, %v14581_v22  ;;  %8215 = vpow2.f32 %v4922_v18  ;;  %v6366_v45 = vadd.f32 %v6238_v32, %v4446_v17 }
 0x5c3   : > { %v5581_v9 = vsel %vm14557_vm4, %v5578_v28, %v5575_v14  ;;  %v4926_v33 = vmul.f32 1.442695, %v4719_v63  ;;  %v4445_v35 = vmax.f32 %v14425_v58, 0.0  ;;  %vm14598_vm5 = vcmp.lt.f32.partialorder %v5597_v44, 0.0004427343 }
 0x5c4   : > { %v14591_v0 = vadd.f32 %v14514_v26, %v6540_v12  ;;  %v6237_v29 = vmul.f32 0.01, %v5581_v9  ;;  %8217 = vlog2.f32 %v5708_v24  ;;  %v8212_v42 = vpop.eup %8211  ;;  %v6542_v15 = vmul.f32 %v12537_v50, %v6366_v45 }
 0x5c5   : > { %8219 = vpow2.f32 %v4926_v33  ;;  %v4604_v26 = vand.u32 2147483647, %v4348_v4  ;;  %v4350_v37 = vmul.f32 100.0, %v14579_v30  ;;  %v5593_v31 = vmul.f32 0.6931472, %v8212_v42  ;;  %v16144_v33 = vld [vmem:[#allocation53_spill] sm:$0xff] }
 0x5c6   : > { %v6365_v17 = vadd.f32 %v6237_v29, %v4445_v35  ;;  %v5596_v40 = vmul.f32 %v14533_v3, %v5595_v59  ;;  %v5711_v57 = vmul.f32 -0.5, %v14581_v22  ;;  %v14607_v58 = vadd.f32 %v14523_v46, %v6542_v15  ;;  %v16143_v46 = vld [vmem:[#allocation12_spill] sm:$0xff] }
 0x5c7   : > { %v4732_v19 = vsub.f32 0.0, %v4604_v26  ;;  %v4606_v16 = vand.u32 2147483647, %v4350_v37  ;;  %v4349_v34 = vmul.f32 100.0, %v14588_v6  ;;  %v4447_v11 = vmax.f32 %v14434_v41, 0.0 }
 0x5c8   : > { %v6541_v20 = vmul.f32 %v12537_v50, %v6365_v17  ;;  %v5599_v39 = vsel %vm14598_vm5, %v5596_v40, %v5593_v31  ;;  %v4460_v54 = vmax.f32 %v14473_v21, 0.0  ;;  %v14617_v52 = vadd.f32 %v16143_v46, %v16139_v25 }
 0x5c9   : > { %v8214_v38 = vpop.eup %8213  ;;  %v6239_v3 = vmul.f32 0.01, %v5599_v39  ;;  %v4952_v56 = vmul.f32 1.442695, %v4732_v19  ;;  %v4734_v62 = vsub.f32 0.0, %v4606_v16  ;;  %v5712_v61 = vadd.f32 1.0, %v5711_v57 }
 0x5ca   : > { %v14620_v13 = vadd.f32 %v14529_v27, %v6541_v20  ;;  %v4462_v60 = vmax.f32 %v14520_v43, 0.0  ;;  %v5726_v41 = vadd.f32 1.0, %v8214_v38  ;;  %v4605_v44 = vand.u32 2147483647, %v4349_v34 }
 0x5cb   : > { %v6367_v8 = vadd.f32 %v6239_v3, %v4447_v11  ;;  %8221 = vpow2.f32 %v4952_v56  ;;  %v4956_v28 = vmul.f32 1.442695, %v4734_v62  ;;  %v5714_v47 = vand.u32 2147483647, %v14581_v22  ;;  %v16146_v11 = vld [vmem:[#allocation46_spill] sm:$0xff]  ;;  %v16156_v62 = vld [vmem:[#allocation15_spill] sm:$0xff] }
 0x5cc   : > { %v14623_v21 = vpop.eup %8215  ;;  %8223 = vlog2.f32 %v5726_v41  ;;  %v4461_v36 = vmax.f32 %v14543_v51, 0.0  ;;  %v4463_v25 = vmax.f32 %v14547_v2, 0.0  ;;  %v5729_v18 = vmul.f32 -0.5, %v8214_v38 }
 0x5cd   : > { %v6543_v27 = vmul.f32 %v12537_v50, %v6367_v8  ;;  %v5717_v63 = vadd.f32 1.0, %v14623_v21  ;;  %v4351_v12 = vmul.f32 100.0, %v14617_v52  ;;  %v5713_v14 = vmul.f32 %v14581_v22, %v5712_v61  ;;  %v16145_v50 = vld [vmem:[#allocation51_spill] sm:$0xff]  ;;  %v16149_v8 = vld [vmem:[#allocation18_spill] sm:$0xff] }
 0x5ce   : > { %v8218_v32 = vpop.eup %8217  ;;  %v4476_v4 = vmax.f32 %v14570_v48, 0.0  ;;  %8225 = vpow2.f32 %v4956_v28  ;;  %v4733_v59 = vsub.f32 0.0, %v4605_v44  ;;  %v14638_v35 = vadd.f32 %v16145_v50, %v16144_v33 }
 0x5cf   : > { %v8220_v24 = vpop.eup %8219  ;;  %v14634_v45 = vadd.f32 %v14561_v53, %v6543_v27  ;;  %v5710_v9 = vmul.f32 0.6931472, %v8218_v32  ;;  %8227 = vlog2.f32 %v5717_v63  ;;  %vm5715_vm6 = vcmp.lt.f32.partialorder %v5714_v47, 0.0004427343 }
 0x5d0   : > { %v5732_v29 = vand.u32 2147483647, %v8214_v38  ;;  %v5735_v55 = vadd.f32 1.0, %v8220_v24  ;;  %v4478_v42 = vmax.f32 %v14579_v30, 0.0  ;;  %v5730_v15 = vadd.f32 1.0, %v5729_v18 }
 0x5d1   : > { %v5716_v22 = vsel %vm5715_vm6, %v5713_v14, %v5710_v9  ;;  %v4954_v26 = vmul.f32 1.442695, %v4733_v59  ;;  %v4607_v37 = vand.u32 2147483647, %v4351_v12  ;;  %v5720_v31 = vmul.f32 -0.5, %v14623_v21 }
 0x5d2   : > { %v6252_v17 = vmul.f32 0.01, %v5716_v22  ;;  %v5723_v53 = vand.u32 2147483647, %v14623_v21  ;;  %8229 = vlog2.f32 %v5735_v55  ;;  %v5738_v40 = vmul.f32 -0.5, %v8220_v24  ;;  %v16154_v55 = vld [vmem:[#allocation11_spill] sm:$0xff] }
 0x5d3   : > { %8231 = vpow2.f32 %v4954_v26  ;;  %v4735_v57 = vsub.f32 0.0, %v4607_v37  ;;  %v4364_v19 = vmul.f32 100.0, %v14638_v35  ;;  %v5741_v34 = vand.u32 2147483647, %v8220_v24 }
 0x5d4   : > { %v6380_v16 = vadd.f32 %v6252_v17, %v4460_v54  ;;  %v4477_v20 = vmax.f32 %v14588_v6, 0.0  ;;  %v14647_v39 = vadd.f32 %v16146_v11, %v16144_v33  ;;  %v5731_v56 = vmul.f32 %v8214_v38, %v5730_v15  ;;  %v16175_v6 = vld [vmem:[#allocation17_spill] sm:$0xff] }
 0x5d5   : > { %v8222_v3 = vpop.eup %8221  ;;  %vm14649_vm7 = vcmp.lt.f32.partialorder %v5732_v29, 0.0004427343  ;;  %v4958_v46 = vmul.f32 1.442695, %v4735_v57  ;;  %v4620_v61 = vand.u32 2147483647, %v4364_v19  ;;  %v14673_v22 = vadd.f32 %v16154_v55, %v16144_v33 }
 0x5d6   : > { %v8224_v41 = vpop.eup %8223  ;;  %v6556_v28 = vmul.f32 %v16149_v8, %v6380_v16  ;;  %v5721_v44 = vadd.f32 1.0, %v5720_v31  ;;  %vm14654_vm8 = vcmp.lt.f32.partialorder %v5723_v53, 0.0004427343  ;;  %v5852_v47 = vadd.f32 1.0, %v8222_v3  ;;  %v16155_v53 = vld [vmem:[#allocation7_spill] sm:$0xff] }
 0x5d7   : > { %v5728_v27 = vmul.f32 0.6931472, %v8224_v41  ;;  %v5739_v18 = vadd.f32 1.0, %v5738_v40  ;;  %8233 = vpow2.f32 %v4958_v46  ;;  %v4748_v63 = vsub.f32 0.0, %v4620_v61 }
 0x5d8   : > { %v14658_v38 = vpop.eup %8225  ;;  %v14661_v12 = vadd.f32 %v14591_v0, %v6556_v28  ;;  %vm14663_vm9 = vcmp.lt.f32.partialorder %v5741_v34, 0.0004427343  ;;  %8235 = vlog2.f32 %v5852_v47  ;;  %v4366_v14 = vmul.f32 100.0, %v14647_v39 }
 0x5d9   : > { %v8228_v59 = vpop.eup %8227  ;;  %v5734_v9 = vsel %vm14649_vm7, %v5731_v56, %v5728_v27  ;;  %v5855_v50 = vmul.f32 -0.5, %v8222_v3  ;;  %v5870_v29 = vadd.f32 1.0, %v14658_v38  ;;  %v5722_v26 = vmul.f32 %v14623_v21, %v5721_v44 }
 0x5da   : > { %v6254_v0 = vmul.f32 0.01, %v5734_v9  ;;  %v5719_v15 = vmul.f32 0.6931472, %v8228_v59  ;;  %v4984_v37 = vmul.f32 1.442695, %v4748_v63  ;;  %v5740_v17 = vmul.f32 %v8220_v24, %v5739_v18 }
 0x5db   : > { %v5858_v31 = vand.u32 2147483647, %v8222_v3  ;;  %8237 = vlog2.f32 %v5870_v29  ;;  %v14678_v40 = vadd.f32 %v16155_v53, %v16144_v33  ;;  %v4622_v34 = vand.u32 2147483647, %v4366_v14 }
 0x5dc   : > { %v8230_v57 = vpop.eup %8229  ;;  %v6382_v19 = vadd.f32 %v6254_v0, %v4462_v60  ;;  %v5725_v16 = vsel %vm14654_vm8, %v5722_v26, %v5719_v15  ;;  %8239 = vpow2.f32 %v4984_v37  ;;  %v4365_v24 = vmul.f32 100.0, %v14673_v22 }
 0x5dd   : > { %v8232_v11 = vpop.eup %8231  ;;  %v6253_v56 = vmul.f32 0.01, %v5725_v16  ;;  %v5737_v21 = vmul.f32 0.6931472, %v8230_v57  ;;  %v14687_v46 = vadd.f32 %v14220_v23, %v16156_v62  ;;  %v5856_v61 = vadd.f32 1.0, %v5855_v50 }
 0x5de   : > { %v6558_v33 = vmul.f32 %v16149_v8, %v6382_v19  ;;  %v5873_v43 = vmul.f32 -0.5, %v14658_v38  ;;  %v5861_v60 = vadd.f32 1.0, %v8232_v11  ;;  %vm14695_vm10 = vcmp.lt.f32.partialorder %v5858_v31, 0.0004427343 }
 0x5df   : > { %v6381_v41 = vadd.f32 %v6253_v56, %v4461_v36  ;;  %v5743_v28 = vsel %vm14663_vm9, %v5740_v17, %v5737_v21  ;;  %v4750_v54 = vsub.f32 0.0, %v4622_v34  ;;  %v5876_v27 = vand.u32 2147483647, %v14658_v38 }
 0x5e0   : > { %v14700_v23 = vadd.f32 %v14607_v58, %v6558_v33  ;;  %v6255_v47 = vmul.f32 0.01, %v5743_v28  ;;  %8241 = vlog2.f32 %v5861_v60  ;;  %v5864_v36 = vmul.f32 -0.5, %v8232_v11  ;;  %v16163_v28 = vld [vmem:[#allocation59_spill] sm:$0xff] }
 0x5e1   : > { %v14703_v18 = vpop.eup %8233  ;;  %v6557_v51 = vmul.f32 %v16149_v8, %v6381_v41  ;;  %v4988_v63 = vmul.f32 1.442695, %v4750_v54  ;;  %v4621_v32 = vand.u32 2147483647, %v4365_v24  ;;  %v5857_v9 = vmul.f32 %v8222_v3, %v5856_v61 }
 0x5e2   : > { %v8236_v14 = vpop.eup %8235  ;;  %v6383_v59 = vadd.f32 %v6255_v47, %v4463_v25  ;;  %v5874_v50 = vadd.f32 1.0, %v5873_v43  ;;  %v5879_v58 = vadd.f32 1.0, %v14703_v18  ;;  %v5882_v0 = vmul.f32 -0.5, %v14703_v18 }
 0x5e3   : > { %v14710_v29 = vadd.f32 %v14620_v13, %v6557_v51  ;;  %v5854_v55 = vmul.f32 0.6931472, %v8236_v14  ;;  %8243 = vpow2.f32 %v4988_v63  ;;  %vm14714_vm11 = vcmp.lt.f32.partialorder %v5876_v27, 0.0004427343 }
 0x5e4   : > { %v6559_v15 = vmul.f32 %v16149_v8, %v6383_v59  ;;  %8245 = vlog2.f32 %v5879_v58  ;;  %v4749_v2 = vsub.f32 0.0, %v4621_v32  ;;  %v5865_v37 = vadd.f32 1.0, %v5864_v36 }
 0x5e5   : > { %v8238_v25 = vpop.eup %8237  ;;  %v5860_v3 = vsel %vm14695_vm10, %v5857_v9, %v5854_v55  ;;  %v5867_v17 = vand.u32 2147483647, %v8232_v11  ;;  %v4367_v13 = vmul.f32 100.0, %v14678_v40  ;;  %v5875_v19 = vmul.f32 %v14658_v38, %v5874_v50 }
 0x5e6   : > { %v8240_v31 = vpop.eup %8239  ;;  %v14722_v53 = vadd.f32 %v14634_v45, %v6559_v15  ;;  %v6268_v57 = vmul.f32 0.01, %v5860_v3  ;;  %v5872_v8 = vmul.f32 0.6931472, %v8238_v25  ;;  %v5883_v16 = vadd.f32 1.0, %v5882_v0 }
 0x5e7   : > { %v5996_v34 = vadd.f32 1.0, %v8240_v31  ;;  %v5999_v56 = vmul.f32 -0.5, %v8240_v31  ;;  %v4986_v21 = vmul.f32 1.442695, %v4749_v2  ;;  %v4623_v61 = vand.u32 2147483647, %v4367_v13 }
 0x5e8   : > { %v6396_v24 = vadd.f32 %v6268_v57, %v4476_v4  ;;  %v5878_v33 = vsel %vm14714_vm11, %v5875_v19, %v5872_v8  ;;  %v4380_v43 = vmul.f32 100.0, %v14687_v46  ;;  %v5866_v45 = vmul.f32 %v8232_v11, %v5865_v37 }
 0x5e9   : > { %v6270_v60 = vmul.f32 0.01, %v5878_v33  ;;  %vm14730_vm13 = vcmp.lt.f32.partialorder %v5867_v17, 0.0004427343  ;;  %8247 = vlog2.f32 %v5996_v34  ;;  %v5885_v54 = vand.u32 2147483647, %v14703_v18 }
 0x5ea   : > { %v8242_v38 = vpop.eup %8241  ;;  %v6572_v44 = vmul.f32 %v16163_v28, %v6396_v24  ;;  %8249 = vpow2.f32 %v4986_v21  ;;  %v4751_v48 = vsub.f32 0.0, %v4623_v61  ;;  %v5884_v27 = vmul.f32 %v14703_v18, %v5883_v16 }
 0x5eb   : > { %v6398_v4 = vadd.f32 %v6270_v60, %v4478_v42  ;;  %v5863_v47 = vmul.f32 0.6931472, %v8242_v38  ;;  %v4636_v51 = vand.u32 2147483647, %v4380_v43  ;;  %v6000_v36 = vadd.f32 1.0, %v5999_v56 }
 0x5ec   : > { %v14740_v11 = vadd.f32 %v14661_v12, %v6572_v44  ;;  %v6002_v63 = vand.u32 2147483647, %v8240_v31  ;;  %v4990_v32 = vmul.f32 1.442695, %v4751_v48  ;;  %v14749_v30 = vadd.f32 %v14229_v7, %v16156_v62 }
 0x5ed   : > { %v14742_v14 = vpop.eup %8243  ;;  %v6574_v59 = vmul.f32 %v16163_v28, %v6398_v4  ;;  %v5869_v9 = vsel %vm14730_vm13, %v5866_v45, %v5863_v47  ;;  %v4764_v50 = vsub.f32 0.0, %v4636_v51  ;;  %v14754_v58 = vadd.f32 %v14271_v1, %v16156_v62  ;;  %v16168_v51 = vld [vmem:[#allocation50_spill] sm:$0xff] }
 0x5ee   : > { %v8246_v42 = vpop.eup %8245  ;;  %v6269_v18 = vmul.f32 0.01, %v5869_v9  ;;  %v6014_v12 = vadd.f32 1.0, %v14742_v14  ;;  %v14758_v55 = vadd.f32 %v14273_v10, %v16156_v62  ;;  %8251 = vpow2.f32 %v4990_v32  ;;  %v16171_v32 = vld [vmem:[#allocation62_spill] sm:$0xff] }
 0x5ef   : > { %v14761_v0 = vadd.f32 %v14700_v23, %v6574_v59  ;;  %v5881_v15 = vmul.f32 0.6931472, %v8246_v42  ;;  %v5016_v26 = vmul.f32 1.442695, %v4764_v50  ;;  %v16164_v7 = vrot.slane %v14342_v49, 1 }
 0x5f0   : > { %v6397_v25 = vadd.f32 %v6269_v18, %v4477_v20  ;;  %vm5886_vm14 = vcmp.lt.f32.partialorder %v5885_v54, 0.0004427343  ;;  %8253 = vlog2.f32 %v6014_v12  ;;  %v6017_v3 = vmul.f32 -0.5, %v14742_v14  ;;  %v16172_v12 = vld [vmem:[#allocation57_spill] sm:$0xff] }
 0x5f1   : > { %v6763_v2 = vadd.f32 %v16164_v7, %v14342_v49  ;;  %v5887_v1 = vsel %vm5886_vm14, %v5884_v27, %v5881_v15  ;;  %8255 = vpow2.f32 %v5016_v26  ;;  %v4382_v10 = vmul.f32 100.0, %v14749_v30 }
 0x5f2   : > { %v6573_v62 = vmul.f32 %v16163_v28, %v6397_v25  ;;  %v4479_v23 = vmax.f32 %v14617_v52, 0.0  ;;  %v6271_v37 = vmul.f32 0.01, %v5887_v1  ;;  %v4381_v17 = vmul.f32 100.0, %v14754_v58 }
 0x5f3   : > { %v8248_v13 = vpop.eup %8247  ;;  %v6001_v49 = vmul.f32 %v8240_v31, %v6000_v36  ;;  %vm14773_vm12 = vcmp.lt.f32.partialorder %v6002_v63, 0.0004427343  ;;  %v4638_v20 = vand.u32 2147483647, %v4382_v10  ;;  %v4383_v57 = vmul.f32 100.0, %v14758_v55  ;;  %v16169_v36 = vld [vmem:[#allocation22_spill] sm:$0xff] }
 0x5f4   : > { %v14778_v8 = vpop.eup %8249  ;;  %v14781_v19 = vadd.f32 %v14710_v29, %v6573_v62  ;;  %v6399_v16 = vadd.f32 %v6271_v37, %v4479_v23  ;;  %v5998_v34 = vmul.f32 0.6931472, %v8248_v13  ;;  %v4637_v52 = vand.u32 2147483647, %v4381_v17  ;;  %v16173_v37 = vld [vmem:[#allocation58_spill] sm:$0xff]  ;;  %v16174_v17 = vld [vmem:[#allocation49_spill] sm:$0xff] }
 0x5f5   : > { %v6018_v56 = vadd.f32 1.0, %v6017_v3  ;;  %v6005_v21 = vadd.f32 1.0, %v14778_v8  ;;  %v6008_v31 = vmul.f32 -0.5, %v14778_v8  ;;  %v4766_v24 = vsub.f32 0.0, %v4638_v20  ;;  %v16176_v20 = vld [vmem:[#allocation10_spill] sm:$0xff] }
 0x5f6   : > { %v6575_v33 = vmul.f32 %v16163_v28, %v6399_v16  ;;  %v6004_v61 = vsel %vm14773_vm12, %v6001_v49, %v5998_v34  ;;  %v4765_v43 = vsub.f32 0.0, %v4637_v52  ;;  %v4639_v60 = vand.u32 2147483647, %v4383_v57  ;;  %v16167_v28 = vld [vmem:[#allocation23_spill] sm:$0xff]  ;;  %v16177_v16 = vld [vmem:[#allocation56_spill] sm:$0xff] }
 0x5f7   : > { %v4492_v45 = vmax.f32 %v14638_v35, 0.0  ;;  %v6284_v29 = vmul.f32 0.01, %v6004_v61  ;;  %v6020_v41 = vand.u32 2147483647, %v14742_v14  ;;  %8257 = vlog2.f32 %v6005_v21  ;;  %v16170_v35 = vld [vmem:[#allocation54_spill] sm:$0xff] }
 0x5f8   : > { %v14791_v38 = vadd.f32 %v14722_v53, %v6575_v33  ;;  %v5020_v44 = vmul.f32 1.442695, %v4766_v24  ;;  %v5018_v54 = vmul.f32 1.442695, %v4765_v43  ;;  %v4767_v48 = vsub.f32 0.0, %v4639_v60  ;;  %v8252_v4 = vpop.eup %8251  ;;  %v16178_v24 = vld [vmem:[#allocation8_spill] sm:$0xff] }
 0x5f9   : > { %v14795_v47 = vadd.f32 %v16167_v28, %v14377_v5  ;;  %v6412_v27 = vadd.f32 %v6284_v29, %v4492_v45  ;;  %v6858_v63 = vcombine.low %v16169_v36, %v16168_v51  ;;  %v6859_v59 = vcombine.low %v16171_v32, %v16170_v35  ;;  %v16179_v33 = vld [vmem:[#allocation16_spill] sm:$0xff] }
 0x5fa   : > { %v8254_v9 = vpop.eup %8253  ;;  %v6019_v50 = vmul.f32 %v14742_v14, %v6018_v56  ;;  %v6009_v53 = vadd.f32 1.0, %v6008_v31  ;;  %v6023_v42 = vadd.f32 1.0, %v8252_v4  ;;  %8259 = vpow2.f32 %v5020_v44 }
 0x5fb   : > { %v14802_v18 = vpop.eup %8255  ;;  %v6588_v15 = vmul.f32 %v16172_v12, %v6412_v27  ;;  %v6016_v26 = vmul.f32 0.6931472, %v8254_v9  ;;  %8261 = vpow2.f32 %v5018_v54  ;;  %v5022_v5 = vmul.f32 1.442695, %v4767_v48 }
 0x5fc   : > { %v6837_v7 = vadd.f32 %v16167_v28, %v6763_v2  ;;  %vm6021_vm15 = vcmp.lt.f32.partialorder %v6020_v41, 0.0004427343  ;;  %8263 = vlog2.f32 %v6023_v42  ;;  %v6140_v25 = vadd.f32 1.0, %v14802_v18 }
 0x5fd   : > { %v14808_v1 = vadd.f32 %v14740_v11, %v6588_v15  ;;  %v4494_v14 = vmax.f32 %v14647_v39, 0.0  ;;  %v6022_v3 = vsel %vm6021_vm15, %v6019_v50, %v6016_v26  ;;  %v6011_v10 = vand.u32 2147483647, %v14778_v8 }
 0x5fe   : > { %v6286_v62 = vmul.f32 0.01, %v6022_v3  ;;  %v6026_v23 = vmul.f32 -0.5, %v8252_v4  ;;  %8265 = vlog2.f32 %v6140_v25  ;;  %v6860_v13 = vcombine.low %v16174_v17, %v16173_v37 }
 0x5ff   : > { %v6010_v2 = vmul.f32 %v14778_v8, %v6009_v53  ;;  %v6143_v49 = vmul.f32 -0.5, %v14802_v18  ;;  %8267 = vpow2.f32 %v5022_v5  ;;  %v6861_v11 = vcombine.low %v16176_v20, %v16175_v6 }
 0x600   : > { %v6414_v57 = vadd.f32 %v6286_v62, %v4494_v14  ;;  %v6868_v39 = vrot.slane %v6858_v63, %v16177_v16  ;;  %v6875_v34 = vrot.slane %v6859_v59, %v16177_v16  ;;  %v6882_v52 = vrot.slane %v6860_v13, %v16177_v16 }
 0x601   : > { %v8258_v56 = vpop.eup %8257  ;;  %v6029_v21 = vand.u32 2147483647, %v8252_v4  ;;  %v6889_v31 = vrot.slane %v6861_v11, %v16177_v16  ;;  %v6907_v8 = vcombine.low %v16178_v24, %v14795_v47  ;;  %v6908_v61 = vcombine.low %v16179_v33, %v6837_v7 }
 0x602   : > { %v6590_v43 = vmul.f32 %v16172_v12, %v6414_v57  ;;  %v6007_v60 = vmul.f32 0.6931472, %v8258_v56  ;;  %v6027_v45 = vadd.f32 1.0, %v6026_v23  ;;  %v6890_v29 = vcombine.low %v6868_v39, %v6875_v34 }
 0x603   : > { %vm6012_vm0 = vcmp.lt.f32.partialorder %v6011_v10, 0.0004427343  ;;  %v6891_v41 = vcombine.low %v6882_v52, %v6889_v31  ;;  %v6144_v27 = vadd.f32 1.0, %v6143_v49  ;;  %v4493_v36 = vmax.f32 %v14673_v22, 0.0 }
 0x604   : > { %v8260_v44 = vpop.eup %8259  ;;  %v14827_v54 = vadd.f32 %v14761_v0, %v6590_v43  ;;  %v6013_v48 = vsel %vm6012_vm0, %v6010_v2, %v6007_v60  ;;  %v4495_v63 = vmax.f32 %v14678_v40, 0.0  ;;  %v6028_v59 = vmul.f32 %v8252_v4, %v6027_v45 }
 0x605   : > { %v8262_v51 = vpop.eup %8261  ;;  %v6285_v47 = vmul.f32 0.01, %v6013_v48  ;;  %v6158_v35 = vadd.f32 1.0, %v8260_v44  ;;  %vm14831_vm1 = vcmp.lt.f32.partialorder %v6029_v21, 0.0004427343  ;;  %v6905_v15 = vrot.slane %v6891_v41, %v16177_v16  ;;  %v16182_v21 = vld [vmem:[#allocation19_spill] sm:$0xff] }
 0x606   : > { %v8264_v32 = vpop.eup %8263  ;;  %v6146_v50 = vand.u32 2147483647, %v14802_v18  ;;  %v6149_v53 = vadd.f32 1.0, %v8262_v51  ;;  %v6145_v26 = vmul.f32 %v14802_v18, %v6144_v27  ;;  %v14840_v40 = vrot.slane %v6907_v8, %v16177_v16 }
 0x607   : > { %v6413_v0 = vadd.f32 %v6285_v47, %v4493_v36  ;;  %v6025_v42 = vmul.f32 0.6931472, %v8264_v32  ;;  %8269 = vlog2.f32 %v6158_v35  ;;  %v14843_v4 = vrot.slane %v6908_v61, %v16177_v16 }
 0x608   : > { %v8266_v22 = vpop.eup %8265  ;;  %8271 = vlog2.f32 %v6149_v53  ;;  %v6898_v3 = vrot.slane %v6890_v29, %v16177_v16  ;;  %vm6147_vm2 = vcmp.lt.f32.partialorder %v6146_v50, 0.0004427343  ;;  %v6161_v62 = vmul.f32 -0.5, %v8260_v44 }
 0x609   : > { %v8268_v5 = vpop.eup %8267  ;;  %v6589_v7 = vmul.f32 %v16172_v12, %v6413_v0  ;;  %v6031_v25 = vsel %vm14831_vm1, %v6028_v59, %v6025_v42  ;;  %v6142_v14 = vmul.f32 0.6931472, %v8266_v22  ;;  %v6152_v17 = vmul.f32 -0.5, %v8262_v51 }
 0x60a   : > { %v6287_v10 = vmul.f32 0.01, %v6031_v25  ;;  %v6167_v18 = vadd.f32 1.0, %v8268_v5  ;;  %v6906_v13 = vcombine.low %v6898_v3, %v6905_v15  ;;  %v4508_v49 = vmax.f32 %v14687_v46, 0.0 }
 0x60b   : > { %v6782_v23 = vadd.f32 %v14781_v19, %v6589_v7  ;;  %v6148_v37 = vsel %vm6147_vm2, %v6145_v26, %v6142_v14  ;;  %v6939_v20 = vcombine.low %v14840_v40, %v14843_v4  ;;  %v6162_v39 = vadd.f32 1.0, %v6161_v62 }
 0x60c   : > { %v6415_v2 = vadd.f32 %v6287_v10, %v4495_v63  ;;  %v6300_v6 = vmul.f32 0.01, %v6148_v37  ;;  %8273 = vlog2.f32 %v6167_v18  ;;  %6958 = vst [vmem:[%s14853_s25] sm:$0xff] %v6906_v13  ;;  %v6164_v19 = vand.u32 2147483647, %v8260_v44 }
 0x60d   : > { %v6153_v34 = vadd.f32 1.0, %v6152_v17  ;;  %v6170_v52 = vmul.f32 -0.5, %v8268_v5  ;;  %v6155_v31 = vand.u32 2147483647, %v8262_v51  ;;  %v6163_v43 = vmul.f32 %v8260_v44, %v6162_v39 }
 0x60e   : > { %v6591_v11 = vmul.f32 %v16172_v12, %v6415_v2  ;;  %v6428_v57 = vadd.f32 %v6300_v6, %v4508_v49  ;;  %vm6165_vm3 = vcmp.lt.f32.partialorder %v6164_v19, 0.0004427343  ;;  %v6173_v48 = vand.u32 2147483647, %v8268_v5 }
 0x60f   : > { %v6154_v45 = vmul.f32 %v8262_v51, %v6153_v34  ;;  %v6171_v12 = vadd.f32 1.0, %v6170_v52  ;;  %vm6156_vm4 = vcmp.lt.f32.partialorder %v6155_v31, 0.0004427343  ;;  %v4510_v27 = vmax.f32 %v14749_v30, 0.0 }
 0x610   : > { %v6808_v56 = vadd.f32 %v14791_v38, %v6591_v11  ;;  %v6604_v46 = vmul.f32 %v16182_v21, %v6428_v57  ;;  %v4509_v35 = vmax.f32 %v14754_v58, 0.0  ;;  %vm6174_vm5 = vcmp.lt.f32.partialorder %v6173_v48, 0.0004427343 }
 0x611   : > { %v8270_v24 = vpop.eup %8269  ;;  %v6172_v44 = vmul.f32 %v8268_v5, %v6171_v12  ;;  %v4511_v30 = vmax.f32 %v14758_v55, 0.0 }
 0x612   : > { %v8272_v8 = vpop.eup %8271  ;;  %v6770_v33 = vadd.f32 %v14808_v1, %v6604_v46  ;;  %v6160_v61 = vmul.f32 0.6931472, %v8270_v24 }
 0x613   : > { %v6151_v60 = vmul.f32 0.6931472, %v8272_v8 }
 0x614   : > { %v6771_v29 = vrot.slane %v6770_v33, 4  ;;  %v6166_v41 = vsel %vm6165_vm3, %v6163_v43, %v6160_v61  ;;  %v6947_v43 = vrot.slane %v6939_v20, %v16177_v16 }
 0x615   : > { %v6302_v38 = vmul.f32 0.01, %v6166_v41  ;;  %v6157_v36 = vsel %vm6156_vm4, %v6154_v45, %v6151_v60 }
 0x616   : > { %v8274_v47 = vpop.eup %8273  ;;  %v6772_v63 = vadd.f32 %v6771_v29, %v6770_v33  ;;  %v6301_v32 = vmul.f32 0.01, %v6157_v36 }
 0x617   : > { %v6430_v1 = vadd.f32 %v6302_v38, %v4510_v27  ;;  %v6169_v59 = vmul.f32 0.6931472, %v8274_v47 }
 0x618   : > { %v6773_v9 = vrot.slane %v6772_v63, 2  ;;  %v6429_v50 = vadd.f32 %v6301_v32, %v4509_v35 }
 0x619   : > { %v6606_v51 = vmul.f32 %v16182_v21, %v6430_v1  ;;  %v6175_v53 = vsel %vm6174_vm5, %v6172_v44, %v6169_v59 }
 0x61a   : > { %v6605_v0 = vmul.f32 %v16182_v21, %v6429_v50  ;;  %v6303_v42 = vmul.f32 0.01, %v6175_v53  ;;  %v6774_v22 = vadd.f32 %v6773_v9, %v6772_v63 }
 0x61b   : > { %v6796_v15 = vadd.f32 %v14827_v54, %v6606_v51 }
 0x61c   : > { %v6783_v26 = vadd.f32 %v6782_v23, %v6605_v0  ;;  %v6431_v58 = vadd.f32 %v6303_v42, %v4511_v30  ;;  %v6775_v3 = vrot.slane %v6774_v22, 1 }
 0x61d   : > { %v6797_v7 = vrot.slane %v6796_v15, 4 }
 0x61e   : > { %v6784_v25 = vrot.slane %v6783_v26, 4  ;;  %v6607_v5 = vmul.f32 %v16182_v21, %v6431_v58  ;;  %v6776_v2 = vadd.f32 %v6775_v3, %v6774_v22 }
 0x61f   : > { %v6798_v14 = vadd.f32 %v6797_v7, %v6796_v15 }
 0x620   : > { %v6785_v10 = vadd.f32 %v6784_v25, %v6783_v26  ;;  %v6809_v62 = vadd.f32 %v6808_v56, %v6607_v5  ;;  %v6838_v11 = vadd.f32 %v16167_v28, %v6776_v2 }
 0x621   : > { %v6799_v18 = vrot.slane %v6798_v14, 2 }
 0x622   : > { %v6786_v37 = vrot.slane %v6785_v10, 2  ;;  %v6810_v17 = vrot.slane %v6809_v62, 4 }
 0x623   : > { %v6800_v13 = vadd.f32 %v6799_v18, %v6798_v14 }
 0x624   : > { %v6787_v55 = vadd.f32 %v6786_v37, %v6785_v10  ;;  %v6811_v49 = vadd.f32 %v6810_v17, %v6809_v62 }
 0x625   : > { %v6801_v6 = vrot.slane %v6800_v13, 1 }
 0x626   : > { %v6788_v54 = vrot.slane %v6787_v55, 1  ;;  %v6812_v23 = vrot.slane %v6811_v49, 2 }
 0x627   : > { %v6802_v57 = vadd.f32 %v6801_v6, %v6800_v13 }
 0x628   : > { %v6789_v39 = vadd.f32 %v6788_v54, %v6787_v55  ;;  %v6813_v19 = vadd.f32 %v6812_v23, %v6811_v49 }
 0x629   : > { %v6840_v56 = vadd.f32 %v16167_v28, %v6802_v57 }
 0x62a   : > { %v6839_v34 = vadd.f32 %v16167_v28, %v6789_v39  ;;  %v6814_v52 = vrot.slane %v6813_v19, 1 }
 0x62c   : > { %v6815_v21 = vadd.f32 %v6814_v52, %v6813_v19  ;;  %v6909_v46 = vcombine.low %v6838_v11, %v6839_v34 }
 0x62e   : > { %v6841_v31 = vadd.f32 %v16167_v28, %v6815_v21  ;;  %v6931_v8 = vrot.slane %v6909_v46, %v16177_v16 }
 0x630   : > { %v6910_v24 = vcombine.low %v6840_v56, %v6841_v31 }
 0x632   : > { %v6938_v33 = vrot.slane %v6910_v24, %v16177_v16 }
 0x634   : > { %v6940_v61 = vcombine.low %v6931_v8, %v6938_v33 }
 0x636   : > { %v6954_v60 = vrot.slane %v6940_v61, %v16177_v16 }
 0x638   : > { %v6955_v45 = vcombine.low %v6947_v43, %v6954_v60 }
 0x63a   : > { %6959 = vst [vmem:[%s14853_s25 + $0x8] sm:$0xff] %v6955_v45 }
 0x63b   : > { %8296 = shalt.err (!%p8293_p5)
}
 0x63c   : > { %s8297_s21 = scalar_lea.hbm %s14884_s14, 256  ;;  %s8301_s22 = scalar_lea.hbm %s14936_s7, 512 }
 0x63d   : > { %p8298_p7 = scmp.ne.s32.totalorder %s14884_s14, %s8297_s21  ;;  %p8302_p12 = scmp.lt.u32.totalorder %s14884_s14, %s14936_s7 }
 0x63e   : > { %p8303_p13 = scmp.lt.u32.totalorder %s8301_s22, %s8297_s21  ;;  %p8305_p1 = scmp.lt.u32.totalorder %s8297_s21, %s14884_s14 }
 0x63f   : > { %p8299_p10 = pnand %p8298_p7, %p8431_p6 }
 0x640   : > { %p8304_p0 = por %p8303_p13, %p8302_p12 }
 0x641   : > { %p8300_p11 = pneg %p8299_p10 }
 0x642   : > { %p8306_p2 = por %p8305_p1, %p8304_p0 }
 0x644   : > { %p8307_p3 = pnand %p8306_p2, %p8300_p11 }
 0x646   : > { %8310 = shalt.err (!%p8307_p3)
}
 0x647   : > { %7184 = dma.vmem_to_hbm [thread:$0]  (%p8431_p6), %s14886_s9, 256, %s14884_s14, %s6961_s6  }
 0x648 PF: > { %s6987_s30 = sand.u32 1, %s8333_s26   ;;  %p7187_p4 = pnand %p7042_p9, %p8435_p8 }
 0x649   : > { %s6988_s23 = scalar_lea.sflag [#allocation5], %s6987_s30 }
 0x64a   : > { %8328 = dma.done.wait (!%p7187_p4), %s6988_s23, 256  }
 0x64b   : > { %8330 = vsyncadd (!%p7187_p4), %s6988_s23, 4294967040  ;;  %p19_p5 = scmp.ge.s32.totalorder %s8416_s8, 4   ;;  %s16183_s26 = smov %s8337_s27 }
 0x64c   : > { %s16184_s27 = smov %s8341_s28  ;;  %s16185_s28 = smov %s8429_s11 }
 0x64d   : > { %s16186_s29 = smov %s8416_s8  ;;  %21 = sbr.rel (!%p19_p5) target bundleno = 6 (0x6), region = 111 }
 0x654   :  { %6993 = vsyncpa [#allocation5], 1 }
 0x655   :  { %6995 = vsyncpa [#allocation5 + $0x1], 1 }

</bundles_post_ra>
